<compile_context>
chip_gen: v7x
topology: tpu7x:2x2x1
jax: 0.10.0
libtpu: 0.0.40
codegen_flags: <defaults>
</compile_context>

<pallas_src>
import functools
import math

import jax
import jax.numpy as jnp
from jax import lax
from jax.experimental import pallas as pl
from jax.experimental.pallas import tpu as pltpu


_VMEM_LIMIT = 64 * 1024 * 1024   # explicit VMEM cap (tune per generation; v7x phys = 64 MiB)
_Q_TILE = 128                    # query-row tile size (full length when shorter)


# ------------------------------ in-kernel helpers ------------------------------

def _ln(x, g, b, eps=1e-5):
    """LayerNorm in f32 (biased variance, matches torch.nn.LayerNorm)."""
    m = jnp.mean(x, axis=-1, keepdims=True)
    v = jnp.mean((x - m) ** 2, axis=-1, keepdims=True)
    return (x - m) * lax.rsqrt(v + eps) * g + b


def _mm(a, w_ref, bias=None):
    """bf16 MXU matmul with f32 accumulation (a: f32/bf16 activation, w_ref: bf16 weight)."""
    y = jnp.dot(a.astype(jnp.bfloat16), w_ref[...],
                preferred_element_type=jnp.float32)
    if bias is not None:
        y = y + bias
    return y


def _mha(q, k, v, wo_ref, bo, n_head, mask_bias, attn_scr):
    """Multi-head attention. q:(Lq,D) f32, k/v:(Lk,D) f32.

    Per-head outputs are stored into a (Lq,D) f32 VMEM scratch so the out-projection
    is a single K=D MXU matmul instead of n_head K=hd block matmuls.
    """
    Lq, D = q.shape
    hd = D // n_head
    scale = 1.0 / math.sqrt(hd)
    qb = (q * scale).astype(jnp.bfloat16)      # fold 1/sqrt(hd) into q (small tensor)
    kb = k.astype(jnp.bfloat16)
    vb = v.astype(jnp.bfloat16)
    # TODO(synk): at production sizes (L~850, n_head=8) use lax.fori_loop / a head grid
    #             axis here to bound live ranges of the (Lq,Lk) score tensors.
    for h in range(n_head):
        lo, hi = h * hd, (h + 1) * hd
        s = lax.dot_general(qb[:, lo:hi], kb[:, lo:hi], (((1,), (1,)), ((), ())),
                            preferred_element_type=jnp.float32)      # (Lq, Lk) f32
        if mask_bias is not None:
            s = s + mask_bias                                        # (1, Lk) broadcast
        s = s - jnp.max(s, axis=-1, keepdims=True)
        p = jnp.exp(s)
        p = p * pl.reciprocal(jnp.sum(p, axis=-1, keepdims=True), approx=True)
        attn_scr[:, lo:hi] = jnp.dot(p.astype(jnp.bfloat16), vb[:, lo:hi],
                                     preferred_element_type=jnp.float32)
    return _mm(attn_scr[...], wo_ref, bo)      # single (Lq,D)@(D,D) out-projection


# ------------------------------ fused layer kernels ------------------------------

def _encoder_layer_kernel(srcq_ref, posq_ref, srcf_ref, posf_ref, maskb_ref,
                          wq_ref, bq_ref, wk_ref, bk_ref, wv_ref, bv_ref,
                          wo_ref, bo_ref, w1_ref, b1_ref, w2_ref, b2_ref,
                          g1_ref, be1_ref, g2_ref, be2_ref,
                          out_ref, attn_scr, *, n_head):
    srcq = srcq_ref[0]        # (tq, D)  query-row tile
    posq = posq_ref[0]        # (tq, D)
    srcf = srcf_ref[0]        # (L, D)   full sequence (K/V source)
    posf = posf_ref[0]        # (L, D)
    maskb = maskb_ref[0]      # (1, L)

    # self-attention: q = srcq + posq (tile), k = srcf + posf, v = srcf
    q = _mm(srcq + posq, wq_ref, bq_ref[...])
    k = _mm(srcf + posf, wk_ref, bk_ref[...])
    v = _mm(srcf, wv_ref, bv_ref[...])
    sa = _mha(q, k, v, wo_ref, bo_ref[...], n_head, maskb, attn_scr)
    x = _ln(srcq + sa, g1_ref[...], be1_ref[...])

    # feed-forward
    h = jnp.maximum(_mm(x, w1_ref, b1_ref[...]), 0.0)
    f = _mm(h, w2_ref, b2_ref[...])
    out_ref[0] = _ln(x + f, g2_ref[...], be2_ref[...])


def _decoder_layer_kernel(tgtq_ref, qposq_ref, tgtf_ref, qposf_ref,
                          mem_ref, pos_ref, maskb_ref,
                          sa_wq_ref, sa_bq_ref, sa_wk_ref, sa_bk_ref,
                          sa_wv_ref, sa_bv_ref, sa_wo_ref, sa_bo_ref,
                          ca_wq_ref, ca_bq_ref, ca_wk_ref, ca_bk_ref,
                          ca_wv_ref, ca_bv_ref, ca_wo_ref, ca_bo_ref,
                          w1_ref, b1_ref, w2_ref, b2_ref,
                          g1_ref, be1_ref, g2_ref, be2_ref, g3_ref, be3_ref,
                          gf_ref, bf_ref,
                          out_ref, attn_scr, *, n_head, final_norm):
    tgtq = tgtq_ref[0]        # (tq, D)  query-row tile
    qposq = qposq_ref[0]      # (tq, D)
    tgtf = tgtf_ref[0]        # (Lt, D)  full target (self-attn K/V source)
    qposf = qposf_ref[0]      # (Lt, D)
    mem = mem_ref[0]          # (Lm, D)
    pos = pos_ref[0]          # (Lm, D)
    maskb = maskb_ref[0]      # (1, Lm)

    # self-attention (no mask): q = tgtq + qposq, k = tgtf + qposf, v = tgtf
    q = _mm(tgtq + qposq, sa_wq_ref, sa_bq_ref[...])
    k = _mm(tgtf + qposf, sa_wk_ref, sa_bk_ref[...])
    v = _mm(tgtf, sa_wv_ref, sa_bv_ref[...])
    sa = _mha(q, k, v, sa_wo_ref, sa_bo_ref[...], n_head, None, attn_scr)
    x = _ln(tgtq + sa, g1_ref[...], be1_ref[...])

    # cross-attention (memory key-padding mask): q = x + qposq, k = mem + pos, v = mem
    # TODO(synk): with >1 q-row tiles, hoist these K/V projections of `mem` to a
    #             per-(layer,batch) precompute to avoid recomputing them per tile.
    q = _mm(x + qposq, ca_wq_ref, ca_bq_ref[...])
    k = _mm(mem + pos, ca_wk_ref, ca_bk_ref[...])
    v = _mm(mem, ca_wv_ref, ca_bv_ref[...])
    ca = _mha(q, k, v, ca_wo_ref, ca_bo_ref[...], n_head, maskb, attn_scr)
    x = _ln(x + ca, g2_ref[...], be2_ref[...])

    # feed-forward
    h = jnp.maximum(_mm(x, w1_ref, b1_ref[...]), 0.0)
    f = _mm(h, w2_ref, b2_ref[...])
    y = _ln(x + f, g3_ref[...], be3_ref[...])
    if final_norm:
        y = _ln(y, gf_ref[...], bf_ref[...])   # fused decoder-stack output norm
    out_ref[0] = y


# ------------------------------ pallas_call wrappers ------------------------------

def _pick_tile(n):
    return n if n <= _Q_TILE else _Q_TILE


def _w_spec(w):
    # Invariant (weight) block: same block every grid step (Pallas skips the re-copy).
    # TODO(synk): single-buffer via pipeline_mode=pl.Buffered(1) at production sizes.
    return pl.BlockSpec(w.shape, lambda b, i: (0, 0))


def encoder_layer(src, pos, maskb, p, n_head):
    B, L, D = src.shape
    tq = _pick_tile(L)
    grid = (B, pl.cdiv(L, tq))
    tile = pl.BlockSpec((1, tq, D), lambda b, i: (b, i, 0))
    full = pl.BlockSpec((1, L, D), lambda b, i: (b, 0, 0))
    mspec = pl.BlockSpec((1, 1, L), lambda b, i: (b, 0, 0))
    weights = [p[n] for n in ("wq", "bq", "wk", "bk", "wv", "bv", "wo", "bo",
                              "w1", "b1", "w2", "b2", "g1", "be1", "g2", "be2")]
    return pl.pallas_call(
        functools.partial(_encoder_layer_kernel, n_head=n_head),
        out_shape=jax.ShapeDtypeStruct((B, L, D), jnp.float32),
        grid=grid,
        in_specs=[tile, tile, full, full, mspec] + [_w_spec(w) for w in weights],
        out_specs=tile,
        scratch_shapes=[pltpu.VMEM((tq, D), jnp.float32)],
        compiler_params=pltpu.CompilerParams(
            dimension_semantics=("parallel", "parallel"),
            vmem_limit_bytes=_VMEM_LIMIT),
    )(src, pos, src, pos, maskb, *weights)


def decoder_layer(tgt, mem, qpos, pos, maskb, p, gf, bf, n_head, final_norm):
    B, Lt, D = tgt.shape
    Lm = mem.shape[1]
    tq = _pick_tile(Lt)
    grid = (B, pl.cdiv(Lt, tq))
    tile = pl.BlockSpec((1, tq, D), lambda b, i: (b, i, 0))
    tfull = pl.BlockSpec((1, Lt, D), lambda b, i: (b, 0, 0))
    mfull = pl.BlockSpec((1, Lm, D), lambda b, i: (b, 0, 0))
    mspec = pl.BlockSpec((1, 1, Lm), lambda b, i: (b, 0, 0))
    weights = [p[n] for n in (
        "sa_wq", "sa_bq", "sa_wk", "sa_bk", "sa_wv", "sa_bv", "sa_wo", "sa_bo",
        "ca_wq", "ca_bq", "ca_wk", "ca_bk", "ca_wv", "ca_bv", "ca_wo", "ca_bo",
        "w1", "b1", "w2", "b2",
        "g1", "be1", "g2", "be2", "g3", "be3")] + [gf, bf]
    return pl.pallas_call(
        functools.partial(_decoder_layer_kernel, n_head=n_head, final_norm=final_norm),
        out_shape=jax.ShapeDtypeStruct((B, Lt, D), jnp.float32),
        grid=grid,
        in_specs=[tile, tile, tfull, tfull, mfull, mfull, mspec]
                 + [_w_spec(w) for w in weights],
        out_specs=tile,
        scratch_shapes=[pltpu.VMEM((tq, D), jnp.float32)],
        compiler_params=pltpu.CompilerParams(
            dimension_semantics=("parallel", "parallel"),
            vmem_limit_bytes=_VMEM_LIMIT),
    )(tgt, qpos, tgt, qpos, mem, pos, maskb, *weights)


# ------------------------------ Transformer forward ------------------------------

def transformer_forward(src, mask, query_embed, pos_embed, params, n_head):
    """Equivalent of Transformer.forward (normalize_before=False, eval mode)."""
    B, C, H, W = src.shape
    L = H * W
    D = C
    NQ = query_embed.shape[0]

    src_seq = src.reshape(B, C, L).transpose(0, 2, 1)        # (B, HW, D)
    pos_seq = pos_embed.reshape(B, C, L).transpose(0, 2, 1)  # (B, HW, D)
    qpos = jnp.broadcast_to(query_embed[None], (B, NQ, D))   # (B, NQ, D)
    tgt = jnp.zeros((B, NQ, D), jnp.float32)
    maskb = jnp.where(mask.reshape(B, 1, L), jnp.float32(-1e9), jnp.float32(0.0))

    mem = src_seq
    for lp in params["encoder"]:
        mem = encoder_layer(mem, pos_seq, maskb, lp, n_head)

    out = tgt
    n_dec = len(params["decoder"])
    for li, lp in enumerate(params["decoder"]):
        out = decoder_layer(out, mem, qpos, pos_seq, maskb, lp,
                            params["dec_norm_g"], params["dec_norm_b"],
                            n_head, final_norm=(li == n_dec - 1))

    hs = out[None]                                            # (1, B, NQ, D)
    memory_out = mem.transpose(0, 2, 1).reshape(B, C, H, W)   # (B, C, H, W)
    return hs, memory_out


# ------------------------------ pure-JAX reference ------------------------------

def _f32(w):
    return w.astype(jnp.float32)


def _ref_ln(x, g, b, eps=1e-5):
    m = jnp.mean(x, axis=-1, keepdims=True)
    v = jnp.var(x, axis=-1, keepdims=True)
    return (x - m) / jnp.sqrt(v + eps) * g + b


def _ref_attention(xq, xk, xv, wq, bq, wk, bk, wv, bv, wo, bo, n_head, mask_bias):
    B, Lq, D = xq.shape
    Lk = xk.shape[1]
    hd = D // n_head
    q = (xq @ _f32(wq) + bq).reshape(B, Lq, n_head, hd).transpose(0, 2, 1, 3)
    k = (xk @ _f32(wk) + bk).reshape(B, Lk, n_head, hd).transpose(0, 2, 1, 3)
    v = (xv @ _f32(wv) + bv).reshape(B, Lk, n_head, hd).transpose(0, 2, 1, 3)
    s = jnp.einsum("bhqd,bhkd->bhqk", q, k) / math.sqrt(hd)
    if mask_bias is not None:
        s = s + mask_bias[:, None, :, :]
    a = jax.nn.softmax(s, axis=-1)
    o = jnp.einsum("bhqk,bhkd->bhqd", a, v).transpose(0, 2, 1, 3).reshape(B, Lq, D)
    return o @ _f32(wo) + bo


def _ref_encoder_layer(src, pos, maskb, p, n_head):
    x = src + pos
    sa = _ref_attention(x, x, src, p["wq"], p["bq"], p["wk"], p["bk"],
                        p["wv"], p["bv"], p["wo"], p["bo"], n_head, maskb)
    src = _ref_ln(src + sa, p["g1"], p["be1"])
    h = jnp.maximum(src @ _f32(p["w1"]) + p["b1"], 0.0)
    f = h @ _f32(p["w2"]) + p["b2"]
    return _ref_ln(src + f, p["g2"], p["be2"])


def _ref_decoder_layer(tgt, mem, qpos, pos, maskb, p, n_head):
    x = tgt + qpos
    sa = _ref_attention(x, x, tgt, p["sa_wq"], p["sa_bq"], p["sa_wk"], p["sa_bk"],
                        p["sa_wv"], p["sa_bv"], p["sa_wo"], p["sa_bo"], n_head, None)
    tgt = _ref_ln(tgt + sa, p["g1"], p["be1"])
    ca = _ref_attention(tgt + qpos, mem + pos, mem,
                        p["ca_wq"], p["ca_bq"], p["ca_wk"], p["ca_bk"],
                        p["ca_wv"], p["ca_bv"], p["ca_wo"], p["ca_bo"], n_head, maskb)
    tgt = _ref_ln(tgt + ca, p["g2"], p["be2"])
    h = jnp.maximum(tgt @ _f32(p["w1"]) + p["b1"], 0.0)
    f = h @ _f32(p["w2"]) + p["b2"]
    return _ref_ln(tgt + f, p["g3"], p["be3"])


def _ref_transformer(src, mask, query_embed, pos_embed, params, n_head):
    B, C, H, W = src.shape
    L = H * W
    D = C
    NQ = query_embed.shape[0]
    src_seq = src.reshape(B, C, L).transpose(0, 2, 1)
    pos_seq = pos_embed.reshape(B, C, L).transpose(0, 2, 1)
    qpos = jnp.broadcast_to(query_embed[None], (B, NQ, D))
    tgt = jnp.zeros((B, NQ, D), jnp.float32)
    maskb = jnp.where(mask.reshape(B, 1, L), jnp.float32(-1e9), jnp.float32(0.0))
    mem = src_seq
    for lp in params["encoder"]:
        mem = _ref_encoder_layer(mem, pos_seq, maskb, lp, n_head)
    out = tgt
    for lp in params["decoder"]:
        out = _ref_decoder_layer(out, mem, qpos, pos_seq, maskb, lp, n_head)
    out = _ref_ln(out, params["dec_norm_g"], params["dec_norm_b"])
    return out[None], mem.transpose(0, 2, 1).reshape(B, C, H, W)


# ------------------------------ parameter init ------------------------------

def _init_params(key, d_model, n_head, dim_ff, n_enc, n_dec):
    s = 0.1

    def lin(k, fan_in, fan_out):
        kw, kb = jax.random.split(k)
        w = (s * jax.random.normal(kw, (fan_in, fan_out), jnp.float32)).astype(jnp.bfloat16)
        b = s * jax.random.normal(kb, (1, fan_out), jnp.float32)
        return w, b

    def norm(k, d):
        kg, kb = jax.random.split(k)
        return (1.0 + 0.1 * jax.random.normal(kg, (1, d), jnp.float32),
                0.1 * jax.random.normal(kb, (1, d), jnp.float32))

    def enc_layer(k):
        ks = jax.random.split(k, 8)
        wq, bq = lin(ks[0], d_model, d_model)
        wk, bk = lin(ks[1], d_model, d_model)
        wv, bv = lin(ks[2], d_model, d_model)
        wo, bo = lin(ks[3], d_model, d_model)
        w1, b1 = lin(ks[4], d_model, dim_ff)
        w2, b2 = lin(ks[5], dim_ff, d_model)
        g1, be1 = norm(ks[6], d_model)
        g2, be2 = norm(ks[7], d_model)
        return dict(wq=wq, bq=bq, wk=wk, bk=bk, wv=wv, bv=bv, wo=wo, bo=bo,
                    w1=w1, b1=b1, w2=w2, b2=b2, g1=g1, be1=be1, g2=g2, be2=be2)

    def dec_layer(k):
        ks = jax.random.split(k, 13)
        sa_wq, sa_bq = lin(ks[0], d_model, d_model)
        sa_wk, sa_bk = lin(ks[1], d_model, d_model)
        sa_wv, sa_bv = lin(ks[2], d_model, d_model)
        sa_wo, sa_bo = lin(ks[3], d_model, d_model)
        ca_wq, ca_bq = lin(ks[4], d_model, d_model)
        ca_wk, ca_bk = lin(ks[5], d_model, d_model)
        ca_wv, ca_bv = lin(ks[6], d_model, d_model)
        ca_wo, ca_bo = lin(ks[7], d_model, d_model)
        w1, b1 = lin(ks[8], d_model, dim_ff)
        w2, b2 = lin(ks[9], dim_ff, d_model)
        g1, be1 = norm(ks[10], d_model)
        g2, be2 = norm(ks[11], d_model)
        g3, be3 = norm(ks[12], d_model)
        return dict(sa_wq=sa_wq, sa_bq=sa_bq, sa_wk=sa_wk, sa_bk=sa_bk,
                    sa_wv=sa_wv, sa_bv=sa_bv, sa_wo=sa_wo, sa_bo=sa_bo,
                    ca_wq=ca_wq, ca_bq=ca_bq, ca_wk=ca_wk, ca_bk=ca_bk,
                    ca_wv=ca_wv, ca_bv=ca_bv, ca_wo=ca_wo, ca_bo=ca_bo,
                    w1=w1, b1=b1, w2=w2, b2=b2,
                    g1=g1, be1=be1, g2=g2, be2=be2, g3=g3, be3=be3)

    keys = jax.random.split(key, n_enc + n_dec + 1)
    params = {
        "encoder": [enc_layer(keys[i]) for i in range(n_enc)],
        "decoder": [dec_layer(keys[n_enc + i]) for i in range(n_dec)],
    }
    g, b = norm(keys[-1], d_model)
    params["dec_norm_g"] = g
    params["dec_norm_b"] = b
    return params


# ----------------------------------- main -----------------------------------

if __name__ == "__main__":
    d_model, n_head, dim_ff = 64, 4, 128
    n_enc, n_dec = 2, 2
    bs, h, w, n_query = 2, 4, 4, 8

    key = jax.random.PRNGKey(0)
    k_src, k_pos, k_q, k_par = jax.random.split(key, 4)

    src = jax.random.normal(k_src, (bs, d_model, h, w), jnp.float32)
    pos_embed = jax.random.normal(k_pos, (bs, d_model, h, w), jnp.float32)
    query_embed = jax.random.normal(k_q, (n_query, d_model), jnp.float32)
    mask = jnp.zeros((bs, h, w), jnp.bool_).at[1, h - 1, w - 1].set(True)
    params = _init_params(k_par, d_model, n_head, dim_ff, n_enc, n_dec)

    fwd = jax.jit(functools.partial(transformer_forward, n_head=n_head))
    hs, memory = fwd(src, mask, query_embed, pos_embed, params)
    hs, memory = jax.block_until_ready((hs, memory))

    hs_ref, mem_ref = _ref_transformer(src, mask, query_embed, pos_embed, params, n_head)

    assert hs.shape == (1, bs, n_query, d_model)
    assert memory.shape == (bs, d_model, h, w)
    assert bool(jnp.all(jnp.isfinite(hs))) and bool(jnp.all(jnp.isfinite(memory)))
    # bf16 matmuls (f32 accumulation) + approx reciprocal => small, bounded drift
    # vs the pure-f32 reference.
    assert bool(jnp.allclose(hs, hs_ref, atol=5e-2, rtol=1e-1))
    assert bool(jnp.allclose(memory, mem_ref, atol=5e-2, rtol=1e-1))
    print("KERNEL_OK")
</pallas_src>

<mosaic_0001>
module attributes {stable_mosaic.version = 11 : i64} {
  func.func @_encoder_layer_kernel(%arg0: i32, %arg1: i32, %arg2: memref<1x16x64xf32, #tpu.memory_space<vmem>>, %arg3: memref<1x16x64xf32, #tpu.memory_space<vmem>>, %arg4: memref<1x16x64xf32, #tpu.memory_space<vmem>>, %arg5: memref<1x16x64xf32, #tpu.memory_space<vmem>>, %arg6: memref<1x1x16xf32, #tpu.memory_space<vmem>>, %arg7: memref<64x64xbf16, #tpu.memory_space<vmem>>, %arg8: memref<1x64xf32, #tpu.memory_space<vmem>>, %arg9: memref<64x64xbf16, #tpu.memory_space<vmem>>, %arg10: memref<1x64xf32, #tpu.memory_space<vmem>>, %arg11: memref<64x64xbf16, #tpu.memory_space<vmem>>, %arg12: memref<1x64xf32, #tpu.memory_space<vmem>>, %arg13: memref<64x64xbf16, #tpu.memory_space<vmem>>, %arg14: memref<1x64xf32, #tpu.memory_space<vmem>>, %arg15: memref<64x128xbf16, #tpu.memory_space<vmem>>, %arg16: memref<1x128xf32, #tpu.memory_space<vmem>>, %arg17: memref<128x64xbf16, #tpu.memory_space<vmem>>, %arg18: memref<1x64xf32, #tpu.memory_space<vmem>>, %arg19: memref<1x64xf32, #tpu.memory_space<vmem>>, %arg20: memref<1x64xf32, #tpu.memory_space<vmem>>, %arg21: memref<1x64xf32, #tpu.memory_space<vmem>>, %arg22: memref<1x64xf32, #tpu.memory_space<vmem>>, %arg23: memref<1x16x64xf32, #tpu.memory_space<vmem>>, %arg24: memref<16x64xf32, #tpu.memory_space<vmem>>) attributes {dimension_semantics = [#tpu.dimension_semantics<parallel>, #tpu.dimension_semantics<parallel>], iteration_bounds = array<i64: 2, 1>, scalar_prefetch = 0 : i64, scratch_operands = 1 : i64, tpu.core_type = #tpu.core_type<tc>, window_params = [{transform_indices = @transform_0, window_bounds = array<i64: 1, 16, 64>}, {transform_indices = @transform_1, window_bounds = array<i64: 1, 16, 64>}, {transform_indices = @transform_2, window_bounds = array<i64: 1, 16, 64>}, {transform_indices = @transform_3, window_bounds = array<i64: 1, 16, 64>}, {transform_indices = @transform_4, window_bounds = array<i64: 1, 1, 16>}, {pipeline_mode = #tpu.pipeline_mode<synchronous>, transform_indices = @transform_5, window_bounds = array<i64: 64, 64>}, {pipeline_mode = #tpu.pipeline_mode<synchronous>, transform_indices = @transform_6, window_bounds = array<i64: 1, 64>}, {pipeline_mode = #tpu.pipeline_mode<synchronous>, transform_indices = @transform_7, window_bounds = array<i64: 64, 64>}, {pipeline_mode = #tpu.pipeline_mode<synchronous>, transform_indices = @transform_8, window_bounds = array<i64: 1, 64>}, {pipeline_mode = #tpu.pipeline_mode<synchronous>, transform_indices = @transform_9, window_bounds = array<i64: 64, 64>}, {pipeline_mode = #tpu.pipeline_mode<synchronous>, transform_indices = @transform_10, window_bounds = array<i64: 1, 64>}, {pipeline_mode = #tpu.pipeline_mode<synchronous>, transform_indices = @transform_11, window_bounds = array<i64: 64, 64>}, {pipeline_mode = #tpu.pipeline_mode<synchronous>, transform_indices = @transform_12, window_bounds = array<i64: 1, 64>}, {pipeline_mode = #tpu.pipeline_mode<synchronous>, transform_indices = @transform_13, window_bounds = array<i64: 64, 128>}, {pipeline_mode = #tpu.pipeline_mode<synchronous>, transform_indices = @transform_14, window_bounds = array<i64: 1, 128>}, {pipeline_mode = #tpu.pipeline_mode<synchronous>, transform_indices = @transform_15, window_bounds = array<i64: 128, 64>}, {pipeline_mode = #tpu.pipeline_mode<synchronous>, transform_indices = @transform_16, window_bounds = array<i64: 1, 64>}, {pipeline_mode = #tpu.pipeline_mode<synchronous>, transform_indices = @transform_17, window_bounds = array<i64: 1, 64>}, {pipeline_mode = #tpu.pipeline_mode<synchronous>, transform_indices = @transform_18, window_bounds = array<i64: 1, 64>}, {pipeline_mode = #tpu.pipeline_mode<synchronous>, transform_indices = @transform_19, window_bounds = array<i64: 1, 64>}, {pipeline_mode = #tpu.pipeline_mode<synchronous>, transform_indices = @transform_20, window_bounds = array<i64: 1, 64>}, {transform_indices = @transform_21, window_bounds = array<i64: 1, 16, 64>}]} {
    %c0 = arith.constant 0 : index
    %c0_0 = arith.constant 0 : index
    %c0_1 = arith.constant 0 : index
    %0 = vector.load %arg2[%c0, %c0_0, %c0_1] : memref<1x16x64xf32, #tpu.memory_space<vmem>>, vector<1x16x64xf32>
    %1 = vector.shape_cast %0 : vector<1x16x64xf32> to vector<16x64xf32>
    %c0_2 = arith.constant 0 : index
    %c0_3 = arith.constant 0 : index
    %c0_4 = arith.constant 0 : index
    %2 = vector.load %arg3[%c0_2, %c0_3, %c0_4] : memref<1x16x64xf32, #tpu.memory_space<vmem>>, vector<1x16x64xf32>
    %3 = vector.shape_cast %2 : vector<1x16x64xf32> to vector<16x64xf32>
    %c0_5 = arith.constant 0 : index
    %c0_6 = arith.constant 0 : index
    %c0_7 = arith.constant 0 : index
    %4 = vector.load %arg4[%c0_5, %c0_6, %c0_7] : memref<1x16x64xf32, #tpu.memory_space<vmem>>, vector<1x16x64xf32>
    %5 = vector.shape_cast %4 : vector<1x16x64xf32> to vector<16x64xf32>
    %c0_8 = arith.constant 0 : index
    %c0_9 = arith.constant 0 : index
    %c0_10 = arith.constant 0 : index
    %6 = vector.load %arg5[%c0_8, %c0_9, %c0_10] : memref<1x16x64xf32, #tpu.memory_space<vmem>>, vector<1x16x64xf32>
    %7 = vector.shape_cast %6 : vector<1x16x64xf32> to vector<16x64xf32>
    %c0_11 = arith.constant 0 : index
    %c0_12 = arith.constant 0 : index
    %c0_13 = arith.constant 0 : index
    %8 = vector.load %arg6[%c0_11, %c0_12, %c0_13] : memref<1x1x16xf32, #tpu.memory_space<vmem>>, vector<1x1x16xf32>
    %9 = vector.shape_cast %8 : vector<1x1x16xf32> to vector<1x16xf32>
    %10 = arith.addf %1, %3 : vector<16x64xf32>
    %c0_14 = arith.constant 0 : index
    %c0_15 = arith.constant 0 : index
    %11 = vector.load %arg8[%c0_14, %c0_15] : memref<1x64xf32, #tpu.memory_space<vmem>>, vector<1x64xf32>
    %12 = arith.truncf %10 : vector<16x64xf32> to vector<16x64xbf16>
    %c0_16 = arith.constant 0 : index
    %c0_17 = arith.constant 0 : index
    %13 = vector.load %arg7[%c0_16, %c0_17] : memref<64x64xbf16, #tpu.memory_space<vmem>>, vector<64x64xbf16>
    %cst = arith.constant dense<0.000000e+00> : vector<16x64xf32>
    %14 = tpu.matmul %12, %13, %cst {dimension_numbers = #tpu.dot_dimension_numbers<[1], [0], [0], [1], [0, 0, 1, 1], [], []>} : vector<16x64xbf16>, vector<64x64xbf16>, vector<16x64xf32> -> vector<16x64xf32>
    %15 = vector.broadcast %11 : vector<1x64xf32> to vector<16x64xf32>
    %16 = arith.addf %14, %15 : vector<16x64xf32>
    %17 = arith.addf %5, %7 : vector<16x64xf32>
    %c0_18 = arith.constant 0 : index
    %c0_19 = arith.constant 0 : index
    %18 = vector.load %arg10[%c0_18, %c0_19] : memref<1x64xf32, #tpu.memory_space<vmem>>, vector<1x64xf32>
    %19 = arith.truncf %17 : vector<16x64xf32> to vector<16x64xbf16>
    %c0_20 = arith.constant 0 : index
    %c0_21 = arith.constant 0 : index
    %20 = vector.load %arg9[%c0_20, %c0_21] : memref<64x64xbf16, #tpu.memory_space<vmem>>, vector<64x64xbf16>
    %cst_22 = arith.constant dense<0.000000e+00> : vector<16x64xf32>
    %21 = tpu.matmul %19, %20, %cst_22 {dimension_numbers = #tpu.dot_dimension_numbers<[1], [0], [0], [1], [0, 0, 1, 1], [], []>} : vector<16x64xbf16>, vector<64x64xbf16>, vector<16x64xf32> -> vector<16x64xf32>
    %22 = vector.broadcast %18 : vector<1x64xf32> to vector<16x64xf32>
    %23 = arith.addf %21, %22 : vector<16x64xf32>
    %c0_23 = arith.constant 0 : index
    %c0_24 = arith.constant 0 : index
    %24 = vector.load %arg12[%c0_23, %c0_24] : memref<1x64xf32, #tpu.memory_space<vmem>>, vector<1x64xf32>
    %25 = arith.truncf %5 : vector<16x64xf32> to vector<16x64xbf16>
    %c0_25 = arith.constant 0 : index
    %c0_26 = arith.constant 0 : index
    %26 = vector.load %arg11[%c0_25, %c0_26] : memref<64x64xbf16, #tpu.memory_space<vmem>>, vector<64x64xbf16>
    %cst_27 = arith.constant dense<0.000000e+00> : vector<16x64xf32>
    %27 = tpu.matmul %25, %26, %cst_27 {dimension_numbers = #tpu.dot_dimension_numbers<[1], [0], [0], [1], [0, 0, 1, 1], [], []>} : vector<16x64xbf16>, vector<64x64xbf16>, vector<16x64xf32> -> vector<16x64xf32>
    %28 = vector.broadcast %24 : vector<1x64xf32> to vector<16x64xf32>
    %29 = arith.addf %27, %28 : vector<16x64xf32>
    %c0_28 = arith.constant 0 : index
    %c0_29 = arith.constant 0 : index
    %30 = vector.load %arg14[%c0_28, %c0_29] : memref<1x64xf32, #tpu.memory_space<vmem>>, vector<1x64xf32>
    %cst_30 = arith.constant 2.500000e-01 : f32
    %31 = vector.broadcast %cst_30 : f32 to vector<16x64xf32>
    %32 = arith.mulf %16, %31 : vector<16x64xf32>
    %33 = arith.truncf %32 : vector<16x64xf32> to vector<16x64xbf16>
    %34 = arith.truncf %23 : vector<16x64xf32> to vector<16x64xbf16>
    %35 = arith.truncf %29 : vector<16x64xf32> to vector<16x64xbf16>
    %36 = vector.extract_strided_slice %33 {offsets = [0, 0], sizes = [16, 16], strides = [1, 1]} : vector<16x64xbf16> to vector<16x16xbf16>
    %37 = vector.extract_strided_slice %34 {offsets = [0, 0], sizes = [16, 16], strides = [1, 1]} : vector<16x64xbf16> to vector<16x16xbf16>
    %cst_31 = arith.constant dense<0.000000e+00> : vector<16x16xf32>
    %38 = tpu.matmul %36, %37, %cst_31 {dimension_numbers = #tpu.dot_dimension_numbers<[1], [1], [0], [0], [0, 0, 1, 0], [], []>} : vector<16x16xbf16>, vector<16x16xbf16>, vector<16x16xf32> -> vector<16x16xf32>
    %39 = vector.broadcast %9 : vector<1x16xf32> to vector<16x16xf32>
    %40 = arith.addf %38, %39 : vector<16x16xf32>
    %cst_32 = arith.constant dense<0xFF800000> : vector<16xf32>
    %41 = vector.multi_reduction <maximumf>, %40, %cst_32 [1] : vector<16x16xf32> to vector<16xf32>
    %42 = vector.shape_cast %41 : vector<16xf32> to vector<16x1xf32>
    %43 = vector.broadcast %42 : vector<16x1xf32> to vector<16x16xf32>
    %44 = arith.subf %40, %43 : vector<16x16xf32>
    %45 = math.exp %44 : vector<16x16xf32>
    %cst_33 = arith.constant dense<0.000000e+00> : vector<16xf32>
    %46 = vector.multi_reduction <add>, %45, %cst_33 [1] : vector<16x16xf32> to vector<16xf32>
    %47 = vector.shape_cast %46 : vector<16xf32> to vector<16x1xf32>
    %48 = tpu.reciprocal %47 {approx = true} : vector<16x1xf32> -> vector<16x1xf32>
    %49 = vector.broadcast %48 : vector<16x1xf32> to vector<16x16xf32>
    %50 = arith.mulf %45, %49 : vector<16x16xf32>
    %51 = arith.truncf %50 : vector<16x16xf32> to vector<16x16xbf16>
    %52 = vector.extract_strided_slice %35 {offsets = [0, 0], sizes = [16, 16], strides = [1, 1]} : vector<16x64xbf16> to vector<16x16xbf16>
    %cst_34 = arith.constant dense<0.000000e+00> : vector<16x16xf32>
    %53 = tpu.matmul %51, %52, %cst_34 {dimension_numbers = #tpu.dot_dimension_numbers<[1], [0], [0], [1], [0, 0, 1, 1], [], []>} : vector<16x16xbf16>, vector<16x16xbf16>, vector<16x16xf32> -> vector<16x16xf32>
    %c0_35 = arith.constant 0 : index
    %c0_36 = arith.constant 0 : index
    %54 = vector.load %arg24[%c0_35, %c0_36] : memref<16x64xf32, #tpu.memory_space<vmem>>, vector<16x16xf32>
    tpu.vector_store %arg24[%c0_35, %c0_36], %53 {strides = array<i32>} : memref<16x64xf32, #tpu.memory_space<vmem>>, vector<16x16xf32>,
    %55 = vector.extract_strided_slice %33 {offsets = [0, 16], sizes = [16, 16], strides = [1, 1]} : vector<16x64xbf16> to vector<16x16xbf16>
    %56 = vector.extract_strided_slice %34 {offsets = [0, 16], sizes = [16, 16], strides = [1, 1]} : vector<16x64xbf16> to vector<16x16xbf16>
    %cst_37 = arith.constant dense<0.000000e+00> : vector<16x16xf32>
    %57 = tpu.matmul %55, %56, %cst_37 {dimension_numbers = #tpu.dot_dimension_numbers<[1], [1], [0], [0], [0, 0, 1, 0], [], []>} : vector<16x16xbf16>, vector<16x16xbf16>, vector<16x16xf32> -> vector<16x16xf32>
    %58 = vector.broadcast %9 : vector<1x16xf32> to vector<16x16xf32>
    %59 = arith.addf %57, %58 : vector<16x16xf32>
    %cst_38 = arith.constant dense<0xFF800000> : vector<16xf32>
    %60 = vector.multi_reduction <maximumf>, %59, %cst_38 [1] : vector<16x16xf32> to vector<16xf32>
    %61 = vector.shape_cast %60 : vector<16xf32> to vector<16x1xf32>
    %62 = vector.broadcast %61 : vector<16x1xf32> to vector<16x16xf32>
    %63 = arith.subf %59, %62 : vector<16x16xf32>
    %64 = math.exp %63 : vector<16x16xf32>
    %cst_39 = arith.constant dense<0.000000e+00> : vector<16xf32>
    %65 = vector.multi_reduction <add>, %64, %cst_39 [1] : vector<16x16xf32> to vector<16xf32>
    %66 = vector.shape_cast %65 : vector<16xf32> to vector<16x1xf32>
    %67 = tpu.reciprocal %66 {approx = true} : vector<16x1xf32> -> vector<16x1xf32>
    %68 = vector.broadcast %67 : vector<16x1xf32> to vector<16x16xf32>
    %69 = arith.mulf %64, %68 : vector<16x16xf32>
    %70 = arith.truncf %69 : vector<16x16xf32> to vector<16x16xbf16>
    %71 = vector.extract_strided_slice %35 {offsets = [0, 16], sizes = [16, 16], strides = [1, 1]} : vector<16x64xbf16> to vector<16x16xbf16>
    %cst_40 = arith.constant dense<0.000000e+00> : vector<16x16xf32>
    %72 = tpu.matmul %70, %71, %cst_40 {dimension_numbers = #tpu.dot_dimension_numbers<[1], [0], [0], [1], [0, 0, 1, 1], [], []>} : vector<16x16xbf16>, vector<16x16xbf16>, vector<16x16xf32> -> vector<16x16xf32>
    %c0_41 = arith.constant 0 : index
    %c16 = arith.constant 16 : index
    %73 = vector.load %arg24[%c0_41, %c16] : memref<16x64xf32, #tpu.memory_space<vmem>>, vector<16x16xf32>
    tpu.vector_store %arg24[%c0_41, %c16], %72 {strides = array<i32>} : memref<16x64xf32, #tpu.memory_space<vmem>>, vector<16x16xf32>,
    %74 = vector.extract_strided_slice %33 {offsets = [0, 32], sizes = [16, 16], strides = [1, 1]} : vector<16x64xbf16> to vector<16x16xbf16>
    %75 = vector.extract_strided_slice %34 {offsets = [0, 32], sizes = [16, 16], strides = [1, 1]} : vector<16x64xbf16> to vector<16x16xbf16>
    %cst_42 = arith.constant dense<0.000000e+00> : vector<16x16xf32>
    %76 = tpu.matmul %74, %75, %cst_42 {dimension_numbers = #tpu.dot_dimension_numbers<[1], [1], [0], [0], [0, 0, 1, 0], [], []>} : vector<16x16xbf16>, vector<16x16xbf16>, vector<16x16xf32> -> vector<16x16xf32>
    %77 = vector.broadcast %9 : vector<1x16xf32> to vector<16x16xf32>
    %78 = arith.addf %76, %77 : vector<16x16xf32>
    %cst_43 = arith.constant dense<0xFF800000> : vector<16xf32>
    %79 = vector.multi_reduction <maximumf>, %78, %cst_43 [1] : vector<16x16xf32> to vector<16xf32>
    %80 = vector.shape_cast %79 : vector<16xf32> to vector<16x1xf32>
    %81 = vector.broadcast %80 : vector<16x1xf32> to vector<16x16xf32>
    %82 = arith.subf %78, %81 : vector<16x16xf32>
    %83 = math.exp %82 : vector<16x16xf32>
    %cst_44 = arith.constant dense<0.000000e+00> : vector<16xf32>
    %84 = vector.multi_reduction <add>, %83, %cst_44 [1] : vector<16x16xf32> to vector<16xf32>
    %85 = vector.shape_cast %84 : vector<16xf32> to vector<16x1xf32>
    %86 = tpu.reciprocal %85 {approx = true} : vector<16x1xf32> -> vector<16x1xf32>
    %87 = vector.broadcast %86 : vector<16x1xf32> to vector<16x16xf32>
    %88 = arith.mulf %83, %87 : vector<16x16xf32>
    %89 = arith.truncf %88 : vector<16x16xf32> to vector<16x16xbf16>
    %90 = vector.extract_strided_slice %35 {offsets = [0, 32], sizes = [16, 16], strides = [1, 1]} : vector<16x64xbf16> to vector<16x16xbf16>
    %cst_45 = arith.constant dense<0.000000e+00> : vector<16x16xf32>
    %91 = tpu.matmul %89, %90, %cst_45 {dimension_numbers = #tpu.dot_dimension_numbers<[1], [0], [0], [1], [0, 0, 1, 1], [], []>} : vector<16x16xbf16>, vector<16x16xbf16>, vector<16x16xf32> -> vector<16x16xf32>
    %c0_46 = arith.constant 0 : index
    %c32 = arith.constant 32 : index
    %92 = vector.load %arg24[%c0_46, %c32] : memref<16x64xf32, #tpu.memory_space<vmem>>, vector<16x16xf32>
    tpu.vector_store %arg24[%c0_46, %c32], %91 {strides = array<i32>} : memref<16x64xf32, #tpu.memory_space<vmem>>, vector<16x16xf32>,
    %93 = vector.extract_strided_slice %33 {offsets = [0, 48], sizes = [16, 16], strides = [1, 1]} : vector<16x64xbf16> to vector<16x16xbf16>
    %94 = vector.extract_strided_slice %34 {offsets = [0, 48], sizes = [16, 16], strides = [1, 1]} : vector<16x64xbf16> to vector<16x16xbf16>
    %cst_47 = arith.constant dense<0.000000e+00> : vector<16x16xf32>
    %95 = tpu.matmul %93, %94, %cst_47 {dimension_numbers = #tpu.dot_dimension_numbers<[1], [1], [0], [0], [0, 0, 1, 0], [], []>} : vector<16x16xbf16>, vector<16x16xbf16>, vector<16x16xf32> -> vector<16x16xf32>
    %96 = vector.broadcast %9 : vector<1x16xf32> to vector<16x16xf32>
    %97 = arith.addf %95, %96 : vector<16x16xf32>
    %cst_48 = arith.constant dense<0xFF800000> : vector<16xf32>
    %98 = vector.multi_reduction <maximumf>, %97, %cst_48 [1] : vector<16x16xf32> to vector<16xf32>
    %99 = vector.shape_cast %98 : vector<16xf32> to vector<16x1xf32>
    %100 = vector.broadcast %99 : vector<16x1xf32> to vector<16x16xf32>
    %101 = arith.subf %97, %100 : vector<16x16xf32>
    %102 = math.exp %101 : vector<16x16xf32>
    %cst_49 = arith.constant dense<0.000000e+00> : vector<16xf32>
    %103 = vector.multi_reduction <add>, %102, %cst_49 [1] : vector<16x16xf32> to vector<16xf32>
    %104 = vector.shape_cast %103 : vector<16xf32> to vector<16x1xf32>
    %105 = tpu.reciprocal %104 {approx = true} : vector<16x1xf32> -> vector<16x1xf32>
    %106 = vector.broadcast %105 : vector<16x1xf32> to vector<16x16xf32>
    %107 = arith.mulf %102, %106 : vector<16x16xf32>
    %108 = arith.truncf %107 : vector<16x16xf32> to vector<16x16xbf16>
    %109 = vector.extract_strided_slice %35 {offsets = [0, 48], sizes = [16, 16], strides = [1, 1]} : vector<16x64xbf16> to vector<16x16xbf16>
    %cst_50 = arith.constant dense<0.000000e+00> : vector<16x16xf32>
    %110 = tpu.matmul %108, %109, %cst_50 {dimension_numbers = #tpu.dot_dimension_numbers<[1], [0], [0], [1], [0, 0, 1, 1], [], []>} : vector<16x16xbf16>, vector<16x16xbf16>, vector<16x16xf32> -> vector<16x16xf32>
    %c0_51 = arith.constant 0 : index
    %c48 = arith.constant 48 : index
    %111 = vector.load %arg24[%c0_51, %c48] : memref<16x64xf32, #tpu.memory_space<vmem>>, vector<16x16xf32>
    tpu.vector_store %arg24[%c0_51, %c48], %110 {strides = array<i32>} : memref<16x64xf32, #tpu.memory_space<vmem>>, vector<16x16xf32>,
    %c0_52 = arith.constant 0 : index
    %c0_53 = arith.constant 0 : index
    %112 = vector.load %arg24[%c0_52, %c0_53] : memref<16x64xf32, #tpu.memory_space<vmem>>, vector<16x64xf32>
    %113 = arith.truncf %112 : vector<16x64xf32> to vector<16x64xbf16>
    %c0_54 = arith.constant 0 : index
    %c0_55 = arith.constant 0 : index
    %114 = vector.load %arg13[%c0_54, %c0_55] : memref<64x64xbf16, #tpu.memory_space<vmem>>, vector<64x64xbf16>
    %cst_56 = arith.constant dense<0.000000e+00> : vector<16x64xf32>
    %115 = tpu.matmul %113, %114, %cst_56 {dimension_numbers = #tpu.dot_dimension_numbers<[1], [0], [0], [1], [0, 0, 1, 1], [], []>} : vector<16x64xbf16>, vector<64x64xbf16>, vector<16x64xf32> -> vector<16x64xf32>
    %116 = vector.broadcast %30 : vector<1x64xf32> to vector<16x64xf32>
    %117 = arith.addf %115, %116 : vector<16x64xf32>
    %118 = arith.addf %1, %117 : vector<16x64xf32>
    %c0_57 = arith.constant 0 : index
    %c0_58 = arith.constant 0 : index
    %119 = vector.load %arg19[%c0_57, %c0_58] : memref<1x64xf32, #tpu.memory_space<vmem>>, vector<1x64xf32>
    %c0_59 = arith.constant 0 : index
    %c0_60 = arith.constant 0 : index
    %120 = vector.load %arg20[%c0_59, %c0_60] : memref<1x64xf32, #tpu.memory_space<vmem>>, vector<1x64xf32>
    %cst_61 = arith.constant dense<0.000000e+00> : vector<16xf32>
    %121 = vector.multi_reduction <add>, %118, %cst_61 [1] : vector<16x64xf32> to vector<16xf32>
    %122 = vector.shape_cast %121 : vector<16xf32> to vector<16x1xf32>
    %cst_62 = arith.constant 6.400000e+01 : f32
    %123 = vector.broadcast %cst_62 : f32 to vector<16x1xf32>
    %124 = arith.divf %122, %123 : vector<16x1xf32>
    %125 = vector.broadcast %124 : vector<16x1xf32> to vector<16x64xf32>
    %126 = arith.subf %118, %125 : vector<16x64xf32>
    %127 = arith.mulf %126, %126 : vector<16x64xf32>
    %cst_63 = arith.constant dense<0.000000e+00> : vector<16xf32>
    %128 = vector.multi_reduction <add>, %127, %cst_63 [1] : vector<16x64xf32> to vector<16xf32>
    %129 = vector.shape_cast %128 : vector<16xf32> to vector<16x1xf32>
    %cst_64 = arith.constant 6.400000e+01 : f32
    %130 = vector.broadcast %cst_64 : f32 to vector<16x1xf32>
    %131 = arith.divf %129, %130 : vector<16x1xf32>
    %132 = vector.broadcast %124 : vector<16x1xf32> to vector<16x64xf32>
    %133 = arith.subf %118, %132 : vector<16x64xf32>
    %cst_65 = arith.constant 9.99999974E-6 : f32
    %134 = vector.broadcast %cst_65 : f32 to vector<16x1xf32>
    %135 = arith.addf %131, %134 : vector<16x1xf32>
    %136 = math.rsqrt %135 : vector<16x1xf32>
    %137 = vector.broadcast %136 : vector<16x1xf32> to vector<16x64xf32>
    %138 = arith.mulf %133, %137 : vector<16x64xf32>
    %139 = vector.broadcast %119 : vector<1x64xf32> to vector<16x64xf32>
    %140 = arith.mulf %138, %139 : vector<16x64xf32>
    %141 = vector.broadcast %120 : vector<1x64xf32> to vector<16x64xf32>
    %142 = arith.addf %140, %141 : vector<16x64xf32>
    %c0_66 = arith.constant 0 : index
    %c0_67 = arith.constant 0 : index
    %143 = vector.load %arg16[%c0_66, %c0_67] : memref<1x128xf32, #tpu.memory_space<vmem>>, vector<1x128xf32>
    %144 = arith.truncf %142 : vector<16x64xf32> to vector<16x64xbf16>
    %c0_68 = arith.constant 0 : index
    %c0_69 = arith.constant 0 : index
    %145 = vector.load %arg15[%c0_68, %c0_69] : memref<64x128xbf16, #tpu.memory_space<vmem>>, vector<64x128xbf16>
    %cst_70 = arith.constant dense<0.000000e+00> : vector<16x128xf32>
    %146 = tpu.matmul %144, %145, %cst_70 {dimension_numbers = #tpu.dot_dimension_numbers<[1], [0], [0], [1], [0, 0, 1, 1], [], []>} : vector<16x64xbf16>, vector<64x128xbf16>, vector<16x128xf32> -> vector<16x128xf32>
    %147 = vector.broadcast %143 : vector<1x128xf32> to vector<16x128xf32>
    %148 = arith.addf %146, %147 : vector<16x128xf32>
    %cst_71 = arith.constant 0.000000e+00 : f32
    %149 = vector.broadcast %cst_71 : f32 to vector<16x128xf32>
    %150 = arith.maximumf %148, %149 : vector<16x128xf32>
    %c0_72 = arith.constant 0 : index
    %c0_73 = arith.constant 0 : index
    %151 = vector.load %arg18[%c0_72, %c0_73] : memref<1x64xf32, #tpu.memory_space<vmem>>, vector<1x64xf32>
    %152 = arith.truncf %150 : vector<16x128xf32> to vector<16x128xbf16>
    %c0_74 = arith.constant 0 : index
    %c0_75 = arith.constant 0 : index
    %153 = vector.load %arg17[%c0_74, %c0_75] : memref<128x64xbf16, #tpu.memory_space<vmem>>, vector<128x64xbf16>
    %cst_76 = arith.constant dense<0.000000e+00> : vector<16x64xf32>
    %154 = tpu.matmul %152, %153, %cst_76 {dimension_numbers = #tpu.dot_dimension_numbers<[1], [0], [0], [1], [0, 0, 1, 1], [], []>} : vector<16x128xbf16>, vector<128x64xbf16>, vector<16x64xf32> -> vector<16x64xf32>
    %155 = vector.broadcast %151 : vector<1x64xf32> to vector<16x64xf32>
    %156 = arith.addf %154, %155 : vector<16x64xf32>
    %157 = arith.addf %142, %156 : vector<16x64xf32>
    %c0_77 = arith.constant 0 : index
    %c0_78 = arith.constant 0 : index
    %158 = vector.load %arg21[%c0_77, %c0_78] : memref<1x64xf32, #tpu.memory_space<vmem>>, vector<1x64xf32>
    %c0_79 = arith.constant 0 : index
    %c0_80 = arith.constant 0 : index
    %159 = vector.load %arg22[%c0_79, %c0_80] : memref<1x64xf32, #tpu.memory_space<vmem>>, vector<1x64xf32>
    %cst_81 = arith.constant dense<0.000000e+00> : vector<16xf32>
    %160 = vector.multi_reduction <add>, %157, %cst_81 [1] : vector<16x64xf32> to vector<16xf32>
    %161 = vector.shape_cast %160 : vector<16xf32> to vector<16x1xf32>
    %cst_82 = arith.constant 6.400000e+01 : f32
    %162 = vector.broadcast %cst_82 : f32 to vector<16x1xf32>
    %163 = arith.divf %161, %162 : vector<16x1xf32>
    %164 = vector.broadcast %163 : vector<16x1xf32> to vector<16x64xf32>
    %165 = arith.subf %157, %164 : vector<16x64xf32>
    %166 = arith.mulf %165, %165 : vector<16x64xf32>
    %cst_83 = arith.constant dense<0.000000e+00> : vector<16xf32>
    %167 = vector.multi_reduction <add>, %166, %cst_83 [1] : vector<16x64xf32> to vector<16xf32>
    %168 = vector.shape_cast %167 : vector<16xf32> to vector<16x1xf32>
    %cst_84 = arith.constant 6.400000e+01 : f32
    %169 = vector.broadcast %cst_84 : f32 to vector<16x1xf32>
    %170 = arith.divf %168, %169 : vector<16x1xf32>
    %171 = vector.broadcast %163 : vector<16x1xf32> to vector<16x64xf32>
    %172 = arith.subf %157, %171 : vector<16x64xf32>
    %cst_85 = arith.constant 9.99999974E-6 : f32
    %173 = vector.broadcast %cst_85 : f32 to vector<16x1xf32>
    %174 = arith.addf %170, %173 : vector<16x1xf32>
    %175 = math.rsqrt %174 : vector<16x1xf32>
    %176 = vector.broadcast %175 : vector<16x1xf32> to vector<16x64xf32>
    %177 = arith.mulf %172, %176 : vector<16x64xf32>
    %178 = vector.broadcast %158 : vector<1x64xf32> to vector<16x64xf32>
    %179 = arith.mulf %177, %178 : vector<16x64xf32>
    %180 = vector.broadcast %159 : vector<1x64xf32> to vector<16x64xf32>
    %181 = arith.addf %179, %180 : vector<16x64xf32>
    %c0_86 = arith.constant 0 : index
    %c0_87 = arith.constant 0 : index
    %c0_88 = arith.constant 0 : index
    %182 = vector.load %arg23[%c0_86, %c0_87, %c0_88] : memref<1x16x64xf32, #tpu.memory_space<vmem>>, vector<1x16x64xf32>
    %183 = vector.shape_cast %182 : vector<1x16x64xf32> to vector<16x64xf32>
    %184 = vector.shape_cast %181 : vector<16x64xf32> to vector<1x16x64xf32>
    tpu.vector_store %arg23[%c0_86, %c0_87, %c0_88], %184 {strides = array<i32>} : memref<1x16x64xf32, #tpu.memory_space<vmem>>, vector<1x16x64xf32>,
    return
  }
  func.func @transform_0(%arg0: i32, %arg1: i32) -> (i32, i32, i32) {
    %c0_i32 = arith.constant 0 : i32
    %c0_i32_0 = arith.constant 0 : i32
    return %arg0, %arg1, %c0_i32 : i32, i32, i32
  }
  func.func @transform_1(%arg0: i32, %arg1: i32) -> (i32, i32, i32) {
    %c0_i32 = arith.constant 0 : i32
    %c0_i32_0 = arith.constant 0 : i32
    return %arg0, %arg1, %c0_i32 : i32, i32, i32
  }
  func.func @transform_2(%arg0: i32, %arg1: i32) -> (i32, i32, i32) {
    %c0_i32 = arith.constant 0 : i32
    %c0_i32_0 = arith.constant 0 : i32
    %c0_i32_1 = arith.constant 0 : i32
    return %arg0, %c0_i32, %c0_i32_0 : i32, i32, i32
  }
  func.func @transform_3(%arg0: i32, %arg1: i32) -> (i32, i32, i32) {
    %c0_i32 = arith.constant 0 : i32
    %c0_i32_0 = arith.constant 0 : i32
    %c0_i32_1 = arith.constant 0 : i32
    return %arg0, %c0_i32, %c0_i32_0 : i32, i32, i32
  }
  func.func @transform_4(%arg0: i32, %arg1: i32) -> (i32, i32, i32) {
    %c0_i32 = arith.constant 0 : i32
    %c0_i32_0 = arith.constant 0 : i32
    %c0_i32_1 = arith.constant 0 : i32
    return %arg0, %c0_i32, %c0_i32_0 : i32, i32, i32
  }
  func.func @transform_5(%arg0: i32, %arg1: i32) -> (i32, i32) {
    %c0_i32 = arith.constant 0 : i32
    %c0_i32_0 = arith.constant 0 : i32
    %c0_i32_1 = arith.constant 0 : i32
    return %c0_i32, %c0_i32_0 : i32, i32
  }
  func.func @transform_6(%arg0: i32, %arg1: i32) -> (i32, i32) {
    %c0_i32 = arith.constant 0 : i32
    %c0_i32_0 = arith.constant 0 : i32
    %c0_i32_1 = arith.constant 0 : i32
    return %c0_i32, %c0_i32_0 : i32, i32
  }
  func.func @transform_7(%arg0: i32, %arg1: i32) -> (i32, i32) {
    %c0_i32 = arith.constant 0 : i32
    %c0_i32_0 = arith.constant 0 : i32
    %c0_i32_1 = arith.constant 0 : i32
    return %c0_i32, %c0_i32_0 : i32, i32
  }
  func.func @transform_8(%arg0: i32, %arg1: i32) -> (i32, i32) {
    %c0_i32 = arith.constant 0 : i32
    %c0_i32_0 = arith.constant 0 : i32
    %c0_i32_1 = arith.constant 0 : i32
    return %c0_i32, %c0_i32_0 : i32, i32
  }
  func.func @transform_9(%arg0: i32, %arg1: i32) -> (i32, i32) {
    %c0_i32 = arith.constant 0 : i32
    %c0_i32_0 = arith.constant 0 : i32
    %c0_i32_1 = arith.constant 0 : i32
    return %c0_i32, %c0_i32_0 : i32, i32
  }
  func.func @transform_10(%arg0: i32, %arg1: i32) -> (i32, i32) {
    %c0_i32 = arith.constant 0 : i32
    %c0_i32_0 = arith.constant 0 : i32
    %c0_i32_1 = arith.constant 0 : i32
    return %c0_i32, %c0_i32_0 : i32, i32
  }
  func.func @transform_11(%arg0: i32, %arg1: i32) -> (i32, i32) {
    %c0_i32 = arith.constant 0 : i32
    %c0_i32_0 = arith.constant 0 : i32
    %c0_i32_1 = arith.constant 0 : i32
    return %c0_i32, %c0_i32_0 : i32, i32
  }
  func.func @transform_12(%arg0: i32, %arg1: i32) -> (i32, i32) {
    %c0_i32 = arith.constant 0 : i32
    %c0_i32_0 = arith.constant 0 : i32
    %c0_i32_1 = arith.constant 0 : i32
    return %c0_i32, %c0_i32_0 : i32, i32
  }
  func.func @transform_13(%arg0: i32, %arg1: i32) -> (i32, i32) {
    %c0_i32 = arith.constant 0 : i32
    %c0_i32_0 = arith.constant 0 : i32
    %c0_i32_1 = arith.constant 0 : i32
    return %c0_i32, %c0_i32_0 : i32, i32
  }
  func.func @transform_14(%arg0: i32, %arg1: i32) -> (i32, i32) {
    %c0_i32 = arith.constant 0 : i32
    %c0_i32_0 = arith.constant 0 : i32
    %c0_i32_1 = arith.constant 0 : i32
    return %c0_i32, %c0_i32_0 : i32, i32
  }
  func.func @transform_15(%arg0: i32, %arg1: i32) -> (i32, i32) {
    %c0_i32 = arith.constant 0 : i32
    %c0_i32_0 = arith.constant 0 : i32
    %c0_i32_1 = arith.constant 0 : i32
    return %c0_i32, %c0_i32_0 : i32, i32
  }
  func.func @transform_16(%arg0: i32, %arg1: i32) -> (i32, i32) {
    %c0_i32 = arith.constant 0 : i32
    %c0_i32_0 = arith.constant 0 : i32
    %c0_i32_1 = arith.constant 0 : i32
    return %c0_i32, %c0_i32_0 : i32, i32
  }
  func.func @transform_17(%arg0: i32, %arg1: i32) -> (i32, i32) {
    %c0_i32 = arith.constant 0 : i32
    %c0_i32_0 = arith.constant 0 : i32
    %c0_i32_1 = arith.constant 0 : i32
    return %c0_i32, %c0_i32_0 : i32, i32
  }
  func.func @transform_18(%arg0: i32, %arg1: i32) -> (i32, i32) {
    %c0_i32 = arith.constant 0 : i32
    %c0_i32_0 = arith.constant 0 : i32
    %c0_i32_1 = arith.constant 0 : i32
    return %c0_i32, %c0_i32_0 : i32, i32
  }
  func.func @transform_19(%arg0: i32, %arg1: i32) -> (i32, i32) {
    %c0_i32 = arith.constant 0 : i32
    %c0_i32_0 = arith.constant 0 : i32
    %c0_i32_1 = arith.constant 0 : i32
    return %c0_i32, %c0_i32_0 : i32, i32
  }
  func.func @transform_20(%arg0: i32, %arg1: i32) -> (i32, i32) {
    %c0_i32 = arith.constant 0 : i32
    %c0_i32_0 = arith.constant 0 : i32
    %c0_i32_1 = arith.constant 0 : i32
    return %c0_i32, %c0_i32_0 : i32, i32
  }
  func.func @transform_21(%arg0: i32, %arg1: i32) -> (i32, i32, i32) {
    %c0_i32 = arith.constant 0 : i32
    %c0_i32_0 = arith.constant 0 : i32
    return %arg0, %arg1, %c0_i32 : i32, i32, i32
  }
}

module attributes {stable_mosaic.version = 11 : i64} {
  func.func @_decoder_layer_kernel(%arg0: i32, %arg1: i32, %arg2: memref<1x8x64xf32, #tpu.memory_space<vmem>>, %arg3: memref<1x8x64xf32, #tpu.memory_space<vmem>>, %arg4: memref<1x8x64xf32, #tpu.memory_space<vmem>>, %arg5: memref<1x8x64xf32, #tpu.memory_space<vmem>>, %arg6: memref<1x16x64xf32, #tpu.memory_space<vmem>>, %arg7: memref<1x16x64xf32, #tpu.memory_space<vmem>>, %arg8: memref<1x1x16xf32, #tpu.memory_space<vmem>>, %arg9: memref<64x64xbf16, #tpu.memory_space<vmem>>, %arg10: memref<1x64xf32, #tpu.memory_space<vmem>>, %arg11: memref<64x64xbf16, #tpu.memory_space<vmem>>, %arg12: memref<1x64xf32, #tpu.memory_space<vmem>>, %arg13: memref<64x64xbf16, #tpu.memory_space<vmem>>, %arg14: memref<1x64xf32, #tpu.memory_space<vmem>>, %arg15: memref<64x64xbf16, #tpu.memory_space<vmem>>, %arg16: memref<1x64xf32, #tpu.memory_space<vmem>>, %arg17: memref<64x64xbf16, #tpu.memory_space<vmem>>, %arg18: memref<1x64xf32, #tpu.memory_space<vmem>>, %arg19: memref<64x64xbf16, #tpu.memory_space<vmem>>, %arg20: memref<1x64xf32, #tpu.memory_space<vmem>>, %arg21: memref<64x64xbf16, #tpu.memory_space<vmem>>, %arg22: memref<1x64xf32, #tpu.memory_space<vmem>>, %arg23: memref<64x64xbf16, #tpu.memory_space<vmem>>, %arg24: memref<1x64xf32, #tpu.memory_space<vmem>>, %arg25: memref<64x128xbf16, #tpu.memory_space<vmem>>, %arg26: memref<1x128xf32, #tpu.memory_space<vmem>>, %arg27: memref<128x64xbf16, #tpu.memory_space<vmem>>, %arg28: memref<1x64xf32, #tpu.memory_space<vmem>>, %arg29: memref<1x64xf32, #tpu.memory_space<vmem>>, %arg30: memref<1x64xf32, #tpu.memory_space<vmem>>, %arg31: memref<1x64xf32, #tpu.memory_space<vmem>>, %arg32: memref<1x64xf32, #tpu.memory_space<vmem>>, %arg33: memref<1x64xf32, #tpu.memory_space<vmem>>, %arg34: memref<1x64xf32, #tpu.memory_space<vmem>>, %arg35: memref<1x64xf32, #tpu.memory_space<vmem>>, %arg36: memref<1x64xf32, #tpu.memory_space<vmem>>, %arg37: memref<1x8x64xf32, #tpu.memory_space<vmem>>, %arg38: memref<8x64xf32, #tpu.memory_space<vmem>>) attributes {dimension_semantics = [#tpu.dimension_semantics<parallel>, #tpu.dimension_semantics<parallel>], iteration_bounds = array<i64: 2, 1>, scalar_prefetch = 0 : i64, scratch_operands = 1 : i64, tpu.core_type = #tpu.core_type<tc>, window_params = [{transform_indices = @transform_0, window_bounds = array<i64: 1, 8, 64>}, {transform_indices = @transform_1, window_bounds = array<i64: 1, 8, 64>}, {transform_indices = @transform_2, window_bounds = array<i64: 1, 8, 64>}, {transform_indices = @transform_3, window_bounds = array<i64: 1, 8, 64>}, {transform_indices = @transform_4, window_bounds = array<i64: 1, 16, 64>}, {transform_indices = @transform_5, window_bounds = array<i64: 1, 16, 64>}, {transform_indices = @transform_6, window_bounds = array<i64: 1, 1, 16>}, {pipeline_mode = #tpu.pipeline_mode<synchronous>, transform_indices = @transform_7, window_bounds = array<i64: 64, 64>}, {pipeline_mode = #tpu.pipeline_mode<synchronous>, transform_indices = @transform_8, window_bounds = array<i64: 1, 64>}, {pipeline_mode = #tpu.pipeline_mode<synchronous>, transform_indices = @transform_9, window_bounds = array<i64: 64, 64>}, {pipeline_mode = #tpu.pipeline_mode<synchronous>, transform_indices = @transform_10, window_bounds = array<i64: 1, 64>}, {pipeline_mode = #tpu.pipeline_mode<synchronous>, transform_indices = @transform_11, window_bounds = array<i64: 64, 64>}, {pipeline_mode = #tpu.pipeline_mode<synchronous>, transform_indices = @transform_12, window_bounds = array<i64: 1, 64>}, {pipeline_mode = #tpu.pipeline_mode<synchronous>, transform_indices = @transform_13, window_bounds = array<i64: 64, 64>}, {pipeline_mode = #tpu.pipeline_mode<synchronous>, transform_indices = @transform_14, window_bounds = array<i64: 1, 64>}, {pipeline_mode = #tpu.pipeline_mode<synchronous>, transform_indices = @transform_15, window_bounds = array<i64: 64, 64>}, {pipeline_mode = #tpu.pipeline_mode<synchronous>, transform_indices = @transform_16, window_bounds = array<i64: 1, 64>}, {pipeline_mode = #tpu.pipeline_mode<synchronous>, transform_indices = @transform_17, window_bounds = array<i64: 64, 64>}, {pipeline_mode = #tpu.pipeline_mode<synchronous>, transform_indices = @transform_18, window_bounds = array<i64: 1, 64>}, {pipeline_mode = #tpu.pipeline_mode<synchronous>, transform_indices = @transform_19, window_bounds = array<i64: 64, 64>}, {pipeline_mode = #tpu.pipeline_mode<synchronous>, transform_indices = @transform_20, window_bounds = array<i64: 1, 64>}, {pipeline_mode = #tpu.pipeline_mode<synchronous>, transform_indices = @transform_21, window_bounds = array<i64: 64, 64>}, {pipeline_mode = #tpu.pipeline_mode<synchronous>, transform_indices = @transform_22, window_bounds = array<i64: 1, 64>}, {pipeline_mode = #tpu.pipeline_mode<synchronous>, transform_indices = @transform_23, window_bounds = array<i64: 64, 128>}, {pipeline_mode = #tpu.pipeline_mode<synchronous>, transform_indices = @transform_24, window_bounds = array<i64: 1, 128>}, {pipeline_mode = #tpu.pipeline_mode<synchronous>, transform_indices = @transform_25, window_bounds = array<i64: 128, 64>}, {pipeline_mode = #tpu.pipeline_mode<synchronous>, transform_indices = @transform_26, window_bounds = array<i64: 1, 64>}, {pipeline_mode = #tpu.pipeline_mode<synchronous>, transform_indices = @transform_27, window_bounds = array<i64: 1, 64>}, {pipeline_mode = #tpu.pipeline_mode<synchronous>, transform_indices = @transform_28, window_bounds = array<i64: 1, 64>}, {pipeline_mode = #tpu.pipeline_mode<synchronous>, transform_indices = @transform_29, window_bounds = array<i64: 1, 64>}, {pipeline_mode = #tpu.pipeline_mode<synchronous>, transform_indices = @transform_30, window_bounds = array<i64: 1, 64>}, {pipeline_mode = #tpu.pipeline_mode<synchronous>, transform_indices = @transform_31, window_bounds = array<i64: 1, 64>}, {pipeline_mode = #tpu.pipeline_mode<synchronous>, transform_indices = @transform_32, window_bounds = array<i64: 1, 64>}, {pipeline_mode = #tpu.pipeline_mode<synchronous>, transform_indices = @transform_33, window_bounds = array<i64: 1, 64>}, {pipeline_mode = #tpu.pipeline_mode<synchronous>, transform_indices = @transform_34, window_bounds = array<i64: 1, 64>}, {transform_indices = @transform_35, window_bounds = array<i64: 1, 8, 64>}]} {
    %c0 = arith.constant 0 : index
    %c0_0 = arith.constant 0 : index
    %c0_1 = arith.constant 0 : index
    %0 = vector.load %arg2[%c0, %c0_0, %c0_1] : memref<1x8x64xf32, #tpu.memory_space<vmem>>, vector<1x8x64xf32>
    %1 = vector.shape_cast %0 : vector<1x8x64xf32> to vector<8x64xf32>
    %c0_2 = arith.constant 0 : index
    %c0_3 = arith.constant 0 : index
    %c0_4 = arith.constant 0 : index
    %2 = vector.load %arg3[%c0_2, %c0_3, %c0_4] : memref<1x8x64xf32, #tpu.memory_space<vmem>>, vector<1x8x64xf32>
    %3 = vector.shape_cast %2 : vector<1x8x64xf32> to vector<8x64xf32>
    %c0_5 = arith.constant 0 : index
    %c0_6 = arith.constant 0 : index
    %c0_7 = arith.constant 0 : index
    %4 = vector.load %arg4[%c0_5, %c0_6, %c0_7] : memref<1x8x64xf32, #tpu.memory_space<vmem>>, vector<1x8x64xf32>
    %5 = vector.shape_cast %4 : vector<1x8x64xf32> to vector<8x64xf32>
    %c0_8 = arith.constant 0 : index
    %c0_9 = arith.constant 0 : index
    %c0_10 = arith.constant 0 : index
    %6 = vector.load %arg5[%c0_8, %c0_9, %c0_10] : memref<1x8x64xf32, #tpu.memory_space<vmem>>, vector<1x8x64xf32>
    %7 = vector.shape_cast %6 : vector<1x8x64xf32> to vector<8x64xf32>
    %c0_11 = arith.constant 0 : index
    %c0_12 = arith.constant 0 : index
    %c0_13 = arith.constant 0 : index
    %8 = vector.load %arg6[%c0_11, %c0_12, %c0_13] : memref<1x16x64xf32, #tpu.memory_space<vmem>>, vector<1x16x64xf32>
    %9 = vector.shape_cast %8 : vector<1x16x64xf32> to vector<16x64xf32>
    %c0_14 = arith.constant 0 : index
    %c0_15 = arith.constant 0 : index
    %c0_16 = arith.constant 0 : index
    %10 = vector.load %arg7[%c0_14, %c0_15, %c0_16] : memref<1x16x64xf32, #tpu.memory_space<vmem>>, vector<1x16x64xf32>
    %11 = vector.shape_cast %10 : vector<1x16x64xf32> to vector<16x64xf32>
    %c0_17 = arith.constant 0 : index
    %c0_18 = arith.constant 0 : index
    %c0_19 = arith.constant 0 : index
    %12 = vector.load %arg8[%c0_17, %c0_18, %c0_19] : memref<1x1x16xf32, #tpu.memory_space<vmem>>, vector<1x1x16xf32>
    %13 = vector.shape_cast %12 : vector<1x1x16xf32> to vector<1x16xf32>
    %14 = arith.addf %1, %3 : vector<8x64xf32>
    %c0_20 = arith.constant 0 : index
    %c0_21 = arith.constant 0 : index
    %15 = vector.load %arg10[%c0_20, %c0_21] : memref<1x64xf32, #tpu.memory_space<vmem>>, vector<1x64xf32>
    %16 = arith.truncf %14 : vector<8x64xf32> to vector<8x64xbf16>
    %c0_22 = arith.constant 0 : index
    %c0_23 = arith.constant 0 : index
    %17 = vector.load %arg9[%c0_22, %c0_23] : memref<64x64xbf16, #tpu.memory_space<vmem>>, vector<64x64xbf16>
    %cst = arith.constant dense<0.000000e+00> : vector<8x64xf32>
    %18 = tpu.matmul %16, %17, %cst {dimension_numbers = #tpu.dot_dimension_numbers<[1], [0], [0], [1], [0, 0, 1, 1], [], []>} : vector<8x64xbf16>, vector<64x64xbf16>, vector<8x64xf32> -> vector<8x64xf32>
    %19 = vector.broadcast %15 : vector<1x64xf32> to vector<8x64xf32>
    %20 = arith.addf %18, %19 : vector<8x64xf32>
    %21 = arith.addf %5, %7 : vector<8x64xf32>
    %c0_24 = arith.constant 0 : index
    %c0_25 = arith.constant 0 : index
    %22 = vector.load %arg12[%c0_24, %c0_25] : memref<1x64xf32, #tpu.memory_space<vmem>>, vector<1x64xf32>
    %23 = arith.truncf %21 : vector<8x64xf32> to vector<8x64xbf16>
    %c0_26 = arith.constant 0 : index
    %c0_27 = arith.constant 0 : index
    %24 = vector.load %arg11[%c0_26, %c0_27] : memref<64x64xbf16, #tpu.memory_space<vmem>>, vector<64x64xbf16>
    %cst_28 = arith.constant dense<0.000000e+00> : vector<8x64xf32>
    %25 = tpu.matmul %23, %24, %cst_28 {dimension_numbers = #tpu.dot_dimension_numbers<[1], [0], [0], [1], [0, 0, 1, 1], [], []>} : vector<8x64xbf16>, vector<64x64xbf16>, vector<8x64xf32> -> vector<8x64xf32>
    %26 = vector.broadcast %22 : vector<1x64xf32> to vector<8x64xf32>
    %27 = arith.addf %25, %26 : vector<8x64xf32>
    %c0_29 = arith.constant 0 : index
    %c0_30 = arith.constant 0 : index
    %28 = vector.load %arg14[%c0_29, %c0_30] : memref<1x64xf32, #tpu.memory_space<vmem>>, vector<1x64xf32>
    %29 = arith.truncf %5 : vector<8x64xf32> to vector<8x64xbf16>
    %c0_31 = arith.constant 0 : index
    %c0_32 = arith.constant 0 : index
    %30 = vector.load %arg13[%c0_31, %c0_32] : memref<64x64xbf16, #tpu.memory_space<vmem>>, vector<64x64xbf16>
    %cst_33 = arith.constant dense<0.000000e+00> : vector<8x64xf32>
    %31 = tpu.matmul %29, %30, %cst_33 {dimension_numbers = #tpu.dot_dimension_numbers<[1], [0], [0], [1], [0, 0, 1, 1], [], []>} : vector<8x64xbf16>, vector<64x64xbf16>, vector<8x64xf32> -> vector<8x64xf32>
    %32 = vector.broadcast %28 : vector<1x64xf32> to vector<8x64xf32>
    %33 = arith.addf %31, %32 : vector<8x64xf32>
    %c0_34 = arith.constant 0 : index
    %c0_35 = arith.constant 0 : index
    %34 = vector.load %arg16[%c0_34, %c0_35] : memref<1x64xf32, #tpu.memory_space<vmem>>, vector<1x64xf32>
    %cst_36 = arith.constant 2.500000e-01 : f32
    %35 = vector.broadcast %cst_36 : f32 to vector<8x64xf32>
    %36 = arith.mulf %20, %35 : vector<8x64xf32>
    %37 = arith.truncf %36 : vector<8x64xf32> to vector<8x64xbf16>
    %38 = arith.truncf %27 : vector<8x64xf32> to vector<8x64xbf16>
    %39 = arith.truncf %33 : vector<8x64xf32> to vector<8x64xbf16>
    %40 = vector.extract_strided_slice %37 {offsets = [0, 0], sizes = [8, 16], strides = [1, 1]} : vector<8x64xbf16> to vector<8x16xbf16>
    %41 = vector.extract_strided_slice %38 {offsets = [0, 0], sizes = [8, 16], strides = [1, 1]} : vector<8x64xbf16> to vector<8x16xbf16>
    %cst_37 = arith.constant dense<0.000000e+00> : vector<8x8xf32>
    %42 = tpu.matmul %40, %41, %cst_37 {dimension_numbers = #tpu.dot_dimension_numbers<[1], [1], [0], [0], [0, 0, 1, 0], [], []>} : vector<8x16xbf16>, vector<8x16xbf16>, vector<8x8xf32> -> vector<8x8xf32>
    %cst_38 = arith.constant dense<0xFF800000> : vector<8xf32>
    %43 = vector.multi_reduction <maximumf>, %42, %cst_38 [1] : vector<8x8xf32> to vector<8xf32>
    %44 = vector.shape_cast %43 : vector<8xf32> to vector<8x1xf32>
    %45 = vector.broadcast %44 : vector<8x1xf32> to vector<8x8xf32>
    %46 = arith.subf %42, %45 : vector<8x8xf32>
    %47 = math.exp %46 : vector<8x8xf32>
    %cst_39 = arith.constant dense<0.000000e+00> : vector<8xf32>
    %48 = vector.multi_reduction <add>, %47, %cst_39 [1] : vector<8x8xf32> to vector<8xf32>
    %49 = vector.shape_cast %48 : vector<8xf32> to vector<8x1xf32>
    %50 = tpu.reciprocal %49 {approx = true} : vector<8x1xf32> -> vector<8x1xf32>
    %51 = vector.broadcast %50 : vector<8x1xf32> to vector<8x8xf32>
    %52 = arith.mulf %47, %51 : vector<8x8xf32>
    %53 = arith.truncf %52 : vector<8x8xf32> to vector<8x8xbf16>
    %54 = vector.extract_strided_slice %39 {offsets = [0, 0], sizes = [8, 16], strides = [1, 1]} : vector<8x64xbf16> to vector<8x16xbf16>
    %cst_40 = arith.constant dense<0.000000e+00> : vector<8x16xf32>
    %55 = tpu.matmul %53, %54, %cst_40 {dimension_numbers = #tpu.dot_dimension_numbers<[1], [0], [0], [1], [0, 0, 1, 1], [], []>} : vector<8x8xbf16>, vector<8x16xbf16>, vector<8x16xf32> -> vector<8x16xf32>
    %c0_41 = arith.constant 0 : index
    %c0_42 = arith.constant 0 : index
    %56 = vector.load %arg38[%c0_41, %c0_42] : memref<8x64xf32, #tpu.memory_space<vmem>>, vector<8x16xf32>
    tpu.vector_store %arg38[%c0_41, %c0_42], %55 {strides = array<i32>} : memref<8x64xf32, #tpu.memory_space<vmem>>, vector<8x16xf32>,
    %57 = vector.extract_strided_slice %37 {offsets = [0, 16], sizes = [8, 16], strides = [1, 1]} : vector<8x64xbf16> to vector<8x16xbf16>
    %58 = vector.extract_strided_slice %38 {offsets = [0, 16], sizes = [8, 16], strides = [1, 1]} : vector<8x64xbf16> to vector<8x16xbf16>
    %cst_43 = arith.constant dense<0.000000e+00> : vector<8x8xf32>
    %59 = tpu.matmul %57, %58, %cst_43 {dimension_numbers = #tpu.dot_dimension_numbers<[1], [1], [0], [0], [0, 0, 1, 0], [], []>} : vector<8x16xbf16>, vector<8x16xbf16>, vector<8x8xf32> -> vector<8x8xf32>
    %cst_44 = arith.constant dense<0xFF800000> : vector<8xf32>
    %60 = vector.multi_reduction <maximumf>, %59, %cst_44 [1] : vector<8x8xf32> to vector<8xf32>
    %61 = vector.shape_cast %60 : vector<8xf32> to vector<8x1xf32>
    %62 = vector.broadcast %61 : vector<8x1xf32> to vector<8x8xf32>
    %63 = arith.subf %59, %62 : vector<8x8xf32>
    %64 = math.exp %63 : vector<8x8xf32>
    %cst_45 = arith.constant dense<0.000000e+00> : vector<8xf32>
    %65 = vector.multi_reduction <add>, %64, %cst_45 [1] : vector<8x8xf32> to vector<8xf32>
    %66 = vector.shape_cast %65 : vector<8xf32> to vector<8x1xf32>
    %67 = tpu.reciprocal %66 {approx = true} : vector<8x1xf32> -> vector<8x1xf32>
    %68 = vector.broadcast %67 : vector<8x1xf32> to vector<8x8xf32>
    %69 = arith.mulf %64, %68 : vector<8x8xf32>
    %70 = arith.truncf %69 : vector<8x8xf32> to vector<8x8xbf16>
    %71 = vector.extract_strided_slice %39 {offsets = [0, 16], sizes = [8, 16], strides = [1, 1]} : vector<8x64xbf16> to vector<8x16xbf16>
    %cst_46 = arith.constant dense<0.000000e+00> : vector<8x16xf32>
    %72 = tpu.matmul %70, %71, %cst_46 {dimension_numbers = #tpu.dot_dimension_numbers<[1], [0], [0], [1], [0, 0, 1, 1], [], []>} : vector<8x8xbf16>, vector<8x16xbf16>, vector<8x16xf32> -> vector<8x16xf32>
    %c0_47 = arith.constant 0 : index
    %c16 = arith.constant 16 : index
    %73 = vector.load %arg38[%c0_47, %c16] : memref<8x64xf32, #tpu.memory_space<vmem>>, vector<8x16xf32>
    tpu.vector_store %arg38[%c0_47, %c16], %72 {strides = array<i32>} : memref<8x64xf32, #tpu.memory_space<vmem>>, vector<8x16xf32>,
    %74 = vector.extract_strided_slice %37 {offsets = [0, 32], sizes = [8, 16], strides = [1, 1]} : vector<8x64xbf16> to vector<8x16xbf16>
    %75 = vector.extract_strided_slice %38 {offsets = [0, 32], sizes = [8, 16], strides = [1, 1]} : vector<8x64xbf16> to vector<8x16xbf16>
    %cst_48 = arith.constant dense<0.000000e+00> : vector<8x8xf32>
    %76 = tpu.matmul %74, %75, %cst_48 {dimension_numbers = #tpu.dot_dimension_numbers<[1], [1], [0], [0], [0, 0, 1, 0], [], []>} : vector<8x16xbf16>, vector<8x16xbf16>, vector<8x8xf32> -> vector<8x8xf32>
    %cst_49 = arith.constant dense<0xFF800000> : vector<8xf32>
    %77 = vector.multi_reduction <maximumf>, %76, %cst_49 [1] : vector<8x8xf32> to vector<8xf32>
    %78 = vector.shape_cast %77 : vector<8xf32> to vector<8x1xf32>
    %79 = vector.broadcast %78 : vector<8x1xf32> to vector<8x8xf32>
    %80 = arith.subf %76, %79 : vector<8x8xf32>
    %81 = math.exp %80 : vector<8x8xf32>
    %cst_50 = arith.constant dense<0.000000e+00> : vector<8xf32>
    %82 = vector.multi_reduction <add>, %81, %cst_50 [1] : vector<8x8xf32> to vector<8xf32>
    %83 = vector.shape_cast %82 : vector<8xf32> to vector<8x1xf32>
    %84 = tpu.reciprocal %83 {approx = true} : vector<8x1xf32> -> vector<8x1xf32>
    %85 = vector.broadcast %84 : vector<8x1xf32> to vector<8x8xf32>
    %86 = arith.mulf %81, %85 : vector<8x8xf32>
    %87 = arith.truncf %86 : vector<8x8xf32> to vector<8x8xbf16>
    %88 = vector.extract_strided_slice %39 {offsets = [0, 32], sizes = [8, 16], strides = [1, 1]} : vector<8x64xbf16> to vector<8x16xbf16>
    %cst_51 = arith.constant dense<0.000000e+00> : vector<8x16xf32>
    %89 = tpu.matmul %87, %88, %cst_51 {dimension_numbers = #tpu.dot_dimension_numbers<[1], [0], [0], [1], [0, 0, 1, 1], [], []>} : vector<8x8xbf16>, vector<8x16xbf16>, vector<8x16xf32> -> vector<8x16xf32>
    %c0_52 = arith.constant 0 : index
    %c32 = arith.constant 32 : index
    %90 = vector.load %arg38[%c0_52, %c32] : memref<8x64xf32, #tpu.memory_space<vmem>>, vector<8x16xf32>
    tpu.vector_store %arg38[%c0_52, %c32], %89 {strides = array<i32>} : memref<8x64xf32, #tpu.memory_space<vmem>>, vector<8x16xf32>,
    %91 = vector.extract_strided_slice %37 {offsets = [0, 48], sizes = [8, 16], strides = [1, 1]} : vector<8x64xbf16> to vector<8x16xbf16>
    %92 = vector.extract_strided_slice %38 {offsets = [0, 48], sizes = [8, 16], strides = [1, 1]} : vector<8x64xbf16> to vector<8x16xbf16>
    %cst_53 = arith.constant dense<0.000000e+00> : vector<8x8xf32>
    %93 = tpu.matmul %91, %92, %cst_53 {dimension_numbers = #tpu.dot_dimension_numbers<[1], [1], [0], [0], [0, 0, 1, 0], [], []>} : vector<8x16xbf16>, vector<8x16xbf16>, vector<8x8xf32> -> vector<8x8xf32>
    %cst_54 = arith.constant dense<0xFF800000> : vector<8xf32>
    %94 = vector.multi_reduction <maximumf>, %93, %cst_54 [1] : vector<8x8xf32> to vector<8xf32>
    %95 = vector.shape_cast %94 : vector<8xf32> to vector<8x1xf32>
    %96 = vector.broadcast %95 : vector<8x1xf32> to vector<8x8xf32>
    %97 = arith.subf %93, %96 : vector<8x8xf32>
    %98 = math.exp %97 : vector<8x8xf32>
    %cst_55 = arith.constant dense<0.000000e+00> : vector<8xf32>
    %99 = vector.multi_reduction <add>, %98, %cst_55 [1] : vector<8x8xf32> to vector<8xf32>
    %100 = vector.shape_cast %99 : vector<8xf32> to vector<8x1xf32>
    %101 = tpu.reciprocal %100 {approx = true} : vector<8x1xf32> -> vector<8x1xf32>
    %102 = vector.broadcast %101 : vector<8x1xf32> to vector<8x8xf32>
    %103 = arith.mulf %98, %102 : vector<8x8xf32>
    %104 = arith.truncf %103 : vector<8x8xf32> to vector<8x8xbf16>
    %105 = vector.extract_strided_slice %39 {offsets = [0, 48], sizes = [8, 16], strides = [1, 1]} : vector<8x64xbf16> to vector<8x16xbf16>
    %cst_56 = arith.constant dense<0.000000e+00> : vector<8x16xf32>
    %106 = tpu.matmul %104, %105, %cst_56 {dimension_numbers = #tpu.dot_dimension_numbers<[1], [0], [0], [1], [0, 0, 1, 1], [], []>} : vector<8x8xbf16>, vector<8x16xbf16>, vector<8x16xf32> -> vector<8x16xf32>
    %c0_57 = arith.constant 0 : index
    %c48 = arith.constant 48 : index
    %107 = vector.load %arg38[%c0_57, %c48] : memref<8x64xf32, #tpu.memory_space<vmem>>, vector<8x16xf32>
    tpu.vector_store %arg38[%c0_57, %c48], %106 {strides = array<i32>} : memref<8x64xf32, #tpu.memory_space<vmem>>, vector<8x16xf32>,
    %c0_58 = arith.constant 0 : index
    %c0_59 = arith.constant 0 : index
    %108 = vector.load %arg38[%c0_58, %c0_59] : memref<8x64xf32, #tpu.memory_space<vmem>>, vector<8x64xf32>
    %109 = arith.truncf %108 : vector<8x64xf32> to vector<8x64xbf16>
    %c0_60 = arith.constant 0 : index
    %c0_61 = arith.constant 0 : index
    %110 = vector.load %arg15[%c0_60, %c0_61] : memref<64x64xbf16, #tpu.memory_space<vmem>>, vector<64x64xbf16>
    %cst_62 = arith.constant dense<0.000000e+00> : vector<8x64xf32>
    %111 = tpu.matmul %109, %110, %cst_62 {dimension_numbers = #tpu.dot_dimension_numbers<[1], [0], [0], [1], [0, 0, 1, 1], [], []>} : vector<8x64xbf16>, vector<64x64xbf16>, vector<8x64xf32> -> vector<8x64xf32>
    %112 = vector.broadcast %34 : vector<1x64xf32> to vector<8x64xf32>
    %113 = arith.addf %111, %112 : vector<8x64xf32>
    %114 = arith.addf %1, %113 : vector<8x64xf32>
    %c0_63 = arith.constant 0 : index
    %c0_64 = arith.constant 0 : index
    %115 = vector.load %arg29[%c0_63, %c0_64] : memref<1x64xf32, #tpu.memory_space<vmem>>, vector<1x64xf32>
    %c0_65 = arith.constant 0 : index
    %c0_66 = arith.constant 0 : index
    %116 = vector.load %arg30[%c0_65, %c0_66] : memref<1x64xf32, #tpu.memory_space<vmem>>, vector<1x64xf32>
    %cst_67 = arith.constant dense<0.000000e+00> : vector<8xf32>
    %117 = vector.multi_reduction <add>, %114, %cst_67 [1] : vector<8x64xf32> to vector<8xf32>
    %118 = vector.shape_cast %117 : vector<8xf32> to vector<8x1xf32>
    %cst_68 = arith.constant 6.400000e+01 : f32
    %119 = vector.broadcast %cst_68 : f32 to vector<8x1xf32>
    %120 = arith.divf %118, %119 : vector<8x1xf32>
    %121 = vector.broadcast %120 : vector<8x1xf32> to vector<8x64xf32>
    %122 = arith.subf %114, %121 : vector<8x64xf32>
    %123 = arith.mulf %122, %122 : vector<8x64xf32>
    %cst_69 = arith.constant dense<0.000000e+00> : vector<8xf32>
    %124 = vector.multi_reduction <add>, %123, %cst_69 [1] : vector<8x64xf32> to vector<8xf32>
    %125 = vector.shape_cast %124 : vector<8xf32> to vector<8x1xf32>
    %cst_70 = arith.constant 6.400000e+01 : f32
    %126 = vector.broadcast %cst_70 : f32 to vector<8x1xf32>
    %127 = arith.divf %125, %126 : vector<8x1xf32>
    %128 = vector.broadcast %120 : vector<8x1xf32> to vector<8x64xf32>
    %129 = arith.subf %114, %128 : vector<8x64xf32>
    %cst_71 = arith.constant 9.99999974E-6 : f32
    %130 = vector.broadcast %cst_71 : f32 to vector<8x1xf32>
    %131 = arith.addf %127, %130 : vector<8x1xf32>
    %132 = math.rsqrt %131 : vector<8x1xf32>
    %133 = vector.broadcast %132 : vector<8x1xf32> to vector<8x64xf32>
    %134 = arith.mulf %129, %133 : vector<8x64xf32>
    %135 = vector.broadcast %115 : vector<1x64xf32> to vector<8x64xf32>
    %136 = arith.mulf %134, %135 : vector<8x64xf32>
    %137 = vector.broadcast %116 : vector<1x64xf32> to vector<8x64xf32>
    %138 = arith.addf %136, %137 : vector<8x64xf32>
    %139 = arith.addf %138, %3 : vector<8x64xf32>
    %c0_72 = arith.constant 0 : index
    %c0_73 = arith.constant 0 : index
    %140 = vector.load %arg18[%c0_72, %c0_73] : memref<1x64xf32, #tpu.memory_space<vmem>>, vector<1x64xf32>
    %141 = arith.truncf %139 : vector<8x64xf32> to vector<8x64xbf16>
    %c0_74 = arith.constant 0 : index
    %c0_75 = arith.constant 0 : index
    %142 = vector.load %arg17[%c0_74, %c0_75] : memref<64x64xbf16, #tpu.memory_space<vmem>>, vector<64x64xbf16>
    %cst_76 = arith.constant dense<0.000000e+00> : vector<8x64xf32>
    %143 = tpu.matmul %141, %142, %cst_76 {dimension_numbers = #tpu.dot_dimension_numbers<[1], [0], [0], [1], [0, 0, 1, 1], [], []>} : vector<8x64xbf16>, vector<64x64xbf16>, vector<8x64xf32> -> vector<8x64xf32>
    %144 = vector.broadcast %140 : vector<1x64xf32> to vector<8x64xf32>
    %145 = arith.addf %143, %144 : vector<8x64xf32>
    %146 = arith.addf %9, %11 : vector<16x64xf32>
    %c0_77 = arith.constant 0 : index
    %c0_78 = arith.constant 0 : index
    %147 = vector.load %arg20[%c0_77, %c0_78] : memref<1x64xf32, #tpu.memory_space<vmem>>, vector<1x64xf32>
    %148 = arith.truncf %146 : vector<16x64xf32> to vector<16x64xbf16>
    %c0_79 = arith.constant 0 : index
    %c0_80 = arith.constant 0 : index
    %149 = vector.load %arg19[%c0_79, %c0_80] : memref<64x64xbf16, #tpu.memory_space<vmem>>, vector<64x64xbf16>
    %cst_81 = arith.constant dense<0.000000e+00> : vector<16x64xf32>
    %150 = tpu.matmul %148, %149, %cst_81 {dimension_numbers = #tpu.dot_dimension_numbers<[1], [0], [0], [1], [0, 0, 1, 1], [], []>} : vector<16x64xbf16>, vector<64x64xbf16>, vector<16x64xf32> -> vector<16x64xf32>
    %151 = vector.broadcast %147 : vector<1x64xf32> to vector<16x64xf32>
    %152 = arith.addf %150, %151 : vector<16x64xf32>
    %c0_82 = arith.constant 0 : index
    %c0_83 = arith.constant 0 : index
    %153 = vector.load %arg22[%c0_82, %c0_83] : memref<1x64xf32, #tpu.memory_space<vmem>>, vector<1x64xf32>
    %154 = arith.truncf %9 : vector<16x64xf32> to vector<16x64xbf16>
    %c0_84 = arith.constant 0 : index
    %c0_85 = arith.constant 0 : index
    %155 = vector.load %arg21[%c0_84, %c0_85] : memref<64x64xbf16, #tpu.memory_space<vmem>>, vector<64x64xbf16>
    %cst_86 = arith.constant dense<0.000000e+00> : vector<16x64xf32>
    %156 = tpu.matmul %154, %155, %cst_86 {dimension_numbers = #tpu.dot_dimension_numbers<[1], [0], [0], [1], [0, 0, 1, 1], [], []>} : vector<16x64xbf16>, vector<64x64xbf16>, vector<16x64xf32> -> vector<16x64xf32>
    %157 = vector.broadcast %153 : vector<1x64xf32> to vector<16x64xf32>
    %158 = arith.addf %156, %157 : vector<16x64xf32>
    %c0_87 = arith.constant 0 : index
    %c0_88 = arith.constant 0 : index
    %159 = vector.load %arg24[%c0_87, %c0_88] : memref<1x64xf32, #tpu.memory_space<vmem>>, vector<1x64xf32>
    %cst_89 = arith.constant 2.500000e-01 : f32
    %160 = vector.broadcast %cst_89 : f32 to vector<8x64xf32>
    %161 = arith.mulf %145, %160 : vector<8x64xf32>
    %162 = arith.truncf %161 : vector<8x64xf32> to vector<8x64xbf16>
    %163 = arith.truncf %152 : vector<16x64xf32> to vector<16x64xbf16>
    %164 = arith.truncf %158 : vector<16x64xf32> to vector<16x64xbf16>
    %165 = vector.extract_strided_slice %162 {offsets = [0, 0], sizes = [8, 16], strides = [1, 1]} : vector<8x64xbf16> to vector<8x16xbf16>
    %166 = vector.extract_strided_slice %163 {offsets = [0, 0], sizes = [16, 16], strides = [1, 1]} : vector<16x64xbf16> to vector<16x16xbf16>
    %cst_90 = arith.constant dense<0.000000e+00> : vector<8x16xf32>
    %167 = tpu.matmul %165, %166, %cst_90 {dimension_numbers = #tpu.dot_dimension_numbers<[1], [1], [0], [0], [0, 0, 1, 0], [], []>} : vector<8x16xbf16>, vector<16x16xbf16>, vector<8x16xf32> -> vector<8x16xf32>
    %168 = vector.broadcast %13 : vector<1x16xf32> to vector<8x16xf32>
    %169 = arith.addf %167, %168 : vector<8x16xf32>
    %cst_91 = arith.constant dense<0xFF800000> : vector<8xf32>
    %170 = vector.multi_reduction <maximumf>, %169, %cst_91 [1] : vector<8x16xf32> to vector<8xf32>
    %171 = vector.shape_cast %170 : vector<8xf32> to vector<8x1xf32>
    %172 = vector.broadcast %171 : vector<8x1xf32> to vector<8x16xf32>
    %173 = arith.subf %169, %172 : vector<8x16xf32>
    %174 = math.exp %173 : vector<8x16xf32>
    %cst_92 = arith.constant dense<0.000000e+00> : vector<8xf32>
    %175 = vector.multi_reduction <add>, %174, %cst_92 [1] : vector<8x16xf32> to vector<8xf32>
    %176 = vector.shape_cast %175 : vector<8xf32> to vector<8x1xf32>
    %177 = tpu.reciprocal %176 {approx = true} : vector<8x1xf32> -> vector<8x1xf32>
    %178 = vector.broadcast %177 : vector<8x1xf32> to vector<8x16xf32>
    %179 = arith.mulf %174, %178 : vector<8x16xf32>
    %180 = arith.truncf %179 : vector<8x16xf32> to vector<8x16xbf16>
    %181 = vector.extract_strided_slice %164 {offsets = [0, 0], sizes = [16, 16], strides = [1, 1]} : vector<16x64xbf16> to vector<16x16xbf16>
    %cst_93 = arith.constant dense<0.000000e+00> : vector<8x16xf32>
    %182 = tpu.matmul %180, %181, %cst_93 {dimension_numbers = #tpu.dot_dimension_numbers<[1], [0], [0], [1], [0, 0, 1, 1], [], []>} : vector<8x16xbf16>, vector<16x16xbf16>, vector<8x16xf32> -> vector<8x16xf32>
    %c0_94 = arith.constant 0 : index
    %c0_95 = arith.constant 0 : index
    %183 = vector.load %arg38[%c0_94, %c0_95] : memref<8x64xf32, #tpu.memory_space<vmem>>, vector<8x16xf32>
    tpu.vector_store %arg38[%c0_94, %c0_95], %182 {strides = array<i32>} : memref<8x64xf32, #tpu.memory_space<vmem>>, vector<8x16xf32>,
    %184 = vector.extract_strided_slice %162 {offsets = [0, 16], sizes = [8, 16], strides = [1, 1]} : vector<8x64xbf16> to vector<8x16xbf16>
    %185 = vector.extract_strided_slice %163 {offsets = [0, 16], sizes = [16, 16], strides = [1, 1]} : vector<16x64xbf16> to vector<16x16xbf16>
    %cst_96 = arith.constant dense<0.000000e+00> : vector<8x16xf32>
    %186 = tpu.matmul %184, %185, %cst_96 {dimension_numbers = #tpu.dot_dimension_numbers<[1], [1], [0], [0], [0, 0, 1, 0], [], []>} : vector<8x16xbf16>, vector<16x16xbf16>, vector<8x16xf32> -> vector<8x16xf32>
    %187 = vector.broadcast %13 : vector<1x16xf32> to vector<8x16xf32>
    %188 = arith.addf %186, %187 : vector<8x16xf32>
    %cst_97 = arith.constant dense<0xFF800000> : vector<8xf32>
    %189 = vector.multi_reduction <maximumf>, %188, %cst_97 [1] : vector<8x16xf32> to vector<8xf32>
    %190 = vector.shape_cast %189 : vector<8xf32> to vector<8x1xf32>
    %191 = vector.broadcast %190 : vector<8x1xf32> to vector<8x16xf32>
    %192 = arith.subf %188, %191 : vector<8x16xf32>
    %193 = math.exp %192 : vector<8x16xf32>
    %cst_98 = arith.constant dense<0.000000e+00> : vector<8xf32>
    %194 = vector.multi_reduction <add>, %193, %cst_98 [1] : vector<8x16xf32> to vector<8xf32>
    %195 = vector.shape_cast %194 : vector<8xf32> to vector<8x1xf32>
    %196 = tpu.reciprocal %195 {approx = true} : vector<8x1xf32> -> vector<8x1xf32>
    %197 = vector.broadcast %196 : vector<8x1xf32> to vector<8x16xf32>
    %198 = arith.mulf %193, %197 : vector<8x16xf32>
    %199 = arith.truncf %198 : vector<8x16xf32> to vector<8x16xbf16>
    %200 = vector.extract_strided_slice %164 {offsets = [0, 16], sizes = [16, 16], strides = [1, 1]} : vector<16x64xbf16> to vector<16x16xbf16>
    %cst_99 = arith.constant dense<0.000000e+00> : vector<8x16xf32>
    %201 = tpu.matmul %199, %200, %cst_99 {dimension_numbers = #tpu.dot_dimension_numbers<[1], [0], [0], [1], [0, 0, 1, 1], [], []>} : vector<8x16xbf16>, vector<16x16xbf16>, vector<8x16xf32> -> vector<8x16xf32>
    %c0_100 = arith.constant 0 : index
    %c16_101 = arith.constant 16 : index
    %202 = vector.load %arg38[%c0_100, %c16_101] : memref<8x64xf32, #tpu.memory_space<vmem>>, vector<8x16xf32>
    tpu.vector_store %arg38[%c0_100, %c16_101], %201 {strides = array<i32>} : memref<8x64xf32, #tpu.memory_space<vmem>>, vector<8x16xf32>,
    %203 = vector.extract_strided_slice %162 {offsets = [0, 32], sizes = [8, 16], strides = [1, 1]} : vector<8x64xbf16> to vector<8x16xbf16>
    %204 = vector.extract_strided_slice %163 {offsets = [0, 32], sizes = [16, 16], strides = [1, 1]} : vector<16x64xbf16> to vector<16x16xbf16>
    %cst_102 = arith.constant dense<0.000000e+00> : vector<8x16xf32>
    %205 = tpu.matmul %203, %204, %cst_102 {dimension_numbers = #tpu.dot_dimension_numbers<[1], [1], [0], [0], [0, 0, 1, 0], [], []>} : vector<8x16xbf16>, vector<16x16xbf16>, vector<8x16xf32> -> vector<8x16xf32>
    %206 = vector.broadcast %13 : vector<1x16xf32> to vector<8x16xf32>
    %207 = arith.addf %205, %206 : vector<8x16xf32>
    %cst_103 = arith.constant dense<0xFF800000> : vector<8xf32>
    %208 = vector.multi_reduction <maximumf>, %207, %cst_103 [1] : vector<8x16xf32> to vector<8xf32>
    %209 = vector.shape_cast %208 : vector<8xf32> to vector<8x1xf32>
    %210 = vector.broadcast %209 : vector<8x1xf32> to vector<8x16xf32>
    %211 = arith.subf %207, %210 : vector<8x16xf32>
    %212 = math.exp %211 : vector<8x16xf32>
    %cst_104 = arith.constant dense<0.000000e+00> : vector<8xf32>
    %213 = vector.multi_reduction <add>, %212, %cst_104 [1] : vector<8x16xf32> to vector<8xf32>
    %214 = vector.shape_cast %213 : vector<8xf32> to vector<8x1xf32>
    %215 = tpu.reciprocal %214 {approx = true} : vector<8x1xf32> -> vector<8x1xf32>
    %216 = vector.broadcast %215 : vector<8x1xf32> to vector<8x16xf32>
    %217 = arith.mulf %212, %216 : vector<8x16xf32>
    %218 = arith.truncf %217 : vector<8x16xf32> to vector<8x16xbf16>
    %219 = vector.extract_strided_slice %164 {offsets = [0, 32], sizes = [16, 16], strides = [1, 1]} : vector<16x64xbf16> to vector<16x16xbf16>
    %cst_105 = arith.constant dense<0.000000e+00> : vector<8x16xf32>
    %220 = tpu.matmul %218, %219, %cst_105 {dimension_numbers = #tpu.dot_dimension_numbers<[1], [0], [0], [1], [0, 0, 1, 1], [], []>} : vector<8x16xbf16>, vector<16x16xbf16>, vector<8x16xf32> -> vector<8x16xf32>
    %c0_106 = arith.constant 0 : index
    %c32_107 = arith.constant 32 : index
    %221 = vector.load %arg38[%c0_106, %c32_107] : memref<8x64xf32, #tpu.memory_space<vmem>>, vector<8x16xf32>
    tpu.vector_store %arg38[%c0_106, %c32_107], %220 {strides = array<i32>} : memref<8x64xf32, #tpu.memory_space<vmem>>, vector<8x16xf32>,
    %222 = vector.extract_strided_slice %162 {offsets = [0, 48], sizes = [8, 16], strides = [1, 1]} : vector<8x64xbf16> to vector<8x16xbf16>
    %223 = vector.extract_strided_slice %163 {offsets = [0, 48], sizes = [16, 16], strides = [1, 1]} : vector<16x64xbf16> to vector<16x16xbf16>
    %cst_108 = arith.constant dense<0.000000e+00> : vector<8x16xf32>
    %224 = tpu.matmul %222, %223, %cst_108 {dimension_numbers = #tpu.dot_dimension_numbers<[1], [1], [0], [0], [0, 0, 1, 0], [], []>} : vector<8x16xbf16>, vector<16x16xbf16>, vector<8x16xf32> -> vector<8x16xf32>
    %225 = vector.broadcast %13 : vector<1x16xf32> to vector<8x16xf32>
    %226 = arith.addf %224, %225 : vector<8x16xf32>
    %cst_109 = arith.constant dense<0xFF800000> : vector<8xf32>
    %227 = vector.multi_reduction <maximumf>, %226, %cst_109 [1] : vector<8x16xf32> to vector<8xf32>
    %228 = vector.shape_cast %227 : vector<8xf32> to vector<8x1xf32>
    %229 = vector.broadcast %228 : vector<8x1xf32> to vector<8x16xf32>
    %230 = arith.subf %226, %229 : vector<8x16xf32>
    %231 = math.exp %230 : vector<8x16xf32>
    %cst_110 = arith.constant dense<0.000000e+00> : vector<8xf32>
    %232 = vector.multi_reduction <add>, %231, %cst_110 [1] : vector<8x16xf32> to vector<8xf32>
    %233 = vector.shape_cast %232 : vector<8xf32> to vector<8x1xf32>
    %234 = tpu.reciprocal %233 {approx = true} : vector<8x1xf32> -> vector<8x1xf32>
    %235 = vector.broadcast %234 : vector<8x1xf32> to vector<8x16xf32>
    %236 = arith.mulf %231, %235 : vector<8x16xf32>
    %237 = arith.truncf %236 : vector<8x16xf32> to vector<8x16xbf16>
    %238 = vector.extract_strided_slice %164 {offsets = [0, 48], sizes = [16, 16], strides = [1, 1]} : vector<16x64xbf16> to vector<16x16xbf16>
    %cst_111 = arith.constant dense<0.000000e+00> : vector<8x16xf32>
    %239 = tpu.matmul %237, %238, %cst_111 {dimension_numbers = #tpu.dot_dimension_numbers<[1], [0], [0], [1], [0, 0, 1, 1], [], []>} : vector<8x16xbf16>, vector<16x16xbf16>, vector<8x16xf32> -> vector<8x16xf32>
    %c0_112 = arith.constant 0 : index
    %c48_113 = arith.constant 48 : index
    %240 = vector.load %arg38[%c0_112, %c48_113] : memref<8x64xf32, #tpu.memory_space<vmem>>, vector<8x16xf32>
    tpu.vector_store %arg38[%c0_112, %c48_113], %239 {strides = array<i32>} : memref<8x64xf32, #tpu.memory_space<vmem>>, vector<8x16xf32>,
    %c0_114 = arith.constant 0 : index
    %c0_115 = arith.constant 0 : index
    %241 = vector.load %arg38[%c0_114, %c0_115] : memref<8x64xf32, #tpu.memory_space<vmem>>, vector<8x64xf32>
    %242 = arith.truncf %241 : vector<8x64xf32> to vector<8x64xbf16>
    %c0_116 = arith.constant 0 : index
    %c0_117 = arith.constant 0 : index
    %243 = vector.load %arg23[%c0_116, %c0_117] : memref<64x64xbf16, #tpu.memory_space<vmem>>, vector<64x64xbf16>
    %cst_118 = arith.constant dense<0.000000e+00> : vector<8x64xf32>
    %244 = tpu.matmul %242, %243, %cst_118 {dimension_numbers = #tpu.dot_dimension_numbers<[1], [0], [0], [1], [0, 0, 1, 1], [], []>} : vector<8x64xbf16>, vector<64x64xbf16>, vector<8x64xf32> -> vector<8x64xf32>
    %245 = vector.broadcast %159 : vector<1x64xf32> to vector<8x64xf32>
    %246 = arith.addf %244, %245 : vector<8x64xf32>
    %247 = arith.addf %138, %246 : vector<8x64xf32>
    %c0_119 = arith.constant 0 : index
    %c0_120 = arith.constant 0 : index
    %248 = vector.load %arg31[%c0_119, %c0_120] : memref<1x64xf32, #tpu.memory_space<vmem>>, vector<1x64xf32>
    %c0_121 = arith.constant 0 : index
    %c0_122 = arith.constant 0 : index
    %249 = vector.load %arg32[%c0_121, %c0_122] : memref<1x64xf32, #tpu.memory_space<vmem>>, vector<1x64xf32>
    %cst_123 = arith.constant dense<0.000000e+00> : vector<8xf32>
    %250 = vector.multi_reduction <add>, %247, %cst_123 [1] : vector<8x64xf32> to vector<8xf32>
    %251 = vector.shape_cast %250 : vector<8xf32> to vector<8x1xf32>
    %cst_124 = arith.constant 6.400000e+01 : f32
    %252 = vector.broadcast %cst_124 : f32 to vector<8x1xf32>
    %253 = arith.divf %251, %252 : vector<8x1xf32>
    %254 = vector.broadcast %253 : vector<8x1xf32> to vector<8x64xf32>
    %255 = arith.subf %247, %254 : vector<8x64xf32>
    %256 = arith.mulf %255, %255 : vector<8x64xf32>
    %cst_125 = arith.constant dense<0.000000e+00> : vector<8xf32>
    %257 = vector.multi_reduction <add>, %256, %cst_125 [1] : vector<8x64xf32> to vector<8xf32>
    %258 = vector.shape_cast %257 : vector<8xf32> to vector<8x1xf32>
    %cst_126 = arith.constant 6.400000e+01 : f32
    %259 = vector.broadcast %cst_126 : f32 to vector<8x1xf32>
    %260 = arith.divf %258, %259 : vector<8x1xf32>
    %261 = vector.broadcast %253 : vector<8x1xf32> to vector<8x64xf32>
    %262 = arith.subf %247, %261 : vector<8x64xf32>
    %cst_127 = arith.constant 9.99999974E-6 : f32
    %263 = vector.broadcast %cst_127 : f32 to vector<8x1xf32>
    %264 = arith.addf %260, %263 : vector<8x1xf32>
    %265 = math.rsqrt %264 : vector<8x1xf32>
    %266 = vector.broadcast %265 : vector<8x1xf32> to vector<8x64xf32>
    %267 = arith.mulf %262, %266 : vector<8x64xf32>
    %268 = vector.broadcast %248 : vector<1x64xf32> to vector<8x64xf32>
    %269 = arith.mulf %267, %268 : vector<8x64xf32>
    %270 = vector.broadcast %249 : vector<1x64xf32> to vector<8x64xf32>
    %271 = arith.addf %269, %270 : vector<8x64xf32>
    %c0_128 = arith.constant 0 : index
    %c0_129 = arith.constant 0 : index
    %272 = vector.load %arg26[%c0_128, %c0_129] : memref<1x128xf32, #tpu.memory_space<vmem>>, vector<1x128xf32>
    %273 = arith.truncf %271 : vector<8x64xf32> to vector<8x64xbf16>
    %c0_130 = arith.constant 0 : index
    %c0_131 = arith.constant 0 : index
    %274 = vector.load %arg25[%c0_130, %c0_131] : memref<64x128xbf16, #tpu.memory_space<vmem>>, vector<64x128xbf16>
    %cst_132 = arith.constant dense<0.000000e+00> : vector<8x128xf32>
    %275 = tpu.matmul %273, %274, %cst_132 {dimension_numbers = #tpu.dot_dimension_numbers<[1], [0], [0], [1], [0, 0, 1, 1], [], []>} : vector<8x64xbf16>, vector<64x128xbf16>, vector<8x128xf32> -> vector<8x128xf32>
    %276 = vector.broadcast %272 : vector<1x128xf32> to vector<8x128xf32>
    %277 = arith.addf %275, %276 : vector<8x128xf32>
    %cst_133 = arith.constant 0.000000e+00 : f32
    %278 = vector.broadcast %cst_133 : f32 to vector<8x128xf32>
    %279 = arith.maximumf %277, %278 : vector<8x128xf32>
    %c0_134 = arith.constant 0 : index
    %c0_135 = arith.constant 0 : index
    %280 = vector.load %arg28[%c0_134, %c0_135] : memref<1x64xf32, #tpu.memory_space<vmem>>, vector<1x64xf32>
    %281 = arith.truncf %279 : vector<8x128xf32> to vector<8x128xbf16>
    %c0_136 = arith.constant 0 : index
    %c0_137 = arith.constant 0 : index
    %282 = vector.load %arg27[%c0_136, %c0_137] : memref<128x64xbf16, #tpu.memory_space<vmem>>, vector<128x64xbf16>
    %cst_138 = arith.constant dense<0.000000e+00> : vector<8x64xf32>
    %283 = tpu.matmul %281, %282, %cst_138 {dimension_numbers = #tpu.dot_dimension_numbers<[1], [0], [0], [1], [0, 0, 1, 1], [], []>} : vector<8x128xbf16>, vector<128x64xbf16>, vector<8x64xf32> -> vector<8x64xf32>
    %284 = vector.broadcast %280 : vector<1x64xf32> to vector<8x64xf32>
    %285 = arith.addf %283, %284 : vector<8x64xf32>
    %286 = arith.addf %271, %285 : vector<8x64xf32>
    %c0_139 = arith.constant 0 : index
    %c0_140 = arith.constant 0 : index
    %287 = vector.load %arg33[%c0_139, %c0_140] : memref<1x64xf32, #tpu.memory_space<vmem>>, vector<1x64xf32>
    %c0_141 = arith.constant 0 : index
    %c0_142 = arith.constant 0 : index
    %288 = vector.load %arg34[%c0_141, %c0_142] : memref<1x64xf32, #tpu.memory_space<vmem>>, vector<1x64xf32>
    %cst_143 = arith.constant dense<0.000000e+00> : vector<8xf32>
    %289 = vector.multi_reduction <add>, %286, %cst_143 [1] : vector<8x64xf32> to vector<8xf32>
    %290 = vector.shape_cast %289 : vector<8xf32> to vector<8x1xf32>
    %cst_144 = arith.constant 6.400000e+01 : f32
    %291 = vector.broadcast %cst_144 : f32 to vector<8x1xf32>
    %292 = arith.divf %290, %291 : vector<8x1xf32>
    %293 = vector.broadcast %292 : vector<8x1xf32> to vector<8x64xf32>
    %294 = arith.subf %286, %293 : vector<8x64xf32>
    %295 = arith.mulf %294, %294 : vector<8x64xf32>
    %cst_145 = arith.constant dense<0.000000e+00> : vector<8xf32>
    %296 = vector.multi_reduction <add>, %295, %cst_145 [1] : vector<8x64xf32> to vector<8xf32>
    %297 = vector.shape_cast %296 : vector<8xf32> to vector<8x1xf32>
    %cst_146 = arith.constant 6.400000e+01 : f32
    %298 = vector.broadcast %cst_146 : f32 to vector<8x1xf32>
    %299 = arith.divf %297, %298 : vector<8x1xf32>
    %300 = vector.broadcast %292 : vector<8x1xf32> to vector<8x64xf32>
    %301 = arith.subf %286, %300 : vector<8x64xf32>
    %cst_147 = arith.constant 9.99999974E-6 : f32
    %302 = vector.broadcast %cst_147 : f32 to vector<8x1xf32>
    %303 = arith.addf %299, %302 : vector<8x1xf32>
    %304 = math.rsqrt %303 : vector<8x1xf32>
    %305 = vector.broadcast %304 : vector<8x1xf32> to vector<8x64xf32>
    %306 = arith.mulf %301, %305 : vector<8x64xf32>
    %307 = vector.broadcast %287 : vector<1x64xf32> to vector<8x64xf32>
    %308 = arith.mulf %306, %307 : vector<8x64xf32>
    %309 = vector.broadcast %288 : vector<1x64xf32> to vector<8x64xf32>
    %310 = arith.addf %308, %309 : vector<8x64xf32>
    %c0_148 = arith.constant 0 : index
    %c0_149 = arith.constant 0 : index
    %c0_150 = arith.constant 0 : index
    %311 = vector.load %arg37[%c0_148, %c0_149, %c0_150] : memref<1x8x64xf32, #tpu.memory_space<vmem>>, vector<1x8x64xf32>
    %312 = vector.shape_cast %311 : vector<1x8x64xf32> to vector<8x64xf32>
    %313 = vector.shape_cast %310 : vector<8x64xf32> to vector<1x8x64xf32>
    tpu.vector_store %arg37[%c0_148, %c0_149, %c0_150], %313 {strides = array<i32>} : memref<1x8x64xf32, #tpu.memory_space<vmem>>, vector<1x8x64xf32>,
    return
  }
  func.func @transform_0(%arg0: i32, %arg1: i32) -> (i32, i32, i32) {
    %c0_i32 = arith.constant 0 : i32
    %c0_i32_0 = arith.constant 0 : i32
    return %arg0, %arg1, %c0_i32 : i32, i32, i32
  }
  func.func @transform_1(%arg0: i32, %arg1: i32) -> (i32, i32, i32) {
    %c0_i32 = arith.constant 0 : i32
    %c0_i32_0 = arith.constant 0 : i32
    return %arg0, %arg1, %c0_i32 : i32, i32, i32
  }
  func.func @transform_2(%arg0: i32, %arg1: i32) -> (i32, i32, i32) {
    %c0_i32 = arith.constant 0 : i32
    %c0_i32_0 = arith.constant 0 : i32
    %c0_i32_1 = arith.constant 0 : i32
    return %arg0, %c0_i32, %c0_i32_0 : i32, i32, i32
  }
  func.func @transform_3(%arg0: i32, %arg1: i32) -> (i32, i32, i32) {
    %c0_i32 = arith.constant 0 : i32
    %c0_i32_0 = arith.constant 0 : i32
    %c0_i32_1 = arith.constant 0 : i32
    return %arg0, %c0_i32, %c0_i32_0 : i32, i32, i32
  }
  func.func @transform_4(%arg0: i32, %arg1: i32) -> (i32, i32, i32) {
    %c0_i32 = arith.constant 0 : i32
    %c0_i32_0 = arith.constant 0 : i32
    %c0_i32_1 = arith.constant 0 : i32
    return %arg0, %c0_i32, %c0_i32_0 : i32, i32, i32
  }
  func.func @transform_5(%arg0: i32, %arg1: i32) -> (i32, i32, i32) {
    %c0_i32 = arith.constant 0 : i32
    %c0_i32_0 = arith.constant 0 : i32
    %c0_i32_1 = arith.constant 0 : i32
    return %arg0, %c0_i32, %c0_i32_0 : i32, i32, i32
  }
  func.func @transform_6(%arg0: i32, %arg1: i32) -> (i32, i32, i32) {
    %c0_i32 = arith.constant 0 : i32
    %c0_i32_0 = arith.constant 0 : i32
    %c0_i32_1 = arith.constant 0 : i32
    return %arg0, %c0_i32, %c0_i32_0 : i32, i32, i32
  }
  func.func @transform_7(%arg0: i32, %arg1: i32) -> (i32, i32) {
    %c0_i32 = arith.constant 0 : i32
    %c0_i32_0 = arith.constant 0 : i32
    %c0_i32_1 = arith.constant 0 : i32
    return %c0_i32, %c0_i32_0 : i32, i32
  }
  func.func @transform_8(%arg0: i32, %arg1: i32) -> (i32, i32) {
    %c0_i32 = arith.constant 0 : i32
    %c0_i32_0 = arith.constant 0 : i32
    %c0_i32_1 = arith.constant 0 : i32
    return %c0_i32, %c0_i32_0 : i32, i32
  }
  func.func @transform_9(%arg0: i32, %arg1: i32) -> (i32, i32) {
    %c0_i32 = arith.constant 0 : i32
    %c0_i32_0 = arith.constant 0 : i32
    %c0_i32_1 = arith.constant 0 : i32
    return %c0_i32, %c0_i32_0 : i32, i32
  }
  func.func @transform_10(%arg0: i32, %arg1: i32) -> (i32, i32) {
    %c0_i32 = arith.constant 0 : i32
    %c0_i32_0 = arith.constant 0 : i32
    %c0_i32_1 = arith.constant 0 : i32
    return %c0_i32, %c0_i32_0 : i32, i32
  }
  func.func @transform_11(%arg0: i32, %arg1: i32) -> (i32, i32) {
    %c0_i32 = arith.constant 0 : i32
    %c0_i32_0 = arith.constant 0 : i32
    %c0_i32_1 = arith.constant 0 : i32
    return %c0_i32, %c0_i32_0 : i32, i32
  }
  func.func @transform_12(%arg0: i32, %arg1: i32) -> (i32, i32) {
    %c0_i32 = arith.constant 0 : i32
    %c0_i32_0 = arith.constant 0 : i32
    %c0_i32_1 = arith.constant 0 : i32
    return %c0_i32, %c0_i32_0 : i32, i32
  }
  func.func @transform_13(%arg0: i32, %arg1: i32) -> (i32, i32) {
    %c0_i32 = arith.constant 0 : i32
    %c0_i32_0 = arith.constant 0 : i32
    %c0_i32_1 = arith.constant 0 : i32
    return %c0_i32, %c0_i32_0 : i32, i32
  }
  func.func @transform_14(%arg0: i32, %arg1: i32) -> (i32, i32) {
    %c0_i32 = arith.constant 0 : i32
    %c0_i32_0 = arith.constant 0 : i32
    %c0_i32_1 = arith.constant 0 : i32
    return %c0_i32, %c0_i32_0 : i32, i32
  }
  func.func @transform_15(%arg0: i32, %arg1: i32) -> (i32, i32) {
    %c0_i32 = arith.constant 0 : i32
    %c0_i32_0 = arith.constant 0 : i32
    %c0_i32_1 = arith.constant 0 : i32
    return %c0_i32, %c0_i32_0 : i32, i32
  }
  func.func @transform_16(%arg0: i32, %arg1: i32) -> (i32, i32) {
    %c0_i32 = arith.constant 0 : i32
    %c0_i32_0 = arith.constant 0 : i32
    %c0_i32_1 = arith.constant 0 : i32
    return %c0_i32, %c0_i32_0 : i32, i32
  }
  func.func @transform_17(%arg0: i32, %arg1: i32) -> (i32, i32) {
    %c0_i32 = arith.constant 0 : i32
    %c0_i32_0 = arith.constant 0 : i32
    %c0_i32_1 = arith.constant 0 : i32
    return %c0_i32, %c0_i32_0 : i32, i32
  }
  func.func @transform_18(%arg0: i32, %arg1: i32) -> (i32, i32) {
    %c0_i32 = arith.constant 0 : i32
    %c0_i32_0 = arith.constant 0 : i32
    %c0_i32_1 = arith.constant 0 : i32
    return %c0_i32, %c0_i32_0 : i32, i32
  }
  func.func @transform_19(%arg0: i32, %arg1: i32) -> (i32, i32) {
    %c0_i32 = arith.constant 0 : i32
    %c0_i32_0 = arith.constant 0 : i32
    %c0_i32_1 = arith.constant 0 : i32
    return %c0_i32, %c0_i32_0 : i32, i32
  }
  func.func @transform_20(%arg0: i32, %arg1: i32) -> (i32, i32) {
    %c0_i32 = arith.constant 0 : i32
    %c0_i32_0 = arith.constant 0 : i32
    %c0_i32_1 = arith.constant 0 : i32
    return %c0_i32, %c0_i32_0 : i32, i32
  }
  func.func @transform_21(%arg0: i32, %arg1: i32) -> (i32, i32) {
    %c0_i32 = arith.constant 0 : i32
    %c0_i32_0 = arith.constant 0 : i32
    %c0_i32_1 = arith.constant 0 : i32
    return %c0_i32, %c0_i32_0 : i32, i32
  }
  func.func @transform_22(%arg0: i32, %arg1: i32) -> (i32, i32) {
    %c0_i32 = arith.constant 0 : i32
    %c0_i32_0 = arith.constant 0 : i32
    %c0_i32_1 = arith.constant 0 : i32
    return %c0_i32, %c0_i32_0 : i32, i32
  }
  func.func @transform_23(%arg0: i32, %arg1: i32) -> (i32, i32) {
    %c0_i32 = arith.constant 0 : i32
    %c0_i32_0 = arith.constant 0 : i32
    %c0_i32_1 = arith.constant 0 : i32
    return %c0_i32, %c0_i32_0 : i32, i32
  }
  func.func @transform_24(%arg0: i32, %arg1: i32) -> (i32, i32) {
    %c0_i32 = arith.constant 0 : i32
    %c0_i32_0 = arith.constant 0 : i32
    %c0_i32_1 = arith.constant 0 : i32
    return %c0_i32, %c0_i32_0 : i32, i32
  }
  func.func @transform_25(%arg0: i32, %arg1: i32) -> (i32, i32) {
    %c0_i32 = arith.constant 0 : i32
    %c0_i32_0 = arith.constant 0 : i32
    %c0_i32_1 = arith.constant 0 : i32
    return %c0_i32, %c0_i32_0 : i32, i32
  }
  func.func @transform_26(%arg0: i32, %arg1: i32) -> (i32, i32) {
    %c0_i32 = arith.constant 0 : i32
    %c0_i32_0 = arith.constant 0 : i32
    %c0_i32_1 = arith.constant 0 : i32
    return %c0_i32, %c0_i32_0 : i32, i32
  }
  func.func @transform_27(%arg0: i32, %arg1: i32) -> (i32, i32) {
    %c0_i32 = arith.constant 0 : i32
    %c0_i32_0 = arith.constant 0 : i32
    %c0_i32_1 = arith.constant 0 : i32
    return %c0_i32, %c0_i32_0 : i32, i32
  }
  func.func @transform_28(%arg0: i32, %arg1: i32) -> (i32, i32) {
    %c0_i32 = arith.constant 0 : i32
    %c0_i32_0 = arith.constant 0 : i32
    %c0_i32_1 = arith.constant 0 : i32
    return %c0_i32, %c0_i32_0 : i32, i32
  }
  func.func @transform_29(%arg0: i32, %arg1: i32) -> (i32, i32) {
    %c0_i32 = arith.constant 0 : i32
    %c0_i32_0 = arith.constant 0 : i32
    %c0_i32_1 = arith.constant 0 : i32
    return %c0_i32, %c0_i32_0 : i32, i32
  }
  func.func @transform_30(%arg0: i32, %arg1: i32) -> (i32, i32) {
    %c0_i32 = arith.constant 0 : i32
    %c0_i32_0 = arith.constant 0 : i32
    %c0_i32_1 = arith.constant 0 : i32
    return %c0_i32, %c0_i32_0 : i32, i32
  }
  func.func @transform_31(%arg0: i32, %arg1: i32) -> (i32, i32) {
    %c0_i32 = arith.constant 0 : i32
    %c0_i32_0 = arith.constant 0 : i32
    %c0_i32_1 = arith.constant 0 : i32
    return %c0_i32, %c0_i32_0 : i32, i32
  }
  func.func @transform_32(%arg0: i32, %arg1: i32) -> (i32, i32) {
    %c0_i32 = arith.constant 0 : i32
    %c0_i32_0 = arith.constant 0 : i32
    %c0_i32_1 = arith.constant 0 : i32
    return %c0_i32, %c0_i32_0 : i32, i32
  }
  func.func @transform_33(%arg0: i32, %arg1: i32) -> (i32, i32) {
    %c0_i32 = arith.constant 0 : i32
    %c0_i32_0 = arith.constant 0 : i32
    %c0_i32_1 = arith.constant 0 : i32
    return %c0_i32, %c0_i32_0 : i32, i32
  }
  func.func @transform_34(%arg0: i32, %arg1: i32) -> (i32, i32) {
    %c0_i32 = arith.constant 0 : i32
    %c0_i32_0 = arith.constant 0 : i32
    %c0_i32_1 = arith.constant 0 : i32
    return %c0_i32, %c0_i32_0 : i32, i32
  }
  func.func @transform_35(%arg0: i32, %arg1: i32) -> (i32, i32, i32) {
    %c0_i32 = arith.constant 0 : i32
    %c0_i32_0 = arith.constant 0 : i32
    return %arg0, %arg1, %c0_i32 : i32, i32, i32
  }
}

module attributes {stable_mosaic.version = 11 : i64} {
  func.func @_decoder_layer_kernel(%arg0: i32, %arg1: i32, %arg2: memref<1x8x64xf32, #tpu.memory_space<vmem>>, %arg3: memref<1x8x64xf32, #tpu.memory_space<vmem>>, %arg4: memref<1x8x64xf32, #tpu.memory_space<vmem>>, %arg5: memref<1x8x64xf32, #tpu.memory_space<vmem>>, %arg6: memref<1x16x64xf32, #tpu.memory_space<vmem>>, %arg7: memref<1x16x64xf32, #tpu.memory_space<vmem>>, %arg8: memref<1x1x16xf32, #tpu.memory_space<vmem>>, %arg9: memref<64x64xbf16, #tpu.memory_space<vmem>>, %arg10: memref<1x64xf32, #tpu.memory_space<vmem>>, %arg11: memref<64x64xbf16, #tpu.memory_space<vmem>>, %arg12: memref<1x64xf32, #tpu.memory_space<vmem>>, %arg13: memref<64x64xbf16, #tpu.memory_space<vmem>>, %arg14: memref<1x64xf32, #tpu.memory_space<vmem>>, %arg15: memref<64x64xbf16, #tpu.memory_space<vmem>>, %arg16: memref<1x64xf32, #tpu.memory_space<vmem>>, %arg17: memref<64x64xbf16, #tpu.memory_space<vmem>>, %arg18: memref<1x64xf32, #tpu.memory_space<vmem>>, %arg19: memref<64x64xbf16, #tpu.memory_space<vmem>>, %arg20: memref<1x64xf32, #tpu.memory_space<vmem>>, %arg21: memref<64x64xbf16, #tpu.memory_space<vmem>>, %arg22: memref<1x64xf32, #tpu.memory_space<vmem>>, %arg23: memref<64x64xbf16, #tpu.memory_space<vmem>>, %arg24: memref<1x64xf32, #tpu.memory_space<vmem>>, %arg25: memref<64x128xbf16, #tpu.memory_space<vmem>>, %arg26: memref<1x128xf32, #tpu.memory_space<vmem>>, %arg27: memref<128x64xbf16, #tpu.memory_space<vmem>>, %arg28: memref<1x64xf32, #tpu.memory_space<vmem>>, %arg29: memref<1x64xf32, #tpu.memory_space<vmem>>, %arg30: memref<1x64xf32, #tpu.memory_space<vmem>>, %arg31: memref<1x64xf32, #tpu.memory_space<vmem>>, %arg32: memref<1x64xf32, #tpu.memory_space<vmem>>, %arg33: memref<1x64xf32, #tpu.memory_space<vmem>>, %arg34: memref<1x64xf32, #tpu.memory_space<vmem>>, %arg35: memref<1x64xf32, #tpu.memory_space<vmem>>, %arg36: memref<1x64xf32, #tpu.memory_space<vmem>>, %arg37: memref<1x8x64xf32, #tpu.memory_space<vmem>>, %arg38: memref<8x64xf32, #tpu.memory_space<vmem>>) attributes {dimension_semantics = [#tpu.dimension_semantics<parallel>, #tpu.dimension_semantics<parallel>], iteration_bounds = array<i64: 2, 1>, scalar_prefetch = 0 : i64, scratch_operands = 1 : i64, tpu.core_type = #tpu.core_type<tc>, window_params = [{transform_indices = @transform_0, window_bounds = array<i64: 1, 8, 64>}, {transform_indices = @transform_1, window_bounds = array<i64: 1, 8, 64>}, {transform_indices = @transform_2, window_bounds = array<i64: 1, 8, 64>}, {transform_indices = @transform_3, window_bounds = array<i64: 1, 8, 64>}, {transform_indices = @transform_4, window_bounds = array<i64: 1, 16, 64>}, {transform_indices = @transform_5, window_bounds = array<i64: 1, 16, 64>}, {transform_indices = @transform_6, window_bounds = array<i64: 1, 1, 16>}, {pipeline_mode = #tpu.pipeline_mode<synchronous>, transform_indices = @transform_7, window_bounds = array<i64: 64, 64>}, {pipeline_mode = #tpu.pipeline_mode<synchronous>, transform_indices = @transform_8, window_bounds = array<i64: 1, 64>}, {pipeline_mode = #tpu.pipeline_mode<synchronous>, transform_indices = @transform_9, window_bounds = array<i64: 64, 64>}, {pipeline_mode = #tpu.pipeline_mode<synchronous>, transform_indices = @transform_10, window_bounds = array<i64: 1, 64>}, {pipeline_mode = #tpu.pipeline_mode<synchronous>, transform_indices = @transform_11, window_bounds = array<i64: 64, 64>}, {pipeline_mode = #tpu.pipeline_mode<synchronous>, transform_indices = @transform_12, window_bounds = array<i64: 1, 64>}, {pipeline_mode = #tpu.pipeline_mode<synchronous>, transform_indices = @transform_13, window_bounds = array<i64: 64, 64>}, {pipeline_mode = #tpu.pipeline_mode<synchronous>, transform_indices = @transform_14, window_bounds = array<i64: 1, 64>}, {pipeline_mode = #tpu.pipeline_mode<synchronous>, transform_indices = @transform_15, window_bounds = array<i64: 64, 64>}, {pipeline_mode = #tpu.pipeline_mode<synchronous>, transform_indices = @transform_16, window_bounds = array<i64: 1, 64>}, {pipeline_mode = #tpu.pipeline_mode<synchronous>, transform_indices = @transform_17, window_bounds = array<i64: 64, 64>}, {pipeline_mode = #tpu.pipeline_mode<synchronous>, transform_indices = @transform_18, window_bounds = array<i64: 1, 64>}, {pipeline_mode = #tpu.pipeline_mode<synchronous>, transform_indices = @transform_19, window_bounds = array<i64: 64, 64>}, {pipeline_mode = #tpu.pipeline_mode<synchronous>, transform_indices = @transform_20, window_bounds = array<i64: 1, 64>}, {pipeline_mode = #tpu.pipeline_mode<synchronous>, transform_indices = @transform_21, window_bounds = array<i64: 64, 64>}, {pipeline_mode = #tpu.pipeline_mode<synchronous>, transform_indices = @transform_22, window_bounds = array<i64: 1, 64>}, {pipeline_mode = #tpu.pipeline_mode<synchronous>, transform_indices = @transform_23, window_bounds = array<i64: 64, 128>}, {pipeline_mode = #tpu.pipeline_mode<synchronous>, transform_indices = @transform_24, window_bounds = array<i64: 1, 128>}, {pipeline_mode = #tpu.pipeline_mode<synchronous>, transform_indices = @transform_25, window_bounds = array<i64: 128, 64>}, {pipeline_mode = #tpu.pipeline_mode<synchronous>, transform_indices = @transform_26, window_bounds = array<i64: 1, 64>}, {pipeline_mode = #tpu.pipeline_mode<synchronous>, transform_indices = @transform_27, window_bounds = array<i64: 1, 64>}, {pipeline_mode = #tpu.pipeline_mode<synchronous>, transform_indices = @transform_28, window_bounds = array<i64: 1, 64>}, {pipeline_mode = #tpu.pipeline_mode<synchronous>, transform_indices = @transform_29, window_bounds = array<i64: 1, 64>}, {pipeline_mode = #tpu.pipeline_mode<synchronous>, transform_indices = @transform_30, window_bounds = array<i64: 1, 64>}, {pipeline_mode = #tpu.pipeline_mode<synchronous>, transform_indices = @transform_31, window_bounds = array<i64: 1, 64>}, {pipeline_mode = #tpu.pipeline_mode<synchronous>, transform_indices = @transform_32, window_bounds = array<i64: 1, 64>}, {pipeline_mode = #tpu.pipeline_mode<synchronous>, transform_indices = @transform_33, window_bounds = array<i64: 1, 64>}, {pipeline_mode = #tpu.pipeline_mode<synchronous>, transform_indices = @transform_34, window_bounds = array<i64: 1, 64>}, {transform_indices = @transform_35, window_bounds = array<i64: 1, 8, 64>}]} {
    %c0 = arith.constant 0 : index
    %c0_0 = arith.constant 0 : index
    %c0_1 = arith.constant 0 : index
    %0 = vector.load %arg2[%c0, %c0_0, %c0_1] : memref<1x8x64xf32, #tpu.memory_space<vmem>>, vector<1x8x64xf32>
    %1 = vector.shape_cast %0 : vector<1x8x64xf32> to vector<8x64xf32>
    %c0_2 = arith.constant 0 : index
    %c0_3 = arith.constant 0 : index
    %c0_4 = arith.constant 0 : index
    %2 = vector.load %arg3[%c0_2, %c0_3, %c0_4] : memref<1x8x64xf32, #tpu.memory_space<vmem>>, vector<1x8x64xf32>
    %3 = vector.shape_cast %2 : vector<1x8x64xf32> to vector<8x64xf32>
    %c0_5 = arith.constant 0 : index
    %c0_6 = arith.constant 0 : index
    %c0_7 = arith.constant 0 : index
    %4 = vector.load %arg4[%c0_5, %c0_6, %c0_7] : memref<1x8x64xf32, #tpu.memory_space<vmem>>, vector<1x8x64xf32>
    %5 = vector.shape_cast %4 : vector<1x8x64xf32> to vector<8x64xf32>
    %c0_8 = arith.constant 0 : index
    %c0_9 = arith.constant 0 : index
    %c0_10 = arith.constant 0 : index
    %6 = vector.load %arg5[%c0_8, %c0_9, %c0_10] : memref<1x8x64xf32, #tpu.memory_space<vmem>>, vector<1x8x64xf32>
    %7 = vector.shape_cast %6 : vector<1x8x64xf32> to vector<8x64xf32>
    %c0_11 = arith.constant 0 : index
    %c0_12 = arith.constant 0 : index
    %c0_13 = arith.constant 0 : index
    %8 = vector.load %arg6[%c0_11, %c0_12, %c0_13] : memref<1x16x64xf32, #tpu.memory_space<vmem>>, vector<1x16x64xf32>
    %9 = vector.shape_cast %8 : vector<1x16x64xf32> to vector<16x64xf32>
    %c0_14 = arith.constant 0 : index
    %c0_15 = arith.constant 0 : index
    %c0_16 = arith.constant 0 : index
    %10 = vector.load %arg7[%c0_14, %c0_15, %c0_16] : memref<1x16x64xf32, #tpu.memory_space<vmem>>, vector<1x16x64xf32>
    %11 = vector.shape_cast %10 : vector<1x16x64xf32> to vector<16x64xf32>
    %c0_17 = arith.constant 0 : index
    %c0_18 = arith.constant 0 : index
    %c0_19 = arith.constant 0 : index
    %12 = vector.load %arg8[%c0_17, %c0_18, %c0_19] : memref<1x1x16xf32, #tpu.memory_space<vmem>>, vector<1x1x16xf32>
    %13 = vector.shape_cast %12 : vector<1x1x16xf32> to vector<1x16xf32>
    %14 = arith.addf %1, %3 : vector<8x64xf32>
    %c0_20 = arith.constant 0 : index
    %c0_21 = arith.constant 0 : index
    %15 = vector.load %arg10[%c0_20, %c0_21] : memref<1x64xf32, #tpu.memory_space<vmem>>, vector<1x64xf32>
    %16 = arith.truncf %14 : vector<8x64xf32> to vector<8x64xbf16>
    %c0_22 = arith.constant 0 : index
    %c0_23 = arith.constant 0 : index
    %17 = vector.load %arg9[%c0_22, %c0_23] : memref<64x64xbf16, #tpu.memory_space<vmem>>, vector<64x64xbf16>
    %cst = arith.constant dense<0.000000e+00> : vector<8x64xf32>
    %18 = tpu.matmul %16, %17, %cst {dimension_numbers = #tpu.dot_dimension_numbers<[1], [0], [0], [1], [0, 0, 1, 1], [], []>} : vector<8x64xbf16>, vector<64x64xbf16>, vector<8x64xf32> -> vector<8x64xf32>
    %19 = vector.broadcast %15 : vector<1x64xf32> to vector<8x64xf32>
    %20 = arith.addf %18, %19 : vector<8x64xf32>
    %21 = arith.addf %5, %7 : vector<8x64xf32>
    %c0_24 = arith.constant 0 : index
    %c0_25 = arith.constant 0 : index
    %22 = vector.load %arg12[%c0_24, %c0_25] : memref<1x64xf32, #tpu.memory_space<vmem>>, vector<1x64xf32>
    %23 = arith.truncf %21 : vector<8x64xf32> to vector<8x64xbf16>
    %c0_26 = arith.constant 0 : index
    %c0_27 = arith.constant 0 : index
    %24 = vector.load %arg11[%c0_26, %c0_27] : memref<64x64xbf16, #tpu.memory_space<vmem>>, vector<64x64xbf16>
    %cst_28 = arith.constant dense<0.000000e+00> : vector<8x64xf32>
    %25 = tpu.matmul %23, %24, %cst_28 {dimension_numbers = #tpu.dot_dimension_numbers<[1], [0], [0], [1], [0, 0, 1, 1], [], []>} : vector<8x64xbf16>, vector<64x64xbf16>, vector<8x64xf32> -> vector<8x64xf32>
    %26 = vector.broadcast %22 : vector<1x64xf32> to vector<8x64xf32>
    %27 = arith.addf %25, %26 : vector<8x64xf32>
    %c0_29 = arith.constant 0 : index
    %c0_30 = arith.constant 0 : index
    %28 = vector.load %arg14[%c0_29, %c0_30] : memref<1x64xf32, #tpu.memory_space<vmem>>, vector<1x64xf32>
    %29 = arith.truncf %5 : vector<8x64xf32> to vector<8x64xbf16>
    %c0_31 = arith.constant 0 : index
    %c0_32 = arith.constant 0 : index
    %30 = vector.load %arg13[%c0_31, %c0_32] : memref<64x64xbf16, #tpu.memory_space<vmem>>, vector<64x64xbf16>
    %cst_33 = arith.constant dense<0.000000e+00> : vector<8x64xf32>
    %31 = tpu.matmul %29, %30, %cst_33 {dimension_numbers = #tpu.dot_dimension_numbers<[1], [0], [0], [1], [0, 0, 1, 1], [], []>} : vector<8x64xbf16>, vector<64x64xbf16>, vector<8x64xf32> -> vector<8x64xf32>
    %32 = vector.broadcast %28 : vector<1x64xf32> to vector<8x64xf32>
    %33 = arith.addf %31, %32 : vector<8x64xf32>
    %c0_34 = arith.constant 0 : index
    %c0_35 = arith.constant 0 : index
    %34 = vector.load %arg16[%c0_34, %c0_35] : memref<1x64xf32, #tpu.memory_space<vmem>>, vector<1x64xf32>
    %cst_36 = arith.constant 2.500000e-01 : f32
    %35 = vector.broadcast %cst_36 : f32 to vector<8x64xf32>
    %36 = arith.mulf %20, %35 : vector<8x64xf32>
    %37 = arith.truncf %36 : vector<8x64xf32> to vector<8x64xbf16>
    %38 = arith.truncf %27 : vector<8x64xf32> to vector<8x64xbf16>
    %39 = arith.truncf %33 : vector<8x64xf32> to vector<8x64xbf16>
    %40 = vector.extract_strided_slice %37 {offsets = [0, 0], sizes = [8, 16], strides = [1, 1]} : vector<8x64xbf16> to vector<8x16xbf16>
    %41 = vector.extract_strided_slice %38 {offsets = [0, 0], sizes = [8, 16], strides = [1, 1]} : vector<8x64xbf16> to vector<8x16xbf16>
    %cst_37 = arith.constant dense<0.000000e+00> : vector<8x8xf32>
    %42 = tpu.matmul %40, %41, %cst_37 {dimension_numbers = #tpu.dot_dimension_numbers<[1], [1], [0], [0], [0, 0, 1, 0], [], []>} : vector<8x16xbf16>, vector<8x16xbf16>, vector<8x8xf32> -> vector<8x8xf32>
    %cst_38 = arith.constant dense<0xFF800000> : vector<8xf32>
    %43 = vector.multi_reduction <maximumf>, %42, %cst_38 [1] : vector<8x8xf32> to vector<8xf32>
    %44 = vector.shape_cast %43 : vector<8xf32> to vector<8x1xf32>
    %45 = vector.broadcast %44 : vector<8x1xf32> to vector<8x8xf32>
    %46 = arith.subf %42, %45 : vector<8x8xf32>
    %47 = math.exp %46 : vector<8x8xf32>
    %cst_39 = arith.constant dense<0.000000e+00> : vector<8xf32>
    %48 = vector.multi_reduction <add>, %47, %cst_39 [1] : vector<8x8xf32> to vector<8xf32>
    %49 = vector.shape_cast %48 : vector<8xf32> to vector<8x1xf32>
    %50 = tpu.reciprocal %49 {approx = true} : vector<8x1xf32> -> vector<8x1xf32>
    %51 = vector.broadcast %50 : vector<8x1xf32> to vector<8x8xf32>
    %52 = arith.mulf %47, %51 : vector<8x8xf32>
    %53 = arith.truncf %52 : vector<8x8xf32> to vector<8x8xbf16>
    %54 = vector.extract_strided_slice %39 {offsets = [0, 0], sizes = [8, 16], strides = [1, 1]} : vector<8x64xbf16> to vector<8x16xbf16>
    %cst_40 = arith.constant dense<0.000000e+00> : vector<8x16xf32>
    %55 = tpu.matmul %53, %54, %cst_40 {dimension_numbers = #tpu.dot_dimension_numbers<[1], [0], [0], [1], [0, 0, 1, 1], [], []>} : vector<8x8xbf16>, vector<8x16xbf16>, vector<8x16xf32> -> vector<8x16xf32>
    %c0_41 = arith.constant 0 : index
    %c0_42 = arith.constant 0 : index
    %56 = vector.load %arg38[%c0_41, %c0_42] : memref<8x64xf32, #tpu.memory_space<vmem>>, vector<8x16xf32>
    tpu.vector_store %arg38[%c0_41, %c0_42], %55 {strides = array<i32>} : memref<8x64xf32, #tpu.memory_space<vmem>>, vector<8x16xf32>,
    %57 = vector.extract_strided_slice %37 {offsets = [0, 16], sizes = [8, 16], strides = [1, 1]} : vector<8x64xbf16> to vector<8x16xbf16>
    %58 = vector.extract_strided_slice %38 {offsets = [0, 16], sizes = [8, 16], strides = [1, 1]} : vector<8x64xbf16> to vector<8x16xbf16>
    %cst_43 = arith.constant dense<0.000000e+00> : vector<8x8xf32>
    %59 = tpu.matmul %57, %58, %cst_43 {dimension_numbers = #tpu.dot_dimension_numbers<[1], [1], [0], [0], [0, 0, 1, 0], [], []>} : vector<8x16xbf16>, vector<8x16xbf16>, vector<8x8xf32> -> vector<8x8xf32>
    %cst_44 = arith.constant dense<0xFF800000> : vector<8xf32>
    %60 = vector.multi_reduction <maximumf>, %59, %cst_44 [1] : vector<8x8xf32> to vector<8xf32>
    %61 = vector.shape_cast %60 : vector<8xf32> to vector<8x1xf32>
    %62 = vector.broadcast %61 : vector<8x1xf32> to vector<8x8xf32>
    %63 = arith.subf %59, %62 : vector<8x8xf32>
    %64 = math.exp %63 : vector<8x8xf32>
    %cst_45 = arith.constant dense<0.000000e+00> : vector<8xf32>
    %65 = vector.multi_reduction <add>, %64, %cst_45 [1] : vector<8x8xf32> to vector<8xf32>
    %66 = vector.shape_cast %65 : vector<8xf32> to vector<8x1xf32>
    %67 = tpu.reciprocal %66 {approx = true} : vector<8x1xf32> -> vector<8x1xf32>
    %68 = vector.broadcast %67 : vector<8x1xf32> to vector<8x8xf32>
    %69 = arith.mulf %64, %68 : vector<8x8xf32>
    %70 = arith.truncf %69 : vector<8x8xf32> to vector<8x8xbf16>
    %71 = vector.extract_strided_slice %39 {offsets = [0, 16], sizes = [8, 16], strides = [1, 1]} : vector<8x64xbf16> to vector<8x16xbf16>
    %cst_46 = arith.constant dense<0.000000e+00> : vector<8x16xf32>
    %72 = tpu.matmul %70, %71, %cst_46 {dimension_numbers = #tpu.dot_dimension_numbers<[1], [0], [0], [1], [0, 0, 1, 1], [], []>} : vector<8x8xbf16>, vector<8x16xbf16>, vector<8x16xf32> -> vector<8x16xf32>
    %c0_47 = arith.constant 0 : index
    %c16 = arith.constant 16 : index
    %73 = vector.load %arg38[%c0_47, %c16] : memref<8x64xf32, #tpu.memory_space<vmem>>, vector<8x16xf32>
    tpu.vector_store %arg38[%c0_47, %c16], %72 {strides = array<i32>} : memref<8x64xf32, #tpu.memory_space<vmem>>, vector<8x16xf32>,
    %74 = vector.extract_strided_slice %37 {offsets = [0, 32], sizes = [8, 16], strides = [1, 1]} : vector<8x64xbf16> to vector<8x16xbf16>
    %75 = vector.extract_strided_slice %38 {offsets = [0, 32], sizes = [8, 16], strides = [1, 1]} : vector<8x64xbf16> to vector<8x16xbf16>
    %cst_48 = arith.constant dense<0.000000e+00> : vector<8x8xf32>
    %76 = tpu.matmul %74, %75, %cst_48 {dimension_numbers = #tpu.dot_dimension_numbers<[1], [1], [0], [0], [0, 0, 1, 0], [], []>} : vector<8x16xbf16>, vector<8x16xbf16>, vector<8x8xf32> -> vector<8x8xf32>
    %cst_49 = arith.constant dense<0xFF800000> : vector<8xf32>
    %77 = vector.multi_reduction <maximumf>, %76, %cst_49 [1] : vector<8x8xf32> to vector<8xf32>
    %78 = vector.shape_cast %77 : vector<8xf32> to vector<8x1xf32>
    %79 = vector.broadcast %78 : vector<8x1xf32> to vector<8x8xf32>
    %80 = arith.subf %76, %79 : vector<8x8xf32>
    %81 = math.exp %80 : vector<8x8xf32>
    %cst_50 = arith.constant dense<0.000000e+00> : vector<8xf32>
    %82 = vector.multi_reduction <add>, %81, %cst_50 [1] : vector<8x8xf32> to vector<8xf32>
    %83 = vector.shape_cast %82 : vector<8xf32> to vector<8x1xf32>
    %84 = tpu.reciprocal %83 {approx = true} : vector<8x1xf32> -> vector<8x1xf32>
    %85 = vector.broadcast %84 : vector<8x1xf32> to vector<8x8xf32>
    %86 = arith.mulf %81, %85 : vector<8x8xf32>
    %87 = arith.truncf %86 : vector<8x8xf32> to vector<8x8xbf16>
    %88 = vector.extract_strided_slice %39 {offsets = [0, 32], sizes = [8, 16], strides = [1, 1]} : vector<8x64xbf16> to vector<8x16xbf16>
    %cst_51 = arith.constant dense<0.000000e+00> : vector<8x16xf32>
    %89 = tpu.matmul %87, %88, %cst_51 {dimension_numbers = #tpu.dot_dimension_numbers<[1], [0], [0], [1], [0, 0, 1, 1], [], []>} : vector<8x8xbf16>, vector<8x16xbf16>, vector<8x16xf32> -> vector<8x16xf32>
    %c0_52 = arith.constant 0 : index
    %c32 = arith.constant 32 : index
    %90 = vector.load %arg38[%c0_52, %c32] : memref<8x64xf32, #tpu.memory_space<vmem>>, vector<8x16xf32>
    tpu.vector_store %arg38[%c0_52, %c32], %89 {strides = array<i32>} : memref<8x64xf32, #tpu.memory_space<vmem>>, vector<8x16xf32>,
    %91 = vector.extract_strided_slice %37 {offsets = [0, 48], sizes = [8, 16], strides = [1, 1]} : vector<8x64xbf16> to vector<8x16xbf16>
    %92 = vector.extract_strided_slice %38 {offsets = [0, 48], sizes = [8, 16], strides = [1, 1]} : vector<8x64xbf16> to vector<8x16xbf16>
    %cst_53 = arith.constant dense<0.000000e+00> : vector<8x8xf32>
    %93 = tpu.matmul %91, %92, %cst_53 {dimension_numbers = #tpu.dot_dimension_numbers<[1], [1], [0], [0], [0, 0, 1, 0], [], []>} : vector<8x16xbf16>, vector<8x16xbf16>, vector<8x8xf32> -> vector<8x8xf32>
    %cst_54 = arith.constant dense<0xFF800000> : vector<8xf32>
    %94 = vector.multi_reduction <maximumf>, %93, %cst_54 [1] : vector<8x8xf32> to vector<8xf32>
    %95 = vector.shape_cast %94 : vector<8xf32> to vector<8x1xf32>
    %96 = vector.broadcast %95 : vector<8x1xf32> to vector<8x8xf32>
    %97 = arith.subf %93, %96 : vector<8x8xf32>
    %98 = math.exp %97 : vector<8x8xf32>
    %cst_55 = arith.constant dense<0.000000e+00> : vector<8xf32>
    %99 = vector.multi_reduction <add>, %98, %cst_55 [1] : vector<8x8xf32> to vector<8xf32>
    %100 = vector.shape_cast %99 : vector<8xf32> to vector<8x1xf32>
    %101 = tpu.reciprocal %100 {approx = true} : vector<8x1xf32> -> vector<8x1xf32>
    %102 = vector.broadcast %101 : vector<8x1xf32> to vector<8x8xf32>
    %103 = arith.mulf %98, %102 : vector<8x8xf32>
    %104 = arith.truncf %103 : vector<8x8xf32> to vector<8x8xbf16>
    %105 = vector.extract_strided_slice %39 {offsets = [0, 48], sizes = [8, 16], strides = [1, 1]} : vector<8x64xbf16> to vector<8x16xbf16>
    %cst_56 = arith.constant dense<0.000000e+00> : vector<8x16xf32>
    %106 = tpu.matmul %104, %105, %cst_56 {dimension_numbers = #tpu.dot_dimension_numbers<[1], [0], [0], [1], [0, 0, 1, 1], [], []>} : vector<8x8xbf16>, vector<8x16xbf16>, vector<8x16xf32> -> vector<8x16xf32>
    %c0_57 = arith.constant 0 : index
    %c48 = arith.constant 48 : index
    %107 = vector.load %arg38[%c0_57, %c48] : memref<8x64xf32, #tpu.memory_space<vmem>>, vector<8x16xf32>
    tpu.vector_store %arg38[%c0_57, %c48], %106 {strides = array<i32>} : memref<8x64xf32, #tpu.memory_space<vmem>>, vector<8x16xf32>,
    %c0_58 = arith.constant 0 : index
    %c0_59 = arith.constant 0 : index
    %108 = vector.load %arg38[%c0_58, %c0_59] : memref<8x64xf32, #tpu.memory_space<vmem>>, vector<8x64xf32>
    %109 = arith.truncf %108 : vector<8x64xf32> to vector<8x64xbf16>
    %c0_60 = arith.constant 0 : index
    %c0_61 = arith.constant 0 : index
    %110 = vector.load %arg15[%c0_60, %c0_61] : memref<64x64xbf16, #tpu.memory_space<vmem>>, vector<64x64xbf16>
    %cst_62 = arith.constant dense<0.000000e+00> : vector<8x64xf32>
    %111 = tpu.matmul %109, %110, %cst_62 {dimension_numbers = #tpu.dot_dimension_numbers<[1], [0], [0], [1], [0, 0, 1, 1], [], []>} : vector<8x64xbf16>, vector<64x64xbf16>, vector<8x64xf32> -> vector<8x64xf32>
    %112 = vector.broadcast %34 : vector<1x64xf32> to vector<8x64xf32>
    %113 = arith.addf %111, %112 : vector<8x64xf32>
    %114 = arith.addf %1, %113 : vector<8x64xf32>
    %c0_63 = arith.constant 0 : index
    %c0_64 = arith.constant 0 : index
    %115 = vector.load %arg29[%c0_63, %c0_64] : memref<1x64xf32, #tpu.memory_space<vmem>>, vector<1x64xf32>
    %c0_65 = arith.constant 0 : index
    %c0_66 = arith.constant 0 : index
    %116 = vector.load %arg30[%c0_65, %c0_66] : memref<1x64xf32, #tpu.memory_space<vmem>>, vector<1x64xf32>
    %cst_67 = arith.constant dense<0.000000e+00> : vector<8xf32>
    %117 = vector.multi_reduction <add>, %114, %cst_67 [1] : vector<8x64xf32> to vector<8xf32>
    %118 = vector.shape_cast %117 : vector<8xf32> to vector<8x1xf32>
    %cst_68 = arith.constant 6.400000e+01 : f32
    %119 = vector.broadcast %cst_68 : f32 to vector<8x1xf32>
    %120 = arith.divf %118, %119 : vector<8x1xf32>
    %121 = vector.broadcast %120 : vector<8x1xf32> to vector<8x64xf32>
    %122 = arith.subf %114, %121 : vector<8x64xf32>
    %123 = arith.mulf %122, %122 : vector<8x64xf32>
    %cst_69 = arith.constant dense<0.000000e+00> : vector<8xf32>
    %124 = vector.multi_reduction <add>, %123, %cst_69 [1] : vector<8x64xf32> to vector<8xf32>
    %125 = vector.shape_cast %124 : vector<8xf32> to vector<8x1xf32>
    %cst_70 = arith.constant 6.400000e+01 : f32
    %126 = vector.broadcast %cst_70 : f32 to vector<8x1xf32>
    %127 = arith.divf %125, %126 : vector<8x1xf32>
    %128 = vector.broadcast %120 : vector<8x1xf32> to vector<8x64xf32>
    %129 = arith.subf %114, %128 : vector<8x64xf32>
    %cst_71 = arith.constant 9.99999974E-6 : f32
    %130 = vector.broadcast %cst_71 : f32 to vector<8x1xf32>
    %131 = arith.addf %127, %130 : vector<8x1xf32>
    %132 = math.rsqrt %131 : vector<8x1xf32>
    %133 = vector.broadcast %132 : vector<8x1xf32> to vector<8x64xf32>
    %134 = arith.mulf %129, %133 : vector<8x64xf32>
    %135 = vector.broadcast %115 : vector<1x64xf32> to vector<8x64xf32>
    %136 = arith.mulf %134, %135 : vector<8x64xf32>
    %137 = vector.broadcast %116 : vector<1x64xf32> to vector<8x64xf32>
    %138 = arith.addf %136, %137 : vector<8x64xf32>
    %139 = arith.addf %138, %3 : vector<8x64xf32>
    %c0_72 = arith.constant 0 : index
    %c0_73 = arith.constant 0 : index
    %140 = vector.load %arg18[%c0_72, %c0_73] : memref<1x64xf32, #tpu.memory_space<vmem>>, vector<1x64xf32>
    %141 = arith.truncf %139 : vector<8x64xf32> to vector<8x64xbf16>
    %c0_74 = arith.constant 0 : index
    %c0_75 = arith.constant 0 : index
    %142 = vector.load %arg17[%c0_74, %c0_75] : memref<64x64xbf16, #tpu.memory_space<vmem>>, vector<64x64xbf16>
    %cst_76 = arith.constant dense<0.000000e+00> : vector<8x64xf32>
    %143 = tpu.matmul %141, %142, %cst_76 {dimension_numbers = #tpu.dot_dimension_numbers<[1], [0], [0], [1], [0, 0, 1, 1], [], []>} : vector<8x64xbf16>, vector<64x64xbf16>, vector<8x64xf32> -> vector<8x64xf32>
    %144 = vector.broadcast %140 : vector<1x64xf32> to vector<8x64xf32>
    %145 = arith.addf %143, %144 : vector<8x64xf32>
    %146 = arith.addf %9, %11 : vector<16x64xf32>
    %c0_77 = arith.constant 0 : index
    %c0_78 = arith.constant 0 : index
    %147 = vector.load %arg20[%c0_77, %c0_78] : memref<1x64xf32, #tpu.memory_space<vmem>>, vector<1x64xf32>
    %148 = arith.truncf %146 : vector<16x64xf32> to vector<16x64xbf16>
    %c0_79 = arith.constant 0 : index
    %c0_80 = arith.constant 0 : index
    %149 = vector.load %arg19[%c0_79, %c0_80] : memref<64x64xbf16, #tpu.memory_space<vmem>>, vector<64x64xbf16>
    %cst_81 = arith.constant dense<0.000000e+00> : vector<16x64xf32>
    %150 = tpu.matmul %148, %149, %cst_81 {dimension_numbers = #tpu.dot_dimension_numbers<[1], [0], [0], [1], [0, 0, 1, 1], [], []>} : vector<16x64xbf16>, vector<64x64xbf16>, vector<16x64xf32> -> vector<16x64xf32>
    %151 = vector.broadcast %147 : vector<1x64xf32> to vector<16x64xf32>
    %152 = arith.addf %150, %151 : vector<16x64xf32>
    %c0_82 = arith.constant 0 : index
    %c0_83 = arith.constant 0 : index
    %153 = vector.load %arg22[%c0_82, %c0_83] : memref<1x64xf32, #tpu.memory_space<vmem>>, vector<1x64xf32>
    %154 = arith.truncf %9 : vector<16x64xf32> to vector<16x64xbf16>
    %c0_84 = arith.constant 0 : index
    %c0_85 = arith.constant 0 : index
    %155 = vector.load %arg21[%c0_84, %c0_85] : memref<64x64xbf16, #tpu.memory_space<vmem>>, vector<64x64xbf16>
    %cst_86 = arith.constant dense<0.000000e+00> : vector<16x64xf32>
    %156 = tpu.matmul %154, %155, %cst_86 {dimension_numbers = #tpu.dot_dimension_numbers<[1], [0], [0], [1], [0, 0, 1, 1], [], []>} : vector<16x64xbf16>, vector<64x64xbf16>, vector<16x64xf32> -> vector<16x64xf32>
    %157 = vector.broadcast %153 : vector<1x64xf32> to vector<16x64xf32>
    %158 = arith.addf %156, %157 : vector<16x64xf32>
    %c0_87 = arith.constant 0 : index
    %c0_88 = arith.constant 0 : index
    %159 = vector.load %arg24[%c0_87, %c0_88] : memref<1x64xf32, #tpu.memory_space<vmem>>, vector<1x64xf32>
    %cst_89 = arith.constant 2.500000e-01 : f32
    %160 = vector.broadcast %cst_89 : f32 to vector<8x64xf32>
    %161 = arith.mulf %145, %160 : vector<8x64xf32>
    %162 = arith.truncf %161 : vector<8x64xf32> to vector<8x64xbf16>
    %163 = arith.truncf %152 : vector<16x64xf32> to vector<16x64xbf16>
    %164 = arith.truncf %158 : vector<16x64xf32> to vector<16x64xbf16>
    %165 = vector.extract_strided_slice %162 {offsets = [0, 0], sizes = [8, 16], strides = [1, 1]} : vector<8x64xbf16> to vector<8x16xbf16>
    %166 = vector.extract_strided_slice %163 {offsets = [0, 0], sizes = [16, 16], strides = [1, 1]} : vector<16x64xbf16> to vector<16x16xbf16>
    %cst_90 = arith.constant dense<0.000000e+00> : vector<8x16xf32>
    %167 = tpu.matmul %165, %166, %cst_90 {dimension_numbers = #tpu.dot_dimension_numbers<[1], [1], [0], [0], [0, 0, 1, 0], [], []>} : vector<8x16xbf16>, vector<16x16xbf16>, vector<8x16xf32> -> vector<8x16xf32>
    %168 = vector.broadcast %13 : vector<1x16xf32> to vector<8x16xf32>
    %169 = arith.addf %167, %168 : vector<8x16xf32>
    %cst_91 = arith.constant dense<0xFF800000> : vector<8xf32>
    %170 = vector.multi_reduction <maximumf>, %169, %cst_91 [1] : vector<8x16xf32> to vector<8xf32>
    %171 = vector.shape_cast %170 : vector<8xf32> to vector<8x1xf32>
    %172 = vector.broadcast %171 : vector<8x1xf32> to vector<8x16xf32>
    %173 = arith.subf %169, %172 : vector<8x16xf32>
    %174 = math.exp %173 : vector<8x16xf32>
    %cst_92 = arith.constant dense<0.000000e+00> : vector<8xf32>
    %175 = vector.multi_reduction <add>, %174, %cst_92 [1] : vector<8x16xf32> to vector<8xf32>
    %176 = vector.shape_cast %175 : vector<8xf32> to vector<8x1xf32>
    %177 = tpu.reciprocal %176 {approx = true} : vector<8x1xf32> -> vector<8x1xf32>
    %178 = vector.broadcast %177 : vector<8x1xf32> to vector<8x16xf32>
    %179 = arith.mulf %174, %178 : vector<8x16xf32>
    %180 = arith.truncf %179 : vector<8x16xf32> to vector<8x16xbf16>
    %181 = vector.extract_strided_slice %164 {offsets = [0, 0], sizes = [16, 16], strides = [1, 1]} : vector<16x64xbf16> to vector<16x16xbf16>
    %cst_93 = arith.constant dense<0.000000e+00> : vector<8x16xf32>
    %182 = tpu.matmul %180, %181, %cst_93 {dimension_numbers = #tpu.dot_dimension_numbers<[1], [0], [0], [1], [0, 0, 1, 1], [], []>} : vector<8x16xbf16>, vector<16x16xbf16>, vector<8x16xf32> -> vector<8x16xf32>
    %c0_94 = arith.constant 0 : index
    %c0_95 = arith.constant 0 : index
    %183 = vector.load %arg38[%c0_94, %c0_95] : memref<8x64xf32, #tpu.memory_space<vmem>>, vector<8x16xf32>
    tpu.vector_store %arg38[%c0_94, %c0_95], %182 {strides = array<i32>} : memref<8x64xf32, #tpu.memory_space<vmem>>, vector<8x16xf32>,
    %184 = vector.extract_strided_slice %162 {offsets = [0, 16], sizes = [8, 16], strides = [1, 1]} : vector<8x64xbf16> to vector<8x16xbf16>
    %185 = vector.extract_strided_slice %163 {offsets = [0, 16], sizes = [16, 16], strides = [1, 1]} : vector<16x64xbf16> to vector<16x16xbf16>
    %cst_96 = arith.constant dense<0.000000e+00> : vector<8x16xf32>
    %186 = tpu.matmul %184, %185, %cst_96 {dimension_numbers = #tpu.dot_dimension_numbers<[1], [1], [0], [0], [0, 0, 1, 0], [], []>} : vector<8x16xbf16>, vector<16x16xbf16>, vector<8x16xf32> -> vector<8x16xf32>
    %187 = vector.broadcast %13 : vector<1x16xf32> to vector<8x16xf32>
    %188 = arith.addf %186, %187 : vector<8x16xf32>
    %cst_97 = arith.constant dense<0xFF800000> : vector<8xf32>
    %189 = vector.multi_reduction <maximumf>, %188, %cst_97 [1] : vector<8x16xf32> to vector<8xf32>
    %190 = vector.shape_cast %189 : vector<8xf32> to vector<8x1xf32>
    %191 = vector.broadcast %190 : vector<8x1xf32> to vector<8x16xf32>
    %192 = arith.subf %188, %191 : vector<8x16xf32>
    %193 = math.exp %192 : vector<8x16xf32>
    %cst_98 = arith.constant dense<0.000000e+00> : vector<8xf32>
    %194 = vector.multi_reduction <add>, %193, %cst_98 [1] : vector<8x16xf32> to vector<8xf32>
    %195 = vector.shape_cast %194 : vector<8xf32> to vector<8x1xf32>
    %196 = tpu.reciprocal %195 {approx = true} : vector<8x1xf32> -> vector<8x1xf32>
    %197 = vector.broadcast %196 : vector<8x1xf32> to vector<8x16xf32>
    %198 = arith.mulf %193, %197 : vector<8x16xf32>
    %199 = arith.truncf %198 : vector<8x16xf32> to vector<8x16xbf16>
    %200 = vector.extract_strided_slice %164 {offsets = [0, 16], sizes = [16, 16], strides = [1, 1]} : vector<16x64xbf16> to vector<16x16xbf16>
    %cst_99 = arith.constant dense<0.000000e+00> : vector<8x16xf32>
    %201 = tpu.matmul %199, %200, %cst_99 {dimension_numbers = #tpu.dot_dimension_numbers<[1], [0], [0], [1], [0, 0, 1, 1], [], []>} : vector<8x16xbf16>, vector<16x16xbf16>, vector<8x16xf32> -> vector<8x16xf32>
    %c0_100 = arith.constant 0 : index
    %c16_101 = arith.constant 16 : index
    %202 = vector.load %arg38[%c0_100, %c16_101] : memref<8x64xf32, #tpu.memory_space<vmem>>, vector<8x16xf32>
    tpu.vector_store %arg38[%c0_100, %c16_101], %201 {strides = array<i32>} : memref<8x64xf32, #tpu.memory_space<vmem>>, vector<8x16xf32>,
    %203 = vector.extract_strided_slice %162 {offsets = [0, 32], sizes = [8, 16], strides = [1, 1]} : vector<8x64xbf16> to vector<8x16xbf16>
    %204 = vector.extract_strided_slice %163 {offsets = [0, 32], sizes = [16, 16], strides = [1, 1]} : vector<16x64xbf16> to vector<16x16xbf16>
    %cst_102 = arith.constant dense<0.000000e+00> : vector<8x16xf32>
    %205 = tpu.matmul %203, %204, %cst_102 {dimension_numbers = #tpu.dot_dimension_numbers<[1], [1], [0], [0], [0, 0, 1, 0], [], []>} : vector<8x16xbf16>, vector<16x16xbf16>, vector<8x16xf32> -> vector<8x16xf32>
    %206 = vector.broadcast %13 : vector<1x16xf32> to vector<8x16xf32>
    %207 = arith.addf %205, %206 : vector<8x16xf32>
    %cst_103 = arith.constant dense<0xFF800000> : vector<8xf32>
    %208 = vector.multi_reduction <maximumf>, %207, %cst_103 [1] : vector<8x16xf32> to vector<8xf32>
    %209 = vector.shape_cast %208 : vector<8xf32> to vector<8x1xf32>
    %210 = vector.broadcast %209 : vector<8x1xf32> to vector<8x16xf32>
    %211 = arith.subf %207, %210 : vector<8x16xf32>
    %212 = math.exp %211 : vector<8x16xf32>
    %cst_104 = arith.constant dense<0.000000e+00> : vector<8xf32>
    %213 = vector.multi_reduction <add>, %212, %cst_104 [1] : vector<8x16xf32> to vector<8xf32>
    %214 = vector.shape_cast %213 : vector<8xf32> to vector<8x1xf32>
    %215 = tpu.reciprocal %214 {approx = true} : vector<8x1xf32> -> vector<8x1xf32>
    %216 = vector.broadcast %215 : vector<8x1xf32> to vector<8x16xf32>
    %217 = arith.mulf %212, %216 : vector<8x16xf32>
    %218 = arith.truncf %217 : vector<8x16xf32> to vector<8x16xbf16>
    %219 = vector.extract_strided_slice %164 {offsets = [0, 32], sizes = [16, 16], strides = [1, 1]} : vector<16x64xbf16> to vector<16x16xbf16>
    %cst_105 = arith.constant dense<0.000000e+00> : vector<8x16xf32>
    %220 = tpu.matmul %218, %219, %cst_105 {dimension_numbers = #tpu.dot_dimension_numbers<[1], [0], [0], [1], [0, 0, 1, 1], [], []>} : vector<8x16xbf16>, vector<16x16xbf16>, vector<8x16xf32> -> vector<8x16xf32>
    %c0_106 = arith.constant 0 : index
    %c32_107 = arith.constant 32 : index
    %221 = vector.load %arg38[%c0_106, %c32_107] : memref<8x64xf32, #tpu.memory_space<vmem>>, vector<8x16xf32>
    tpu.vector_store %arg38[%c0_106, %c32_107], %220 {strides = array<i32>} : memref<8x64xf32, #tpu.memory_space<vmem>>, vector<8x16xf32>,
    %222 = vector.extract_strided_slice %162 {offsets = [0, 48], sizes = [8, 16], strides = [1, 1]} : vector<8x64xbf16> to vector<8x16xbf16>
    %223 = vector.extract_strided_slice %163 {offsets = [0, 48], sizes = [16, 16], strides = [1, 1]} : vector<16x64xbf16> to vector<16x16xbf16>
    %cst_108 = arith.constant dense<0.000000e+00> : vector<8x16xf32>
    %224 = tpu.matmul %222, %223, %cst_108 {dimension_numbers = #tpu.dot_dimension_numbers<[1], [1], [0], [0], [0, 0, 1, 0], [], []>} : vector<8x16xbf16>, vector<16x16xbf16>, vector<8x16xf32> -> vector<8x16xf32>
    %225 = vector.broadcast %13 : vector<1x16xf32> to vector<8x16xf32>
    %226 = arith.addf %224, %225 : vector<8x16xf32>
    %cst_109 = arith.constant dense<0xFF800000> : vector<8xf32>
    %227 = vector.multi_reduction <maximumf>, %226, %cst_109 [1] : vector<8x16xf32> to vector<8xf32>
    %228 = vector.shape_cast %227 : vector<8xf32> to vector<8x1xf32>
    %229 = vector.broadcast %228 : vector<8x1xf32> to vector<8x16xf32>
    %230 = arith.subf %226, %229 : vector<8x16xf32>
    %231 = math.exp %230 : vector<8x16xf32>
    %cst_110 = arith.constant dense<0.000000e+00> : vector<8xf32>
    %232 = vector.multi_reduction <add>, %231, %cst_110 [1] : vector<8x16xf32> to vector<8xf32>
    %233 = vector.shape_cast %232 : vector<8xf32> to vector<8x1xf32>
    %234 = tpu.reciprocal %233 {approx = true} : vector<8x1xf32> -> vector<8x1xf32>
    %235 = vector.broadcast %234 : vector<8x1xf32> to vector<8x16xf32>
    %236 = arith.mulf %231, %235 : vector<8x16xf32>
    %237 = arith.truncf %236 : vector<8x16xf32> to vector<8x16xbf16>
    %238 = vector.extract_strided_slice %164 {offsets = [0, 48], sizes = [16, 16], strides = [1, 1]} : vector<16x64xbf16> to vector<16x16xbf16>
    %cst_111 = arith.constant dense<0.000000e+00> : vector<8x16xf32>
    %239 = tpu.matmul %237, %238, %cst_111 {dimension_numbers = #tpu.dot_dimension_numbers<[1], [0], [0], [1], [0, 0, 1, 1], [], []>} : vector<8x16xbf16>, vector<16x16xbf16>, vector<8x16xf32> -> vector<8x16xf32>
    %c0_112 = arith.constant 0 : index
    %c48_113 = arith.constant 48 : index
    %240 = vector.load %arg38[%c0_112, %c48_113] : memref<8x64xf32, #tpu.memory_space<vmem>>, vector<8x16xf32>
    tpu.vector_store %arg38[%c0_112, %c48_113], %239 {strides = array<i32>} : memref<8x64xf32, #tpu.memory_space<vmem>>, vector<8x16xf32>,
    %c0_114 = arith.constant 0 : index
    %c0_115 = arith.constant 0 : index
    %241 = vector.load %arg38[%c0_114, %c0_115] : memref<8x64xf32, #tpu.memory_space<vmem>>, vector<8x64xf32>
    %242 = arith.truncf %241 : vector<8x64xf32> to vector<8x64xbf16>
    %c0_116 = arith.constant 0 : index
    %c0_117 = arith.constant 0 : index
    %243 = vector.load %arg23[%c0_116, %c0_117] : memref<64x64xbf16, #tpu.memory_space<vmem>>, vector<64x64xbf16>
    %cst_118 = arith.constant dense<0.000000e+00> : vector<8x64xf32>
    %244 = tpu.matmul %242, %243, %cst_118 {dimension_numbers = #tpu.dot_dimension_numbers<[1], [0], [0], [1], [0, 0, 1, 1], [], []>} : vector<8x64xbf16>, vector<64x64xbf16>, vector<8x64xf32> -> vector<8x64xf32>
    %245 = vector.broadcast %159 : vector<1x64xf32> to vector<8x64xf32>
    %246 = arith.addf %244, %245 : vector<8x64xf32>
    %247 = arith.addf %138, %246 : vector<8x64xf32>
    %c0_119 = arith.constant 0 : index
    %c0_120 = arith.constant 0 : index
    %248 = vector.load %arg31[%c0_119, %c0_120] : memref<1x64xf32, #tpu.memory_space<vmem>>, vector<1x64xf32>
    %c0_121 = arith.constant 0 : index
    %c0_122 = arith.constant 0 : index
    %249 = vector.load %arg32[%c0_121, %c0_122] : memref<1x64xf32, #tpu.memory_space<vmem>>, vector<1x64xf32>
    %cst_123 = arith.constant dense<0.000000e+00> : vector<8xf32>
    %250 = vector.multi_reduction <add>, %247, %cst_123 [1] : vector<8x64xf32> to vector<8xf32>
    %251 = vector.shape_cast %250 : vector<8xf32> to vector<8x1xf32>
    %cst_124 = arith.constant 6.400000e+01 : f32
    %252 = vector.broadcast %cst_124 : f32 to vector<8x1xf32>
    %253 = arith.divf %251, %252 : vector<8x1xf32>
    %254 = vector.broadcast %253 : vector<8x1xf32> to vector<8x64xf32>
    %255 = arith.subf %247, %254 : vector<8x64xf32>
    %256 = arith.mulf %255, %255 : vector<8x64xf32>
    %cst_125 = arith.constant dense<0.000000e+00> : vector<8xf32>
    %257 = vector.multi_reduction <add>, %256, %cst_125 [1] : vector<8x64xf32> to vector<8xf32>
    %258 = vector.shape_cast %257 : vector<8xf32> to vector<8x1xf32>
    %cst_126 = arith.constant 6.400000e+01 : f32
    %259 = vector.broadcast %cst_126 : f32 to vector<8x1xf32>
    %260 = arith.divf %258, %259 : vector<8x1xf32>
    %261 = vector.broadcast %253 : vector<8x1xf32> to vector<8x64xf32>
    %262 = arith.subf %247, %261 : vector<8x64xf32>
    %cst_127 = arith.constant 9.99999974E-6 : f32
    %263 = vector.broadcast %cst_127 : f32 to vector<8x1xf32>
    %264 = arith.addf %260, %263 : vector<8x1xf32>
    %265 = math.rsqrt %264 : vector<8x1xf32>
    %266 = vector.broadcast %265 : vector<8x1xf32> to vector<8x64xf32>
    %267 = arith.mulf %262, %266 : vector<8x64xf32>
    %268 = vector.broadcast %248 : vector<1x64xf32> to vector<8x64xf32>
    %269 = arith.mulf %267, %268 : vector<8x64xf32>
    %270 = vector.broadcast %249 : vector<1x64xf32> to vector<8x64xf32>
    %271 = arith.addf %269, %270 : vector<8x64xf32>
    %c0_128 = arith.constant 0 : index
    %c0_129 = arith.constant 0 : index
    %272 = vector.load %arg26[%c0_128, %c0_129] : memref<1x128xf32, #tpu.memory_space<vmem>>, vector<1x128xf32>
    %273 = arith.truncf %271 : vector<8x64xf32> to vector<8x64xbf16>
    %c0_130 = arith.constant 0 : index
    %c0_131 = arith.constant 0 : index
    %274 = vector.load %arg25[%c0_130, %c0_131] : memref<64x128xbf16, #tpu.memory_space<vmem>>, vector<64x128xbf16>
    %cst_132 = arith.constant dense<0.000000e+00> : vector<8x128xf32>
    %275 = tpu.matmul %273, %274, %cst_132 {dimension_numbers = #tpu.dot_dimension_numbers<[1], [0], [0], [1], [0, 0, 1, 1], [], []>} : vector<8x64xbf16>, vector<64x128xbf16>, vector<8x128xf32> -> vector<8x128xf32>
    %276 = vector.broadcast %272 : vector<1x128xf32> to vector<8x128xf32>
    %277 = arith.addf %275, %276 : vector<8x128xf32>
    %cst_133 = arith.constant 0.000000e+00 : f32
    %278 = vector.broadcast %cst_133 : f32 to vector<8x128xf32>
    %279 = arith.maximumf %277, %278 : vector<8x128xf32>
    %c0_134 = arith.constant 0 : index
    %c0_135 = arith.constant 0 : index
    %280 = vector.load %arg28[%c0_134, %c0_135] : memref<1x64xf32, #tpu.memory_space<vmem>>, vector<1x64xf32>
    %281 = arith.truncf %279 : vector<8x128xf32> to vector<8x128xbf16>
    %c0_136 = arith.constant 0 : index
    %c0_137 = arith.constant 0 : index
    %282 = vector.load %arg27[%c0_136, %c0_137] : memref<128x64xbf16, #tpu.memory_space<vmem>>, vector<128x64xbf16>
    %cst_138 = arith.constant dense<0.000000e+00> : vector<8x64xf32>
    %283 = tpu.matmul %281, %282, %cst_138 {dimension_numbers = #tpu.dot_dimension_numbers<[1], [0], [0], [1], [0, 0, 1, 1], [], []>} : vector<8x128xbf16>, vector<128x64xbf16>, vector<8x64xf32> -> vector<8x64xf32>
    %284 = vector.broadcast %280 : vector<1x64xf32> to vector<8x64xf32>
    %285 = arith.addf %283, %284 : vector<8x64xf32>
    %286 = arith.addf %271, %285 : vector<8x64xf32>
    %c0_139 = arith.constant 0 : index
    %c0_140 = arith.constant 0 : index
    %287 = vector.load %arg33[%c0_139, %c0_140] : memref<1x64xf32, #tpu.memory_space<vmem>>, vector<1x64xf32>
    %c0_141 = arith.constant 0 : index
    %c0_142 = arith.constant 0 : index
    %288 = vector.load %arg34[%c0_141, %c0_142] : memref<1x64xf32, #tpu.memory_space<vmem>>, vector<1x64xf32>
    %cst_143 = arith.constant dense<0.000000e+00> : vector<8xf32>
    %289 = vector.multi_reduction <add>, %286, %cst_143 [1] : vector<8x64xf32> to vector<8xf32>
    %290 = vector.shape_cast %289 : vector<8xf32> to vector<8x1xf32>
    %cst_144 = arith.constant 6.400000e+01 : f32
    %291 = vector.broadcast %cst_144 : f32 to vector<8x1xf32>
    %292 = arith.divf %290, %291 : vector<8x1xf32>
    %293 = vector.broadcast %292 : vector<8x1xf32> to vector<8x64xf32>
    %294 = arith.subf %286, %293 : vector<8x64xf32>
    %295 = arith.mulf %294, %294 : vector<8x64xf32>
    %cst_145 = arith.constant dense<0.000000e+00> : vector<8xf32>
    %296 = vector.multi_reduction <add>, %295, %cst_145 [1] : vector<8x64xf32> to vector<8xf32>
    %297 = vector.shape_cast %296 : vector<8xf32> to vector<8x1xf32>
    %cst_146 = arith.constant 6.400000e+01 : f32
    %298 = vector.broadcast %cst_146 : f32 to vector<8x1xf32>
    %299 = arith.divf %297, %298 : vector<8x1xf32>
    %300 = vector.broadcast %292 : vector<8x1xf32> to vector<8x64xf32>
    %301 = arith.subf %286, %300 : vector<8x64xf32>
    %cst_147 = arith.constant 9.99999974E-6 : f32
    %302 = vector.broadcast %cst_147 : f32 to vector<8x1xf32>
    %303 = arith.addf %299, %302 : vector<8x1xf32>
    %304 = math.rsqrt %303 : vector<8x1xf32>
    %305 = vector.broadcast %304 : vector<8x1xf32> to vector<8x64xf32>
    %306 = arith.mulf %301, %305 : vector<8x64xf32>
    %307 = vector.broadcast %287 : vector<1x64xf32> to vector<8x64xf32>
    %308 = arith.mulf %306, %307 : vector<8x64xf32>
    %309 = vector.broadcast %288 : vector<1x64xf32> to vector<8x64xf32>
    %310 = arith.addf %308, %309 : vector<8x64xf32>
    %c0_148 = arith.constant 0 : index
    %c0_149 = arith.constant 0 : index
    %311 = vector.load %arg35[%c0_148, %c0_149] : memref<1x64xf32, #tpu.memory_space<vmem>>, vector<1x64xf32>
    %c0_150 = arith.constant 0 : index
    %c0_151 = arith.constant 0 : index
    %312 = vector.load %arg36[%c0_150, %c0_151] : memref<1x64xf32, #tpu.memory_space<vmem>>, vector<1x64xf32>
    %cst_152 = arith.constant dense<0.000000e+00> : vector<8xf32>
    %313 = vector.multi_reduction <add>, %310, %cst_152 [1] : vector<8x64xf32> to vector<8xf32>
    %314 = vector.shape_cast %313 : vector<8xf32> to vector<8x1xf32>
    %cst_153 = arith.constant 6.400000e+01 : f32
    %315 = vector.broadcast %cst_153 : f32 to vector<8x1xf32>
    %316 = arith.divf %314, %315 : vector<8x1xf32>
    %317 = vector.broadcast %316 : vector<8x1xf32> to vector<8x64xf32>
    %318 = arith.subf %310, %317 : vector<8x64xf32>
    %319 = arith.mulf %318, %318 : vector<8x64xf32>
    %cst_154 = arith.constant dense<0.000000e+00> : vector<8xf32>
    %320 = vector.multi_reduction <add>, %319, %cst_154 [1] : vector<8x64xf32> to vector<8xf32>
    %321 = vector.shape_cast %320 : vector<8xf32> to vector<8x1xf32>
    %cst_155 = arith.constant 6.400000e+01 : f32
    %322 = vector.broadcast %cst_155 : f32 to vector<8x1xf32>
    %323 = arith.divf %321, %322 : vector<8x1xf32>
    %324 = vector.broadcast %316 : vector<8x1xf32> to vector<8x64xf32>
    %325 = arith.subf %310, %324 : vector<8x64xf32>
    %cst_156 = arith.constant 9.99999974E-6 : f32
    %326 = vector.broadcast %cst_156 : f32 to vector<8x1xf32>
    %327 = arith.addf %323, %326 : vector<8x1xf32>
    %328 = math.rsqrt %327 : vector<8x1xf32>
    %329 = vector.broadcast %328 : vector<8x1xf32> to vector<8x64xf32>
    %330 = arith.mulf %325, %329 : vector<8x64xf32>
    %331 = vector.broadcast %311 : vector<1x64xf32> to vector<8x64xf32>
    %332 = arith.mulf %330, %331 : vector<8x64xf32>
    %333 = vector.broadcast %312 : vector<1x64xf32> to vector<8x64xf32>
    %334 = arith.addf %332, %333 : vector<8x64xf32>
    %c0_157 = arith.constant 0 : index
    %c0_158 = arith.constant 0 : index
    %c0_159 = arith.constant 0 : index
    %335 = vector.load %arg37[%c0_157, %c0_158, %c0_159] : memref<1x8x64xf32, #tpu.memory_space<vmem>>, vector<1x8x64xf32>
    %336 = vector.shape_cast %335 : vector<1x8x64xf32> to vector<8x64xf32>
    %337 = vector.shape_cast %334 : vector<8x64xf32> to vector<1x8x64xf32>
    tpu.vector_store %arg37[%c0_157, %c0_158, %c0_159], %337 {strides = array<i32>} : memref<1x8x64xf32, #tpu.memory_space<vmem>>, vector<1x8x64xf32>,
    return
  }
  func.func @transform_0(%arg0: i32, %arg1: i32) -> (i32, i32, i32) {
    %c0_i32 = arith.constant 0 : i32
    %c0_i32_0 = arith.constant 0 : i32
    return %arg0, %arg1, %c0_i32 : i32, i32, i32
  }
  func.func @transform_1(%arg0: i32, %arg1: i32) -> (i32, i32, i32) {
    %c0_i32 = arith.constant 0 : i32
    %c0_i32_0 = arith.constant 0 : i32
    return %arg0, %arg1, %c0_i32 : i32, i32, i32
  }
  func.func @transform_2(%arg0: i32, %arg1: i32) -> (i32, i32, i32) {
    %c0_i32 = arith.constant 0 : i32
    %c0_i32_0 = arith.constant 0 : i32
    %c0_i32_1 = arith.constant 0 : i32
    return %arg0, %c0_i32, %c0_i32_0 : i32, i32, i32
  }
  func.func @transform_3(%arg0: i32, %arg1: i32) -> (i32, i32, i32) {
    %c0_i32 = arith.constant 0 : i32
    %c0_i32_0 = arith.constant 0 : i32
    %c0_i32_1 = arith.constant 0 : i32
    return %arg0, %c0_i32, %c0_i32_0 : i32, i32, i32
  }
  func.func @transform_4(%arg0: i32, %arg1: i32) -> (i32, i32, i32) {
    %c0_i32 = arith.constant 0 : i32
    %c0_i32_0 = arith.constant 0 : i32
    %c0_i32_1 = arith.constant 0 : i32
    return %arg0, %c0_i32, %c0_i32_0 : i32, i32, i32
  }
  func.func @transform_5(%arg0: i32, %arg1: i32) -> (i32, i32, i32) {
    %c0_i32 = arith.constant 0 : i32
    %c0_i32_0 = arith.constant 0 : i32
    %c0_i32_1 = arith.constant 0 : i32
    return %arg0, %c0_i32, %c0_i32_0 : i32, i32, i32
  }
  func.func @transform_6(%arg0: i32, %arg1: i32) -> (i32, i32, i32) {
    %c0_i32 = arith.constant 0 : i32
    %c0_i32_0 = arith.constant 0 : i32
    %c0_i32_1 = arith.constant 0 : i32
    return %arg0, %c0_i32, %c0_i32_0 : i32, i32, i32
  }
  func.func @transform_7(%arg0: i32, %arg1: i32) -> (i32, i32) {
    %c0_i32 = arith.constant 0 : i32
    %c0_i32_0 = arith.constant 0 : i32
    %c0_i32_1 = arith.constant 0 : i32
    return %c0_i32, %c0_i32_0 : i32, i32
  }
  func.func @transform_8(%arg0: i32, %arg1: i32) -> (i32, i32) {
    %c0_i32 = arith.constant 0 : i32
    %c0_i32_0 = arith.constant 0 : i32
    %c0_i32_1 = arith.constant 0 : i32
    return %c0_i32, %c0_i32_0 : i32, i32
  }
  func.func @transform_9(%arg0: i32, %arg1: i32) -> (i32, i32) {
    %c0_i32 = arith.constant 0 : i32
    %c0_i32_0 = arith.constant 0 : i32
    %c0_i32_1 = arith.constant 0 : i32
    return %c0_i32, %c0_i32_0 : i32, i32
  }
  func.func @transform_10(%arg0: i32, %arg1: i32) -> (i32, i32) {
    %c0_i32 = arith.constant 0 : i32
    %c0_i32_0 = arith.constant 0 : i32
    %c0_i32_1 = arith.constant 0 : i32
    return %c0_i32, %c0_i32_0 : i32, i32
  }
  func.func @transform_11(%arg0: i32, %arg1: i32) -> (i32, i32) {
    %c0_i32 = arith.constant 0 : i32
    %c0_i32_0 = arith.constant 0 : i32
    %c0_i32_1 = arith.constant 0 : i32
    return %c0_i32, %c0_i32_0 : i32, i32
  }
  func.func @transform_12(%arg0: i32, %arg1: i32) -> (i32, i32) {
    %c0_i32 = arith.constant 0 : i32
    %c0_i32_0 = arith.constant 0 : i32
    %c0_i32_1 = arith.constant 0 : i32
    return %c0_i32, %c0_i32_0 : i32, i32
  }
  func.func @transform_13(%arg0: i32, %arg1: i32) -> (i32, i32) {
    %c0_i32 = arith.constant 0 : i32
    %c0_i32_0 = arith.constant 0 : i32
    %c0_i32_1 = arith.constant 0 : i32
    return %c0_i32, %c0_i32_0 : i32, i32
  }
  func.func @transform_14(%arg0: i32, %arg1: i32) -> (i32, i32) {
    %c0_i32 = arith.constant 0 : i32
    %c0_i32_0 = arith.constant 0 : i32
    %c0_i32_1 = arith.constant 0 : i32
    return %c0_i32, %c0_i32_0 : i32, i32
  }
  func.func @transform_15(%arg0: i32, %arg1: i32) -> (i32, i32) {
    %c0_i32 = arith.constant 0 : i32
    %c0_i32_0 = arith.constant 0 : i32
    %c0_i32_1 = arith.constant 0 : i32
    return %c0_i32, %c0_i32_0 : i32, i32
  }
  func.func @transform_16(%arg0: i32, %arg1: i32) -> (i32, i32) {
    %c0_i32 = arith.constant 0 : i32
    %c0_i32_0 = arith.constant 0 : i32
    %c0_i32_1 = arith.constant 0 : i32
    return %c0_i32, %c0_i32_0 : i32, i32
  }
  func.func @transform_17(%arg0: i32, %arg1: i32) -> (i32, i32) {
    %c0_i32 = arith.constant 0 : i32
    %c0_i32_0 = arith.constant 0 : i32
    %c0_i32_1 = arith.constant 0 : i32
    return %c0_i32, %c0_i32_0 : i32, i32
  }
  func.func @transform_18(%arg0: i32, %arg1: i32) -> (i32, i32) {
    %c0_i32 = arith.constant 0 : i32
    %c0_i32_0 = arith.constant 0 : i32
    %c0_i32_1 = arith.constant 0 : i32
    return %c0_i32, %c0_i32_0 : i32, i32
  }
  func.func @transform_19(%arg0: i32, %arg1: i32) -> (i32, i32) {
    %c0_i32 = arith.constant 0 : i32
    %c0_i32_0 = arith.constant 0 : i32
    %c0_i32_1 = arith.constant 0 : i32
    return %c0_i32, %c0_i32_0 : i32, i32
  }
  func.func @transform_20(%arg0: i32, %arg1: i32) -> (i32, i32) {
    %c0_i32 = arith.constant 0 : i32
    %c0_i32_0 = arith.constant 0 : i32
    %c0_i32_1 = arith.constant 0 : i32
    return %c0_i32, %c0_i32_0 : i32, i32
  }
  func.func @transform_21(%arg0: i32, %arg1: i32) -> (i32, i32) {
    %c0_i32 = arith.constant 0 : i32
    %c0_i32_0 = arith.constant 0 : i32
    %c0_i32_1 = arith.constant 0 : i32
    return %c0_i32, %c0_i32_0 : i32, i32
  }
  func.func @transform_22(%arg0: i32, %arg1: i32) -> (i32, i32) {
    %c0_i32 = arith.constant 0 : i32
    %c0_i32_0 = arith.constant 0 : i32
    %c0_i32_1 = arith.constant 0 : i32
    return %c0_i32, %c0_i32_0 : i32, i32
  }
  func.func @transform_23(%arg0: i32, %arg1: i32) -> (i32, i32) {
    %c0_i32 = arith.constant 0 : i32
    %c0_i32_0 = arith.constant 0 : i32
    %c0_i32_1 = arith.constant 0 : i32
    return %c0_i32, %c0_i32_0 : i32, i32
  }
  func.func @transform_24(%arg0: i32, %arg1: i32) -> (i32, i32) {
    %c0_i32 = arith.constant 0 : i32
    %c0_i32_0 = arith.constant 0 : i32
    %c0_i32_1 = arith.constant 0 : i32
    return %c0_i32, %c0_i32_0 : i32, i32
  }
  func.func @transform_25(%arg0: i32, %arg1: i32) -> (i32, i32) {
    %c0_i32 = arith.constant 0 : i32
    %c0_i32_0 = arith.constant 0 : i32
    %c0_i32_1 = arith.constant 0 : i32
    return %c0_i32, %c0_i32_0 : i32, i32
  }
  func.func @transform_26(%arg0: i32, %arg1: i32) -> (i32, i32) {
    %c0_i32 = arith.constant 0 : i32
    %c0_i32_0 = arith.constant 0 : i32
    %c0_i32_1 = arith.constant 0 : i32
    return %c0_i32, %c0_i32_0 : i32, i32
  }
  func.func @transform_27(%arg0: i32, %arg1: i32) -> (i32, i32) {
    %c0_i32 = arith.constant 0 : i32
    %c0_i32_0 = arith.constant 0 : i32
    %c0_i32_1 = arith.constant 0 : i32
    return %c0_i32, %c0_i32_0 : i32, i32
  }
  func.func @transform_28(%arg0: i32, %arg1: i32) -> (i32, i32) {
    %c0_i32 = arith.constant 0 : i32
    %c0_i32_0 = arith.constant 0 : i32
    %c0_i32_1 = arith.constant 0 : i32
    return %c0_i32, %c0_i32_0 : i32, i32
  }
  func.func @transform_29(%arg0: i32, %arg1: i32) -> (i32, i32) {
    %c0_i32 = arith.constant 0 : i32
    %c0_i32_0 = arith.constant 0 : i32
    %c0_i32_1 = arith.constant 0 : i32
    return %c0_i32, %c0_i32_0 : i32, i32
  }
  func.func @transform_30(%arg0: i32, %arg1: i32) -> (i32, i32) {
    %c0_i32 = arith.constant 0 : i32
    %c0_i32_0 = arith.constant 0 : i32
    %c0_i32_1 = arith.constant 0 : i32
    return %c0_i32, %c0_i32_0 : i32, i32
  }
  func.func @transform_31(%arg0: i32, %arg1: i32) -> (i32, i32) {
    %c0_i32 = arith.constant 0 : i32
    %c0_i32_0 = arith.constant 0 : i32
    %c0_i32_1 = arith.constant 0 : i32
    return %c0_i32, %c0_i32_0 : i32, i32
  }
  func.func @transform_32(%arg0: i32, %arg1: i32) -> (i32, i32) {
    %c0_i32 = arith.constant 0 : i32
    %c0_i32_0 = arith.constant 0 : i32
    %c0_i32_1 = arith.constant 0 : i32
    return %c0_i32, %c0_i32_0 : i32, i32
  }
  func.func @transform_33(%arg0: i32, %arg1: i32) -> (i32, i32) {
    %c0_i32 = arith.constant 0 : i32
    %c0_i32_0 = arith.constant 0 : i32
    %c0_i32_1 = arith.constant 0 : i32
    return %c0_i32, %c0_i32_0 : i32, i32
  }
  func.func @transform_34(%arg0: i32, %arg1: i32) -> (i32, i32) {
    %c0_i32 = arith.constant 0 : i32
    %c0_i32_0 = arith.constant 0 : i32
    %c0_i32_1 = arith.constant 0 : i32
    return %c0_i32, %c0_i32_0 : i32, i32
  }
  func.func @transform_35(%arg0: i32, %arg1: i32) -> (i32, i32, i32) {
    %c0_i32 = arith.constant 0 : i32
    %c0_i32_0 = arith.constant 0 : i32
    return %arg0, %arg1, %c0_i32 : i32, i32, i32
  }
}

</mosaic_0001>

<bundles_post_ra>
// kernel: transformer_forward.4
= control target key start
LH: loop header
LB: loop body
LE: loop exit
PB: predicated region body
PF: predicated region fallthrough
CT: control target
= control target key end

     0   :  { %s4930_s0 = inlined_call_operand.hbm [shape: f32[2,16,64], index: 0, kind: input, shape index: {}, may-alias: {0,2}]   ;;  %s4931_s1 = inlined_call_operand.hbm [shape: f32[2,16,64], index: 1, kind: input, shape index: {}, may-alias: {1,3}]   ;;  %s4932_s2 = inlined_call_operand.hbm [shape: f32[2,16,64], index: 2, kind: input, shape index: {}, may-alias: {0,2}]   ;;  %s4933_s3 = inlined_call_operand.hbm [shape: f32[2,16,64], index: 3, kind: input, shape index: {}, may-alias: {1,3}]   ;;  %s4934_s4 = inlined_call_operand.hbm [shape: f32[2,1,16], index: 4, kind: input, shape index: {}]   ;;  %s4935_s5 = inlined_call_operand.hbm [shape: bf16[64,64], index: 5, kind: input, shape index: {}]   ;;  %s4936_s6 = inlined_call_operand.hbm [shape: f32[1,64], index: 6, kind: input, shape index: {}]   ;;  %s4937_s7 = inlined_call_operand.hbm [shape: bf16[64,64], index: 7, kind: input, shape index: {}]   ;;  %s4938_s8 = inlined_call_operand.hbm [shape: f32[1,64], index: 8, kind: input, shape index: {}]   ;;  %s4939_s9 = inlined_call_operand.hbm [shape: bf16[64,64], index: 9, kind: input, shape index: {}]   ;;  %s4940_s10 = inlined_call_operand.hbm [shape: f32[1,64], index: 10, kind: input, shape index: {}]   ;;  %s4941_s11 = inlined_call_operand.hbm [shape: bf16[64,64], index: 11, kind: input, shape index: {}]   ;;  %s4942_s12 = inlined_call_operand.hbm [shape: f32[1,64], index: 12, kind: input, shape index: {}]   ;;  %s4943_s13 = inlined_call_operand.hbm [shape: bf16[64,128], index: 13, kind: input, shape index: {}]   ;;  %s4944_s14 = inlined_call_operand.hbm [shape: f32[1,128], index: 14, kind: input, shape index: {}]   ;;  %s4945_s15 = inlined_call_operand.hbm [shape: bf16[128,64], index: 15, kind: input, shape index: {}]   ;;  %s4946_s16 = inlined_call_operand.hbm [shape: f32[1,64], index: 16, kind: input, shape index: {}]   ;;  %s4947_s17 = inlined_call_operand.hbm [shape: f32[1,64], index: 17, kind: input, shape index: {}]   ;;  %s4948_s18 = inlined_call_operand.hbm [shape: f32[1,64], index: 18, kind: input, shape index: {}]   ;;  %s4949_s19 = inlined_call_operand.hbm [shape: f32[1,64], index: 19, kind: input, shape index: {}]   ;;  %s4950_s20 = inlined_call_operand.hbm [shape: f32[1,64], index: 20, kind: input, shape index: {}]   ;;  %s4951_s21 = inlined_call_operand.hbm [shape: f32[2,16,64], index: 21, kind: output, shape index: {}]  }
   0x1   :  { %5001 = sst [smem:[#allocation58_spill]] %s4930_s0 }
   0x2   :  { %5002 = sst [smem:[#allocation59_spill]] %s4931_s1 }
   0x3   :  { %5003 = sst [smem:[#allocation60_spill]] %s4932_s2 }
   0x4   :  { %5004 = sst [smem:[#allocation61_spill]] %s4933_s3 }
   0x5   :  { %5005 = sst [smem:[#allocation62_spill]] %s4934_s4 }
   0x6   :  { %5006 = sst [smem:[#allocation63_spill]] %s4935_s5 }
   0x7   :  { %5007 = sst [smem:[#allocation64_spill]] %s4936_s6 }
   0x8   :  { %5008 = sst [smem:[#allocation65_spill]] %s4937_s7 }
   0x9   :  { %5009 = sst [smem:[#allocation66_spill]] %s4938_s8 }
   0xa   :  { %5010 = sst [smem:[#allocation67_spill]] %s4939_s9 }
   0xb   :  { %5011 = sst [smem:[#allocation68_spill]] %s4940_s10 }
   0xc   :  { %5012 = sst [smem:[#allocation69_spill]] %s4941_s11 }
   0xd   :  { %5013 = sst [smem:[#allocation70_spill]] %s4942_s12 }
   0xe   :  { %5014 = sst [smem:[#allocation71_spill]] %s4943_s13 }
   0xf   :  { %5015 = sst [smem:[#allocation72_spill]] %s4944_s14 }
  0x10   :  { %5016 = sst [smem:[#allocation73_spill]] %s4945_s15 }
  0x11   :  { %5017 = sst [smem:[#allocation74_spill]] %s4946_s16 }
  0x12   :  { %5018 = sst [smem:[#allocation75_spill]] %s4947_s17 }
  0x13   :  { %5019 = sst [smem:[#allocation76_spill]] %s4948_s18 }
  0x14   :  { %5020 = sst [smem:[#allocation77_spill]] %s4949_s19 }
  0x15   :  { %5021 = sst [smem:[#allocation78_spill]] %s4950_s20 }
  0x16   :  { %5022 = sst [smem:[#allocation79_spill]] %s4951_s21 }
  0x17   :  { %26 = vsyncpa [#allocation4], 0 }
  0x18   :  { %28 = vsyncpa [#allocation4 + $0x1], 0 }
  0x19   :  { %29 = vsyncpa [#allocation7], 0 }
  0x1a   :  { %31 = vsyncpa [#allocation7 + $0x1], 0 }
  0x1b   :  { %32 = vsyncpa [#allocation10], 0 }
  0x1c   :  { %34 = vsyncpa [#allocation10 + $0x1], 0 }
  0x1d   :  { %35 = vsyncpa [#allocation13], 0 }
  0x1e   :  { %36 = vsyncpa [#allocation16], 0 }
  0x1f   :  { %37 = vsyncpa [#allocation19], 0 }
  0x20   :  { %38 = vsyncpa [#allocation22], 0 }
  0x21   :  { %39 = vsyncpa [#allocation25], 0 }
  0x22   :  { %40 = vsyncpa [#allocation28], 0 }
  0x23   :  { %41 = vsyncpa [#allocation31], 0 }
  0x24   :  { %42 = vsyncpa [#allocation34], 0 }
  0x25   :  { %43 = vsyncpa [#allocation5], 0 }
  0x26   :  { %45 = vsyncpa [#allocation5 + $0x1], 0  ;;  %s4063_s2 = smov 0   ;;  %s4065_s25 = smov 0  }
  0x27   :  { %s4067_s26 = smov 0   ;;  %s4069_s27 = smov 0  }
  0x28   :  { %s4071_s3 = smov 0   ;;  %s4073_s28 = smov 0  }
  0x29 LB: > { %5023 = sst [smem:[#allocation49_spill]] %s3895_s2  ;;  %s4094_s29 = sadd.s32 4294967295, %s3915_s28   ;;  %s3915_s28 = sphi %s4073_s28, %s51_s28   ;;  %s3911_s3 = sphi %s4071_s3, %s5108_s3   ;;  %s3907_s27 = sphi %s4069_s27, %s5107_s27   ;;  %s3903_s26 = sphi %s4067_s26, %s5103_s26   ;;  %s3899_s25 = sphi %s4065_s25, %s5106_s25   ;;  %s3895_s2 = sphi %s4063_s2, %s5105_s2  }
  0x2a   : > { %5024 = sst [smem:[#allocation50_spill]] %s3903_s26  ;;  %p2577_p0 = scmp.ge.s32.totalorder %s3915_s28, 1 }
  0x2b   : > { %5025 = sst [smem:[#allocation51_spill]] %s3907_s27  ;;  %p4967_p1 = scmp.eq.s32.totalorder %s4094_s29, 0 }
  0x2c   : > { %5026 = sst [smem:[#allocation52_spill]] %s3915_s28  ;;  %p566_p2 = scmp.lt.s32.totalorder %s3915_s28, 3 }
  0x2d   : > { %s3917_s4 = smov [#allocation12]   ;;  %s3918_s22 = smov [#allocation15]  }
  0x2e   : > { %p4099_p3 = pnand %p2577_p0, %p566_p2  ;;  %s578_s30 = sshll.u32 %s3917_s4, 4  ;;  %s4103_s30 = int_to_ptr.vmem [resolvable:$true] %s578_s30 }
  0x2f   : > { %s602_s23 = sshll.u32 %s3918_s22, 4  ;;  %s3919_s1 = smov [#allocation18]   ;;  %s4114_s23 = int_to_ptr.vmem [resolvable:$true] %s602_s23 }
  0x30   : > { %s5027_s0 = scalar_select %p4099_p3, 1, 0 }
  0x31   : > { %p2946_p4 = pneg %p4099_p3  ;;  %s4116_s24 = sshll.u32 %s3919_s1, 4  ;;  %s627_s24 = int_to_ptr.vmem [resolvable:$true] %s4116_s24 }
  0x32   : > { %5028 = sst [smem:[#allocation53_spill]] %s5027_s0  ;;  %s5030_s27 = sld [smem:[#allocation63_spill]] }
  0x33   : > { %p4110_p6 = pnand %p2946_p4, %p4967_p1 }
  0x35   : > { %s5029_s5 = scalar_select %p4110_p6, 1, 0 }
  0x36   : > { %p4126_p8 = pneg %p4110_p6 }
  0x38   : > { %s5031_s20 = smov %s5030_s27  ;;  %s3195_s18 = scalar_lea.hbm %s5030_s27, 512 }
  0x39   : > { %p3196_p7 = scmp.ne.s32.totalorder %s5031_s20, %s3195_s18  ;;  %p3202_p11 = scmp.lt.u32.totalorder %s3195_s18, %s5031_s20 }
  0x3a   : > { %s5032_s14 = scalar_select %p4126_p8, 1, 0 }
  0x3b   : > { %p3198_p9 = pnand %p4126_p8, %p3196_p7 }
  0x3d   : > { %p3199_p10 = pneg %p3198_p9 }
  0x3f   : > { %p3204_p12 = pnand %p3202_p11, %p3199_p10 }
  0x41   : > { %3207 = shalt.err (!%p3204_p12)
}
  0x42   : > { %s3208_s16 = scalar_lea.vmem %s4103_s30, 512  ;;  %p3216_p4 = scmp.lt.s32.totalorder %s4103_s30, %s4103_s30 }
  0x43   : > { %p3209_p13 = scmp.ne.s32.totalorder %s4103_s30, %s3208_s16  ;;  %p3217_p5 = scmp.lt.s32.totalorder %s3208_s16, %s3208_s16 }
  0x45   : > { %p3211_p0 = pnand %p3209_p13, %p4126_p8  ;;  %p3218_p7 = por %p3217_p5, %p3216_p4 }
  0x47   : > { %p3212_p2 = pneg %p3211_p0 }
  0x49   : > { %p3219_p9 = pnand %p3218_p7, %p3212_p2 }
  0x4b   : > { %3222 = shalt.err (!%p3219_p9)
}
  0x4c   : > { %s3920_s21 = smov 64   ;;  %s3921_s18 = smov 4  }
  0x4d   : > { %2949 = dma.hbm_to_vmem [thread:$0]  (!%p4110_p6), %s5031_s20, 512, %s4103_s30, [#allocation13], %s3920_s21, %s3920_s21, %s3921_s18  }
  0x4e   : > { %s5033_s7 = sld [smem:[#allocation65_spill]] }
  0x54   : > { %s3223_s1 = scalar_lea.hbm %s5033_s7, 512 }
  0x55   : > { %p3224_p5 = scmp.ne.s32.totalorder %s5033_s7, %s3223_s1  ;;  %p3230_p12 = scmp.lt.u32.totalorder %s3223_s1, %s5033_s7 }
  0x57   : > { %p3226_p10 = pnand %p3224_p5, %p4126_p8 }
  0x59   : > { %p3227_p11 = pneg %p3226_p10 }
  0x5b   : > { %p3232_p13 = pnand %p3230_p12, %p3227_p11 }
  0x5d   : > { %3235 = shalt.err (!%p3232_p13)
}
  0x5e   : > { %s3236_s30 = scalar_lea.vmem %s4114_s23, 512  ;;  %p3244_p7 = scmp.lt.s32.totalorder %s4114_s23, %s4114_s23 }
  0x5f   : > { %p3237_p0 = scmp.ne.s32.totalorder %s4114_s23, %s3236_s30  ;;  %p3245_p9 = scmp.lt.s32.totalorder %s3236_s30, %s3236_s30 }
  0x61   : > { %p3239_p2 = pnand %p3237_p0, %p4126_p8  ;;  %p3246_p5 = por %p3245_p9, %p3244_p7 }
  0x63   : > { %p3240_p4 = pneg %p3239_p2 }
  0x65   : > { %p3247_p10 = pnand %p3246_p5, %p3240_p4 }
  0x67   : > { %3250 = shalt.err (!%p3247_p10)
}
  0x68   : > { %2955 = dma.hbm_to_vmem [thread:$0]  (!%p4110_p6), %s5033_s7, 512, %s4114_s23, [#allocation16], %s3920_s21, %s3920_s21, %s3921_s18  }
  0x69   : > { %s5034_s9 = sld [smem:[#allocation67_spill]] }
  0x6f   : > { %s3251_s0 = scalar_lea.hbm %s5034_s9, 512 }
  0x70   : > { %p3252_p11 = scmp.ne.s32.totalorder %s5034_s9, %s3251_s0  ;;  %p3258_p0 = scmp.lt.u32.totalorder %s3251_s0, %s5034_s9 }
  0x72   : > { %p3254_p12 = pnand %p3252_p11, %p4126_p8 }
  0x74   : > { %p3255_p13 = pneg %p3254_p12 }
  0x76   : > { %p3260_p2 = pnand %p3258_p0, %p3255_p13 }
  0x78   : > { %3263 = shalt.err (!%p3260_p2)
}
  0x79   : > { %s3264_s30 = scalar_lea.vmem %s627_s24, 512  ;;  %p3272_p5 = scmp.lt.s32.totalorder %s627_s24, %s627_s24 }
  0x7a   : > { %p3265_p4 = scmp.ne.s32.totalorder %s627_s24, %s3264_s30  ;;  %p3273_p10 = scmp.lt.s32.totalorder %s3264_s30, %s3264_s30 }
  0x7c   : > { %p3267_p7 = pnand %p3265_p4, %p4126_p8  ;;  %p3274_p1 = por %p3273_p10, %p3272_p5 }
  0x7e   : > { %p3268_p9 = pneg %p3267_p7 }
  0x80   : > { %p3275_p3 = pnand %p3274_p1, %p3268_p9 }
  0x82   : > { %3278 = shalt.err (!%p3275_p3)
}
  0x83   : > { %2961 = dma.hbm_to_vmem [thread:$0]  (!%p4110_p6), %s5034_s9, 512, %s627_s24, [#allocation19], %s3920_s21, %s3920_s21, %s3921_s18  }
  0x84   : > { %s3922_s10 = smov [#allocation21]   ;;  %s3923_s27 = smov [#allocation24]  }
  0x85   : > { %s650_s12 = sshll.u32 %s3922_s10, 4  ;;  %s674_s0 = sshll.u32 %s3923_s27, 4  ;;  %s651_s12 = int_to_ptr.vmem [resolvable:$true] %s650_s12  ;;  %s675_s0 = int_to_ptr.vmem [resolvable:$true] %s674_s0 }
  0x86   : > { %s5035_s11 = sld [smem:[#allocation69_spill]] }
  0x8c   : > { %s3279_s1 = scalar_lea.hbm %s5035_s11, 512 }
  0x8d   : > { %p3280_p1 = scmp.ne.s32.totalorder %s5035_s11, %s3279_s1  ;;  %p3286_p12 = scmp.lt.u32.totalorder %s3279_s1, %s5035_s11 }
  0x8f   : > { %p3282_p3 = pnand %p3280_p1, %p4126_p8 }
  0x91   : > { %p3283_p11 = pneg %p3282_p3 }
  0x93   : > { %p3288_p13 = pnand %p3286_p12, %p3283_p11 }
  0x95   : > { %3291 = shalt.err (!%p3288_p13)
}
  0x96   : > { %s3292_s24 = scalar_lea.vmem %s651_s12, 512  ;;  %p3300_p7 = scmp.lt.s32.totalorder %s651_s12, %s651_s12 }
  0x97   : > { %p3293_p0 = scmp.ne.s32.totalorder %s651_s12, %s3292_s24  ;;  %p3301_p9 = scmp.lt.s32.totalorder %s3292_s24, %s3292_s24 }
  0x99   : > { %p3295_p2 = pnand %p3293_p0, %p4126_p8  ;;  %p3302_p5 = por %p3301_p9, %p3300_p7 }
  0x9b   : > { %p3296_p4 = pneg %p3295_p2 }
  0x9d   : > { %p3303_p10 = pnand %p3302_p5, %p3296_p4 }
  0x9f   : > { %3306 = shalt.err (!%p3303_p10)
}
  0xa0   : > { %2967 = dma.hbm_to_vmem [thread:$0]  (!%p4110_p6), %s5035_s11, 512, %s651_s12, [#allocation22], %s3920_s21, %s3920_s21, %s3921_s18  }
  0xa1   : > { %s5036_s13 = sld [smem:[#allocation71_spill]] }
  0xa7   : > { %s3307_s4 = scalar_lea.hbm %s5036_s13, 512 }
  0xa8   : > { %p3308_p1 = scmp.ne.s32.totalorder %s5036_s13, %s3307_s4  ;;  %p3314_p12 = scmp.lt.u32.totalorder %s3307_s4, %s5036_s13 }
  0xaa   : > { %p3310_p3 = pnand %p3308_p1, %p4126_p8 }
  0xac   : > { %p3311_p11 = pneg %p3310_p3 }
  0xae   : > { %p3316_p13 = pnand %p3314_p12, %p3311_p11 }
  0xb0   : > { %3319 = shalt.err (!%p3316_p13)
}
  0xb1   : > { %s3320_s23 = scalar_lea.vmem %s675_s0, 512  ;;  %p3328_p7 = scmp.lt.s32.totalorder %s675_s0, %s675_s0 }
  0xb2   : > { %p3321_p0 = scmp.ne.s32.totalorder %s675_s0, %s3320_s23  ;;  %p3329_p9 = scmp.lt.s32.totalorder %s3320_s23, %s3320_s23 }
  0xb4   : > { %p3323_p2 = pnand %p3321_p0, %p4126_p8  ;;  %p3330_p5 = por %p3329_p9, %p3328_p7 }
  0xb6   : > { %p3324_p4 = pneg %p3323_p2 }
  0xb8   : > { %p3331_p10 = pnand %p3330_p5, %p3324_p4 }
  0xba   : > { %3334 = shalt.err (!%p3331_p10)
}
  0xbb   : > { %2973 = dma.hbm_to_vmem [thread:$0]  (!%p4110_p6), %s5036_s13, 512, %s675_s0, [#allocation25], %s3920_s21, %s3920_s21, %s3921_s18  }
  0xbc   : > { %s3924_s7 = smov [#allocation27]   ;;  %s3925_s10 = smov [#allocation30]  }
  0xbd   : > { %s698_s8 = sshll.u32 %s3924_s7, 4  ;;  %s723_s27 = sshll.u32 %s3925_s10, 4  ;;  %s699_s8 = int_to_ptr.vmem [resolvable:$true] %s698_s8  ;;  %s724_s27 = int_to_ptr.vmem [resolvable:$true] %s723_s27 }
  0xbe   : > { %s5037_s15 = sld [smem:[#allocation73_spill]] }
  0xc4   : > { %s3335_s1 = scalar_lea.hbm %s5037_s15, 1024 }
  0xc5   : > { %p3336_p1 = scmp.ne.s32.totalorder %s5037_s15, %s3335_s1  ;;  %p3342_p12 = scmp.lt.u32.totalorder %s3335_s1, %s5037_s15 }
  0xc7   : > { %p3338_p3 = pnand %p3336_p1, %p4126_p8 }
  0xc9   : > { %p3339_p11 = pneg %p3338_p3 }
  0xcb   : > { %p3344_p13 = pnand %p3342_p12, %p3339_p11 }
  0xcd   : > { %3347 = shalt.err (!%p3344_p13)
}
  0xce   : > { %s3348_s0 = scalar_lea.vmem %s699_s8, 1024  ;;  %p3356_p7 = scmp.lt.s32.totalorder %s699_s8, %s699_s8 }
  0xcf   : > { %p3349_p0 = scmp.ne.s32.totalorder %s699_s8, %s3348_s0  ;;  %p3357_p9 = scmp.lt.s32.totalorder %s3348_s0, %s3348_s0 }
  0xd1   : > { %p3351_p2 = pnand %p3349_p0, %p4126_p8  ;;  %p3358_p5 = por %p3357_p9, %p3356_p7 }
  0xd3   : > { %p3352_p4 = pneg %p3351_p2 }
  0xd5   : > { %p3359_p10 = pnand %p3358_p5, %p3352_p4 }
  0xd7   : > { %3362 = shalt.err (!%p3359_p10)
}
  0xd8   : > { %2979 = dma.hbm_to_vmem [thread:$0]  (!%p4110_p6), %s5037_s15, 1024, %s699_s8, [#allocation28], %s3920_s21, %s3920_s21, %s3921_s18  }
  0xd9   : > { %s5038_s17 = sld [smem:[#allocation75_spill]] }
  0xdf   : > { %s3363_s22 = scalar_lea.hbm %s5038_s17, 16 }
  0xe0   : > { %p3364_p1 = scmp.ne.s32.totalorder %s5038_s17, %s3363_s22  ;;  %p3370_p12 = scmp.lt.u32.totalorder %s3363_s22, %s5038_s17 }
  0xe2   : > { %p3366_p3 = pnand %p3364_p1, %p4126_p8 }
  0xe4   : > { %p3367_p11 = pneg %p3366_p3 }
  0xe6   : > { %p3372_p13 = pnand %p3370_p12, %p3367_p11 }
  0xe8   : > { %3375 = shalt.err (!%p3372_p13)
}
  0xe9   : > { %s3376_s12 = scalar_lea.vmem %s724_s27, 16  ;;  %s3383_s21 = scalar_lea.vmem %s724_s27, 32 }
  0xea   : > { %p3377_p0 = scmp.ne.s32.totalorder %s724_s27, %s3376_s12  ;;  %p3384_p7 = scmp.lt.s32.totalorder %s724_s27, %s724_s27 }
  0xeb   : > { %p3385_p9 = scmp.lt.s32.totalorder %s3383_s21, %s3376_s12 }
  0xec   : > { %p3379_p2 = pnand %p3377_p0, %p4126_p8 }
  0xed   : > { %p3386_p5 = por %p3385_p9, %p3384_p7 }
  0xee   : > { %p3380_p4 = pneg %p3379_p2 }
  0xf0   : > { %p3387_p10 = pnand %p3386_p5, %p3380_p4 }
  0xf2   : > { %3390 = shalt.err (!%p3387_p10)
}
  0xf3   : > { %2985 = dma.hbm_to_vmem [thread:$0]  (!%p4110_p6), %s5038_s17, 16, %s724_s27, [#allocation31]  }
  0xf4   : > { %s3926_s0 = smov [#allocation33]   ;;  %s5039_s19 = sld [smem:[#allocation77_spill]] }
  0xf5   : > { %s745_s24 = sshll.u32 %s3926_s0, 4  ;;  %s746_s24 = int_to_ptr.vmem [resolvable:$true] %s745_s24 }
  0xfa   : > { %s3391_s4 = scalar_lea.hbm %s5039_s19, 16 }
  0xfb   : > { %p3392_p1 = scmp.ne.s32.totalorder %s5039_s19, %s3391_s4  ;;  %p3398_p12 = scmp.lt.u32.totalorder %s3391_s4, %s5039_s19 }
  0xfd   : > { %p3394_p3 = pnand %p3392_p1, %p4126_p8 }
  0xff   : > { %p3395_p11 = pneg %p3394_p3 }
 0x101   : > { %p3400_p13 = pnand %p3398_p12, %p3395_p11 }
 0x103   : > { %3403 = shalt.err (!%p3400_p13)
}
 0x104   : > { %s3404_s27 = scalar_lea.vmem %s746_s24, 16  ;;  %s3411_s23 = scalar_lea.vmem %s746_s24, 32 }
 0x105   : > { %p3405_p0 = scmp.ne.s32.totalorder %s746_s24, %s3404_s27  ;;  %p3412_p7 = scmp.lt.s32.totalorder %s746_s24, %s746_s24 }
 0x106   : > { %p3413_p9 = scmp.lt.s32.totalorder %s3411_s23, %s3404_s27 }
 0x107   : > { %p3407_p2 = pnand %p3405_p0, %p4126_p8 }
 0x108   : > { %p3414_p5 = por %p3413_p9, %p3412_p7 }
 0x109   : > { %p3408_p4 = pneg %p3407_p2 }
 0x10b   : > { %p3415_p10 = pnand %p3414_p5, %p3408_p4 }
 0x10d   : > { %3418 = shalt.err (!%p3415_p10)
}
 0x10e   : > { %2991 = dma.hbm_to_vmem [thread:$0]  (!%p4110_p6), %s5039_s19, 16, %s746_s24, [#allocation34]  }
 0x10f   : > { %s2576_s18 = sadd.s32 4294967294, %s3915_s28   ;;  %s63_s8 = sadd.s32 1, %s3911_s3 }
 0x110   : > { %p65_p1 = scmp.ge.s32.totalorder %s63_s8, 2  ;;  %s72_s0 = sadd.s32 1, %s3903_s26 }
 0x111   : > { %p79_p3 = scmp.ne.s32.totalorder %s3903_s26, %s3899_s25  ;;  %p80_p11 = scmp.eq.s32.totalorder %s3915_s28, 0 }
 0x112   : > { %s5110_s8 = smov (%p65_p1, %s63_s8), 0  ;;  %p85_p13 = scmp.ne.s32.totalorder %s3899_s25, %s3895_s2 }
 0x113   : > { %5040 = sst [smem:[#allocation54_spill]] %s5110_s8  ;;  %p4305_p12 = por %p80_p11, %p79_p3 }
 0x114   : > { %s67_s24 = ssub.s32 %s3911_s3, %s5110_s8  ;;  %p553_p0 = scmp.eq.s32.totalorder %s4094_s29, 1 }
 0x115   : > { %p70_p2 = scmp.eq.s32.totalorder %s67_s24, 0  ;;  %p5042_p4 = scmp.eq.s32.totalorder %s4094_s29, 0 }
 0x116   : > { %p4320_p9 = por %p553_p0, %p79_p3  ;;  %p559_p5 = scmp.eq.s32.totalorder %s2576_s18, 1 }
 0x117   : > { %p4316_p7 = por %p5042_p4, %p85_p13  ;;  %p3031_p1 = scmp.lt.s32.totalorder %s3915_s28, 2 }
 0x118   : > { %s5044_s4 = scalar_select %p4320_p9, 1, 0 }
 0x119   : > { %s5043_s10 = scalar_select %p4316_p7, 1, 0 }
 0x11a   : > { %5045 = sst [smem:[#allocation55_spill]] %s5044_s4  ;;  %p4327_p10 = por %p559_p5, %p85_p13 }
 0x11b   : > { %s4325_s22 = scalar_select %p70_p2, %s3903_s26, %s72_s0  }
 0x11c   : > { %s5047_s1 = scalar_select %p4327_p10, 1, 0 }
 0x11d   : > { %5046 = sst [smem:[#allocation56_spill]] %s4325_s22  ;;  %s4333_s16 = sand.u32 1, %s3903_s26  }
 0x11e   : > { %5048 = sst [smem:[#allocation57_spill]] %s5047_s1  ;;  %s4336_s30 = sshll.u32 %s3911_s3, 8 }
 0x11f   : > { %s4339_s27 = sshll.u32 %s4333_s16, 4  ;;  %p4343_p3 = pnand %p3031_p1, %p4305_p12 }
 0x120   : > { %s4970_s12 = sand.u32 1, %s3915_s28   ;;  %s5050_s0 = sld [smem:[#allocation59_spill]] }
 0x121   : > { %s5049_s23 = scalar_select %p4343_p3, 1, 0 }
 0x122   : > { %s794_s9 = scalar_lea.vmem [#allocation6], %s4339_s27  ;;  %s4359_s7 = scalar_lea.sflag [#allocation7], %s4970_s12 }
 0x123   : > { %s803_s11 = sshll.u32 %s794_s9, 4  ;;  %p4365_p12 = pneg %p4343_p3  ;;  %s4355_s11 = int_to_ptr.vmem [resolvable:$true] %s803_s11 }
 0x125   : > { %s5051_s15 = scalar_select %p4365_p12, 1, 0 }
 0x126   : > { %s4352_s24 = scalar_lea.hbm %s5050_s0, %s4336_s30  ;;  %s3424_s9 = scalar_lea.hbm %s5050_s0, 512 }
 0x127   : > { %s3419_s13 = scalar_lea.hbm %s4352_s24, 256  ;;  %p3425_p2 = scmp.lt.u32.totalorder %s4352_s24, %s5050_s0 }
 0x128   : > { %p3420_p11 = scmp.ne.s32.totalorder %s4352_s24, %s3419_s13  ;;  %p3426_p4 = scmp.lt.u32.totalorder %s3424_s9, %s3419_s13 }
 0x129   : > { %p3428_p1 = scmp.lt.u32.totalorder %s3419_s13, %s4352_s24 }
 0x12a   : > { %p3422_p13 = pnand %p4365_p12, %p3420_p11  ;;  %p3427_p5 = por %p3426_p4, %p3425_p2 }
 0x12c   : > { %p3423_p0 = pneg %p3422_p13  ;;  %p3429_p10 = por %p3428_p1, %p3427_p5 }
 0x12e   : > { %p3430_p9 = pnand %p3429_p10, %p3423_p0 }
 0x130   : > { %3433 = shalt.err (!%p3430_p9)
}
 0x131   : > { %s3434_s12 = scalar_lea.vmem %s4355_s11, 256  ;;  %s3927_s21 = smov [#allocation6]  }
 0x132   : > { %p3435_p11 = scmp.ne.s32.totalorder %s4355_s11, %s3434_s12  ;;  %s3439_s18 = sshll.u32 %s3927_s21, 4  ;;  %s3440_s18 = int_to_ptr.vmem [resolvable:$false] %s3439_s18 }
 0x133   : > { %s3441_s17 = scalar_lea.vmem %s3440_s18, 512  ;;  %p3442_p6 = scmp.lt.s32.totalorder %s4355_s11, %s3440_s18 }
 0x134   : > { %p3437_p13 = pnand %p3435_p11, %p4365_p12  ;;  %p3443_p8 = scmp.lt.s32.totalorder %s3441_s17, %s3434_s12 }
 0x136   : > { %p3438_p7 = pneg %p3437_p13  ;;  %p3444_p2 = por %p3443_p8, %p3442_p6 }
 0x138   : > { %p3445_p4 = pnand %p3444_p2, %p3438_p7 }
 0x13a   : > { %3448 = shalt.err (!%p3445_p4)
}
 0x13b   : > { %s4980_s13 = smov 128   ;;  %s4982_s19 = smov 8  }
 0x13c   : > { %3001 = dma.hbm_to_vmem [thread:$0]  (!%p4343_p3), %s4352_s24, 256, %s4355_s11, %s4359_s7, %s4980_s13, %s4980_s13, %s4982_s19  }
 0x13d   : > { %s5052_s21 = sld [smem:[#allocation61_spill]]  ;;  %s838_s17 = scalar_lea.vmem [#allocation9], %s4339_s27 }
 0x13e   : > { %s845_s0 = sshll.u32 %s838_s17, 4  ;;  %s3930_s20 = smov [#allocation14]   ;;  %s4399_s0 = int_to_ptr.vmem [resolvable:$true] %s845_s0 }
 0x13f   : > { %s4401_s8 = sshll.u32 %s3930_s20, 4  ;;  %s5053_s22 = sand.u32 1, %s3915_s28   ;;  %s593_s8 = int_to_ptr.vmem [resolvable:$true] %s4401_s8 }
 0x140   : > { %s4405_s26 = scalar_lea.sflag [#allocation10], %s5053_s22 }
 0x143   : > { %s4396_s18 = scalar_lea.hbm %s5052_s21, %s4336_s30  ;;  %s3454_s12 = scalar_lea.hbm %s5052_s21, 512 }
 0x144   : > { %s3449_s11 = scalar_lea.hbm %s4396_s18, 256  ;;  %p3455_p9 = scmp.lt.u32.totalorder %s4396_s18, %s5052_s21 }
 0x145   : > { %p3450_p6 = scmp.ne.s32.totalorder %s4396_s18, %s3449_s11  ;;  %p3456_p10 = scmp.lt.u32.totalorder %s3454_s12, %s3449_s11 }
 0x146   : > { %p3458_p5 = scmp.lt.u32.totalorder %s3449_s11, %s4396_s18 }
 0x147   : > { %p3452_p8 = pnand %p3450_p6, %p4365_p12  ;;  %p3457_p0 = por %p3456_p10, %p3455_p9 }
 0x149   : > { %p3453_p7 = pneg %p3452_p8  ;;  %p3459_p1 = por %p3458_p5, %p3457_p0 }
 0x14b   : > { %p3460_p11 = pnand %p3459_p1, %p3453_p7 }
 0x14d   : > { %3463 = shalt.err (!%p3460_p11)
}
 0x14e   : > { %s3464_s20 = scalar_lea.vmem %s4399_s0, 256  ;;  %s3931_s22 = smov [#allocation9]  }
 0x14f   : > { %p3465_p13 = scmp.ne.s32.totalorder %s4399_s0, %s3464_s20  ;;  %s3469_s17 = sshll.u32 %s3931_s22, 4  ;;  %s3470_s17 = int_to_ptr.vmem [resolvable:$false] %s3469_s17 }
 0x150   : > { %s3471_s13 = scalar_lea.vmem %s3470_s17, 512  ;;  %p3472_p6 = scmp.lt.s32.totalorder %s4399_s0, %s3470_s17 }
 0x151   : > { %p3467_p2 = pnand %p3465_p13, %p4365_p12  ;;  %p3473_p8 = scmp.lt.s32.totalorder %s3471_s13, %s3464_s20 }
 0x153   : > { %p3468_p4 = pneg %p3467_p2  ;;  %p3474_p9 = por %p3473_p8, %p3472_p6 }
 0x155   : > { %p3475_p10 = pnand %p3474_p9, %p3468_p4 }
 0x157   : > { %3478 = shalt.err (!%p3475_p10)
}
 0x158   : > { %s5054_s19 = smov 8   ;;  %s5055_s11 = smov 128  }
 0x159   : > { %3007 = dma.hbm_to_vmem [thread:$0]  (!%p4343_p3), %s4396_s18, 256, %s4399_s0, %s4405_s26, %s5055_s11, %s5055_s11, %s5054_s19  }
 0x15a   : > { %s5056_s6 = sld [smem:[#allocation64_spill]]  ;;  %p5057_p0 = scmp.ne.s32.totalorder %s5032_s14, 0 }
 0x160   : > { %s3479_s12 = scalar_lea.hbm %s5056_s6, 16 }
 0x161   : > { %p3480_p7 = scmp.ne.s32.totalorder %s5056_s6, %s3479_s12  ;;  %p3486_p11 = scmp.lt.u32.totalorder %s3479_s12, %s5056_s6 }
 0x163   : > { %p3482_p5 = pnand %p3480_p7, %p5057_p0 }
 0x165   : > { %p3483_p1 = pneg %p3482_p5 }
 0x167   : > { %p3488_p13 = pnand %p3486_p11, %p3483_p1 }
 0x169   : > { %3491 = shalt.err (!%p3488_p13)
}
 0x16a   : > { %s3492_s21 = scalar_lea.vmem %s593_s8, 16  ;;  %s3499_s0 = scalar_lea.vmem %s593_s8, 32 }
 0x16b   : > { %p3493_p2 = scmp.ne.s32.totalorder %s593_s8, %s3492_s21  ;;  %p3500_p8 = scmp.lt.s32.totalorder %s593_s8, %s593_s8 }
 0x16c   : > { %p3501_p9 = scmp.lt.s32.totalorder %s3499_s0, %s3492_s21 }
 0x16d   : > { %p3495_p4 = pnand %p3493_p2, %p5057_p0 }
 0x16e   : > { %p3502_p10 = por %p3501_p9, %p3500_p8 }
 0x16f   : > { %p3496_p6 = pneg %p3495_p4 }
 0x171   : > { %p3503_p3 = pnand %p3502_p10, %p3496_p6 }
 0x173   : > { %3506 = shalt.err (!%p3503_p3)
}
 0x174   : > { %p5058_p7 = scmp.ne.s32.totalorder %s5029_s5, 0  ;;  %s3932_s9 = smov [#allocation17]  }
 0x175   : > { %s616_s12 = sshll.u32 %s3932_s9, 4  ;;  %s3933_s20 = smov [#allocation20]   ;;  %s617_s12 = int_to_ptr.vmem [resolvable:$true] %s616_s12 }
 0x176   : > { %2952 = dma.hbm_to_vmem [thread:$0]  (!%p5058_p7), %s5056_s6, 16, %s593_s8, [#allocation13]  }
 0x177   : > { %s640_s22 = sshll.u32 %s3933_s20, 4  ;;  %s5059_s28 = sld [smem:[#allocation66_spill]]  ;;  %s641_s22 = int_to_ptr.vmem [resolvable:$true] %s640_s22 }
 0x17d   : > { %s5060_s1 = smov %s5059_s28  ;;  %s3507_s2 = scalar_lea.hbm %s5059_s28, 16 }
 0x17e   : > { %p3508_p3 = scmp.ne.s32.totalorder %s5060_s1, %s3507_s2  ;;  %p3514_p11 = scmp.lt.u32.totalorder %s3507_s2, %s5060_s1 }
 0x180   : > { %p3510_p5 = pnand %p3508_p3, %p5057_p0 }
 0x182   : > { %p3511_p1 = pneg %p3510_p5 }
 0x184   : > { %p3516_p13 = pnand %p3514_p11, %p3511_p1 }
 0x186   : > { %3519 = shalt.err (!%p3516_p13)
}
 0x187   : > { %s3520_s8 = scalar_lea.vmem %s617_s12, 16  ;;  %s3527_s28 = scalar_lea.vmem %s617_s12, 32 }
 0x188   : > { %p3521_p2 = scmp.ne.s32.totalorder %s617_s12, %s3520_s8  ;;  %p3528_p8 = scmp.lt.s32.totalorder %s617_s12, %s617_s12 }
 0x189   : > { %p3529_p9 = scmp.lt.s32.totalorder %s3527_s28, %s3520_s8 }
 0x18a   : > { %p3523_p4 = pnand %p3521_p2, %p5057_p0 }
 0x18b   : > { %p3530_p10 = por %p3529_p9, %p3528_p8 }
 0x18c   : > { %p3524_p6 = pneg %p3523_p4 }
 0x18e   : > { %p3531_p12 = pnand %p3530_p10, %p3524_p6 }
 0x190   : > { %3534 = shalt.err (!%p3531_p12)
}
 0x191   : > { %2958 = dma.hbm_to_vmem [thread:$0]  (!%p5058_p7), %s5060_s1, 16, %s617_s12, [#allocation16]  }
 0x192   : > { %s5061_s20 = sld [smem:[#allocation68_spill]] }
 0x198   : > { %s3535_s17 = scalar_lea.hbm %s5061_s20, 16 }
 0x199   : > { %p3536_p3 = scmp.ne.s32.totalorder %s5061_s20, %s3535_s17  ;;  %p3542_p12 = scmp.lt.u32.totalorder %s3535_s17, %s5061_s20 }
 0x19b   : > { %p3538_p5 = pnand %p3536_p3, %p5057_p0 }
 0x19d   : > { %p3539_p1 = pneg %p3538_p5 }
 0x19f   : > { %p3544_p11 = pnand %p3542_p12, %p3539_p1 }
 0x1a1   : > { %3547 = shalt.err (!%p3544_p11)
}
 0x1a2   : > { %s3548_s8 = scalar_lea.vmem %s641_s22, 16  ;;  %s3555_s12 = scalar_lea.vmem %s641_s22, 32 }
 0x1a3   : > { %p3549_p13 = scmp.ne.s32.totalorder %s641_s22, %s3548_s8  ;;  %p3556_p6 = scmp.lt.s32.totalorder %s641_s22, %s641_s22 }
 0x1a4   : > { %p3557_p8 = scmp.lt.s32.totalorder %s3555_s12, %s3548_s8 }
 0x1a5   : > { %p3551_p2 = pnand %p3549_p13, %p5057_p0 }
 0x1a6   : > { %p3558_p9 = por %p3557_p8, %p3556_p6 }
 0x1a7   : > { %p3552_p4 = pneg %p3551_p2 }
 0x1a9   : > { %p3559_p10 = pnand %p3558_p9, %p3552_p4 }
 0x1ab   : > { %3562 = shalt.err (!%p3559_p10)
}
 0x1ac   : > { %2964 = dma.hbm_to_vmem [thread:$0]  (!%p5058_p7), %s5061_s20, 16, %s641_s22, [#allocation19]  }
 0x1ad   : > { %s3934_s9 = smov [#allocation23]   ;;  %s3935_s4 = smov [#allocation26]  }
 0x1ae   : > { %s664_s2 = sshll.u32 %s3934_s9, 4  ;;  %s688_s17 = sshll.u32 %s3935_s4, 4  ;;  %s665_s2 = int_to_ptr.vmem [resolvable:$true] %s664_s2  ;;  %s689_s17 = int_to_ptr.vmem [resolvable:$true] %s688_s17 }
 0x1af   : > { %s5062_s0 = sld [smem:[#allocation70_spill]] }
 0x1b5   : > { %s3563_s18 = scalar_lea.hbm %s5062_s0, 16 }
 0x1b6   : > { %p3564_p3 = scmp.ne.s32.totalorder %s5062_s0, %s3563_s18  ;;  %p3570_p12 = scmp.lt.u32.totalorder %s3563_s18, %s5062_s0 }
 0x1b8   : > { %p3566_p5 = pnand %p3564_p3, %p5057_p0 }
 0x1ba   : > { %p3567_p1 = pneg %p3566_p5 }
 0x1bc   : > { %p3572_p11 = pnand %p3570_p12, %p3567_p1 }
 0x1be   : > { %3575 = shalt.err (!%p3572_p11)
}
 0x1bf   : > { %s3576_s22 = scalar_lea.vmem %s665_s2, 16  ;;  %s3583_s24 = scalar_lea.vmem %s665_s2, 32 }
 0x1c0   : > { %p3577_p13 = scmp.ne.s32.totalorder %s665_s2, %s3576_s22  ;;  %p3584_p6 = scmp.lt.s32.totalorder %s665_s2, %s665_s2 }
 0x1c1   : > { %p3585_p8 = scmp.lt.s32.totalorder %s3583_s24, %s3576_s22 }
 0x1c2   : > { %p3579_p2 = pnand %p3577_p13, %p5057_p0 }
 0x1c3   : > { %p3586_p9 = por %p3585_p8, %p3584_p6 }
 0x1c4   : > { %p3580_p4 = pneg %p3579_p2 }
 0x1c6   : > { %p3587_p10 = pnand %p3586_p9, %p3580_p4 }
 0x1c8   : > { %3590 = shalt.err (!%p3587_p10)
}
 0x1c9   : > { %2970 = dma.hbm_to_vmem [thread:$0]  (!%p5058_p7), %s5062_s0, 16, %s665_s2, [#allocation22]  }
 0x1ca   : > { %s5063_s21 = sld [smem:[#allocation72_spill]] }
 0x1d0   : > { %s3591_s18 = scalar_lea.hbm %s5063_s21, 16 }
 0x1d1   : > { %p3592_p3 = scmp.ne.s32.totalorder %s5063_s21, %s3591_s18  ;;  %p3598_p12 = scmp.lt.u32.totalorder %s3591_s18, %s5063_s21 }
 0x1d3   : > { %p3594_p5 = pnand %p3592_p3, %p5057_p0 }
 0x1d5   : > { %p3595_p1 = pneg %p3594_p5 }
 0x1d7   : > { %p3600_p11 = pnand %p3598_p12, %p3595_p1 }
 0x1d9   : > { %3603 = shalt.err (!%p3600_p11)
}
 0x1da   : > { %s3604_s24 = scalar_lea.vmem %s689_s17, 16  ;;  %s3611_s2 = scalar_lea.vmem %s689_s17, 32 }
 0x1db   : > { %p3605_p13 = scmp.ne.s32.totalorder %s689_s17, %s3604_s24  ;;  %p3612_p6 = scmp.lt.s32.totalorder %s689_s17, %s689_s17 }
 0x1dc   : > { %p3613_p8 = scmp.lt.s32.totalorder %s3611_s2, %s3604_s24 }
 0x1dd   : > { %p3607_p2 = pnand %p3605_p13, %p5057_p0 }
 0x1de   : > { %p3614_p9 = por %p3613_p8, %p3612_p6 }
 0x1df   : > { %p3608_p4 = pneg %p3607_p2 }
 0x1e1   : > { %p3615_p10 = pnand %p3614_p9, %p3608_p4 }
 0x1e3   : > { %3618 = shalt.err (!%p3615_p10)
}
 0x1e4   : > { %2976 = dma.hbm_to_vmem [thread:$0]  (!%p5058_p7), %s5063_s21, 16, %s689_s17, [#allocation25]  }
 0x1e5   : > { %s3936_s1 = smov [#allocation29]   ;;  %s3937_s18 = smov [#allocation32]  }
 0x1e6   : > { %s712_s13 = sshll.u32 %s3936_s1, 4  ;;  %s734_s8 = sshll.u32 %s3937_s18, 4  ;;  %s713_s13 = int_to_ptr.vmem [resolvable:$true] %s712_s13  ;;  %s735_s8 = int_to_ptr.vmem [resolvable:$true] %s734_s8 }
 0x1e7   : > { %s5064_s22 = sld [smem:[#allocation74_spill]] }
 0x1ed   : > { %s3619_s0 = scalar_lea.hbm %s5064_s22, 16 }
 0x1ee   : > { %p3620_p3 = scmp.ne.s32.totalorder %s5064_s22, %s3619_s0  ;;  %p3626_p12 = scmp.lt.u32.totalorder %s3619_s0, %s5064_s22 }
 0x1f0   : > { %p3622_p5 = pnand %p3620_p3, %p5057_p0 }
 0x1f2   : > { %p3623_p1 = pneg %p3622_p5 }
 0x1f4   : > { %p3628_p11 = pnand %p3626_p12, %p3623_p1 }
 0x1f6   : > { %3631 = shalt.err (!%p3628_p11)
}
 0x1f7   : > { %s3632_s17 = scalar_lea.vmem %s713_s13, 16  ;;  %s3639_s4 = scalar_lea.vmem %s713_s13, 32 }
 0x1f8   : > { %p3633_p13 = scmp.ne.s32.totalorder %s713_s13, %s3632_s17  ;;  %p3640_p6 = scmp.lt.s32.totalorder %s713_s13, %s713_s13 }
 0x1f9   : > { %p3641_p8 = scmp.lt.s32.totalorder %s3639_s4, %s3632_s17 }
 0x1fa   : > { %p3635_p2 = pnand %p3633_p13, %p5057_p0 }
 0x1fb   : > { %p3642_p9 = por %p3641_p8, %p3640_p6 }
 0x1fc   : > { %p3636_p4 = pneg %p3635_p2 }
 0x1fe   : > { %p3643_p10 = pnand %p3642_p9, %p3636_p4 }
 0x200   : > { %3646 = shalt.err (!%p3643_p10)
}
 0x201   : > { %2982 = dma.hbm_to_vmem [thread:$0]  (!%p5058_p7), %s5064_s22, 16, %s713_s13, [#allocation28]  }
 0x202   : > { %s5065_s12 = sld [smem:[#allocation76_spill]] }
 0x208   : > { %s3647_s28 = scalar_lea.hbm %s5065_s12, 16 }
 0x209   : > { %p3648_p3 = scmp.ne.s32.totalorder %s5065_s12, %s3647_s28  ;;  %p3654_p12 = scmp.lt.u32.totalorder %s3647_s28, %s5065_s12 }
 0x20b   : > { %p3650_p5 = pnand %p3648_p3, %p5057_p0 }
 0x20d   : > { %p3651_p1 = pneg %p3650_p5 }
 0x20f   : > { %p3656_p11 = pnand %p3654_p12, %p3651_p1 }
 0x211   : > { %3659 = shalt.err (!%p3656_p11)
}
 0x212   : > { %s3660_s4 = scalar_lea.vmem %s735_s8, 16  ;;  %s3667_s13 = scalar_lea.vmem %s735_s8, 32 }
 0x213   : > { %p3661_p13 = scmp.ne.s32.totalorder %s735_s8, %s3660_s4  ;;  %p3668_p6 = scmp.lt.s32.totalorder %s735_s8, %s735_s8 }
 0x214   : > { %p3669_p8 = scmp.lt.s32.totalorder %s3667_s13, %s3660_s4 }
 0x215   : > { %p3663_p2 = pnand %p3661_p13, %p5057_p0 }
 0x216   : > { %p3670_p9 = por %p3669_p8, %p3668_p6 }
 0x217   : > { %p3664_p4 = pneg %p3663_p2 }
 0x219   : > { %p3671_p10 = pnand %p3670_p9, %p3664_p4 }
 0x21b   : > { %3674 = shalt.err (!%p3671_p10)
}
 0x21c   : > { %2988 = dma.hbm_to_vmem [thread:$0]  (!%p5058_p7), %s5065_s12, 16, %s735_s8, [#allocation31]  }
 0x21d   : > { %s3938_s6 = smov [#allocation35]   ;;  %s5066_s2 = sld [smem:[#allocation78_spill]] }
 0x21e   : > { %s756_s0 = sshll.u32 %s3938_s6, 4  ;;  %s757_s0 = int_to_ptr.vmem [resolvable:$true] %s756_s0 }
 0x223   : > { %s5067_s9 = smov %s5066_s2  ;;  %s3675_s17 = scalar_lea.hbm %s5066_s2, 16 }
 0x224   : > { %p3676_p3 = scmp.ne.s32.totalorder %s5067_s9, %s3675_s17  ;;  %p3682_p12 = scmp.lt.u32.totalorder %s3675_s17, %s5067_s9 }
 0x226   : > { %p3678_p5 = pnand %p3676_p3, %p5057_p0 }
 0x228   : > { %p3679_p1 = pneg %p3678_p5 }
 0x22a   : > { %p3684_p11 = pnand %p3682_p12, %p3679_p1 }
 0x22c   : > { %3687 = shalt.err (!%p3684_p11)
}
 0x22d   : > { %s3688_s8 = scalar_lea.vmem %s757_s0, 16  ;;  %s3695_s1 = scalar_lea.vmem %s757_s0, 32 }
 0x22e   : > { %p3689_p13 = scmp.ne.s32.totalorder %s757_s0, %s3688_s8  ;;  %p3696_p6 = scmp.lt.s32.totalorder %s757_s0, %s757_s0 }
 0x22f   : > { %p3697_p8 = scmp.lt.s32.totalorder %s3695_s1, %s3688_s8 }
 0x230   : > { %p3691_p2 = pnand %p3689_p13, %p5057_p0 }
 0x231   : > { %p3698_p9 = por %p3697_p8, %p3696_p6 }
 0x232   : > { %p3692_p4 = pneg %p3691_p2 }
 0x234   : > { %p3699_p10 = pnand %p3698_p9, %p3692_p4 }
 0x236   : > { %3702 = shalt.err (!%p3699_p10)
}
 0x237   : > { %2994 = dma.hbm_to_vmem [thread:$0]  (!%p5058_p7), %s5067_s9, 16, %s757_s0, [#allocation34]  }
 0x238   : > { %s5068_s6 = sld [smem:[#allocation58_spill]]  ;;  %s771_s24 = scalar_lea.vmem [#allocation3], %s4339_s27 }
 0x239   : > { %s780_s2 = sshll.u32 %s771_s24, 4  ;;  %s768_s5 = scalar_lea.sflag [#allocation4], %s4333_s16  ;;  %s4584_s2 = int_to_ptr.vmem [resolvable:$true] %s780_s2 }
 0x23a   : > { %p5069_p3 = scmp.ne.s32.totalorder %s5051_s15, 0 }
 0x23e   : > { %s4581_s28 = scalar_lea.hbm %s5068_s6, %s4336_s30  ;;  %s3708_s13 = scalar_lea.hbm %s5068_s6, 512 }
 0x23f   : > { %s3703_s17 = scalar_lea.hbm %s4581_s28, 256  ;;  %p3709_p7 = scmp.lt.u32.totalorder %s4581_s28, %s5068_s6 }
 0x240   : > { %p3704_p0 = scmp.ne.s32.totalorder %s4581_s28, %s3703_s17  ;;  %p3710_p12 = scmp.lt.u32.totalorder %s3708_s13, %s3703_s17 }
 0x241   : > { %p3712_p13 = scmp.lt.u32.totalorder %s3703_s17, %s4581_s28 }
 0x242   : > { %p3706_p5 = pnand %p3704_p0, %p5069_p3  ;;  %p3711_p11 = por %p3710_p12, %p3709_p7 }
 0x244   : > { %p3707_p1 = pneg %p3706_p5  ;;  %p3713_p2 = por %p3712_p13, %p3711_p11 }
 0x246   : > { %p3714_p4 = pnand %p3713_p2, %p3707_p1 }
 0x248   : > { %3717 = shalt.err (!%p3714_p4)
}
 0x249   : > { %s3718_s20 = scalar_lea.vmem %s4584_s2, 256  ;;  %s3939_s21 = smov [#allocation3]  }
 0x24a   : > { %p3719_p6 = scmp.ne.s32.totalorder %s4584_s2, %s3718_s20  ;;  %s3723_s18 = sshll.u32 %s3939_s21, 4  ;;  %s3724_s18 = int_to_ptr.vmem [resolvable:$false] %s3723_s18 }
 0x24b   : > { %s3725_s14 = scalar_lea.vmem %s3724_s18, 512  ;;  %p3726_p10 = scmp.lt.s32.totalorder %s4584_s2, %s3724_s18 }
 0x24c   : > { %p3721_p8 = pnand %p3719_p6, %p5069_p3  ;;  %p3727_p0 = scmp.lt.s32.totalorder %s3725_s14, %s3718_s20 }
 0x24e   : > { %p3722_p9 = pneg %p3721_p8  ;;  %p3728_p5 = por %p3727_p0, %p3726_p10 }
 0x250   : > { %p3729_p7 = pnand %p3728_p5, %p3722_p9 }
 0x252   : > { %3732 = shalt.err (!%p3729_p7)
}
 0x253   : > { %p5070_p1 = scmp.ne.s32.totalorder %s5049_s23, 0  ;;  %s5071_s0 = sld [smem:[#allocation60_spill]] }
 0x254   : > { %s817_s13 = scalar_lea.vmem [#allocation8], %s4339_s27 }
 0x255   : > { %2998 = dma.hbm_to_vmem [thread:$0]  (!%p5070_p1), %s4581_s28, 256, %s4584_s2, %s768_s5, %s5055_s11, %s5055_s11, %s5054_s19  }
 0x256   : > { %s824_s8 = sshll.u32 %s817_s13, 4  ;;  %s4620_s8 = int_to_ptr.vmem [resolvable:$true] %s824_s8 }
 0x259   : > { %s4617_s4 = scalar_lea.hbm %s5071_s0, %s4336_s30  ;;  %s3738_s2 = scalar_lea.hbm %s5071_s0, 512 }
 0x25a   : > { %s3733_s1 = scalar_lea.hbm %s4617_s4, 256  ;;  %p3739_p2 = scmp.lt.u32.totalorder %s4617_s4, %s5071_s0 }
 0x25b   : > { %p3734_p12 = scmp.ne.s32.totalorder %s4617_s4, %s3733_s1  ;;  %p3740_p4 = scmp.lt.u32.totalorder %s3738_s2, %s3733_s1 }
 0x25c   : > { %p3742_p8 = scmp.lt.u32.totalorder %s3733_s1, %s4617_s4 }
 0x25d   : > { %p3736_p11 = pnand %p3734_p12, %p5069_p3  ;;  %p3741_p6 = por %p3740_p4, %p3739_p2 }
 0x25f   : > { %p3737_p13 = pneg %p3736_p11  ;;  %p3743_p9 = por %p3742_p8, %p3741_p6 }
 0x261   : > { %p3744_p10 = pnand %p3743_p9, %p3737_p13 }
 0x263   : > { %3747 = shalt.err (!%p3744_p10)
}
 0x264   : > { %s3748_s27 = scalar_lea.vmem %s4620_s8, 256  ;;  %s3940_s21 = smov [#allocation8]  }
 0x265   : > { %p3749_p0 = scmp.ne.s32.totalorder %s4620_s8, %s3748_s27  ;;  %s3753_s18 = sshll.u32 %s3940_s21, 4  ;;  %s3754_s18 = int_to_ptr.vmem [resolvable:$false] %s3753_s18 }
 0x266   : > { %s3755_s14 = scalar_lea.vmem %s3754_s18, 512  ;;  %p3756_p12 = scmp.lt.s32.totalorder %s4620_s8, %s3754_s18 }
 0x267   : > { %p3751_p5 = pnand %p3749_p0, %p5069_p3  ;;  %p3757_p11 = scmp.lt.s32.totalorder %s3755_s14, %s3748_s27 }
 0x269   : > { %p3752_p7 = pneg %p3751_p5  ;;  %p3758_p2 = por %p3757_p11, %p3756_p12 }
 0x26b   : > { %p3759_p4 = pnand %p3758_p2, %p3752_p7 }
 0x26d   : > { %3762 = shalt.err (!%p3759_p4)
}
 0x26e   : > { %3004 = dma.hbm_to_vmem [thread:$0]  (!%p5070_p1), %s4617_s4, 256, %s4620_s8, %s4359_s7, %s5055_s11, %s5055_s11, %s5054_s19  }
 0x26f   : > { %s2607_s24 = sshll.u32 %s3911_s3, 4  ;;  %s858_s17 = scalar_lea.vmem [#allocation11], %s4333_s16 }
 0x270   : > { %s865_s13 = sshll.u32 %s858_s17, 4  ;;  %s5072_s28 = sld [smem:[#allocation62_spill]]  ;;  %s866_s13 = int_to_ptr.vmem [resolvable:$true] %s865_s13 }
 0x276   : > { %s5073_s5 = smov %s5072_s28  ;;  %s863_s2 = scalar_lea.hbm %s5072_s28, %s2607_s24 }
 0x277   : > { %s3763_s30 = scalar_lea.hbm %s863_s2, 16  ;;  %s3768_s18 = scalar_lea.hbm %s5073_s5, 32 }
 0x278   : > { %p3764_p13 = scmp.ne.s32.totalorder %s863_s2, %s3763_s30  ;;  %p3769_p9 = scmp.lt.u32.totalorder %s863_s2, %s5073_s5 }
 0x279   : > { %p3770_p10 = scmp.lt.u32.totalorder %s3768_s18, %s3763_s30  ;;  %p3772_p5 = scmp.lt.u32.totalorder %s3763_s30, %s863_s2 }
 0x27a   : > { %p3766_p6 = pnand %p3764_p13, %p5069_p3 }
 0x27b   : > { %p3771_p0 = por %p3770_p10, %p3769_p9 }
 0x27c   : > { %p3767_p8 = pneg %p3766_p6 }
 0x27d   : > { %p3773_p7 = por %p3772_p5, %p3771_p0 }
 0x27f   : > { %p3774_p12 = pnand %p3773_p7, %p3767_p8 }
 0x281   : > { %3777 = shalt.err (!%p3774_p12)
}
 0x282   : > { %s3778_s16 = scalar_lea.vmem %s866_s13, 16  ;;  %s3941_s7 = smov [#allocation11]  }
 0x283   : > { %p3779_p11 = scmp.ne.s32.totalorder %s866_s13, %s3778_s16  ;;  %s3783_s19 = sshll.u32 %s3941_s7, 4  ;;  %s3784_s19 = int_to_ptr.vmem [resolvable:$false] %s3783_s19 }
 0x284   : > { %s3785_s11 = scalar_lea.vmem %s3784_s19, 32  ;;  %p3786_p13 = scmp.lt.s32.totalorder %s866_s13, %s3784_s19 }
 0x285   : > { %p3781_p2 = pnand %p3779_p11, %p5069_p3  ;;  %p3787_p6 = scmp.lt.s32.totalorder %s3785_s11, %s3778_s16 }
 0x287   : > { %p3782_p4 = pneg %p3781_p2  ;;  %p3788_p1 = por %p3787_p6, %p3786_p13 }
 0x289   : > { %p3789_p9 = pnand %p3788_p1, %p3782_p4 }
 0x28b   : > { %3792 = shalt.err (!%p3789_p9)
}
 0x28c   : > { %p5074_p10 = scmp.ne.s32.totalorder %s5049_s23, 0  ;;  %s5075_s0 = sld [smem:[#allocation53_spill]] }
 0x28e   : > { %3010 = dma.hbm_to_vmem [thread:$0]  (!%p5074_p10), %s863_s2, 16, %s866_s13, %s4405_s26  }
 0x292   : > { %p5076_p8 = scmp.ne.s32.totalorder %s5075_s0, 0 }
 0x293   : > { %s4668_s15 = sand.u32 (!%p5076_p8), 1, %s3899_s25   ;;  %p5077_p3 = scmp.ne.s32.totalorder (!%p5076_p8), %s5043_s10, 0 }
 0x294   : > { %874 = sbr.rel (%p5076_p8) target bundleno = 3262 (0xcbe), region = 104  ;;  %s4671_s4 = sshll.u32 (!%p5076_p8), %s4668_s15, 4 }
 0x295   : > { %s877_s8 = scalar_lea.sflag (!%p5076_p8), [#allocation4], %s4668_s15  ;;  %s880_s24 = scalar_lea.vmem (!%p5076_p8), [#allocation3], %s4671_s4 }
 0x29b   : > { %3846 = dma.done.wait (%p5077_p3), %s877_s8, 256  }
 0x29c   : > { %3848 = vsyncadd (%p5077_p3), %s877_s8, 4294967040  ;;  %s885_s26 = sand.u32 1, %s4094_s29   ;;  %s889_s17 = scalar_lea.vmem [#allocation6], %s4671_s4 }
 0x29d   : > { %s886_s23 = scalar_lea.sflag [#allocation7], %s885_s26 }
 0x29e   : > { %3850 = dma.done.wait (%p5077_p3), %s886_s23, 512  }
 0x29f   : > { %3852 = vsyncadd (%p5077_p3), %s886_s23, 4294966784  ;;  %s898_s13 = scalar_lea.vmem [#allocation8], %s4671_s4  ;;  %s904_s1 = scalar_lea.sflag [#allocation10], %s885_s26 }
 0x2a0   : > { %s907_s20 = scalar_lea.vmem [#allocation9], %s4671_s4 }
 0x2a1   : > { %3854 = dma.done.wait (%p5077_p3), %s904_s1, 272  }
 0x2a2   : > { %3856 = vsyncadd (%p5077_p3), %s904_s1, 4294967024  ;;  %s915_s28 = scalar_lea.vmem [#allocation11], %s4668_s15  ;;  %p5078_p1 = scmp.eq.s32.totalorder %s4094_s29, 0 }
 0x2a4   : > { %3858 = dma.done.wait (%p5078_p1), [#allocation13], 528   ;;  %p5079_p0 = pmov %p5078_p1 }
 0x2a6   : > { %3860 = vsyncadd (%p5079_p0), [#allocation13], 4294966768  ;;  %p5080_p5 = pmov %p5079_p0 }
 0x2a7   : > { %p5081_p7 = pmov %p5079_p0 }
 0x2a8   : > { %3862 = dma.done.wait (%p5080_p5), [#allocation16], 528  }
 0x2a9   : > { %3864 = vsyncadd (%p5081_p7), [#allocation16], 4294966768  ;;  %p5082_p12 = pmov %p5079_p0 }
 0x2aa   : > { %p5083_p11 = pmov %p5079_p0 }
 0x2ab   : > { %3866 = dma.done.wait (%p5082_p12), [#allocation19], 528  }
 0x2ac   : > { %3868 = vsyncadd (%p5083_p11), [#allocation19], 4294966768  ;;  %p5084_p2 = pmov %p5079_p0 }
 0x2ad   : > { %p5085_p4 = pmov %p5079_p0 }
 0x2ae   : > { %3870 = dma.done.wait (%p5084_p2), [#allocation22], 528  }
 0x2af   : > { %3872 = vsyncadd (%p5085_p4), [#allocation22], 4294966768  ;;  %p5086_p13 = pmov %p5079_p0 }
 0x2b0   : > { %p5087_p6 = pmov %p5079_p0 }
 0x2b1   : > { %3874 = dma.done.wait (%p5086_p13), [#allocation25], 528  }
 0x2b2   : > { %3876 = vsyncadd (%p5087_p6), [#allocation25], 4294966768  ;;  %p5088_p9 = pmov %p5079_p0 }
 0x2b3   : > { %p5089_p10 = pmov %p5079_p0 }
 0x2b4   : > { %3878 = dma.done.wait (%p5088_p9), [#allocation28], 1040  }
 0x2b5   : > { %3880 = vsyncadd (%p5089_p10), [#allocation28], 4294966256  ;;  %p5090_p8 = pmov %p5079_p0 }
 0x2b6   : > { %p5091_p3 = pmov %p5079_p0 }
 0x2b7   : > { %3882 = dma.done.wait (%p5090_p8), [#allocation31], 32  }
 0x2b8   : > { %3884 = vsyncadd (%p5091_p3), [#allocation31], 4294967264  ;;  %p5092_p1 = pmov %p5079_p0 }
 0x2ba   : > { %3886 = dma.done.wait (%p5092_p1), [#allocation34], 32  }
 0x2bb   : > { %3888 = vsyncadd (%p5079_p0), [#allocation34], 4294967264  ;;  %v3942_v0 = vmov 0.0   ;;  %vm3943_vm0 = vmmov 0   ;;  %v3127_v1 = vld [vmem:[#allocation12] sm:$0xff]   ;;  %v3128_v2 = vld [vmem:[#allocation12 + $0x8] sm:$0xff]  }
 0x2bc   : > { %2742 = vmatprep.subr.bf16.mxu1 %v3942_v0  ;;  %2750 = vmatprep.mubr.msk.bf16.mxu1 %vm3943_vm0, %v3942_v0  ;;  %v3129_v3 = vld [vmem:[#allocation12 + $0x10] sm:$0xff]   ;;  %v3130_v10 = vld [vmem:[#allocation12 + $0x18] sm:$0xff]   ;;  %vm1112_vm1 = vcmask 523264   ;;  %v3131_v11 = vld [vmem:[#allocation15] sm:$0xff]   ;;  %vm1339_vm2 = vcmask 130048   ;;  %s3944_s29 = smov 96  }
 0x2bd   : > { %2766 = vmatprep.subr.bf16.mxu0 %v3942_v0  ;;  %2774 = vmatprep.mubr.msk.bf16.mxu0 %vm3943_vm0, %v3942_v0  ;;  %v4733_v4 = vld [vmem:[%s880_s24] sm:$0xff]  ;;  %v4737_v5 = vld [vmem:[%s880_s24 + $0x8] sm:$0xff]  ;;  %s3945_s10 = smov 112   ;;  %s3946_s2 = smov 80   ;;  %vm1588_vm3 = vcmask 261248   ;;  %vm1720_vm4 = vcmask 392448  }
 0x2be   : > { %2743 = vmatpush3.bf16.msra.mxu1 %v3127_v1  ;;  %v1063_v6 = vld [vmem:[%s889_s17] sm:$0xff]  ;;  %v1064_v7 = vld [vmem:[%s889_s17 + $0x8] sm:$0xff]  ;;  %s3947_s30 = smov 16   ;;  %s3948_s27 = smov 32   ;;  %vm1852_vm5 = vcmask 523648  }
 0x2bf   : > { %2744 = vmatprep.subr.bf16.mxu1 %v3942_v0  ;;  %v1070_v8 = vadd.f32 %v1063_v6, %v4733_v4  ;;  %v1071_v9 = vadd.f32 %v1064_v7, %v4737_v5  ;;  %v3132_v13 = vld [vmem:[#allocation15 + $0x8] sm:$0xff]   ;;  %v3133_v14 = vld [vmem:[#allocation15 + $0x10] sm:$0xff]   ;;  %v3134_v21 = vld [vmem:[#allocation15 + $0x18] sm:$0xff]   ;;  %s3949_s21 = smov 48   ;;  %s5093_s18 = sld [smem:[#allocation51_spill]] }
 0x2c0   : > { %v1065_v15 = vld [vmem:[%s898_s13] sm:$0xff]  ;;  %v1066_v16 = vld [vmem:[%s898_s13 + $0x8] sm:$0xff]  ;;  %s5094_s14 = sld [smem:[#allocation55_spill]]  ;;  %s1056_s7 = scalar_lea.vmem [#allocation36], %s4671_s4 }
 0x2c1   : > { %v1073_v12 = vpack.c.bf16 %v1071_v9, %v1070_v8  ;;  %v1067_v17 = vld [vmem:[%s907_s20] sm:$0xff]  ;;  %v1068_v18 = vld [vmem:[%s907_s20 + $0x8] sm:$0xff]  ;;  %v1244_v27 = vpack.c.bf16 %v1066_v16, %v1065_v15  ;;  %s2250_s19 = sshll.u32 %s1056_s7, 4  ;;  %s5095_s8 = sld [smem:[#allocation79_spill]]  ;;  %s4879_s19 = int_to_ptr.vmem [resolvable:$true] %s2250_s19 }
 0x2c2   : > { %2745 = vmatpush3.bf16.msra.mxu1 %v3128_v2  ;;  %v1157_v19 = vadd.f32 %v1067_v17, %v1065_v15  ;;  %v1158_v20 = vadd.f32 %v1068_v18, %v1066_v16  ;;  %v3135_v23 = vld [vmem:[#allocation18] sm:$0xff]   ;;  %v3136_v24 = vld [vmem:[#allocation18 + $0x8] sm:$0xff]   ;;  %v3137_v25 = vld [vmem:[#allocation18 + $0x10] sm:$0xff]   ;;  %s2235_s26 = scalar_lea.sflag [#allocation5], %s4668_s15  ;;  %s3793_s4 = scalar_lea.vmem %s4879_s19, 256 }
 0x2c3   : > { %2746 = vmatprep.subr.bf16.mxu1 %v3942_v0  ;;  %2767 = vmatpush3.bf16.msra.mxu0 %v3135_v23  ;;  %v3138_v26 = vld [vmem:[#allocation18 + $0x18] sm:$0xff]   ;;  %v2642_v47 = vld [vmem:[#allocation20] ss:$0 sm:$0xff]  ;;  %v2648_v1 = vld [vmem:[%s915_s28] ss:$0 sm:$0xff]  ;;  %p3794_p5 = scmp.ne.s32.totalorder %s4879_s19, %s3793_s4  ;;  %s3950_s23 = smov [#allocation36]  }
 0x2c4   : > { %v1160_v22 = vpack.c.bf16 %v1158_v20, %v1157_v19  ;;  %2768 = vmatprep.subr.bf16.mxu0 %v3942_v0  ;;  %v2630_v28 = vld [vmem:[#allocation14] ss:$0 sm:$0xff]  ;;  %v2636_v38 = vld [vmem:[#allocation17] ss:$0 sm:$0xff]  ;;  %s3797_s17 = sshll.u32 %s3950_s23, 4  ;;  %s3798_s17 = int_to_ptr.vmem [resolvable:$false] %s3797_s17 }
 0x2c5   : > { %s2691_s16 = sshll.u32 %s5093_s18, 8  ;;  %s3799_s13 = scalar_lea.vmem %s3798_s17, 512 }
 0x2c6   : > { %2747 = vmatpush3.bf16.msra.mxu1 %v3129_v3  ;;  %p5096_p7 = scmp.ne.s32.totalorder %s5094_s14, 0  ;;  %p3800_p2 = scmp.lt.s32.totalorder %s4879_s19, %s3798_s17 }
 0x2c7   : > { %2748 = vmatprep.subr.bf16.mxu1 %v3942_v0  ;;  %2769 = vmatpush3.bf16.msra.mxu0 %v3136_v24  ;;  %s4877_s24 = scalar_lea.hbm %s5095_s8, %s2691_s16  ;;  %p3801_p4 = scmp.lt.s32.totalorder %s3799_s13, %s3793_s4 }
 0x2c8   : > { %2770 = vmatprep.subr.bf16.mxu0 %v3942_v0  ;;  %p3795_p12 = pnand %p3794_p5, %p5096_p7 }
 0x2c9   : > { %p3802_p13 = por %p3801_p4, %p3800_p2 }
 0x2ca   : > { %2749 = vmatpush3.bf16.msra.mxu1 %v3130_v10  ;;  %p3796_p11 = pneg %p3795_p12 }
 0x2cb   : > { %2754 = vmatprep.subr.bf16.mxu1 %v3942_v0  ;;  %2771 = vmatpush3.bf16.msra.mxu0 %v3137_v25 }
 0x2cc   : > { %2772 = vmatprep.subr.bf16.mxu0 %v3942_v0  ;;  %p3803_p6 = pnand %p3802_p13, %p3796_p11 }
 0x2cd   : > { %2751 = vmatmul.mubr.msk.bf16.vlgmr.msra.gmra.mrb[0].mxu1 %vm1112_vm1, %v1073_v12 }
 0x2ce   : > { %2755 = vmatpush3.bf16.msra.mxu1 %v3131_v11  ;;  %2762 = vmatprep.mubr.msk.bf16.mxu1 %vm3943_vm0, %v3942_v0 }
 0x2cf   : > { %2756 = vmatprep.subr.bf16.mxu1 %v3942_v0  ;;  %2773 = vmatpush3.bf16.msra.mxu0 %v3138_v26 }
 0x2d0   : > { %2790 = vmatprep.subr.bf16.mxu0 %v3942_v0 }
 0x2d2   : > { %2757 = vmatpush3.bf16.msra.mxu1 %v3132_v13  ;;  %2775 = vmatmul.mubr.msk.bf16.vlgmr.msra.gmra.mrb[0].mxu0 %vm1112_vm1, %v1244_v27 }
 0x2d3   : > { %2758 = vmatprep.subr.bf16.mxu1 %v3942_v0  ;;  %2792 = vmatprep.mubr.msk.bf16.mxu0 %vm3943_vm0, %v3942_v0 }
 0x2d6   : > { %2759 = vmatpush3.bf16.msra.mxu1 %v3133_v14 }
 0x2d7   : > { %2760 = vmatprep.subr.bf16.mxu1 %v3942_v0 }
 0x2da   : > { %2761 = vmatpush3.bf16.msra.mxu1 %v3134_v21 }
 0x2db   : > { %2778 = vmatprep.subr.bf16.mxu1 %v3942_v0 }
 0x2dd   : > { %2763 = vmatmul.mubr.msk.bf16.vlgmr.msra.gmra.mrb[4].mxu1 %vm1112_vm1, %v1160_v22 }
 0x2de   : > { %2780 = vmatprep.mubr.msk.bf16.mxu1 %vm3943_vm0, %v3942_v0 }
 0x3a0   : > { %v1150_v29 = vpop.f32.mrb[0].mxu1 }
 0x3a1   : > { %v1151_v30 = vadd.f32 %v2630_v28, %v1150_v29  ;;  %v2752_v31 = vpop.f32.mrb[1].mxu1 }
 0x3a2   : > { %v1153_v32 = vpop.f32.mrb[2].mxu1 }
 0x3a3   : > { %v1328_v33 = vmul.f32 0.25, %v1151_v30  ;;  %v1154_v34 = vadd.f32 %v2630_v28, %v1153_v32  ;;  %v2753_v35 = vpop.f32.mrb[3].mxu1 }
 0x3a5   : > { %v1329_v36 = vmul.f32 0.25, %v1154_v34  ;;  %v1320_v48 = vpop.f32.mrb[0].mxu0 }
 0x3a6   : > { %v1321_v49 = vadd.f32 %v2642_v47, %v1320_v48  ;;  %v2776_v50 = vpop.f32.mrb[1].mxu0 }
 0x3a7   : > { %v1330_v37 = vpack.c.bf16 %v1329_v36, %v1328_v33  ;;  %v1323_v51 = vpop.f32.mrb[2].mxu0 }
 0x3a8   : > { %v1324_v52 = vadd.f32 %v2642_v47, %v1323_v51  ;;  %v2777_v53 = vpop.f32.mrb[3].mxu0 }
 0x3aa   : > { %v4784_v55 = vpack.c.bf16 %v1324_v52, %v1321_v49 }
 0x3b0   : > { %v1236_v39 = vpop.f32.mrb[4].mxu1 }
 0x3b1   : > { %v2764_v40 = vpop.f32.mrb[5].mxu1  ;;  %v1237_v42 = vadd.f32 %v2636_v38, %v1236_v39 }
 0x3b2   : > { %v1239_v41 = vpop.f32.mrb[6].mxu1 }
 0x3b3   : > { %v1240_v43 = vadd.f32 %v2636_v38, %v1239_v41  ;;  %v2765_v44 = vpop.f32.mrb[7].mxu1 }
 0x3b5   : > { %v1331_v45 = vpack.c.bf16 %v1240_v43, %v1237_v42 }
 0x3b7   : > { %1593 = vrot.lane.b32.xlu1 %v1331_v45, %s3944_s29  ;;  %1460 = vrot.lane.b32.xlu0 %v1331_v45, %s3945_s10  ;;  %v1344_v46 = vsel %vm1339_vm2, %v1331_v45, 0 }
 0x3b8   : > { %2779 = vmatpush3.bf16.xpose.msra.mxu1 %v1344_v46 }
 0x3b9   : > { %2784 = vmatprep.subr.bf16.mxu1 %v3942_v0 }
 0x3bb   : > { %1591 = vrot.lane.b32.xlu1 %v1330_v37, %s3944_s29  ;;  %1457 = vrot.lane.b32.xlu0 %v1330_v37, %s3945_s10 }
 0x3bf   : > { %1723 = vrot.lane.b32.xlu1 %v1330_v37, %s3946_s2  ;;  %1725 = vrot.lane.b32.xlu0 %v1331_v45, %s3946_s2 }
 0x3c0   : > { %2781 = vmatmul.mubr.msk.bf16.vlgmr.msra.gmra.mrb[8].mxu1 %vm1339_vm2, %v1330_v37 }
 0x3c1   : > { %2786 = vmatprep.mubr.msk.bf16.mxu1 %vm3943_vm0, %v3942_v0  ;;  %2785 = vmatpush3.bf16.msra.mxu1 %v4784_v55 }
 0x3c2   : > { %2796 = vmatprep.subr.bf16.mxu1 %v3942_v0 }
 0x429   : > { %v1461_v54 = vpop.permute.xlu0 %1460  ;;  %v1594_v57 = vpop.permute.xlu1 %1593 }
 0x42a   : > { %v1466_v56 = vsel %vm1339_vm2, %v1461_v54, 0  ;;  %v1599_v59 = vsel %vm1339_vm2, %v1594_v57, 0 }
 0x42b   : > { %2791 = vmatpush3.bf16.xpose.msra.mxu0 %v1466_v56 }
 0x42c   : > { %2802 = vmatprep.subr.bf16.mxu0 %v3942_v0 }
 0x42d   : > { %v1458_v58 = vpop.permute.xlu0 %1457  ;;  %v1592_v61 = vpop.permute.xlu1 %1591 }
 0x431   : > { %v1726_v60 = vpop.permute.xlu0 %1725  ;;  %v1724_v63 = vpop.permute.xlu1 %1723 }
 0x432   : > { %2793 = vmatmul.mubr.msk.bf16.vlgmr.msra.gmra.mrb[4].mxu0 %vm1339_vm2, %v1458_v58  ;;  %v1731_v62 = vsel %vm1339_vm2, %v1726_v60, 0 }
 0x433   : > { %2803 = vmatpush3.bf16.xpose.msra.mxu0 %v1599_v59  ;;  %2804 = vmatprep.mubr.msk.bf16.mxu0 %vm3943_vm0, %v3942_v0 }
 0x434   : > { %2814 = vmatprep.subr.bf16.mxu0 %v3942_v0 }
 0x43a   : > { %2805 = vmatmul.mubr.msk.bf16.vlgmr.msra.gmra.mrb[8].mxu0 %vm1339_vm2, %v1592_v61 }
 0x43b   : > { %2815 = vmatpush3.bf16.xpose.msra.mxu0 %v1731_v62  ;;  %2816 = vmatprep.mubr.msk.bf16.mxu0 %vm3943_vm0, %v3942_v0 }
 0x43c   : > { %2826 = vmatprep.subr.bf16.mxu0 %v3942_v0 }
 0x442   : > { %2817 = vmatmul.mubr.msk.bf16.vlgmr.msra.gmra.mrb[12].mxu0 %vm1339_vm2, %v1724_v63 }
 0x443   : > { %2834 = vmatprep.mubr.msk.bf16.mxu0 %vm3943_vm0, %v3942_v0 }
 0x493   : > { %v1380_v2 = vpop.f32.mrb[8].mxu1 }
 0x494   : > { %v1381_v3 = vadd.f32 %v2648_v1, %v1380_v2  ;;  %v2782_v6 = vpop.f32.mrb[9].mxu1 }
 0x495   : > { %v1383_v7 = vpop.f32.mrb[10].mxu1 }
 0x496   : > { %v1384_v8 = vadd.f32 %v2648_v1, %v1383_v7  ;;  %v2783_v9 = vpop.f32.mrb[11].mxu1  ;;  %v1387_v10 = vsel %vm1339_vm2, %v1381_v3, -inf }
 0x497   : > { %1388 = vmax.xlane.f32.xlu0 %v1387_v10 }
 0x498   : > { %v1390_v11 = vsel %vm1339_vm2, %v1384_v8, -inf }
 0x499   : > { %1391 = vmax.xlane.f32.xlu1 %v1390_v11 }
 0x505   : > { %v1502_v12 = vpop.f32.mrb[4].mxu0 }
 0x506   : > { %v1503_v13 = vadd.f32 %v2648_v1, %v1502_v12  ;;  %v2794_v14 = vpop.f32.mrb[5].mxu0 }
 0x507   : > { %v1505_v15 = vpop.f32.mrb[6].mxu0 }
 0x508   : > { %v1506_v16 = vadd.f32 %v2648_v1, %v1505_v15  ;;  %v2795_v17 = vpop.f32.mrb[7].mxu0  ;;  %v1509_v18 = vsel %vm1339_vm2, %v1503_v13, -inf }
 0x509   : > { %1510 = vmax.xlane.f32.xlu0 %v1509_v18 }
 0x50a   : > { %v1512_v19 = vsel %vm1339_vm2, %v1506_v16, -inf }
 0x50d   : > { %v1635_v20 = vpop.f32.mrb[8].mxu0  ;;  %1513 = vmax.xlane.f32.xlu0 %v1512_v19 }
 0x50e   : > { %v1636_v21 = vadd.f32 %v2648_v1, %v1635_v20  ;;  %v2806_v22 = vpop.f32.mrb[9].mxu0 }
 0x50f   : > { %v1638_v23 = vpop.f32.mrb[10].mxu0 }
 0x510   : > { %v1639_v24 = vadd.f32 %v2648_v1, %v1638_v23  ;;  %v2807_v25 = vpop.f32.mrb[11].mxu0  ;;  %v1642_v26 = vsel %vm1339_vm2, %v1636_v21, -inf }
 0x511   : > { %1643 = vmax.xlane.f32.xlu1 %v1642_v26 }
 0x512   : > { %v1645_v27 = vsel %vm1339_vm2, %v1639_v24, -inf }
 0x513   : > { %1646 = vmax.xlane.f32.xlu0 %v1645_v27 }
 0x515   : > { %v1767_v28 = vpop.f32.mrb[12].mxu0 }
 0x516   : > { %v1768_v29 = vadd.f32 %v2648_v1, %v1767_v28  ;;  %v2818_v30 = vpop.f32.mrb[13].mxu0 }
 0x517   : > { %v1770_v31 = vpop.f32.mrb[14].mxu0 }
 0x518   : > { %v1771_v32 = vadd.f32 %v2648_v1, %v1770_v31  ;;  %v2819_v33 = vpop.f32.mrb[15].mxu0  ;;  %v1774_v34 = vsel %vm1339_vm2, %v1768_v29, -inf }
 0x519   : > { %1775 = vmax.xlane.f32.xlu1 %v1774_v34 }
 0x51a   : > { %v1777_v35 = vsel %vm1339_vm2, %v1771_v32, -inf }
 0x51b   : > { %1778 = vmax.xlane.f32.xlu0 %v1777_v35 }
 0x524   : > { %v1389_v36 = vpop.xlane.xlu0 %1388 }
 0x525   : > { %v1393_v37 = vsub.f32 %v1381_v3, %v1389_v36 }
 0x526   : > { %v1392_v38 = vpop.xlane.xlu1 %1391 }
 0x527   : > { %v1395_v39 = vmul.f32 1.442695, %v1393_v37  ;;  %v1394_v40 = vsub.f32 %v1384_v8, %v1392_v38 }
 0x529   : > { %3155 = vpow2.f32 %v1395_v39  ;;  %v1397_v41 = vmul.f32 1.442695, %v1394_v40 }
 0x52b   : > { %3157 = vpow2.f32 %v1397_v41 }
 0x533   : > { %v3156_v42 = vpop.eup %3155 }
 0x534   : > { %v1399_v43 = vsel %vm1339_vm2, %v3156_v42, 0.0 }
 0x535   : > { %v3158_v44 = vpop.eup %3157  ;;  %1400 = vadd.xlane.f32.xlu1 %v1399_v43 }
 0x536   : > { %v1402_v45 = vsel %vm1339_vm2, %v3158_v44, 0.0 }
 0x537   : > { %1403 = vadd.xlane.f32.xlu0 %v1402_v45 }
 0x546   : > { %1533 = vrot.lane.b32.xlu1 %v4784_v55, %s3945_s10 }
 0x596   : > { %v1511_v46 = vpop.xlane.xlu0 %1510 }
 0x597   : > { %v1515_v47 = vsub.f32 %v1503_v13, %v1511_v46 }
 0x599   : > { %v1517_v48 = vmul.f32 1.442695, %v1515_v47 }
 0x59a   : > { %v1514_v49 = vpop.xlane.xlu0 %1513 }
 0x59b   : > { %3159 = vpow2.f32 %v1517_v48  ;;  %v1516_v50 = vsub.f32 %v1506_v16, %v1514_v49 }
 0x59d   : > { %v1519_v51 = vmul.f32 1.442695, %v1516_v50  ;;  %v3139_v50 = vld [vmem:[#allocation21] sm:$0xff]  }
 0x59e   : > { %v1644_v52 = vpop.xlane.xlu1 %1643  ;;  %2827 = vmatpush3.bf16.msra.mxu0 %v3139_v50  ;;  %v2663_v50 = vld [vmem:[#allocation30] ss:$0 sm:$0xff] }
 0x59f   : > { %3161 = vpow2.f32 %v1519_v51  ;;  %v1648_v53 = vsub.f32 %v1636_v21, %v1644_v52  ;;  %2828 = vmatprep.subr.bf16.mxu0 %v3942_v0 }
 0x5a0   : > { %v1647_v54 = vpop.xlane.xlu0 %1646 }
 0x5a1   : > { %v1650_v56 = vmul.f32 1.442695, %v1648_v53  ;;  %v1649_v57 = vsub.f32 %v1639_v24, %v1647_v54 }
 0x5a3   : > { %3163 = vpow2.f32 %v1650_v56  ;;  %v1652_v58 = vmul.f32 1.442695, %v1649_v57  ;;  %v3140_v56 = vld [vmem:[#allocation21 + $0x8] sm:$0xff]   ;;  %v3141_v57 = vld [vmem:[#allocation21 + $0x10] sm:$0xff]  }
 0x5a4   : > { %2829 = vmatpush3.bf16.msra.mxu0 %v3140_v56  ;;  %v2664_v56 = vld [vmem:[#allocation32] ss:$0 sm:$0xff] }
 0x5a5   : > { %v3160_v59 = vpop.eup %3159  ;;  %3165 = vpow2.f32 %v1652_v58  ;;  %2830 = vmatprep.subr.bf16.mxu0 %v3942_v0 }
 0x5a6   : > { %v1776_v60 = vpop.xlane.xlu1 %1775  ;;  %v1521_v61 = vsel %vm1339_vm2, %v3160_v59, 0.0 }
 0x5a7   : > { %v1780_v62 = vsub.f32 %v1768_v29, %v1776_v60  ;;  %1522 = vadd.xlane.f32.xlu1 %v1521_v61  ;;  %v3142_v61 = vld [vmem:[#allocation21 + $0x18] sm:$0xff]  }
 0x5a8   : > { %v1779_v63 = vpop.xlane.xlu0 %1778  ;;  %2831 = vmatpush3.bf16.msra.mxu0 %v3141_v57 }
 0x5a9   : > { %v3162_v1 = vpop.eup %3161  ;;  %v1782_v2 = vmul.f32 1.442695, %v1780_v62  ;;  %v1781_v3 = vsub.f32 %v1771_v32, %v1779_v63  ;;  %2832 = vmatprep.subr.bf16.mxu0 %v3942_v0 }
 0x5aa   : > { %v1524_v6 = vsel %vm1339_vm2, %v3162_v1, 0.0 }
 0x5ab   : > { %3167 = vpow2.f32 %v1782_v2  ;;  %v1784_v7 = vmul.f32 1.442695, %v1781_v3  ;;  %1525 = vadd.xlane.f32.xlu0 %v1524_v6 }
 0x5ac   : > { %2833 = vmatpush3.bf16.msra.mxu0 %v3142_v61  ;;  %v3153_v61 = vld [vmem:[#allocation27 + $0x30] sm:$0xff]  }
 0x5ad   : > { %v3164_v8 = vpop.eup %3163  ;;  %3169 = vpow2.f32 %v1784_v7  ;;  %2850 = vmatprep.subr.bf16.mxu0 %v3942_v0 }
 0x5ae   : > { %v1654_v9 = vsel %vm1339_vm2, %v3164_v8, 0.0 }
 0x5af   : > { %v3166_v10 = vpop.eup %3165  ;;  %1655 = vadd.xlane.f32.xlu1 %v1654_v9 }
 0x5b0   : > { %v1657_v11 = vsel %vm1339_vm2, %v3166_v10, 0.0 }
 0x5b1   : > { %1658 = vadd.xlane.f32.xlu0 %v1657_v11 }
 0x5b5   : > { %v3168_v12 = vpop.eup %3167 }
 0x5b6   : > { %v1786_v13 = vsel %vm1339_vm2, %v3168_v12, 0.0 }
 0x5b7   : > { %v3170_v14 = vpop.eup %3169  ;;  %1787 = vadd.xlane.f32.xlu1 %v1786_v13 }
 0x5b8   : > { %v1789_v15 = vsel %vm1339_vm2, %v3170_v14, 0.0 }
 0x5b9   : > { %1790 = vadd.xlane.f32.xlu0 %v1789_v15  ;;  %v2657_v15 = vld [vmem:[#allocation23] ss:$0 sm:$0xff] }
 0x5c2   : > { %v1401_v16 = vpop.xlane.xlu1 %1400 }
 0x5c3   : > { %3171 = vrcp.f32 %v1401_v16 }
 0x5c4   : > { %v1404_v17 = vpop.xlane.xlu0 %1403 }
 0x5c5   : > { %3173 = vrcp.f32 %v1404_v17 }
 0x5c6   : > { %v1534_v23 = vpop.permute.xlu1 %1533 }
 0x5c8   : > { %1797 = vrot.lane.b32.xlu1 %v4784_v55, %s3946_s2 }
 0x5cd   : > { %v3172_v18 = vpop.eup %3171 }
 0x5ce   : > { %v1407_v20 = vmul.f32 %v3172_v18, %v3156_v42 }
 0x5cf   : > { %v3174_v19 = vpop.eup %3173  ;;  %1665 = vrot.lane.b32.xlu0 %v4784_v55, %s3944_s29 }
 0x5d0   : > { %v1408_v21 = vmul.f32 %v3174_v19, %v3158_v44 }
 0x5d2   : > { %v1409_v22 = vpack.c.bf16 %v1408_v21, %v1407_v20 }
 0x5d4   : > { %2787 = vmatmul.mubr.msk.bf16.vlgmr.msra.gmra.mrb[12].mxu1 %vm1339_vm2, %v1409_v22 }
 0x5d5   : > { %2797 = vmatpush3.bf16.msra.mxu1 %v1534_v23  ;;  %2798 = vmatprep.mubr.msk.bf16.mxu1 %vm3943_vm0, %v3942_v0 }
 0x5d6   : > { %2808 = vmatprep.subr.bf16.mxu1 %v3942_v0 }
 0x634   : > { %v1523_v24 = vpop.xlane.xlu1 %1522 }
 0x635   : > { %3175 = vrcp.f32 %v1523_v24 }
 0x638   : > { %v1526_v25 = vpop.xlane.xlu0 %1525 }
 0x639   : > { %3177 = vrcp.f32 %v1526_v25 }
 0x63c   : > { %v1656_v26 = vpop.xlane.xlu1 %1655 }
 0x63d   : > { %3179 = vrcp.f32 %v1656_v26 }
 0x63e   : > { %v1659_v27 = vpop.xlane.xlu0 %1658 }
 0x63f   : > { %3181 = vrcp.f32 %v1659_v27  ;;  %v3176_v55 = vpop.eup %3175 }
 0x640   : > { %v1529_v29 = vmul.f32 %v3176_v55, %v3160_v59 }
 0x643   : > { %v3178_v28 = vpop.eup %3177 }
 0x644   : > { %v1530_v30 = vmul.f32 %v3178_v28, %v3162_v1  ;;  %v1788_v31 = vpop.xlane.xlu1 %1787 }
 0x645   : > { %3183 = vrcp.f32 %v1788_v31 }
 0x646   : > { %v1791_v32 = vpop.xlane.xlu0 %1790  ;;  %v1531_v33 = vpack.c.bf16 %v1530_v30, %v1529_v29 }
 0x647   : > { %3185 = vrcp.f32 %v1791_v32  ;;  %v3180_v34 = vpop.eup %3179 }
 0x648   : > { %2799 = vmatmul.mubr.msk.bf16.vlgmr.msra.gmra.mrb[16].mxu1 %vm1339_vm2, %v1531_v33  ;;  %v1662_v38 = vmul.f32 %v3180_v34, %v3164_v8  ;;  %v1798_v41 = vpop.permute.xlu1 %1797  ;;  %v3143_v34 = vld [vmem:[#allocation24] sm:$0xff]  }
 0x649   : > { %v3182_v35 = vpop.eup %3181  ;;  %2810 = vmatprep.mubr.msk.bf16.mxu1 %vm3943_vm0, %v3942_v0 }
 0x64a   : > { %v1663_v36 = vmul.f32 %v3182_v35, %v3166_v10  ;;  %v1666_v37 = vpop.permute.xlu0 %1665  ;;  %v3145_v35 = vld [vmem:[#allocation24 + $0x10] sm:$0xff]  }
 0x64b   : > { %2809 = vmatpush3.bf16.msra.mxu1 %v1666_v37  ;;  %v3147_v37 = vld [vmem:[#allocation27] sm:$0xff]  }
 0x64c   : > { %2820 = vmatprep.subr.bf16.mxu1 %v3942_v0  ;;  %v1664_v39 = vpack.c.bf16 %v1663_v36, %v1662_v38  ;;  %v3146_v36 = vld [vmem:[#allocation24 + $0x18] sm:$0xff]   ;;  %v3148_v38 = vld [vmem:[#allocation27 + $0x8] sm:$0xff]  }
 0x64f   : > { %v3184_v40 = vpop.eup %3183 }
 0x650   : > { %2811 = vmatmul.mubr.msk.bf16.vlgmr.msra.gmra.mrb[20].mxu1 %vm1339_vm2, %v1664_v39  ;;  %v1794_v44 = vmul.f32 %v3184_v40, %v3168_v12  ;;  %v3149_v39 = vld [vmem:[#allocation27 + $0x10] sm:$0xff]   ;;  %v3150_v40 = vld [vmem:[#allocation27 + $0x18] sm:$0xff]  }
 0x651   : > { %v3186_v42 = vpop.eup %3185  ;;  %2821 = vmatpush3.bf16.msra.mxu1 %v1798_v41  ;;  %2822 = vmatprep.mubr.msk.bf16.mxu1 %vm3943_vm0, %v3942_v0  ;;  %v3151_v41 = vld [vmem:[#allocation27 + $0x20] sm:$0xff]  }
 0x652   : > { %v1795_v43 = vmul.f32 %v3186_v42, %v3170_v14  ;;  %2838 = vmatprep.subr.bf16.mxu1 %v3942_v0  ;;  %v3152_v42 = vld [vmem:[#allocation27 + $0x28] sm:$0xff]  }
 0x654   : > { %v1796_v45 = vpack.c.bf16 %v1795_v43, %v1794_v44 }
 0x658   : > { %2823 = vmatmul.mubr.msk.bf16.vlgmr.msra.gmra.mrb[24].mxu1 %vm1339_vm2, %v1796_v45 }
 0x659   : > { %2846 = vmatprep.mubr.msk.bf16.mxu1 %vm3943_vm0, %v3942_v0  ;;  %2839 = vmatpush3.bf16.msra.mxu1 %v3143_v34 }
 0x65a   : > { %2840 = vmatprep.subr.bf16.mxu1 %v3942_v0 }
 0x6a7   : > { %v1447_v46 = vpop.f32.mrb[12].mxu1 }
 0x6a8   : > { %1454 = vst.msk [vmem:[#allocation2] sm:$0xff] %vm1339_vm2, %v1447_v46  ;;  %v2788_v47 = vpop.f32.mrb[13].mxu1 }
 0x6a9   : > { %v1450_v48 = vpop.f32.mrb[14].mxu1 }
 0x6aa   : > { %1455 = vst.msk [vmem:[#allocation2 + $0x8] sm:$0xff] %vm1339_vm2, %v1450_v48  ;;  %v2789_v49 = vpop.f32.mrb[15].mxu1 }
 0x71b   : > { %v1573_v51 = vpop.f32.mrb[16].mxu1 }
 0x71c   : > { %1582 = vrot.lane.b32.xlu1 %v1573_v51, %s3947_s30  ;;  %v2800_v52 = vpop.f32.mrb[17].mxu1 }
 0x71d   : > { %v1576_v53 = vpop.f32.mrb[18].mxu1 }
 0x71e   : > { %1584 = vrot.lane.b32.xlu0 %v1576_v53, %s3947_s30  ;;  %v2801_v54 = vpop.f32.mrb[19].mxu1 }
 0x723   : > { %v1705_v58 = vpop.f32.mrb[20].mxu1 }
 0x724   : > { %1714 = vrot.lane.b32.xlu1 %v1705_v58, %s3948_s27  ;;  %v2812_v59 = vpop.f32.mrb[21].mxu1 }
 0x725   : > { %v1708_v60 = vpop.f32.mrb[22].mxu1 }
 0x726   : > { %1716 = vrot.lane.b32.xlu0 %v1708_v60, %s3948_s27  ;;  %v2813_v62 = vpop.f32.mrb[23].mxu1 }
 0x727   : > { %v3154_v62 = vld [vmem:[#allocation27 + $0x38] sm:$0xff]  }
 0x72b   : > { %v1837_v63 = vpop.f32.mrb[24].mxu1 }
 0x72c   : > { %1846 = vrot.lane.b32.xlu1 %v1837_v63, %s3949_s21  ;;  %v2824_v1 = vpop.f32.mrb[25].mxu1  ;;  %v2665_v63 = vld [vmem:[#allocation26] ss:$0 sm:$0xff] }
 0x72d   : > { %v1840_v2 = vpop.f32.mrb[26].mxu1 }
 0x72e   : > { %1848 = vrot.lane.b32.xlu0 %v1840_v2, %s3949_s21  ;;  %v2825_v3 = vpop.f32.mrb[27].mxu1 }
 0x78e   : > { %v1583_v6 = vpop.permute.xlu1 %1582 }
 0x78f   : > { %1589 = vst.msk [vmem:[#allocation2] sm:$0xff] %vm1588_vm3, %v1583_v6 }
 0x790   : > { %v1585_v7 = vpop.permute.xlu0 %1584 }
 0x791   : > { %1590 = vst.msk [vmem:[#allocation2 + $0x8] sm:$0xff] %vm1588_vm3, %v1585_v7 }
 0x796   : > { %v1715_v8 = vpop.permute.xlu1 %1714 }
 0x797   : > { %1721 = vst.msk [vmem:[#allocation2] sm:$0xff] %vm1720_vm4, %v1715_v8 }
 0x798   : > { %v1717_v9 = vpop.permute.xlu0 %1716 }
 0x799   : > { %1722 = vst.msk [vmem:[#allocation2 + $0x8] sm:$0xff] %vm1720_vm4, %v1717_v9 }
 0x79e   : > { %v1847_v10 = vpop.permute.xlu1 %1846 }
 0x79f   : > { %1853 = vst.msk [vmem:[#allocation2] sm:$0xff] %vm1852_vm5, %v1847_v10 }
 0x7a0   : > { %v1849_v11 = vpop.permute.xlu0 %1848 }
 0x7a1   : > { %1854 = vst.msk [vmem:[#allocation2 + $0x8] sm:$0xff] %vm1852_vm5, %v1849_v11 }
 0x7a6   : > { %v1855_v12 = vld [vmem:[#allocation2] sm:$0xff] }
 0x7a8   : > { %v1856_v13 = vld [vmem:[#allocation2 + $0x8] sm:$0xff] }
 0x7a9   : > { %v1857_v14 = vpack.c.bf16 %v1856_v13, %v1855_v12  ;;  %v2671_v12 = vld [vmem:[#allocation29] ss:$0 sm:$0xff] }
 0x7ab   : > { %2835 = vmatmul.mubr.msk.bf16.vlgmr.msra.gmra.mrb[16].mxu0 %vm1112_vm1, %v1857_v14 }
 0x7ac   : > { %2866 = vmatprep.mubr.msk.bf16.mxu0 %vm3943_vm0, %v3942_v0  ;;  %2851 = vmatpush3.bf16.msra.mxu0 %v3147_v37 }
 0x7ad   : > { %2852 = vmatprep.subr.bf16.mxu0 %v3942_v0 }
 0x7b0   : > { %2853 = vmatpush3.bf16.msra.mxu0 %v3148_v38 }
 0x7b1   : > { %2854 = vmatprep.subr.bf16.mxu0 %v3942_v0 }
 0x7b4   : > { %2855 = vmatpush3.bf16.msra.mxu0 %v3149_v39  ;;  %v2681_v39 = vld [vmem:[#allocation35] ss:$0 sm:$0xff] }
 0x7b5   : > { %2856 = vmatprep.subr.bf16.mxu0 %v3942_v0 }
 0x7b8   : > { %2857 = vmatpush3.bf16.msra.mxu0 %v3150_v40 }
 0x7b9   : > { %2858 = vmatprep.subr.bf16.mxu0 %v3942_v0 }
 0x7bc   : > { %2859 = vmatpush3.bf16.msra.mxu0 %v3151_v41 }
 0x7bd   : > { %2860 = vmatprep.subr.bf16.mxu0 %v3942_v0 }
 0x7c0   : > { %2861 = vmatpush3.bf16.msra.mxu0 %v3152_v42 }
 0x7c1   : > { %2862 = vmatprep.subr.bf16.mxu0 %v3942_v0 }
 0x7c4   : > { %2863 = vmatpush3.bf16.msra.mxu0 %v3153_v61 }
 0x7c5   : > { %2864 = vmatprep.subr.bf16.mxu0 %v3942_v0 }
 0x7c8   : > { %2865 = vmatpush3.bf16.msra.mxu0 %v3154_v62 }
 0x87e   : > { %v1933_v16 = vpop.f32.mrb[16].mxu0 }
 0x87f   : > { %v1934_v17 = vadd.f32 %v2657_v15, %v1933_v16  ;;  %v2836_v18 = vpop.f32.mrb[17].mxu0 }
 0x880   : > { %v1936_v19 = vpop.f32.mrb[18].mxu0 }
 0x881   : > { %v1937_v20 = vadd.f32 %v2657_v15, %v1936_v19  ;;  %v2837_v21 = vpop.f32.mrb[19].mxu0  ;;  %v1940_v22 = vadd.f32 %v1934_v17, %v4733_v4 }
 0x883   : > { %v1944_v23 = vsel %vm1112_vm1, %v1940_v22, 0.0  ;;  %v1941_v24 = vadd.f32 %v1937_v20, %v4737_v5  ;;  %v3144_v5 = vld [vmem:[#allocation24 + $0x8] sm:$0xff]  }
 0x884   : > { %1945 = vadd.xlane.f32.xlu1 %v1944_v23  ;;  %2841 = vmatpush3.bf16.msra.mxu1 %v3144_v5 }
 0x885   : > { %v1947_v25 = vsel %vm1112_vm1, %v1941_v24, 0.0  ;;  %2842 = vmatprep.subr.bf16.mxu1 %v3942_v0 }
 0x886   : > { %1948 = vadd.xlane.f32.xlu0 %v1947_v25 }
 0x888   : > { %2843 = vmatpush3.bf16.msra.mxu1 %v3145_v35 }
 0x889   : > { %2844 = vmatprep.subr.bf16.mxu1 %v3942_v0 }
 0x88c   : > { %2845 = vmatpush3.bf16.msra.mxu1 %v3146_v36  ;;  %v2680_v36 = vld [vmem:[#allocation33] ss:$0 sm:$0xff] }
 0x911   : > { %v1946_v26 = vpop.xlane.xlu1 %1945 }
 0x912   : > { %v1951_v27 = vmul.f32 0.015625, %v1946_v26 }
 0x913   : > { %v1949_v55 = vpop.xlane.xlu0 %1948 }
 0x914   : > { %v1953_v28 = vsub.f32 %v1940_v22, %v1951_v27  ;;  %v1952_v29 = vmul.f32 0.015625, %v1949_v55 }
 0x916   : > { %v1954_v30 = vsub.f32 %v1941_v24, %v1952_v29  ;;  %v1955_v31 = vmul.f32 %v1953_v28, %v1953_v28 }
 0x918   : > { %v1957_v32 = vsel %vm1112_vm1, %v1955_v31, 0.0  ;;  %v1956_v33 = vmul.f32 %v1954_v30, %v1954_v30 }
 0x919   : > { %1958 = vadd.xlane.f32.xlu0 %v1957_v32 }
 0x91a   : > { %v1960_v4 = vsel %vm1112_vm1, %v1956_v33, 0.0 }
 0x91b   : > { %1961 = vadd.xlane.f32.xlu1 %v1960_v4 }
 0x9a6   : > { %v1959_v43 = vpop.xlane.xlu0 %1958 }
 0x9a7   : > { %v1963_v44 = vmul.f32 0.015625, %v1959_v43 }
 0x9a8   : > { %v1962_v45 = vpop.xlane.xlu1 %1961 }
 0x9a9   : > { %v1965_v46 = vadd.f32 1e-05, %v1963_v44  ;;  %v1964_v47 = vmul.f32 0.015625, %v1962_v45 }
 0x9ab   : > { %3187 = vrsqrt.f32 %v1965_v46  ;;  %v1966_v48 = vadd.f32 1e-05, %v1964_v47 }
 0x9ad   : > { %3189 = vrsqrt.f32 %v1966_v48 }
 0x9b5   : > { %v3188_v49 = vpop.eup %3187 }
 0x9b6   : > { %v1969_v51 = vmul.f32 %v3188_v49, %v1953_v28 }
 0x9b7   : > { %v3190_v52 = vpop.eup %3189 }
 0x9b8   : > { %v1977_v53 = vmul.f32 %v2663_v50, %v1969_v51  ;;  %v1970_v54 = vmul.f32 %v3190_v52, %v1954_v30 }
 0x9ba   : > { %v1978_v57 = vmul.f32 %v2663_v50, %v1970_v54  ;;  %v1985_v58 = vadd.f32 %v2664_v56, %v1977_v53 }
 0x9bc   : > { %v1986_v59 = vadd.f32 %v2664_v56, %v1978_v57 }
 0x9be   : > { %v1988_v60 = vpack.c.bf16 %v1986_v59, %v1985_v58 }
 0x9c0   : > { %2847 = vmatmul.mubr.msk.bf16.vlgmr.msra.gmra.mrb[28].mxu1 %vm1112_vm1, %v1988_v60 }
 0xa93   : > { %v2064_v1 = vpop.f32.mrb[28].mxu1 }
 0xa94   : > { %v2065_v2 = vadd.f32 %v2665_v63, %v2064_v1  ;;  %v2848_v3 = vpop.f32.mrb[29].mxu1 }
 0xa95   : > { %v2067_v6 = vpop.f32.mrb[30].mxu1 }
 0xa96   : > { %v2068_v7 = vadd.f32 %v2665_v63, %v2067_v6  ;;  %v2849_v8 = vpop.f32.mrb[31].mxu1  ;;  %v2071_v9 = vmax.f32 %v2065_v2, 0.0 }
 0xa98   : > { %v2072_v10 = vmax.f32 %v2068_v7, 0.0 }
 0xa9a   : > { %v2074_v11 = vpack.c.bf16 %v2072_v10, %v2071_v9 }
 0xa9c   : > { %2867 = vmatmul.mubr.bf16.vlgmr.msra.gmra.mrb[20].mxu0 %v2074_v11 }
 0xb6f   : > { %v2179_v13 = vpop.f32.mrb[20].mxu0 }
 0xb70   : > { %v2180_v14 = vadd.f32 %v2671_v12, %v2179_v13  ;;  %v2868_v15 = vpop.f32.mrb[21].mxu0 }
 0xb71   : > { %v2182_v16 = vpop.f32.mrb[22].mxu0 }
 0xb72   : > { %v2183_v17 = vadd.f32 %v2671_v12, %v2182_v16  ;;  %v2869_v0 = vpop.f32.mrb[23].mxu0  ;;  %v2186_v18 = vadd.f32 %v2180_v14, %v1985_v58 }
 0xb74   : > { %v2190_v19 = vsel %vm1112_vm1, %v2186_v18, 0.0  ;;  %v2187_v20 = vadd.f32 %v2183_v17, %v1986_v59 }
 0xb75   : > { %2191 = vadd.xlane.f32.xlu0 %v2190_v19 }
 0xb76   : > { %v2193_v21 = vsel %vm1112_vm1, %v2187_v20, 0.0 }
 0xb77   : > { %2194 = vadd.xlane.f32.xlu1 %v2193_v21 }
 0xc02   : > { %v2192_v22 = vpop.xlane.xlu0 %2191 }
 0xc03   : > { %v2196_v23 = vmul.f32 0.015625, %v2192_v22 }
 0xc04   : > { %v2195_v24 = vpop.xlane.xlu1 %2194 }
 0xc05   : > { %v2198_v25 = vsub.f32 %v2186_v18, %v2196_v23  ;;  %v2197_v26 = vmul.f32 0.015625, %v2195_v24 }
 0xc07   : > { %v2199_v27 = vsub.f32 %v2187_v20, %v2197_v26  ;;  %v2200_v55 = vmul.f32 %v2198_v25, %v2198_v25 }
 0xc09   : > { %v2202_v28 = vsel %vm1112_vm1, %v2200_v55, 0.0  ;;  %v2201_v29 = vmul.f32 %v2199_v27, %v2199_v27 }
 0xc0a   : > { %2203 = vadd.xlane.f32.xlu0 %v2202_v28 }
 0xc0b   : > { %v2205_v30 = vsel %vm1112_vm1, %v2201_v29, 0.0 }
 0xc0c   : > { %2206 = vadd.xlane.f32.xlu1 %v2205_v30 }
 0xc97   : > { %v2204_v31 = vpop.xlane.xlu0 %2203 }
 0xc98   : > { %v2208_v32 = vmul.f32 0.015625, %v2204_v31 }
 0xc99   : > { %v2207_v33 = vpop.xlane.xlu1 %2206 }
 0xc9a   : > { %v2210_v4 = vadd.f32 1e-05, %v2208_v32  ;;  %v2209_v34 = vmul.f32 0.015625, %v2207_v33 }
 0xc9c   : > { %3191 = vrsqrt.f32 %v2210_v4  ;;  %v2211_v5 = vadd.f32 1e-05, %v2209_v34 }
 0xc9e   : > { %3193 = vrsqrt.f32 %v2211_v5 }
 0xca6   : > { %v3192_v35 = vpop.eup %3191 }
 0xca7   : > { %v2214_v37 = vmul.f32 %v3192_v35, %v2198_v25 }
 0xca8   : > { %v3194_v38 = vpop.eup %3193 }
 0xca9   : > { %v2222_v40 = vmul.f32 %v2680_v36, %v2214_v37  ;;  %v2215_v41 = vmul.f32 %v3194_v38, %v2199_v27 }
 0xcab   : > { %v2230_v42 = vadd.f32 %v2681_v39, %v2222_v40  ;;  %v2223_v43 = vmul.f32 %v2680_v36, %v2215_v41 }
 0xcad   : > { %v2231_v44 = vadd.f32 %v2681_v39, %v2223_v43  ;;  %2232 = vst.msk [vmem:[%s1056_s7] sm:$0xff] %vm1112_vm1, %v2230_v42 }
 0xcaf   : > { %2233 = vst.msk [vmem:[%s1056_s7 + $0x8] sm:$0xff] %vm1112_vm1, %v2231_v44 }
 0xcb0   : > { %3806 = shalt.err (!%p3803_p6)
}
 0xcb1   : > { %s3807_s1 = scalar_lea.hbm %s4877_s24, 256  ;;  %s3811_s29 = scalar_lea.hbm %s5095_s8, 512 }
 0xcb2   : > { %p3808_p9 = scmp.ne.s32.totalorder %s4877_s24, %s3807_s1  ;;  %p3812_p3 = scmp.lt.u32.totalorder %s4877_s24, %s5095_s8 }
 0xcb3   : > { %p3813_p1 = scmp.lt.u32.totalorder %s3811_s29, %s3807_s1  ;;  %p3815_p5 = scmp.lt.u32.totalorder %s3807_s1, %s4877_s24 }
 0xcb4   : > { %p3809_p10 = pnand %p3808_p9, %p5096_p7 }
 0xcb5   : > { %p3814_p0 = por %p3813_p1, %p3812_p3 }
 0xcb6   : > { %p3810_p8 = pneg %p3809_p10 }
 0xcb7   : > { %p3816_p12 = por %p3815_p5, %p3814_p0 }
 0xcb9   : > { %p3817_p11 = pnand %p3816_p12, %p3810_p8 }
 0xcbb   : > { %3820 = shalt.err (!%p3817_p11)
}
 0xcbc   : > { %s3951_s30 = smov 128   ;;  %s3952_s27 = smov 8  }
 0xcbd   : > { %2944 = dma.vmem_to_hbm [thread:$0]  (%p5096_p7), %s4879_s19, 256, %s4877_s24, %s2235_s26, %s3951_s30, %s3951_s30, %s3952_s27  }
 0xcbe PF: > { %s5097_s21 = sld [smem:[#allocation49_spill]]  ;;  %s5098_s18 = sld [smem:[#allocation57_spill]] }
 0xcbf   : > { %s5099_s16 = sld [smem:[#allocation52_spill]] }
 0xcc4   : > { %s2265_s7 = sand.u32 1, %s5097_s21   ;;  %p5100_p2 = scmp.ne.s32.totalorder %s5098_s18, 0 }
 0xcc5   : > { %p5101_p4 = scmp.ge.s32.totalorder %s5099_s16, 2  ;;  %s2266_s11 = scalar_lea.sflag [#allocation5], %s2265_s7 }
 0xcc7   : > { %p3012_p13 = pnand %p5101_p4, %p5100_p2 }
 0xcc9   : > { %3890 = dma.done.wait (!%p3012_p13), %s2266_s11, 256  }
 0xcca   : > { %3892 = vsyncadd (!%p3012_p13), %s2266_s11, 4294967040  ;;  %s51_s28 = sadd.s32 1, %s5099_s16   ;;  %s5102_s0 = sld [smem:[#allocation50_spill]] }
 0xccb   : > { %p48_p6 = scmp.ge.s32.totalorder %s51_s28, 4   ;;  %s5103_s26 = sld [smem:[#allocation56_spill]] }
 0xccc   : > { %s5104_s15 = sld [smem:[#allocation54_spill]]  ;;  %s5105_s2 = smov %s3899_s25 }
 0xccd   : > { %s5107_s27 = smov %s3911_s3  ;;  %50 = sbr.rel (!%p48_p6) target bundleno = 41 (0x29), region = 261 }
 0xcd0   : > { %s5106_s25 = smov %s5102_s0 }
 0xcd2   : > { %s5108_s3 = smov %s5104_s15 }
 0xcd4   :  { %2271 = vsyncpa [#allocation4], 1 }
 0xcd5   :  { %2273 = vsyncpa [#allocation4 + $0x1], 1 }
 0xcd6   :  { %2274 = vsyncpa [#allocation7], 1 }
 0xcd7   :  { %2276 = vsyncpa [#allocation7 + $0x1], 1 }
 0xcd8   :  { %2277 = vsyncpa [#allocation10], 1 }
 0xcd9   :  { %2279 = vsyncpa [#allocation10 + $0x1], 1 }
 0xcda   :  { %2280 = vsyncpa [#allocation13], 1 }
 0xcdb   :  { %2281 = vsyncpa [#allocation16], 1 }
 0xcdc   :  { %2282 = vsyncpa [#allocation19], 1 }
 0xcdd   :  { %2283 = vsyncpa [#allocation22], 1 }
 0xcde   :  { %2284 = vsyncpa [#allocation25], 1 }
 0xcdf   :  { %2285 = vsyncpa [#allocation28], 1 }
 0xce0   :  { %2286 = vsyncpa [#allocation31], 1 }
 0xce1   :  { %2287 = vsyncpa [#allocation34], 1 }
 0xce2   :  { %2288 = vsyncpa [#allocation5], 1 }
 0xce3   :  { %2290 = vsyncpa [#allocation5 + $0x1], 1 }

// kernel: transformer_forward.6
= control target key start
LH: loop header
LB: loop body
LE: loop exit
PB: predicated region body
PF: predicated region fallthrough
CT: control target
= control target key end

     0   :  { %s6237_s6 = smov 1   ;;  %s6238_s10 = smov 2   ;;  %s7512_s0 = inlined_call_operand.smem [shape: u32[36], index: -1, kind: input, shape index: {}] }
   0x1   :  { %s6328_s5 = sld [smem:[%s7512_s0]]   ;;  %s6239_s14 = smov 3  }
   0x2   :  { %s6333_s9 = sld [smem:[%s7512_s0 + %s6237_s6]]   ;;  %s6240_s18 = smov 4  }
   0x3   :  { %s6338_s13 = sld [smem:[%s7512_s0 + %s6238_s10]]   ;;  %s6241_s22 = smov 5  }
   0x4   :  { %s6343_s17 = sld [smem:[%s7512_s0 + %s6239_s14]]   ;;  %s6242_s26 = smov 6  }
   0x5   :  { %s6348_s21 = sld [smem:[%s7512_s0 + %s6240_s18]]   ;;  %s6243_s30 = smov 7  }
   0x6   :  { %s6353_s25 = sld [smem:[%s7512_s0 + %s6241_s22]]   ;;  %s6244_s4 = smov 8  }
   0x7   :  { %7581 = sst [smem:[#allocation77_spill]] %s6328_s5  ;;  %s6245_s10 = smov 9  }
   0x8   :  { %7582 = sst [smem:[#allocation78_spill]] %s6333_s9  ;;  %s6246_s15 = smov 10  }
   0x9   :  { %7583 = sst [smem:[#allocation79_spill]] %s6338_s13  ;;  %s6247_s20 = smov 11  }
   0xa   :  { %7584 = sst [smem:[#allocation80_spill]] %s6343_s17  ;;  %s6249_s1 = smov 13  }
   0xb   :  { %7585 = sst [smem:[#allocation81_spill]] %s6348_s21  ;;  %s6250_s7 = smov 14  }
   0xc   :  { %7586 = sst [smem:[#allocation82_spill]] %s6353_s25  ;;  %s6252_s22 = smov 16  }
   0xd   :  { %s6358_s29 = sld [smem:[%s7512_s0 + %s6242_s26]]   ;;  %s6248_s26 = smov 12  }
   0xe   :  { %s6363_s3 = sld [smem:[%s7512_s0 + %s6243_s30]]   ;;  %s6253_s28 = smov 17  }
   0xf   :  { %s6368_s8 = sld [smem:[%s7512_s0 + %s6244_s4]]  }
  0x10   :  { %s6373_s14 = sld [smem:[%s7512_s0 + %s6245_s10]]  }
  0x11   :  { %s6378_s19 = sld [smem:[%s7512_s0 + %s6246_s15]]   ;;  %s6251_s15 = smov 15  }
  0x12   :  { %s6383_s24 = sld [smem:[%s7512_s0 + %s6247_s20]]  }
  0x13   :  { %7587 = sst [smem:[#allocation83_spill]] %s6358_s29 }
  0x14   :  { %7588 = sst [smem:[#allocation84_spill]] %s6363_s3 }
  0x15   :  { %7589 = sst [smem:[#allocation85_spill]] %s6368_s8 }
  0x16   :  { %7590 = sst [smem:[#allocation86_spill]] %s6373_s14 }
  0x17   :  { %7591 = sst [smem:[#allocation87_spill]] %s6378_s19 }
  0x18   :  { %7592 = sst [smem:[#allocation88_spill]] %s6383_s24 }
  0x19   :  { %s6388_s30 = sld [smem:[%s7512_s0 + %s6248_s26]]  }
  0x1a   :  { %s6393_s6 = sld [smem:[%s7512_s0 + %s6249_s1]]  }
  0x1b   :  { %s6398_s12 = sld [smem:[%s7512_s0 + %s6250_s7]]   ;;  %s6254_s7 = smov 18  }
  0x1c   :  { %s6403_s20 = sld [smem:[%s7512_s0 + %s6251_s15]]   ;;  %s6255_s15 = smov 19  }
  0x1d   :  { %s6408_s27 = sld [smem:[%s7512_s0 + %s6252_s22]]   ;;  %s6256_s22 = smov 20  }
  0x1e   :  { %s6413_s4 = sld [smem:[%s7512_s0 + %s6253_s28]]   ;;  %s6257_s28 = smov 21  }
  0x1f   :  { %7593 = sst [smem:[#allocation89_spill]] %s6388_s30 }
  0x20   :  { %7594 = sst [smem:[#allocation90_spill]] %s6393_s6 }
  0x21   :  { %7595 = sst [smem:[#allocation91_spill]] %s6398_s12 }
  0x22   :  { %7596 = sst [smem:[#allocation92_spill]] %s6403_s20 }
  0x23   :  { %7597 = sst [smem:[#allocation93_spill]] %s6408_s27 }
  0x24   :  { %7598 = sst [smem:[#allocation94_spill]] %s6413_s4 }
  0x25   :  { %s6418_s29 = sld [smem:[%s7512_s0 + %s6254_s7]]   ;;  %s6258_s7 = smov 22  }
  0x26   :  { %s6423_s13 = sld [smem:[%s7512_s0 + %s6255_s15]]   ;;  %s6259_s15 = smov 23  }
  0x27   :  { %s6428_s5 = sld [smem:[%s7512_s0 + %s6256_s22]]   ;;  %s6260_s22 = smov 24  }
  0x28   :  { %s6433_s27 = sld [smem:[%s7512_s0 + %s6257_s28]]   ;;  %s6261_s28 = smov 25  }
  0x29   :  { %s6443_s12 = sld [smem:[%s7512_s0 + %s6259_s15]]   ;;  %s6263_s15 = smov 27  }
  0x2a   :  { %s6453_s30 = sld [smem:[%s7512_s0 + %s6261_s28]]   ;;  %s6265_s28 = smov 29  }
  0x2b   :  { %7599 = sst [smem:[#allocation95_spill]] %s6418_s29 }
  0x2c   :  { %7600 = sst [smem:[#allocation96_spill]] %s6423_s13 }
  0x2d   :  { %7601 = sst [smem:[#allocation97_spill]] %s6428_s5 }
  0x2e   :  { %7602 = sst [smem:[#allocation98_spill]] %s6433_s27 }
  0x2f   :  { %s6438_s29 = sld [smem:[%s7512_s0 + %s6258_s7]]   ;;  %s6262_s7 = smov 26  }
  0x30   :  { %7604 = sst [smem:[#allocation100_spill]] %s6443_s12 }
  0x31   :  { %s6448_s5 = sld [smem:[%s7512_s0 + %s6260_s22]]   ;;  %s6264_s22 = smov 28  }
  0x32   :  { %7606 = sst [smem:[#allocation102_spill]] %s6453_s30 }
  0x33   :  { %s6463_s19 = sld [smem:[%s7512_s0 + %s6263_s15]]   ;;  %s6267_s15 = smov 31  }
  0x34   :  { %s6473_s8 = sld [smem:[%s7512_s0 + %s6265_s28]]   ;;  %s6269_s28 = smov 33  }
  0x35   :  { %7603 = sst [smem:[#allocation99_spill]] %s6438_s29 }
  0x36   :  { %s6458_s29 = sld [smem:[%s7512_s0 + %s6262_s7]]   ;;  %s6266_s7 = smov 30  }
  0x37   :  { %7605 = sst [smem:[#allocation101_spill]] %s6448_s5 }
  0x38   :  { %s6468_s5 = sld [smem:[%s7512_s0 + %s6264_s22]]   ;;  %s6268_s22 = smov 32  }
  0x39   :  { %7608 = sst [smem:[#allocation104_spill]] %s6463_s19 }
  0x3a   :  { %7610 = sst [smem:[#allocation106_spill]] %s6473_s8 }
  0x3b   :  { %s6483_s25 = sld [smem:[%s7512_s0 + %s6267_s15]]   ;;  %s6271_s15 = smov 35  }
  0x3c   :  { %7607 = sst [smem:[#allocation103_spill]] %s6458_s29 }
  0x3d   :  { %s6478_s29 = sld [smem:[%s7512_s0 + %s6266_s7]]   ;;  %s6270_s7 = smov 34  }
  0x3e   :  { %7609 = sst [smem:[#allocation105_spill]] %s6468_s5 }
  0x3f   :  { %s6488_s5 = sld [smem:[%s7512_s0 + %s6268_s22]]  }
  0x40   :  { %s6493_s21 = sld [smem:[%s7512_s0 + %s6269_s28]]  }
  0x41   :  { %7612 = sst [smem:[#allocation108_spill]] %s6483_s25 }
  0x42   :  { %s6503_s17 = sld [smem:[%s7512_s0 + %s6271_s15]]  }
  0x43   :  { %7611 = sst [smem:[#allocation107_spill]] %s6478_s29 }
  0x44   :  { %s6498_s29 = sld [smem:[%s7512_s0 + %s6270_s7]]  }
  0x45   :  { %7613 = sst [smem:[#allocation109_spill]] %s6488_s5 }
  0x46   :  { %7614 = sst [smem:[#allocation110_spill]] %s6493_s21 }
  0x48   :  { %7616 = sst [smem:[#allocation112_spill]] %s6503_s17 }
  0x4a   :  { %7615 = sst [smem:[#allocation111_spill]] %s6498_s29 }
  0x4b   :  { %76 = vsyncpa [#allocation4], 0 }
  0x4c   :  { %78 = vsyncpa [#allocation4 + $0x1], 0 }
  0x4d   :  { %79 = vsyncpa [#allocation7], 0 }
  0x4e   :  { %81 = vsyncpa [#allocation7 + $0x1], 0 }
  0x4f   :  { %82 = vsyncpa [#allocation10], 0 }
  0x50   :  { %84 = vsyncpa [#allocation10 + $0x1], 0 }
  0x51   :  { %85 = vsyncpa [#allocation13], 0 }
  0x52   :  { %87 = vsyncpa [#allocation13 + $0x1], 0 }
  0x53   :  { %88 = vsyncpa [#allocation16], 0 }
  0x54   :  { %89 = vsyncpa [#allocation19], 0 }
  0x55   :  { %90 = vsyncpa [#allocation22], 0 }
  0x56   :  { %91 = vsyncpa [#allocation25], 0 }
  0x57   :  { %92 = vsyncpa [#allocation28], 0 }
  0x58   :  { %93 = vsyncpa [#allocation31], 0 }
  0x59   :  { %94 = vsyncpa [#allocation34], 0 }
  0x5a   :  { %95 = vsyncpa [#allocation37], 0 }
  0x5b   :  { %96 = vsyncpa [#allocation40], 0 }
  0x5c   :  { %97 = vsyncpa [#allocation43], 0 }
  0x5d   :  { %98 = vsyncpa [#allocation46], 0 }
  0x5e   :  { %99 = vsyncpa [#allocation49], 0 }
  0x5f   :  { %100 = vsyncpa [#allocation52], 0 }
  0x60   :  { %101 = vsyncpa [#allocation55], 0 }
  0x61   :  { %102 = vsyncpa [#allocation5], 0 }
  0x62   :  { %104 = vsyncpa [#allocation5 + $0x1], 0  ;;  %s6505_s0 = smov 0   ;;  %s6507_s22 = smov 0  }
  0x63   :  { %s6509_s23 = smov 0   ;;  %s6511_s26 = smov 0  }
  0x64   :  { %s6513_s28 = smov 0   ;;  %s6515_s1 = smov 0  }
  0x65 LB: > { %s7617_s5 = sld [smem:[#allocation109_spill]]  ;;  %s7618_s30 = sld [smem:[#allocation102_spill]]  ;;  %s6227_s26 = sphi %s6511_s26, %s7727_s26   ;;  %s6223_s23 = sphi %s6509_s23, %s7726_s23   ;;  %s6219_s22 = sphi %s6507_s22, %s7725_s22   ;;  %s6215_s0 = sphi %s6505_s0, %s7724_s0   ;;  %s6235_s1 = sphi %s6515_s1, %s110_s1   ;;  %s6231_s28 = sphi %s6513_s28, %s7728_s28  }
  0x66   : > { %s7619_s27 = sld [smem:[#allocation98_spill]]  ;;  %s7620_s9 = sld [smem:[#allocation78_spill]] }
  0x67   : > { %s7621_s25 = sld [smem:[#allocation108_spill]]  ;;  %s7622_s24 = sld [smem:[#allocation88_spill]] }
  0x68   : > { %s7623_s21 = sld [smem:[#allocation110_spill]]  ;;  %s7624_s20 = sld [smem:[#allocation92_spill]] }
  0x69   : > { %s7625_s19 = sld [smem:[#allocation104_spill]]  ;;  %s7627_s12 = sld [smem:[#allocation100_spill]] }
  0x6a   : > { %s7626_s13 = sld [smem:[#allocation96_spill]]  ;;  %s7628_s8 = sld [smem:[#allocation106_spill]] }
  0x6b   : > { %s7629_s6 = sld [smem:[#allocation90_spill]]  ;;  %s7630_s4 = sld [smem:[#allocation94_spill]] }
  0x6c   : > { %s7631_s14 = sld [smem:[#allocation86_spill]]  ;;  %s7632_s3 = sld [smem:[#allocation84_spill]] }
  0x6d   : > { %7633 = sst [smem:[#allocation113_spill]] %s6223_s23  ;;  %s6536_s2 = sadd.s32 4294967295, %s6235_s1  }
  0x6e   : > { %7634 = sst [smem:[#allocation114_spill]] %s6227_s26  ;;  %p4106_p0 = scmp.ge.s32.totalorder %s6235_s1, 1 }
  0x6f   : > { %7635 = sst [smem:[#allocation115_spill]] %s6235_s1  ;;  %p7533_p1 = scmp.eq.s32.totalorder %s6536_s2, 0 }
  0x70   : > { %p929_p2 = scmp.lt.s32.totalorder %s6235_s1, 3  ;;  %s6272_s10 = smov [#allocation15]  }
  0x71   : > { %s941_s11 = sshll.u32 %s6272_s10, 4  ;;  %s6273_s16 = smov [#allocation18]   ;;  %s6545_s11 = int_to_ptr.vmem [resolvable:$true] %s941_s11 }
  0x72   : > { %p6541_p3 = pnand %p4106_p0, %p929_p2  ;;  %s965_s18 = sshll.u32 %s6273_s16, 4  ;;  %s6556_s18 = int_to_ptr.vmem [resolvable:$true] %s965_s18 }
  0x73   : > { %s6274_s17 = smov [#allocation21]   ;;  %s5091_s29 = scalar_lea.hbm %s7632_s3, 512 }
  0x74   : > { %s7636_s7 = scalar_select %p6541_p3, 1, 0 }
  0x75   : > { %p4717_p4 = pneg %p6541_p3  ;;  %s6558_s26 = sshll.u32 %s6274_s17, 4  ;;  %s990_s26 = int_to_ptr.vmem [resolvable:$true] %s6558_s26 }
  0x76   : > { %7637 = sst [smem:[#allocation116_spill]] %s7636_s7  ;;  %p5092_p7 = scmp.ne.s32.totalorder %s7632_s3, %s5091_s29 }
  0x77   : > { %p6552_p6 = pnand %p4717_p4, %p7533_p1  ;;  %p5098_p11 = scmp.lt.u32.totalorder %s5091_s29, %s7632_s3 }
  0x79   : > { %s7638_s15 = scalar_select %p6552_p6, 1, 0 }
  0x7a   : > { %p6564_p8 = pneg %p6552_p6 }
  0x7c   : > { %s7639_s10 = scalar_select %p6564_p8, 1, 0 }
  0x7d   : > { %p5094_p9 = pnand %p6564_p8, %p5092_p7 }
  0x7f   : > { %p5095_p10 = pneg %p5094_p9 }
  0x81   : > { %p5100_p12 = pnand %p5098_p11, %p5095_p10 }
  0x83   : > { %5103 = shalt.err (!%p5100_p12)
}
  0x84   : > { %s5104_s17 = scalar_lea.vmem %s6545_s11, 512  ;;  %p5112_p4 = scmp.lt.s32.totalorder %s6545_s11, %s6545_s11 }
  0x85   : > { %p5105_p13 = scmp.ne.s32.totalorder %s6545_s11, %s5104_s17  ;;  %p5113_p5 = scmp.lt.s32.totalorder %s5104_s17, %s5104_s17 }
  0x87   : > { %p5107_p0 = pnand %p5105_p13, %p6564_p8  ;;  %p5114_p1 = por %p5113_p5, %p5112_p4 }
  0x89   : > { %p5108_p2 = pneg %p5107_p0 }
  0x8b   : > { %p5115_p3 = pnand %p5114_p1, %p5108_p2 }
  0x8d   : > { %5118 = shalt.err (!%p5115_p3)
}
  0x8e   : > { %s6275_s16 = smov 64   ;;  %s6276_s29 = smov 4  }
  0x8f   : > { %4720 = dma.hbm_to_vmem [thread:$0]  (!%p6552_p6), %s7632_s3, 512, %s6545_s11, [#allocation16], %s6275_s16, %s6275_s16, %s6276_s29  }
  0x90   : > { %s5119_s7 = scalar_lea.hbm %s7631_s14, 512 }
  0x91   : > { %p5120_p7 = scmp.ne.s32.totalorder %s7631_s14, %s5119_s7  ;;  %p5126_p3 = scmp.lt.u32.totalorder %s5119_s7, %s7631_s14 }
  0x93   : > { %p5122_p5 = pnand %p5120_p7, %p6564_p8 }
  0x95   : > { %p5123_p1 = pneg %p5122_p5 }
  0x97   : > { %p5128_p9 = pnand %p5126_p3, %p5123_p1 }
  0x99   : > { %5131 = shalt.err (!%p5128_p9)
}
  0x9a   : > { %s5132_s17 = scalar_lea.vmem %s6556_s18, 512  ;;  %p5140_p13 = scmp.lt.s32.totalorder %s6556_s18, %s6556_s18 }
  0x9b   : > { %p5133_p10 = scmp.ne.s32.totalorder %s6556_s18, %s5132_s17  ;;  %p5141_p0 = scmp.lt.s32.totalorder %s5132_s17, %s5132_s17 }
  0x9d   : > { %p5135_p11 = pnand %p5133_p10, %p6564_p8  ;;  %p5142_p2 = por %p5141_p0, %p5140_p13 }
  0x9f   : > { %p5136_p12 = pneg %p5135_p11 }
  0xa1   : > { %p5143_p4 = pnand %p5142_p2, %p5136_p12 }
  0xa3   : > { %5146 = shalt.err (!%p5143_p4)
}
  0xa4   : > { %4726 = dma.hbm_to_vmem [thread:$0]  (!%p6552_p6), %s7631_s14, 512, %s6556_s18, [#allocation19], %s6275_s16, %s6275_s16, %s6276_s29  }
  0xa5   : > { %s5147_s7 = scalar_lea.hbm %s7622_s24, 512 }
  0xa6   : > { %p5148_p7 = scmp.ne.s32.totalorder %s7622_s24, %s5147_s7  ;;  %p5154_p3 = scmp.lt.u32.totalorder %s5147_s7, %s7622_s24 }
  0xa8   : > { %p5150_p5 = pnand %p5148_p7, %p6564_p8 }
  0xaa   : > { %p5151_p1 = pneg %p5150_p5 }
  0xac   : > { %p5156_p9 = pnand %p5154_p3, %p5151_p1 }
  0xae   : > { %5159 = shalt.err (!%p5156_p9)
}
  0xaf   : > { %s5160_s11 = scalar_lea.vmem %s990_s26, 512  ;;  %p5168_p13 = scmp.lt.s32.totalorder %s990_s26, %s990_s26 }
  0xb0   : > { %p5161_p10 = scmp.ne.s32.totalorder %s990_s26, %s5160_s11  ;;  %p5169_p0 = scmp.lt.s32.totalorder %s5160_s11, %s5160_s11 }
  0xb2   : > { %p5163_p11 = pnand %p5161_p10, %p6564_p8  ;;  %p5170_p2 = por %p5169_p0, %p5168_p13 }
  0xb4   : > { %p5164_p12 = pneg %p5163_p11 }
  0xb6   : > { %p5171_p4 = pnand %p5170_p2, %p5164_p12 }
  0xb8   : > { %5174 = shalt.err (!%p5171_p4)
}
  0xb9   : > { %4732 = dma.hbm_to_vmem [thread:$0]  (!%p6552_p6), %s7622_s24, 512, %s990_s26, [#allocation22], %s6275_s16, %s6275_s16, %s6276_s29  }
  0xba   : > { %s6277_s18 = smov [#allocation24]   ;;  %s6278_s7 = smov [#allocation27]  }
  0xbb   : > { %s1013_s17 = sshll.u32 %s6277_s18, 4  ;;  %s1037_s3 = sshll.u32 %s6278_s7, 4  ;;  %s1014_s17 = int_to_ptr.vmem [resolvable:$true] %s1013_s17  ;;  %s1038_s3 = int_to_ptr.vmem [resolvable:$true] %s1037_s3 }
  0xbc   : > { %s5175_s11 = scalar_lea.hbm %s7629_s6, 512 }
  0xbd   : > { %p5176_p7 = scmp.ne.s32.totalorder %s7629_s6, %s5175_s11  ;;  %p5182_p3 = scmp.lt.u32.totalorder %s5175_s11, %s7629_s6 }
  0xbf   : > { %p5178_p5 = pnand %p5176_p7, %p6564_p8 }
  0xc1   : > { %p5179_p1 = pneg %p5178_p5 }
  0xc3   : > { %p5184_p9 = pnand %p5182_p3, %p5179_p1 }
  0xc5   : > { %5187 = shalt.err (!%p5184_p9)
}
  0xc6   : > { %s5188_s14 = scalar_lea.vmem %s1014_s17, 512  ;;  %p5196_p13 = scmp.lt.s32.totalorder %s1014_s17, %s1014_s17 }
  0xc7   : > { %p5189_p10 = scmp.ne.s32.totalorder %s1014_s17, %s5188_s14  ;;  %p5197_p0 = scmp.lt.s32.totalorder %s5188_s14, %s5188_s14 }
  0xc9   : > { %p5191_p11 = pnand %p5189_p10, %p6564_p8  ;;  %p5198_p2 = por %p5197_p0, %p5196_p13 }
  0xcb   : > { %p5192_p12 = pneg %p5191_p11 }
  0xcd   : > { %p5199_p4 = pnand %p5198_p2, %p5192_p12 }
  0xcf   : > { %5202 = shalt.err (!%p5199_p4)
}
  0xd0   : > { %4738 = dma.hbm_to_vmem [thread:$0]  (!%p6552_p6), %s7629_s6, 512, %s1014_s17, [#allocation25], %s6275_s16, %s6275_s16, %s6276_s29  }
  0xd1   : > { %s5203_s26 = scalar_lea.hbm %s7624_s20, 512 }
  0xd2   : > { %p5204_p7 = scmp.ne.s32.totalorder %s7624_s20, %s5203_s26  ;;  %p5210_p3 = scmp.lt.u32.totalorder %s5203_s26, %s7624_s20 }
  0xd4   : > { %p5206_p5 = pnand %p5204_p7, %p6564_p8 }
  0xd6   : > { %p5207_p1 = pneg %p5206_p5 }
  0xd8   : > { %p5212_p9 = pnand %p5210_p3, %p5207_p1 }
  0xda   : > { %5215 = shalt.err (!%p5212_p9)
}
  0xdb   : > { %s5216_s14 = scalar_lea.vmem %s1038_s3, 512  ;;  %p5224_p13 = scmp.lt.s32.totalorder %s1038_s3, %s1038_s3 }
  0xdc   : > { %p5217_p10 = scmp.ne.s32.totalorder %s1038_s3, %s5216_s14  ;;  %p5225_p0 = scmp.lt.s32.totalorder %s5216_s14, %s5216_s14 }
  0xde   : > { %p5219_p11 = pnand %p5217_p10, %p6564_p8  ;;  %p5226_p2 = por %p5225_p0, %p5224_p13 }
  0xe0   : > { %p5220_p12 = pneg %p5219_p11 }
  0xe2   : > { %p5227_p4 = pnand %p5226_p2, %p5220_p12 }
  0xe4   : > { %5230 = shalt.err (!%p5227_p4)
}
  0xe5   : > { %4744 = dma.hbm_to_vmem [thread:$0]  (!%p6552_p6), %s7624_s20, 512, %s1038_s3, [#allocation28], %s6275_s16, %s6275_s16, %s6276_s29  }
  0xe6   : > { %s6279_s18 = smov [#allocation30]   ;;  %s6280_s7 = smov [#allocation33]  }
  0xe7   : > { %s1061_s17 = sshll.u32 %s6279_s18, 4  ;;  %s1085_s11 = sshll.u32 %s6280_s7, 4  ;;  %s1062_s17 = int_to_ptr.vmem [resolvable:$true] %s1061_s17  ;;  %s1086_s11 = int_to_ptr.vmem [resolvable:$true] %s1085_s11 }
  0xe8   : > { %s5231_s26 = scalar_lea.hbm %s7630_s4, 512 }
  0xe9   : > { %p5232_p7 = scmp.ne.s32.totalorder %s7630_s4, %s5231_s26  ;;  %p5238_p3 = scmp.lt.u32.totalorder %s5231_s26, %s7630_s4 }
  0xeb   : > { %p5234_p5 = pnand %p5232_p7, %p6564_p8 }
  0xed   : > { %p5235_p1 = pneg %p5234_p5 }
  0xef   : > { %p5240_p9 = pnand %p5238_p3, %p5235_p1 }
  0xf1   : > { %5243 = shalt.err (!%p5240_p9)
}
  0xf2   : > { %s5244_s14 = scalar_lea.vmem %s1062_s17, 512  ;;  %p5252_p13 = scmp.lt.s32.totalorder %s1062_s17, %s1062_s17 }
  0xf3   : > { %p5245_p10 = scmp.ne.s32.totalorder %s1062_s17, %s5244_s14  ;;  %p5253_p0 = scmp.lt.s32.totalorder %s5244_s14, %s5244_s14 }
  0xf5   : > { %p5247_p11 = pnand %p5245_p10, %p6564_p8  ;;  %p5254_p2 = por %p5253_p0, %p5252_p13 }
  0xf7   : > { %p5248_p12 = pneg %p5247_p11 }
  0xf9   : > { %p5255_p4 = pnand %p5254_p2, %p5248_p12 }
  0xfb   : > { %5258 = shalt.err (!%p5255_p4)
}
  0xfc   : > { %4750 = dma.hbm_to_vmem [thread:$0]  (!%p6552_p6), %s7630_s4, 512, %s1062_s17, [#allocation31], %s6275_s16, %s6275_s16, %s6276_s29  }
  0xfd   : > { %s5259_s3 = scalar_lea.hbm %s7626_s13, 512 }
  0xfe   : > { %p5260_p7 = scmp.ne.s32.totalorder %s7626_s13, %s5259_s3  ;;  %p5266_p3 = scmp.lt.u32.totalorder %s5259_s3, %s7626_s13 }
 0x100   : > { %p5262_p5 = pnand %p5260_p7, %p6564_p8 }
 0x102   : > { %p5263_p1 = pneg %p5262_p5 }
 0x104   : > { %p5268_p9 = pnand %p5266_p3, %p5263_p1 }
 0x106   : > { %5271 = shalt.err (!%p5268_p9)
}
 0x107   : > { %s5272_s18 = scalar_lea.vmem %s1086_s11, 512  ;;  %p5280_p13 = scmp.lt.s32.totalorder %s1086_s11, %s1086_s11 }
 0x108   : > { %p5273_p10 = scmp.ne.s32.totalorder %s1086_s11, %s5272_s18  ;;  %p5281_p0 = scmp.lt.s32.totalorder %s5272_s18, %s5272_s18 }
 0x10a   : > { %p5275_p11 = pnand %p5273_p10, %p6564_p8  ;;  %p5282_p2 = por %p5281_p0, %p5280_p13 }
 0x10c   : > { %p5276_p12 = pneg %p5275_p11 }
 0x10e   : > { %p5283_p4 = pnand %p5282_p2, %p5276_p12 }
 0x110   : > { %5286 = shalt.err (!%p5283_p4)
}
 0x111   : > { %4756 = dma.hbm_to_vmem [thread:$0]  (!%p6552_p6), %s7626_s13, 512, %s1086_s11, [#allocation34], %s6275_s16, %s6275_s16, %s6276_s29  }
 0x112   : > { %s6281_s17 = smov [#allocation36]   ;;  %s6282_s26 = smov [#allocation39]  }
 0x113   : > { %s1109_s7 = sshll.u32 %s6281_s17, 4  ;;  %s1133_s14 = sshll.u32 %s6282_s26, 4  ;;  %s1110_s7 = int_to_ptr.vmem [resolvable:$true] %s1109_s7  ;;  %s1134_s14 = int_to_ptr.vmem [resolvable:$true] %s1133_s14 }
 0x114   : > { %s5287_s3 = scalar_lea.hbm %s7619_s27, 512 }
 0x115   : > { %p5288_p7 = scmp.ne.s32.totalorder %s7619_s27, %s5287_s3  ;;  %p5294_p3 = scmp.lt.u32.totalorder %s5287_s3, %s7619_s27 }
 0x117   : > { %p5290_p5 = pnand %p5288_p7, %p6564_p8 }
 0x119   : > { %p5291_p1 = pneg %p5290_p5 }
 0x11b   : > { %p5296_p9 = pnand %p5294_p3, %p5291_p1 }
 0x11d   : > { %5299 = shalt.err (!%p5296_p9)
}
 0x11e   : > { %s5300_s18 = scalar_lea.vmem %s1110_s7, 512  ;;  %p5308_p13 = scmp.lt.s32.totalorder %s1110_s7, %s1110_s7 }
 0x11f   : > { %p5301_p10 = scmp.ne.s32.totalorder %s1110_s7, %s5300_s18  ;;  %p5309_p0 = scmp.lt.s32.totalorder %s5300_s18, %s5300_s18 }
 0x121   : > { %p5303_p11 = pnand %p5301_p10, %p6564_p8  ;;  %p5310_p2 = por %p5309_p0, %p5308_p13 }
 0x123   : > { %p5304_p12 = pneg %p5303_p11 }
 0x125   : > { %p5311_p4 = pnand %p5310_p2, %p5304_p12 }
 0x127   : > { %5314 = shalt.err (!%p5311_p4)
}
 0x128   : > { %4762 = dma.hbm_to_vmem [thread:$0]  (!%p6552_p6), %s7619_s27, 512, %s1110_s7, [#allocation37], %s6275_s16, %s6275_s16, %s6276_s29  }
 0x129   : > { %s5315_s11 = scalar_lea.hbm %s7627_s12, 512 }
 0x12a   : > { %p5316_p7 = scmp.ne.s32.totalorder %s7627_s12, %s5315_s11  ;;  %p5322_p3 = scmp.lt.u32.totalorder %s5315_s11, %s7627_s12 }
 0x12c   : > { %p5318_p5 = pnand %p5316_p7, %p6564_p8 }
 0x12e   : > { %p5319_p1 = pneg %p5318_p5 }
 0x130   : > { %p5324_p9 = pnand %p5322_p3, %p5319_p1 }
 0x132   : > { %5327 = shalt.err (!%p5324_p9)
}
 0x133   : > { %s5328_s17 = scalar_lea.vmem %s1134_s14, 512  ;;  %p5336_p13 = scmp.lt.s32.totalorder %s1134_s14, %s1134_s14 }
 0x134   : > { %p5329_p10 = scmp.ne.s32.totalorder %s1134_s14, %s5328_s17  ;;  %p5337_p0 = scmp.lt.s32.totalorder %s5328_s17, %s5328_s17 }
 0x136   : > { %p5331_p11 = pnand %p5329_p10, %p6564_p8  ;;  %p5338_p2 = por %p5337_p0, %p5336_p13 }
 0x138   : > { %p5332_p12 = pneg %p5331_p11 }
 0x13a   : > { %p5339_p4 = pnand %p5338_p2, %p5332_p12 }
 0x13c   : > { %5342 = shalt.err (!%p5339_p4)
}
 0x13d   : > { %4768 = dma.hbm_to_vmem [thread:$0]  (!%p6552_p6), %s7627_s12, 512, %s1134_s14, [#allocation40], %s6275_s16, %s6275_s16, %s6276_s29  }
 0x13e   : > { %s6283_s7 = smov [#allocation42]   ;;  %s6284_s3 = smov [#allocation45]  }
 0x13f   : > { %s1157_s26 = sshll.u32 %s6283_s7, 4  ;;  %s1182_s18 = sshll.u32 %s6284_s3, 4  ;;  %s1158_s26 = int_to_ptr.vmem [resolvable:$true] %s1157_s26  ;;  %s1183_s18 = int_to_ptr.vmem [resolvable:$true] %s1182_s18 }
 0x140   : > { %s5343_s11 = scalar_lea.hbm %s7618_s30, 1024 }
 0x141   : > { %p5344_p7 = scmp.ne.s32.totalorder %s7618_s30, %s5343_s11  ;;  %p5350_p3 = scmp.lt.u32.totalorder %s5343_s11, %s7618_s30 }
 0x143   : > { %p5346_p5 = pnand %p5344_p7, %p6564_p8 }
 0x145   : > { %p5347_p1 = pneg %p5346_p5 }
 0x147   : > { %p5352_p9 = pnand %p5350_p3, %p5347_p1 }
 0x149   : > { %5355 = shalt.err (!%p5352_p9)
}
 0x14a   : > { %s5356_s17 = scalar_lea.vmem %s1158_s26, 1024  ;;  %p5364_p13 = scmp.lt.s32.totalorder %s1158_s26, %s1158_s26 }
 0x14b   : > { %p5357_p10 = scmp.ne.s32.totalorder %s1158_s26, %s5356_s17  ;;  %p5365_p0 = scmp.lt.s32.totalorder %s5356_s17, %s5356_s17 }
 0x14d   : > { %p5359_p11 = pnand %p5357_p10, %p6564_p8  ;;  %p5366_p2 = por %p5365_p0, %p5364_p13 }
 0x14f   : > { %p5360_p12 = pneg %p5359_p11 }
 0x151   : > { %p5367_p4 = pnand %p5366_p2, %p5360_p12 }
 0x153   : > { %5370 = shalt.err (!%p5367_p4)
}
 0x154   : > { %4774 = dma.hbm_to_vmem [thread:$0]  (!%p6552_p6), %s7618_s30, 1024, %s1158_s26, [#allocation43], %s6275_s16, %s6275_s16, %s6276_s29  }
 0x155   : > { %s5371_s14 = scalar_lea.hbm %s7625_s19, 16 }
 0x156   : > { %p5372_p7 = scmp.ne.s32.totalorder %s7625_s19, %s5371_s14  ;;  %p5378_p3 = scmp.lt.u32.totalorder %s5371_s14, %s7625_s19 }
 0x158   : > { %p5374_p5 = pnand %p5372_p7, %p6564_p8 }
 0x15a   : > { %p5375_p1 = pneg %p5374_p5 }
 0x15c   : > { %p5380_p9 = pnand %p5378_p3, %p5375_p1 }
 0x15e   : > { %5383 = shalt.err (!%p5380_p9)
}
 0x15f   : > { %s5384_s7 = scalar_lea.vmem %s1183_s18, 16  ;;  %s5391_s3 = scalar_lea.vmem %s1183_s18, 32 }
 0x160   : > { %p5385_p10 = scmp.ne.s32.totalorder %s1183_s18, %s5384_s7  ;;  %p5392_p13 = scmp.lt.s32.totalorder %s1183_s18, %s1183_s18 }
 0x161   : > { %p5393_p0 = scmp.lt.s32.totalorder %s5391_s3, %s5384_s7 }
 0x162   : > { %p5387_p11 = pnand %p5385_p10, %p6564_p8 }
 0x163   : > { %p5394_p2 = por %p5393_p0, %p5392_p13 }
 0x164   : > { %p5388_p12 = pneg %p5387_p11 }
 0x166   : > { %p5395_p4 = pnand %p5394_p2, %p5388_p12 }
 0x168   : > { %5398 = shalt.err (!%p5395_p4)
}
 0x169   : > { %4780 = dma.hbm_to_vmem [thread:$0]  (!%p6552_p6), %s7625_s19, 16, %s1183_s18, [#allocation46]  }
 0x16a   : > { %s6285_s16 = smov [#allocation48]   ;;  %s6286_s26 = smov [#allocation51]  }
 0x16b   : > { %s1204_s29 = sshll.u32 %s6285_s16, 4  ;;  %s1226_s11 = sshll.u32 %s6286_s26, 4  ;;  %s1205_s29 = int_to_ptr.vmem [resolvable:$true] %s1204_s29  ;;  %s1227_s11 = int_to_ptr.vmem [resolvable:$true] %s1226_s11 }
 0x16c   : > { %s5399_s17 = scalar_lea.hbm %s7628_s8, 16 }
 0x16d   : > { %p5400_p7 = scmp.ne.s32.totalorder %s7628_s8, %s5399_s17  ;;  %p5406_p3 = scmp.lt.u32.totalorder %s5399_s17, %s7628_s8 }
 0x16f   : > { %p5402_p5 = pnand %p5400_p7, %p6564_p8 }
 0x171   : > { %p5403_p1 = pneg %p5402_p5 }
 0x173   : > { %p5408_p9 = pnand %p5406_p3, %p5403_p1 }
 0x175   : > { %5411 = shalt.err (!%p5408_p9)
}
 0x176   : > { %s5412_s14 = scalar_lea.vmem %s1205_s29, 16  ;;  %s5419_s18 = scalar_lea.vmem %s1205_s29, 32 }
 0x177   : > { %p5413_p10 = scmp.ne.s32.totalorder %s1205_s29, %s5412_s14  ;;  %p5420_p13 = scmp.lt.s32.totalorder %s1205_s29, %s1205_s29 }
 0x178   : > { %p5421_p0 = scmp.lt.s32.totalorder %s5419_s18, %s5412_s14 }
 0x179   : > { %p5415_p11 = pnand %p5413_p10, %p6564_p8 }
 0x17a   : > { %p5422_p2 = por %p5421_p0, %p5420_p13 }
 0x17b   : > { %p5416_p12 = pneg %p5415_p11 }
 0x17d   : > { %p5423_p4 = pnand %p5422_p2, %p5416_p12 }
 0x17f   : > { %5426 = shalt.err (!%p5423_p4)
}
 0x180   : > { %4786 = dma.hbm_to_vmem [thread:$0]  (!%p6552_p6), %s7628_s8, 16, %s1205_s29, [#allocation49]  }
 0x181   : > { %s5427_s7 = scalar_lea.hbm %s7621_s25, 16 }
 0x182   : > { %p5428_p7 = scmp.ne.s32.totalorder %s7621_s25, %s5427_s7  ;;  %p5434_p3 = scmp.lt.u32.totalorder %s5427_s7, %s7621_s25 }
 0x184   : > { %p5430_p5 = pnand %p5428_p7, %p6564_p8 }
 0x186   : > { %p5431_p1 = pneg %p5430_p5 }
 0x188   : > { %p5436_p9 = pnand %p5434_p3, %p5431_p1 }
 0x18a   : > { %5439 = shalt.err (!%p5436_p9)
}
 0x18b   : > { %s5440_s3 = scalar_lea.vmem %s1227_s11, 16  ;;  %s5447_s16 = scalar_lea.vmem %s1227_s11, 32 }
 0x18c   : > { %p5441_p10 = scmp.ne.s32.totalorder %s1227_s11, %s5440_s3  ;;  %p5448_p13 = scmp.lt.s32.totalorder %s1227_s11, %s1227_s11 }
 0x18d   : > { %p5449_p0 = scmp.lt.s32.totalorder %s5447_s16, %s5440_s3 }
 0x18e   : > { %p5443_p11 = pnand %p5441_p10, %p6564_p8 }
 0x18f   : > { %p5450_p2 = por %p5449_p0, %p5448_p13 }
 0x190   : > { %p5444_p12 = pneg %p5443_p11 }
 0x192   : > { %p5451_p4 = pnand %p5450_p2, %p5444_p12 }
 0x194   : > { %5454 = shalt.err (!%p5451_p4)
}
 0x195   : > { %4792 = dma.hbm_to_vmem [thread:$0]  (!%p6552_p6), %s7621_s25, 16, %s1227_s11, [#allocation52]  }
 0x196   : > { %s6287_s29 = smov [#allocation54]   ;;  %s5455_s17 = scalar_lea.hbm %s7623_s21, 16 }
 0x197   : > { %s1248_s26 = sshll.u32 %s6287_s29, 4  ;;  %p5456_p7 = scmp.ne.s32.totalorder %s7623_s21, %s5455_s17  ;;  %s1249_s26 = int_to_ptr.vmem [resolvable:$true] %s1248_s26 }
 0x198   : > { %p5462_p3 = scmp.lt.u32.totalorder %s5455_s17, %s7623_s21 }
 0x199   : > { %p5458_p5 = pnand %p5456_p7, %p6564_p8 }
 0x19b   : > { %p5459_p1 = pneg %p5458_p5 }
 0x19d   : > { %p5464_p9 = pnand %p5462_p3, %p5459_p1 }
 0x19f   : > { %5467 = shalt.err (!%p5464_p9)
}
 0x1a0   : > { %s5468_s14 = scalar_lea.vmem %s1249_s26, 16  ;;  %s5475_s18 = scalar_lea.vmem %s1249_s26, 32 }
 0x1a1   : > { %p5469_p10 = scmp.ne.s32.totalorder %s1249_s26, %s5468_s14  ;;  %p5476_p13 = scmp.lt.s32.totalorder %s1249_s26, %s1249_s26 }
 0x1a2   : > { %p5477_p0 = scmp.lt.s32.totalorder %s5475_s18, %s5468_s14 }
 0x1a3   : > { %p5471_p11 = pnand %p5469_p10, %p6564_p8 }
 0x1a4   : > { %p5478_p2 = por %p5477_p0, %p5476_p13 }
 0x1a5   : > { %p5472_p12 = pneg %p5471_p11 }
 0x1a7   : > { %p5479_p4 = pnand %p5478_p2, %p5472_p12 }
 0x1a9   : > { %5482 = shalt.err (!%p5479_p4)
}
 0x1aa   : > { %4798 = dma.hbm_to_vmem [thread:$0]  (!%p6552_p6), %s7623_s21, 16, %s1249_s26, [#allocation55]  }
 0x1ab   : > { %s4105_s11 = sadd.s32 4294967294, %s6235_s1   ;;  %s122_s7 = sadd.s32 1, %s6231_s28 }
 0x1ac   : > { %p124_p7 = scmp.ge.s32.totalorder %s122_s7, 2  ;;  %s131_s3 = sadd.s32 1, %s6223_s23 }
 0x1ad   : > { %p138_p5 = scmp.ne.s32.totalorder %s6223_s23, %s6219_s22  ;;  %p139_p1 = scmp.eq.s32.totalorder %s6235_s1, 0 }
 0x1ae   : > { %s7730_s7 = smov (%p124_p7, %s122_s7), 0  ;;  %p144_p9 = scmp.ne.s32.totalorder %s6219_s22, %s6215_s0 }
 0x1af   : > { %7640 = sst [smem:[#allocation117_spill]] %s7730_s7  ;;  %p6755_p3 = por %p139_p1, %p138_p5 }
 0x1b0   : > { %s126_s29 = ssub.s32 %s6231_s28, %s7730_s7  ;;  %p916_p10 = scmp.eq.s32.totalorder %s6536_s2, 1 }
 0x1b1   : > { %p129_p11 = scmp.eq.s32.totalorder %s126_s29, 0  ;;  %p7642_p12 = scmp.eq.s32.totalorder %s6536_s2, 0 }
 0x1b2   : > { %p6770_p0 = por %p916_p10, %p138_p5  ;;  %p922_p2 = scmp.eq.s32.totalorder %s4105_s11, 1 }
 0x1b3   : > { %p6766_p13 = por %p7642_p12, %p144_p9  ;;  %p4856_p7 = scmp.lt.s32.totalorder %s6235_s1, 2 }
 0x1b4   : > { %s7644_s17 = scalar_select %p6770_p0, 1, 0 }
 0x1b5   : > { %s7643_s26 = scalar_select %p6766_p13, 1, 0 }
 0x1b6   : > { %s6775_s14 = scalar_select %p129_p11, %s6223_s23, %s131_s3  }
 0x1b7   : > { %p6777_p4 = por %p922_p2, %p144_p9  ;;  %s6783_s4 = sand.u32 1, %s6223_s23  }
 0x1b8   : > { %7645 = sst [smem:[#allocation118_spill]] %s6775_s14  ;;  %s6786_s29 = sshll.u32 %s6231_s28, 7 }
 0x1b9   : > { %s7646_s18 = scalar_select %p6777_p4, 1, 0 }
 0x1ba   : > { %s6789_s6 = sshll.u32 %s6783_s4, 3  ;;  %p6793_p5 = pnand %p4856_p7, %p6755_p3 }
 0x1bb   : > { %s6798_s3 = sand.u32 1, %s6235_s1   ;;  %s6802_s8 = scalar_lea.hbm %s7620_s9, %s6786_s29 }
 0x1bc   : > { %s7647_s11 = scalar_select %p6793_p5, 1, 0 }
 0x1bd   : > { %s1293_s12 = scalar_lea.vmem [#allocation6], %s6789_s6  ;;  %s5483_s19 = scalar_lea.hbm %s6802_s8, 128 }
 0x1be   : > { %s1301_s13 = sshll.u32 %s1293_s12, 4  ;;  %p5484_p1 = scmp.ne.s32.totalorder %s6802_s8, %s5483_s19  ;;  %s6805_s13 = int_to_ptr.vmem [resolvable:$true] %s1301_s13 }
 0x1bf   : > { %p6812_p3 = pneg %p6793_p5  ;;  %s5488_s21 = scalar_lea.hbm %s7620_s9, 256 }
 0x1c0   : > { %p5489_p11 = scmp.lt.u32.totalorder %s6802_s8, %s7620_s9  ;;  %p5490_p12 = scmp.lt.u32.totalorder %s5488_s21, %s5483_s19 }
 0x1c1   : > { %s7648_s20 = scalar_select %p6812_p3, 1, 0 }
 0x1c2   : > { %p5486_p9 = pnand %p6812_p3, %p5484_p1  ;;  %p5491_p2 = por %p5490_p12, %p5489_p11 }
 0x1c3   : > { %p5492_p7 = scmp.lt.u32.totalorder %s5483_s19, %s6802_s8 }
 0x1c4   : > { %p5487_p10 = pneg %p5486_p9 }
 0x1c5   : > { %p5493_p4 = por %p5492_p7, %p5491_p2 }
 0x1c7   : > { %p5494_p0 = pnand %p5493_p4, %p5487_p10 }
 0x1c9   : > { %5497 = shalt.err (!%p5494_p0)
}
 0x1ca   : > { %s5498_s12 = scalar_lea.vmem %s6805_s13, 128  ;;  %s6288_s16 = smov [#allocation6]  }
 0x1cb   : > { %p5499_p13 = scmp.ne.s32.totalorder %s6805_s13, %s5498_s12  ;;  %s5503_s24 = sshll.u32 %s6288_s16, 4  ;;  %s5504_s24 = int_to_ptr.vmem [resolvable:$false] %s5503_s24 }
 0x1cc   : > { %s5505_s25 = scalar_lea.vmem %s5504_s24, 256  ;;  %p5506_p1 = scmp.lt.s32.totalorder %s6805_s13, %s5504_s24 }
 0x1cd   : > { %p5501_p6 = pnand %p5499_p13, %p6812_p3  ;;  %p5507_p9 = scmp.lt.s32.totalorder %s5505_s25, %s5498_s12 }
 0x1cf   : > { %p5502_p8 = pneg %p5501_p6  ;;  %p5508_p11 = por %p5507_p9, %p5506_p1 }
 0x1d1   : > { %p5509_p12 = pnand %p5508_p11, %p5502_p8 }
 0x1d3   : > { %5512 = shalt.err (!%p5509_p12)
}
 0x1d4   : > { %s7649_s21 = scalar_lea.sflag [#allocation7], %s6798_s3  ;;  %s7650_s19 = sld [smem:[#allocation80_spill]] }
 0x1d5   : > { %4808 = dma.hbm_to_vmem [thread:$0]  (!%p6793_p5), %s6802_s8, 128, %s6805_s13, %s7649_s21  }
 0x1d6   : > { %s1330_s25 = scalar_lea.vmem [#allocation9], %s6789_s6  ;;  %s4144_s12 = sshll.u32 %s6783_s4, 4 }
 0x1d7   : > { %s1337_s16 = sshll.u32 %s1330_s25, 4  ;;  %s7559_s9 = scalar_lea.sflag [#allocation10], %s6798_s3  ;;  %s6838_s16 = int_to_ptr.vmem [resolvable:$true] %s1337_s16 }
 0x1da   : > { %s6835_s24 = scalar_lea.hbm %s7650_s19, %s6786_s29  ;;  %s5518_s30 = scalar_lea.hbm %s7650_s19, 256 }
 0x1db   : > { %s5513_s27 = scalar_lea.hbm %s6835_s24, 128  ;;  %p5519_p0 = scmp.lt.u32.totalorder %s6835_s24, %s7650_s19 }
 0x1dc   : > { %p5514_p6 = scmp.ne.s32.totalorder %s6835_s24, %s5513_s27  ;;  %p5520_p4 = scmp.lt.u32.totalorder %s5518_s30, %s5513_s27 }
 0x1dd   : > { %p5522_p2 = scmp.lt.u32.totalorder %s5513_s27, %s6835_s24 }
 0x1de   : > { %p5516_p8 = pnand %p5514_p6, %p6812_p3  ;;  %p5521_p10 = por %p5520_p4, %p5519_p0 }
 0x1e0   : > { %p5517_p13 = pneg %p5516_p8  ;;  %p5523_p7 = por %p5522_p2, %p5521_p10 }
 0x1e2   : > { %p5524_p1 = pnand %p5523_p7, %p5517_p13 }
 0x1e4   : > { %5527 = shalt.err (!%p5524_p1)
}
 0x1e5   : > { %s5528_s13 = scalar_lea.vmem %s6838_s16, 128  ;;  %s6289_s8 = smov [#allocation9]  }
 0x1e6   : > { %p5529_p9 = scmp.ne.s32.totalorder %s6838_s16, %s5528_s13  ;;  %s5533_s21 = sshll.u32 %s6289_s8, 4  ;;  %s5534_s21 = int_to_ptr.vmem [resolvable:$false] %s5533_s21 }
 0x1e7   : > { %s5535_s25 = scalar_lea.vmem %s5534_s21, 256  ;;  %p5536_p6 = scmp.lt.s32.totalorder %s6838_s16, %s5534_s21 }
 0x1e8   : > { %p5531_p11 = pnand %p5529_p9, %p6812_p3  ;;  %p5537_p8 = scmp.lt.s32.totalorder %s5535_s25, %s5528_s13 }
 0x1ea   : > { %p5532_p12 = pneg %p5531_p11  ;;  %p5538_p0 = por %p5537_p8, %p5536_p6 }
 0x1ec   : > { %p5539_p4 = pnand %p5538_p0, %p5532_p12 }
 0x1ee   : > { %5542 = shalt.err (!%p5539_p4)
}
 0x1ef   : > { %s7651_s30 = sld [smem:[#allocation81_spill]]  ;;  %s7652_s27 = sld [smem:[#allocation82_spill]] }
 0x1f0   : > { %4814 = dma.hbm_to_vmem [thread:$0]  (!%p6793_p5), %s6835_s24, 128, %s6838_s16, %s7559_s9  }
 0x1f1   : > { %s4277_s13 = sshll.u32 %s6231_s28, 8  ;;  %s1348_s21 = scalar_lea.vmem [#allocation11], %s4144_s12 }
 0x1f2   : > { %s1355_s25 = sshll.u32 %s1348_s21, 4  ;;  %s1369_s7 = scalar_lea.vmem [#allocation12], %s4144_s12  ;;  %s6867_s25 = int_to_ptr.vmem [resolvable:$true] %s1355_s25 }
 0x1f3   : > { %s1376_s14 = sshll.u32 %s1369_s7, 4  ;;  %s6874_s14 = int_to_ptr.vmem [resolvable:$true] %s1376_s14 }
 0x1f5   : > { %s6863_s8 = scalar_lea.hbm %s7651_s30, %s4277_s13  ;;  %s6870_s19 = scalar_lea.hbm %s7652_s27, %s4277_s13 }
 0x1f6   : > { %s5543_s16 = scalar_lea.hbm %s6870_s19, 256  ;;  %s5548_s21 = scalar_lea.hbm %s7652_s27, 512 }
 0x1f7   : > { %p5544_p13 = scmp.ne.s32.totalorder %s6870_s19, %s5543_s16  ;;  %p5549_p7 = scmp.lt.u32.totalorder %s6870_s19, %s7652_s27 }
 0x1f8   : > { %p5550_p1 = scmp.lt.u32.totalorder %s5548_s21, %s5543_s16  ;;  %p5552_p11 = scmp.lt.u32.totalorder %s5543_s16, %s6870_s19 }
 0x1f9   : > { %p5546_p10 = pnand %p5544_p13, %p6812_p3 }
 0x1fa   : > { %p5551_p9 = por %p5550_p1, %p5549_p7 }
 0x1fb   : > { %p5547_p2 = pneg %p5546_p10 }
 0x1fc   : > { %p5553_p12 = por %p5552_p11, %p5551_p9 }
 0x1fe   : > { %p5554_p6 = pnand %p5553_p12, %p5547_p2 }
 0x200   : > { %5557 = shalt.err (!%p5554_p6)
}
 0x201   : > { %s5558_s7 = scalar_lea.vmem %s6874_s14, 256  ;;  %s6290_s12 = smov [#allocation12]  }
 0x202   : > { %p5559_p8 = scmp.ne.s32.totalorder %s6874_s14, %s5558_s7  ;;  %s5563_s13 = sshll.u32 %s6290_s12, 4  ;;  %s5564_s13 = int_to_ptr.vmem [resolvable:$false] %s5563_s13 }
 0x203   : > { %s5565_s9 = scalar_lea.vmem %s5564_s13, 512  ;;  %p5566_p13 = scmp.lt.s32.totalorder %s6874_s14, %s5564_s13 }
 0x204   : > { %p5561_p0 = pnand %p5559_p8, %p6812_p3  ;;  %p5567_p10 = scmp.lt.s32.totalorder %s5565_s9, %s5558_s7 }
 0x206   : > { %p5562_p4 = pneg %p5561_p0  ;;  %p5568_p7 = por %p5567_p10, %p5566_p13 }
 0x208   : > { %p5569_p1 = pnand %p5568_p7, %p5562_p4 }
 0x20a   : > { %5572 = shalt.err (!%p5569_p1)
}
 0x20b   : > { %s7568_s16 = smov 128   ;;  %s7653_s21 = sld [smem:[#allocation85_spill]] }
 0x20c   : > { %s7569_s24 = smov 8   ;;  %s7654_s12 = scalar_lea.sflag [#allocation13], %s6798_s3 }
 0x20d   : > { %4820 = dma.hbm_to_vmem [thread:$0]  (!%p6793_p5), %s6870_s19, 256, %s6874_s14, %s7654_s12, %s7568_s16, %s7568_s16, %s7569_s24  }
 0x20e   : > { %s6293_s9 = smov [#allocation17]   ;;  %s6294_s13 = smov [#allocation20]  }
 0x20f   : > { %s955_s7 = sshll.u32 %s6293_s9, 4  ;;  %s979_s27 = sshll.u32 %s6294_s13, 4  ;;  %s956_s7 = int_to_ptr.vmem [resolvable:$true] %s955_s7  ;;  %s980_s27 = int_to_ptr.vmem [resolvable:$true] %s979_s27 }
 0x210   : > { %p7655_p9 = scmp.ne.s32.totalorder %s7639_s10, 0 }
 0x211   : > { %s5573_s23 = scalar_lea.hbm %s7653_s21, 16 }
 0x212   : > { %p5574_p2 = scmp.ne.s32.totalorder %s7653_s21, %s5573_s23  ;;  %p5580_p6 = scmp.lt.u32.totalorder %s5573_s23, %s7653_s21 }
 0x214   : > { %p5576_p11 = pnand %p5574_p2, %p7655_p9 }
 0x216   : > { %p5577_p12 = pneg %p5576_p11 }
 0x218   : > { %p5582_p8 = pnand %p5580_p6, %p5577_p12 }
 0x21a   : > { %5585 = shalt.err (!%p5582_p8)
}
 0x21b   : > { %s5586_s1 = scalar_lea.vmem %s956_s7, 16  ;;  %s5593_s14 = scalar_lea.vmem %s956_s7, 32 }
 0x21c   : > { %p5587_p0 = scmp.ne.s32.totalorder %s956_s7, %s5586_s1  ;;  %p5594_p10 = scmp.lt.s32.totalorder %s956_s7, %s956_s7 }
 0x21d   : > { %p5595_p7 = scmp.lt.s32.totalorder %s5593_s14, %s5586_s1 }
 0x21e   : > { %p5589_p4 = pnand %p5587_p0, %p7655_p9 }
 0x21f   : > { %p5596_p1 = por %p5595_p7, %p5594_p10 }
 0x220   : > { %p5590_p13 = pneg %p5589_p4 }
 0x222   : > { %p5597_p5 = pnand %p5596_p1, %p5590_p13 }
 0x224   : > { %5600 = shalt.err (!%p5597_p5)
}
 0x225   : > { %p7656_p3 = scmp.ne.s32.totalorder %s7638_s15, 0  ;;  %s7657_s19 = sld [smem:[#allocation87_spill]] }
 0x227   : > { %4723 = dma.hbm_to_vmem [thread:$0]  (!%p7656_p3), %s7653_s21, 16, %s956_s7, [#allocation16]  }
 0x22b   : > { %s5601_s23 = scalar_lea.hbm %s7657_s19, 16 }
 0x22c   : > { %p5602_p2 = scmp.ne.s32.totalorder %s7657_s19, %s5601_s23  ;;  %p5608_p6 = scmp.lt.u32.totalorder %s5601_s23, %s7657_s19 }
 0x22e   : > { %p5604_p11 = pnand %p5602_p2, %p7655_p9 }
 0x230   : > { %p5605_p12 = pneg %p5604_p11 }
 0x232   : > { %p5610_p8 = pnand %p5608_p6, %p5605_p12 }
 0x234   : > { %5613 = shalt.err (!%p5610_p8)
}
 0x235   : > { %s5614_s1 = scalar_lea.vmem %s980_s27, 16  ;;  %s5621_s12 = scalar_lea.vmem %s980_s27, 32 }
 0x236   : > { %p5615_p5 = scmp.ne.s32.totalorder %s980_s27, %s5614_s1  ;;  %p5622_p13 = scmp.lt.s32.totalorder %s980_s27, %s980_s27 }
 0x237   : > { %p5623_p10 = scmp.lt.s32.totalorder %s5621_s12, %s5614_s1 }
 0x238   : > { %p5617_p0 = pnand %p5615_p5, %p7655_p9 }
 0x239   : > { %p5624_p7 = por %p5623_p10, %p5622_p13 }
 0x23a   : > { %p5618_p4 = pneg %p5617_p0 }
 0x23c   : > { %p5625_p1 = pnand %p5624_p7, %p5618_p4 }
 0x23e   : > { %5628 = shalt.err (!%p5625_p1)
}
 0x23f   : > { %s7658_s9 = sld [smem:[#allocation89_spill]]  ;;  %s6295_s7 = smov [#allocation23]  }
 0x240   : > { %4729 = dma.hbm_to_vmem [thread:$0]  (!%p7656_p3), %s7657_s19, 16, %s980_s27, [#allocation19]  }
 0x241   : > { %s1003_s13 = sshll.u32 %s6295_s7, 4  ;;  %s6296_s14 = smov [#allocation26]   ;;  %s1004_s13 = int_to_ptr.vmem [resolvable:$true] %s1003_s13 }
 0x242   : > { %s1027_s23 = sshll.u32 %s6296_s14, 4  ;;  %s1028_s23 = int_to_ptr.vmem [resolvable:$true] %s1027_s23 }
 0x245   : > { %s5629_s16 = scalar_lea.hbm %s7658_s9, 16 }
 0x246   : > { %p5630_p2 = scmp.ne.s32.totalorder %s7658_s9, %s5629_s16  ;;  %p5636_p6 = scmp.lt.u32.totalorder %s5629_s16, %s7658_s9 }
 0x248   : > { %p5632_p11 = pnand %p5630_p2, %p7655_p9 }
 0x24a   : > { %p5633_p12 = pneg %p5632_p11 }
 0x24c   : > { %p5638_p8 = pnand %p5636_p6, %p5633_p12 }
 0x24e   : > { %5641 = shalt.err (!%p5638_p8)
}
 0x24f   : > { %s5642_s1 = scalar_lea.vmem %s1004_s13, 16  ;;  %s5649_s27 = scalar_lea.vmem %s1004_s13, 32 }
 0x250   : > { %p5643_p5 = scmp.ne.s32.totalorder %s1004_s13, %s5642_s1  ;;  %p5650_p13 = scmp.lt.s32.totalorder %s1004_s13, %s1004_s13 }
 0x251   : > { %p5651_p10 = scmp.lt.s32.totalorder %s5649_s27, %s5642_s1 }
 0x252   : > { %p5645_p0 = pnand %p5643_p5, %p7655_p9 }
 0x253   : > { %p5652_p7 = por %p5651_p10, %p5650_p13 }
 0x254   : > { %p5646_p4 = pneg %p5645_p0 }
 0x256   : > { %p5653_p1 = pnand %p5652_p7, %p5646_p4 }
 0x258   : > { %5656 = shalt.err (!%p5653_p1)
}
 0x259   : > { %s7659_s12 = sld [smem:[#allocation91_spill]] }
 0x25a   : > { %4735 = dma.hbm_to_vmem [thread:$0]  (!%p7656_p3), %s7658_s9, 16, %s1004_s13, [#allocation22]  }
 0x25f   : > { %s5657_s16 = scalar_lea.hbm %s7659_s12, 16 }
 0x260   : > { %p5658_p2 = scmp.ne.s32.totalorder %s7659_s12, %s5657_s16  ;;  %p5664_p6 = scmp.lt.u32.totalorder %s5657_s16, %s7659_s12 }
 0x262   : > { %p5660_p11 = pnand %p5658_p2, %p7655_p9 }
 0x264   : > { %p5661_p12 = pneg %p5660_p11 }
 0x266   : > { %p5666_p8 = pnand %p5664_p6, %p5661_p12 }
 0x268   : > { %5669 = shalt.err (!%p5666_p8)
}
 0x269   : > { %s5670_s7 = scalar_lea.vmem %s1028_s23, 16  ;;  %s5677_s14 = scalar_lea.vmem %s1028_s23, 32 }
 0x26a   : > { %p5671_p5 = scmp.ne.s32.totalorder %s1028_s23, %s5670_s7  ;;  %p5678_p13 = scmp.lt.s32.totalorder %s1028_s23, %s1028_s23 }
 0x26b   : > { %p5679_p10 = scmp.lt.s32.totalorder %s5677_s14, %s5670_s7 }
 0x26c   : > { %p5673_p0 = pnand %p5671_p5, %p7655_p9 }
 0x26d   : > { %p5680_p7 = por %p5679_p10, %p5678_p13 }
 0x26e   : > { %p5674_p4 = pneg %p5673_p0 }
 0x270   : > { %p5681_p1 = pnand %p5680_p7, %p5674_p4 }
 0x272   : > { %5684 = shalt.err (!%p5681_p1)
}
 0x273   : > { %s7660_s13 = sld [smem:[#allocation93_spill]]  ;;  %s6297_s1 = smov [#allocation29]  }
 0x274   : > { %4741 = dma.hbm_to_vmem [thread:$0]  (!%p7656_p3), %s7659_s12, 16, %s1028_s23, [#allocation25]  }
 0x275   : > { %s1051_s27 = sshll.u32 %s6297_s1, 4  ;;  %s6298_s16 = smov [#allocation32]   ;;  %s1052_s27 = int_to_ptr.vmem [resolvable:$true] %s1051_s27 }
 0x276   : > { %s1075_s24 = sshll.u32 %s6298_s16, 4  ;;  %s1076_s24 = int_to_ptr.vmem [resolvable:$true] %s1075_s24 }
 0x279   : > { %s5685_s9 = scalar_lea.hbm %s7660_s13, 16 }
 0x27a   : > { %p5686_p2 = scmp.ne.s32.totalorder %s7660_s13, %s5685_s9  ;;  %p5692_p6 = scmp.lt.u32.totalorder %s5685_s9, %s7660_s13 }
 0x27c   : > { %p5688_p11 = pnand %p5686_p2, %p7655_p9 }
 0x27e   : > { %p5689_p12 = pneg %p5688_p11 }
 0x280   : > { %p5694_p8 = pnand %p5692_p6, %p5689_p12 }
 0x282   : > { %5697 = shalt.err (!%p5694_p8)
}
 0x283   : > { %s5698_s7 = scalar_lea.vmem %s1052_s27, 16  ;;  %s5705_s23 = scalar_lea.vmem %s1052_s27, 32 }
 0x284   : > { %p5699_p5 = scmp.ne.s32.totalorder %s1052_s27, %s5698_s7  ;;  %p5706_p13 = scmp.lt.s32.totalorder %s1052_s27, %s1052_s27 }
 0x285   : > { %p5707_p10 = scmp.lt.s32.totalorder %s5705_s23, %s5698_s7 }
 0x286   : > { %p5701_p0 = pnand %p5699_p5, %p7655_p9 }
 0x287   : > { %p5708_p7 = por %p5707_p10, %p5706_p13 }
 0x288   : > { %p5702_p4 = pneg %p5701_p0 }
 0x28a   : > { %p5709_p1 = pnand %p5708_p7, %p5702_p4 }
 0x28c   : > { %5712 = shalt.err (!%p5709_p1)
}
 0x28d   : > { %s7661_s14 = sld [smem:[#allocation95_spill]] }
 0x28e   : > { %4747 = dma.hbm_to_vmem [thread:$0]  (!%p7656_p3), %s7660_s13, 16, %s1052_s27, [#allocation28]  }
 0x293   : > { %s5713_s9 = scalar_lea.hbm %s7661_s14, 16 }
 0x294   : > { %p5714_p2 = scmp.ne.s32.totalorder %s7661_s14, %s5713_s9  ;;  %p5720_p6 = scmp.lt.u32.totalorder %s5713_s9, %s7661_s14 }
 0x296   : > { %p5716_p11 = pnand %p5714_p2, %p7655_p9 }
 0x298   : > { %p5717_p12 = pneg %p5716_p11 }
 0x29a   : > { %p5722_p8 = pnand %p5720_p6, %p5717_p12 }
 0x29c   : > { %5725 = shalt.err (!%p5722_p8)
}
 0x29d   : > { %s5726_s1 = scalar_lea.vmem %s1076_s24, 16  ;;  %s5733_s16 = scalar_lea.vmem %s1076_s24, 32 }
 0x29e   : > { %p5727_p5 = scmp.ne.s32.totalorder %s1076_s24, %s5726_s1  ;;  %p5734_p13 = scmp.lt.s32.totalorder %s1076_s24, %s1076_s24 }
 0x29f   : > { %p5735_p10 = scmp.lt.s32.totalorder %s5733_s16, %s5726_s1 }
 0x2a0   : > { %p5729_p0 = pnand %p5727_p5, %p7655_p9 }
 0x2a1   : > { %p5736_p7 = por %p5735_p10, %p5734_p13 }
 0x2a2   : > { %p5730_p4 = pneg %p5729_p0 }
 0x2a4   : > { %p5737_p1 = pnand %p5736_p7, %p5730_p4 }
 0x2a6   : > { %5740 = shalt.err (!%p5737_p1)
}
 0x2a7   : > { %s7662_s27 = sld [smem:[#allocation97_spill]]  ;;  %s6299_s7 = smov [#allocation35]  }
 0x2a8   : > { %4753 = dma.hbm_to_vmem [thread:$0]  (!%p7656_p3), %s7661_s14, 16, %s1076_s24, [#allocation31]  }
 0x2a9   : > { %s1099_s23 = sshll.u32 %s6299_s7, 4  ;;  %s6300_s9 = smov [#allocation38]   ;;  %s1100_s23 = int_to_ptr.vmem [resolvable:$true] %s1099_s23 }
 0x2aa   : > { %s1123_s12 = sshll.u32 %s6300_s9, 4  ;;  %s1124_s12 = int_to_ptr.vmem [resolvable:$true] %s1123_s12 }
 0x2ad   : > { %s5741_s13 = scalar_lea.hbm %s7662_s27, 16 }
 0x2ae   : > { %p5742_p2 = scmp.ne.s32.totalorder %s7662_s27, %s5741_s13  ;;  %p5748_p6 = scmp.lt.u32.totalorder %s5741_s13, %s7662_s27 }
 0x2b0   : > { %p5744_p11 = pnand %p5742_p2, %p7655_p9 }
 0x2b2   : > { %p5745_p12 = pneg %p5744_p11 }
 0x2b4   : > { %p5750_p8 = pnand %p5748_p6, %p5745_p12 }
 0x2b6   : > { %5753 = shalt.err (!%p5750_p8)
}
 0x2b7   : > { %s5754_s1 = scalar_lea.vmem %s1100_s23, 16  ;;  %s5761_s24 = scalar_lea.vmem %s1100_s23, 32 }
 0x2b8   : > { %p5755_p5 = scmp.ne.s32.totalorder %s1100_s23, %s5754_s1  ;;  %p5762_p13 = scmp.lt.s32.totalorder %s1100_s23, %s1100_s23 }
 0x2b9   : > { %p5763_p10 = scmp.lt.s32.totalorder %s5761_s24, %s5754_s1 }
 0x2ba   : > { %p5757_p0 = pnand %p5755_p5, %p7655_p9 }
 0x2bb   : > { %p5764_p7 = por %p5763_p10, %p5762_p13 }
 0x2bc   : > { %p5758_p4 = pneg %p5757_p0 }
 0x2be   : > { %p5765_p1 = pnand %p5764_p7, %p5758_p4 }
 0x2c0   : > { %5768 = shalt.err (!%p5765_p1)
}
 0x2c1   : > { %s7663_s16 = sld [smem:[#allocation99_spill]] }
 0x2c2   : > { %4759 = dma.hbm_to_vmem [thread:$0]  (!%p7656_p3), %s7662_s27, 16, %s1100_s23, [#allocation34]  }
 0x2c7   : > { %s5769_s13 = scalar_lea.hbm %s7663_s16, 16 }
 0x2c8   : > { %p5770_p2 = scmp.ne.s32.totalorder %s7663_s16, %s5769_s13  ;;  %p5776_p6 = scmp.lt.u32.totalorder %s5769_s13, %s7663_s16 }
 0x2ca   : > { %p5772_p11 = pnand %p5770_p2, %p7655_p9 }
 0x2cc   : > { %p5773_p12 = pneg %p5772_p11 }
 0x2ce   : > { %p5778_p8 = pnand %p5776_p6, %p5773_p12 }
 0x2d0   : > { %5781 = shalt.err (!%p5778_p8)
}
 0x2d1   : > { %s5782_s7 = scalar_lea.vmem %s1124_s12, 16  ;;  %s5789_s9 = scalar_lea.vmem %s1124_s12, 32 }
 0x2d2   : > { %p5783_p5 = scmp.ne.s32.totalorder %s1124_s12, %s5782_s7  ;;  %p5790_p13 = scmp.lt.s32.totalorder %s1124_s12, %s1124_s12 }
 0x2d3   : > { %p5791_p10 = scmp.lt.s32.totalorder %s5789_s9, %s5782_s7 }
 0x2d4   : > { %p5785_p0 = pnand %p5783_p5, %p7655_p9 }
 0x2d5   : > { %p5792_p7 = por %p5791_p10, %p5790_p13 }
 0x2d6   : > { %p5786_p4 = pneg %p5785_p0 }
 0x2d8   : > { %p5793_p1 = pnand %p5792_p7, %p5786_p4 }
 0x2da   : > { %5796 = shalt.err (!%p5793_p1)
}
 0x2db   : > { %s7664_s23 = sld [smem:[#allocation101_spill]]  ;;  %s6301_s1 = smov [#allocation41]  }
 0x2dc   : > { %4765 = dma.hbm_to_vmem [thread:$0]  (!%p7656_p3), %s7663_s16, 16, %s1124_s12, [#allocation37]  }
 0x2dd   : > { %s1147_s13 = sshll.u32 %s6301_s1, 4  ;;  %s6302_s14 = smov [#allocation44]   ;;  %s1148_s13 = int_to_ptr.vmem [resolvable:$true] %s1147_s13 }
 0x2de   : > { %s1171_s19 = sshll.u32 %s6302_s14, 4  ;;  %s1172_s19 = int_to_ptr.vmem [resolvable:$true] %s1171_s19 }
 0x2e1   : > { %s7665_s24 = smov %s7664_s23  ;;  %s5797_s21 = scalar_lea.hbm %s7664_s23, 16 }
 0x2e2   : > { %p5798_p2 = scmp.ne.s32.totalorder %s7665_s24, %s5797_s21  ;;  %p5804_p6 = scmp.lt.u32.totalorder %s5797_s21, %s7665_s24 }
 0x2e4   : > { %p5800_p11 = pnand %p5798_p2, %p7655_p9 }
 0x2e6   : > { %p5801_p12 = pneg %p5800_p11 }
 0x2e8   : > { %p5806_p8 = pnand %p5804_p6, %p5801_p12 }
 0x2ea   : > { %5809 = shalt.err (!%p5806_p8)
}
 0x2eb   : > { %s5810_s7 = scalar_lea.vmem %s1148_s13, 16  ;;  %s5817_s12 = scalar_lea.vmem %s1148_s13, 32 }
 0x2ec   : > { %p5811_p5 = scmp.ne.s32.totalorder %s1148_s13, %s5810_s7  ;;  %p5818_p13 = scmp.lt.s32.totalorder %s1148_s13, %s1148_s13 }
 0x2ed   : > { %p5819_p10 = scmp.lt.s32.totalorder %s5817_s12, %s5810_s7 }
 0x2ee   : > { %p5813_p0 = pnand %p5811_p5, %p7655_p9 }
 0x2ef   : > { %p5820_p7 = por %p5819_p10, %p5818_p13 }
 0x2f0   : > { %p5814_p4 = pneg %p5813_p0 }
 0x2f2   : > { %p5821_p1 = pnand %p5820_p7, %p5814_p4 }
 0x2f4   : > { %5824 = shalt.err (!%p5821_p1)
}
 0x2f5   : > { %s7666_s14 = sld [smem:[#allocation103_spill]] }
 0x2f6   : > { %4771 = dma.hbm_to_vmem [thread:$0]  (!%p7656_p3), %s7665_s24, 16, %s1148_s13, [#allocation40]  }
 0x2fb   : > { %s5825_s21 = scalar_lea.hbm %s7666_s14, 16 }
 0x2fc   : > { %p5826_p2 = scmp.ne.s32.totalorder %s7666_s14, %s5825_s21  ;;  %p5832_p6 = scmp.lt.u32.totalorder %s5825_s21, %s7666_s14 }
 0x2fe   : > { %p5828_p11 = pnand %p5826_p2, %p7655_p9 }
 0x300   : > { %p5829_p12 = pneg %p5828_p11 }
 0x302   : > { %p5834_p8 = pnand %p5832_p6, %p5829_p12 }
 0x304   : > { %5837 = shalt.err (!%p5834_p8)
}
 0x305   : > { %s5838_s9 = scalar_lea.vmem %s1172_s19, 16  ;;  %s5845_s23 = scalar_lea.vmem %s1172_s19, 32 }
 0x306   : > { %p5839_p5 = scmp.ne.s32.totalorder %s1172_s19, %s5838_s9  ;;  %p5846_p13 = scmp.lt.s32.totalorder %s1172_s19, %s1172_s19 }
 0x307   : > { %p5847_p10 = scmp.lt.s32.totalorder %s5845_s23, %s5838_s9 }
 0x308   : > { %p5841_p0 = pnand %p5839_p5, %p7655_p9 }
 0x309   : > { %p5848_p7 = por %p5847_p10, %p5846_p13 }
 0x30a   : > { %p5842_p4 = pneg %p5841_p0 }
 0x30c   : > { %p5849_p1 = pnand %p5848_p7, %p5842_p4 }
 0x30e   : > { %5852 = shalt.err (!%p5849_p1)
}
 0x30f   : > { %s7667_s1 = sld [smem:[#allocation105_spill]]  ;;  %s6303_s7 = smov [#allocation47]  }
 0x310   : > { %4777 = dma.hbm_to_vmem [thread:$0]  (!%p7656_p3), %s7666_s14, 16, %s1172_s19, [#allocation43]  }
 0x311   : > { %s1193_s12 = sshll.u32 %s6303_s7, 4  ;;  %s6304_s21 = smov [#allocation50]   ;;  %s1194_s12 = int_to_ptr.vmem [resolvable:$true] %s1193_s12 }
 0x312   : > { %s1215_s16 = sshll.u32 %s6304_s21, 4  ;;  %s1216_s16 = int_to_ptr.vmem [resolvable:$true] %s1215_s16 }
 0x315   : > { %s7668_s13 = smov %s7667_s1  ;;  %s5853_s24 = scalar_lea.hbm %s7667_s1, 16 }
 0x316   : > { %p5854_p2 = scmp.ne.s32.totalorder %s7668_s13, %s5853_s24  ;;  %p5860_p6 = scmp.lt.u32.totalorder %s5853_s24, %s7668_s13 }
 0x318   : > { %p5856_p11 = pnand %p5854_p2, %p7655_p9 }
 0x31a   : > { %p5857_p12 = pneg %p5856_p11 }
 0x31c   : > { %p5862_p8 = pnand %p5860_p6, %p5857_p12 }
 0x31e   : > { %5865 = shalt.err (!%p5862_p8)
}
 0x31f   : > { %s5866_s9 = scalar_lea.vmem %s1194_s12, 16  ;;  %s5873_s19 = scalar_lea.vmem %s1194_s12, 32 }
 0x320   : > { %p5867_p5 = scmp.ne.s32.totalorder %s1194_s12, %s5866_s9  ;;  %p5874_p13 = scmp.lt.s32.totalorder %s1194_s12, %s1194_s12 }
 0x321   : > { %p5875_p10 = scmp.lt.s32.totalorder %s5873_s19, %s5866_s9 }
 0x322   : > { %p5869_p0 = pnand %p5867_p5, %p7655_p9 }
 0x323   : > { %p5876_p7 = por %p5875_p10, %p5874_p13 }
 0x324   : > { %p5870_p4 = pneg %p5869_p0 }
 0x326   : > { %p5877_p1 = pnand %p5876_p7, %p5870_p4 }
 0x328   : > { %5880 = shalt.err (!%p5877_p1)
}
 0x329   : > { %s7669_s23 = sld [smem:[#allocation107_spill]] }
 0x32a   : > { %4783 = dma.hbm_to_vmem [thread:$0]  (!%p7656_p3), %s7668_s13, 16, %s1194_s12, [#allocation46]  }
 0x32f   : > { %s7670_s7 = smov %s7669_s23  ;;  %s5881_s24 = scalar_lea.hbm %s7669_s23, 16 }
 0x330   : > { %p5882_p2 = scmp.ne.s32.totalorder %s7670_s7, %s5881_s24  ;;  %p5888_p6 = scmp.lt.u32.totalorder %s5881_s24, %s7670_s7 }
 0x332   : > { %p5884_p11 = pnand %p5882_p2, %p7655_p9 }
 0x334   : > { %p5885_p12 = pneg %p5884_p11 }
 0x336   : > { %p5890_p8 = pnand %p5888_p6, %p5885_p12 }
 0x338   : > { %5893 = shalt.err (!%p5890_p8)
}
 0x339   : > { %s5894_s1 = scalar_lea.vmem %s1216_s16, 16  ;;  %s5901_s21 = scalar_lea.vmem %s1216_s16, 32 }
 0x33a   : > { %p5895_p5 = scmp.ne.s32.totalorder %s1216_s16, %s5894_s1  ;;  %p5902_p13 = scmp.lt.s32.totalorder %s1216_s16, %s1216_s16 }
 0x33b   : > { %p5903_p10 = scmp.lt.s32.totalorder %s5901_s21, %s5894_s1 }
 0x33c   : > { %p5897_p0 = pnand %p5895_p5, %p7655_p9 }
 0x33d   : > { %p5904_p7 = por %p5903_p10, %p5902_p13 }
 0x33e   : > { %p5898_p4 = pneg %p5897_p0 }
 0x340   : > { %p5905_p1 = pnand %p5904_p7, %p5898_p4 }
 0x342   : > { %5908 = shalt.err (!%p5905_p1)
}
 0x343   : > { %4789 = dma.hbm_to_vmem [thread:$0]  (!%p7656_p3), %s7670_s7, 16, %s1216_s16, [#allocation49]  }
 0x344   : > { %s6305_s12 = smov [#allocation53]   ;;  %s6306_s19 = smov [#allocation56]  }
 0x345   : > { %s1237_s9 = sshll.u32 %s6305_s12, 4  ;;  %s1259_s23 = sshll.u32 %s6306_s19, 4  ;;  %s1238_s9 = int_to_ptr.vmem [resolvable:$true] %s1237_s9  ;;  %s1260_s23 = int_to_ptr.vmem [resolvable:$true] %s1259_s23 }
 0x346   : > { %s5909_s24 = scalar_lea.hbm %s7617_s5, 16 }
 0x347   : > { %p5910_p2 = scmp.ne.s32.totalorder %s7617_s5, %s5909_s24  ;;  %p5916_p6 = scmp.lt.u32.totalorder %s5909_s24, %s7617_s5 }
 0x349   : > { %p5912_p11 = pnand %p5910_p2, %p7655_p9 }
 0x34b   : > { %p5913_p12 = pneg %p5912_p11 }
 0x34d   : > { %p5918_p8 = pnand %p5916_p6, %p5913_p12 }
 0x34f   : > { %5921 = shalt.err (!%p5918_p8)
}
 0x350   : > { %s5922_s1 = scalar_lea.vmem %s1238_s9, 16  ;;  %s5929_s16 = scalar_lea.vmem %s1238_s9, 32 }
 0x351   : > { %p5923_p5 = scmp.ne.s32.totalorder %s1238_s9, %s5922_s1  ;;  %p5930_p13 = scmp.lt.s32.totalorder %s1238_s9, %s1238_s9 }
 0x352   : > { %p5931_p10 = scmp.lt.s32.totalorder %s5929_s16, %s5922_s1 }
 0x353   : > { %p5925_p0 = pnand %p5923_p5, %p7655_p9 }
 0x354   : > { %p5932_p7 = por %p5931_p10, %p5930_p13 }
 0x355   : > { %p5926_p4 = pneg %p5925_p0 }
 0x357   : > { %p5933_p1 = pnand %p5932_p7, %p5926_p4 }
 0x359   : > { %5936 = shalt.err (!%p5933_p1)
}
 0x35a   : > { %s7671_s21 = sld [smem:[#allocation111_spill]] }
 0x35b   : > { %4795 = dma.hbm_to_vmem [thread:$0]  (!%p7656_p3), %s7617_s5, 16, %s1238_s9, [#allocation52]  }
 0x360   : > { %s5937_s12 = scalar_lea.hbm %s7671_s21, 16 }
 0x361   : > { %p5938_p2 = scmp.ne.s32.totalorder %s7671_s21, %s5937_s12  ;;  %p5944_p6 = scmp.lt.u32.totalorder %s5937_s12, %s7671_s21 }
 0x363   : > { %p5940_p11 = pnand %p5938_p2, %p7655_p9 }
 0x365   : > { %p5941_p12 = pneg %p5940_p11 }
 0x367   : > { %p5946_p8 = pnand %p5944_p6, %p5941_p12 }
 0x369   : > { %5949 = shalt.err (!%p5946_p8)
}
 0x36a   : > { %s5950_s19 = scalar_lea.vmem %s1260_s23, 16  ;;  %s5957_s24 = scalar_lea.vmem %s1260_s23, 32 }
 0x36b   : > { %p5951_p5 = scmp.ne.s32.totalorder %s1260_s23, %s5950_s19  ;;  %p5958_p13 = scmp.lt.s32.totalorder %s1260_s23, %s1260_s23 }
 0x36c   : > { %p5959_p10 = scmp.lt.s32.totalorder %s5957_s24, %s5950_s19 }
 0x36d   : > { %p5953_p0 = pnand %p5951_p5, %p7655_p9 }
 0x36e   : > { %p5960_p7 = por %p5959_p10, %p5958_p13 }
 0x36f   : > { %p5954_p4 = pneg %p5953_p0 }
 0x371   : > { %p5961_p1 = pnand %p5960_p7, %p5954_p4 }
 0x373   : > { %5964 = shalt.err (!%p5961_p1)
}
 0x374   : > { %s7672_s9 = sld [smem:[#allocation77_spill]]  ;;  %s7673_s1 = sld [smem:[#allocation79_spill]] }
 0x375   : > { %4801 = dma.hbm_to_vmem [thread:$0]  (!%p7656_p3), %s7671_s21, 16, %s1260_s23, [#allocation55]  }
 0x376   : > { %s1274_s12 = scalar_lea.vmem [#allocation3], %s6789_s6  ;;  %s1271_s24 = scalar_lea.sflag [#allocation4], %s6783_s4 }
 0x377   : > { %s1282_s19 = sshll.u32 %s1274_s12, 4  ;;  %p7675_p2 = scmp.ne.s32.totalorder %s7648_s20, 0  ;;  %s7044_s19 = int_to_ptr.vmem [resolvable:$true] %s1282_s19 }
 0x37a   : > { %s7674_s16 = smov %s7673_s1  ;;  %s7041_s10 = scalar_lea.hbm %s7672_s9, %s6786_s29 }
 0x37b   : > { %s7048_s15 = scalar_lea.hbm %s7673_s1, %s6786_s29  ;;  %s5965_s5 = scalar_lea.hbm %s7041_s10, 128 }
 0x37c   : > { %p5966_p9 = scmp.ne.s32.totalorder %s7041_s10, %s5965_s5  ;;  %s5970_s7 = scalar_lea.hbm %s7672_s9, 256 }
 0x37d   : > { %p5971_p3 = scmp.lt.u32.totalorder %s7041_s10, %s7672_s9  ;;  %p5972_p6 = scmp.lt.u32.totalorder %s5970_s7, %s5965_s5 }
 0x37e   : > { %p5968_p11 = pnand %p5966_p9, %p7675_p2  ;;  %p5974_p5 = scmp.lt.u32.totalorder %s5965_s5, %s7041_s10 }
 0x37f   : > { %p5973_p8 = por %p5972_p6, %p5971_p3 }
 0x380   : > { %p5969_p12 = pneg %p5968_p11 }
 0x381   : > { %p5975_p0 = por %p5974_p5, %p5973_p8 }
 0x383   : > { %p5976_p4 = pnand %p5975_p0, %p5969_p12 }
 0x385   : > { %5979 = shalt.err (!%p5976_p4)
}
 0x386   : > { %s5980_s29 = scalar_lea.vmem %s7044_s19, 128  ;;  %s6307_s23 = smov [#allocation3]  }
 0x387   : > { %p5981_p13 = scmp.ne.s32.totalorder %s7044_s19, %s5980_s29  ;;  %s5985_s1 = sshll.u32 %s6307_s23, 4  ;;  %s5986_s1 = int_to_ptr.vmem [resolvable:$false] %s5985_s1 }
 0x388   : > { %s5987_s12 = scalar_lea.vmem %s5986_s1, 256  ;;  %p5988_p1 = scmp.lt.s32.totalorder %s7044_s19, %s5986_s1 }
 0x389   : > { %p5983_p10 = pnand %p5981_p13, %p7675_p2  ;;  %p5989_p9 = scmp.lt.s32.totalorder %s5987_s12, %s5980_s29 }
 0x38b   : > { %p5984_p7 = pneg %p5983_p10  ;;  %p5990_p11 = por %p5989_p9, %p5988_p1 }
 0x38d   : > { %p5991_p3 = pnand %p5990_p11, %p5984_p7 }
 0x38f   : > { %5994 = shalt.err (!%p5991_p3)
}
 0x390   : > { %p7676_p12 = scmp.ne.s32.totalorder %s7647_s11, 0  ;;  %s1312_s5 = scalar_lea.vmem [#allocation8], %s6789_s6 }
 0x391   : > { %s1319_s7 = sshll.u32 %s1312_s5, 4  ;;  %s4150_s29 = sshll.u32 %s6231_s28, 4  ;;  %s1320_s7 = int_to_ptr.vmem [resolvable:$true] %s1319_s7 }
 0x392   : > { %4805 = dma.hbm_to_vmem [thread:$0]  (!%p7676_p12), %s7041_s10, 128, %s7044_s19, %s1271_s24  }
 0x393   : > { %s5995_s23 = scalar_lea.hbm %s7048_s15, 128  ;;  %s6000_s1 = scalar_lea.hbm %s7674_s16, 256 }
 0x394   : > { %p5996_p6 = scmp.ne.s32.totalorder %s7048_s15, %s5995_s23  ;;  %p6001_p0 = scmp.lt.u32.totalorder %s7048_s15, %s7674_s16 }
 0x395   : > { %p6002_p4 = scmp.lt.u32.totalorder %s6000_s1, %s5995_s23  ;;  %p6004_p10 = scmp.lt.u32.totalorder %s5995_s23, %s7048_s15 }
 0x396   : > { %p5998_p8 = pnand %p5996_p6, %p7675_p2 }
 0x397   : > { %p6003_p13 = por %p6002_p4, %p6001_p0 }
 0x398   : > { %p5999_p5 = pneg %p5998_p8 }
 0x399   : > { %p6005_p7 = por %p6004_p10, %p6003_p13 }
 0x39b   : > { %p6006_p1 = pnand %p6005_p7, %p5999_p5 }
 0x39d   : > { %6009 = shalt.err (!%p6006_p1)
}
 0x39e   : > { %s6010_s12 = scalar_lea.vmem %s1320_s7, 128  ;;  %s6308_s6 = smov [#allocation8]  }
 0x39f   : > { %p6011_p9 = scmp.ne.s32.totalorder %s1320_s7, %s6010_s12  ;;  %s6015_s10 = sshll.u32 %s6308_s6, 4  ;;  %s6016_s10 = int_to_ptr.vmem [resolvable:$false] %s6015_s10 }
 0x3a0   : > { %s6017_s19 = scalar_lea.vmem %s6016_s10, 256  ;;  %p6018_p6 = scmp.lt.s32.totalorder %s1320_s7, %s6016_s10 }
 0x3a1   : > { %p6013_p11 = pnand %p6011_p9, %p7675_p2  ;;  %p6019_p8 = scmp.lt.s32.totalorder %s6017_s19, %s6010_s12 }
 0x3a3   : > { %p6014_p3 = pneg %p6013_p11  ;;  %p6020_p12 = por %p6019_p8, %p6018_p6 }
 0x3a5   : > { %p6021_p0 = pnand %p6020_p12, %p6014_p3 }
 0x3a7   : > { %6024 = shalt.err (!%p6021_p0)
}
 0x3a8   : > { %p7677_p4 = scmp.ne.s32.totalorder %s7647_s11, 0  ;;  %s7678_s24 = scalar_lea.sflag [#allocation7], %s6798_s3 }
 0x3a9   : > { %s6025_s5 = scalar_lea.hbm %s6863_s8, 256  ;;  %s6030_s23 = scalar_lea.hbm %s7651_s30, 512 }
 0x3aa   : > { %4811 = dma.hbm_to_vmem [thread:$0]  (!%p7677_p4), %s7048_s15, 128, %s1320_s7, %s7678_s24  }
 0x3ab   : > { %p6026_p5 = scmp.ne.s32.totalorder %s6863_s8, %s6025_s5  ;;  %p6031_p12 = scmp.lt.u32.totalorder %s6863_s8, %s7651_s30 }
 0x3ac   : > { %p6032_p7 = scmp.lt.u32.totalorder %s6030_s23, %s6025_s5  ;;  %p6034_p9 = scmp.lt.u32.totalorder %s6025_s5, %s6863_s8 }
 0x3ad   : > { %p6028_p13 = pnand %p6026_p5, %p7675_p2 }
 0x3ae   : > { %p6033_p1 = por %p6032_p7, %p6031_p12 }
 0x3af   : > { %p6029_p10 = pneg %p6028_p13 }
 0x3b0   : > { %p6035_p11 = por %p6034_p9, %p6033_p1 }
 0x3b2   : > { %p6036_p3 = pnand %p6035_p11, %p6029_p10 }
 0x3b4   : > { %6039 = shalt.err (!%p6036_p3)
}
 0x3b5   : > { %s6040_s1 = scalar_lea.vmem %s6867_s25, 256  ;;  %s6309_s15 = smov [#allocation11]  }
 0x3b6   : > { %p6041_p6 = scmp.ne.s32.totalorder %s6867_s25, %s6040_s1  ;;  %s6045_s7 = sshll.u32 %s6309_s15, 4  ;;  %s6046_s7 = int_to_ptr.vmem [resolvable:$false] %s6045_s7 }
 0x3b7   : > { %s6047_s12 = scalar_lea.vmem %s6046_s7, 512  ;;  %p6048_p5 = scmp.lt.s32.totalorder %s6867_s25, %s6046_s7 }
 0x3b8   : > { %p6043_p8 = pnand %p6041_p6, %p7675_p2  ;;  %p6049_p13 = scmp.lt.s32.totalorder %s6047_s12, %s6040_s1 }
 0x3ba   : > { %p6044_p0 = pneg %p6043_p8  ;;  %p6050_p12 = por %p6049_p13, %p6048_p5 }
 0x3bc   : > { %p6051_p7 = pnand %p6050_p12, %p6044_p0 }
 0x3be   : > { %6054 = shalt.err (!%p6051_p7)
}
 0x3bf   : > { %s7679_s6 = smov 8   ;;  %s7680_s10 = smov 128  }
 0x3c0   : > { %s7681_s19 = scalar_lea.sflag [#allocation10], %s6798_s3  ;;  %s7682_s24 = sld [smem:[#allocation83_spill]] }
 0x3c1   : > { %4817 = dma.hbm_to_vmem [thread:$0]  (!%p7677_p4), %s6863_s8, 256, %s6867_s25, %s7681_s19, %s7680_s10, %s7680_s10, %s7679_s6  }
 0x3c2   : > { %s1389_s23 = scalar_lea.vmem [#allocation14], %s6783_s4 }
 0x3c3   : > { %s1396_s1 = sshll.u32 %s1389_s23, 4  ;;  %s1397_s1 = int_to_ptr.vmem [resolvable:$true] %s1396_s1 }
 0x3c6   : > { %s7110_s5 = scalar_lea.hbm %s7682_s24, %s4150_s29  ;;  %s6060_s7 = scalar_lea.hbm %s7682_s24, 32 }
 0x3c7   : > { %s6055_s15 = scalar_lea.hbm %s7110_s5, 16  ;;  %p6061_p11 = scmp.lt.u32.totalorder %s7110_s5, %s7682_s24 }
 0x3c8   : > { %p6056_p10 = scmp.ne.s32.totalorder %s7110_s5, %s6055_s15  ;;  %p6062_p3 = scmp.lt.u32.totalorder %s6060_s7, %s6055_s15 }
 0x3c9   : > { %p6064_p8 = scmp.lt.u32.totalorder %s6055_s15, %s7110_s5 }
 0x3ca   : > { %p6058_p1 = pnand %p6056_p10, %p7675_p2  ;;  %p6063_p6 = por %p6062_p3, %p6061_p11 }
 0x3cc   : > { %p6059_p9 = pneg %p6058_p1  ;;  %p6065_p0 = por %p6064_p8, %p6063_p6 }
 0x3ce   : > { %p6066_p5 = pnand %p6065_p0, %p6059_p9 }
 0x3d0   : > { %6069 = shalt.err (!%p6066_p5)
}
 0x3d1   : > { %s6070_s8 = scalar_lea.vmem %s1397_s1, 16  ;;  %s6310_s4 = smov [#allocation14]  }
 0x3d2   : > { %p6071_p13 = scmp.ne.s32.totalorder %s1397_s1, %s6070_s8  ;;  %s6075_s25 = sshll.u32 %s6310_s4, 4  ;;  %s6076_s25 = int_to_ptr.vmem [resolvable:$false] %s6075_s25 }
 0x3d3   : > { %s6077_s29 = scalar_lea.vmem %s6076_s25, 32  ;;  %p6078_p10 = scmp.lt.s32.totalorder %s1397_s1, %s6076_s25 }
 0x3d4   : > { %p6073_p12 = pnand %p6071_p13, %p7675_p2  ;;  %p6079_p1 = scmp.lt.s32.totalorder %s6077_s29, %s6070_s8 }
 0x3d6   : > { %p6074_p7 = pneg %p6073_p12  ;;  %p6080_p4 = por %p6079_p1, %p6078_p10 }
 0x3d8   : > { %p6081_p3 = pnand %p6080_p4, %p6074_p7 }
 0x3da   : > { %6084 = shalt.err (!%p6081_p3)
}
 0x3db   : > { %p7683_p11 = scmp.ne.s32.totalorder %s7647_s11, 0  ;;  %s7684_s12 = scalar_lea.sflag [#allocation13], %s6798_s3 }
 0x3dc   : > { %s7685_s6 = sld [smem:[#allocation116_spill]] }
 0x3dd   : > { %4823 = dma.hbm_to_vmem [thread:$0]  (!%p7683_p11), %s7110_s5, 16, %s1397_s1, %s7684_s12  }
 0x3e2   : > { %p7686_p9 = scmp.ne.s32.totalorder %s7685_s6, 0 }
 0x3e3   : > { %s7131_s20 = sand.u32 (!%p7686_p9), 1, %s6219_s22   ;;  %p7687_p2 = scmp.ne.s32.totalorder (!%p7686_p9), %s7643_s26, 0 }
 0x3e4   : > { %1405 = sbr.rel (%p7686_p9) target bundleno = 5352 (0x14e8), region = 160  ;;  %s7134_s10 = sshll.u32 (!%p7686_p9), %s7131_s20, 3 }
 0x3e5   : > { %s1408_s19 = scalar_lea.sflag (!%p7686_p9), [#allocation4], %s7131_s20  ;;  %s1411_s23 = scalar_lea.vmem (!%p7686_p9), [#allocation3], %s7134_s10 }
 0x3eb   : > { %6138 = dma.done.wait (%p7687_p2), %s1408_s19, 128  }
 0x3ec   : > { %6140 = vsyncadd (%p7687_p2), %s1408_s19, 4294967168  ;;  %s1416_s11 = sand.u32 1, %s6536_s2   ;;  %s1420_s5 = scalar_lea.vmem [#allocation6], %s7134_s10 }
 0x3ed   : > { %s1417_s3 = scalar_lea.sflag [#allocation7], %s1416_s11 }
 0x3ee   : > { %6142 = dma.done.wait (%p7687_p2), %s1417_s3, 256  }
 0x3ef   : > { %6144 = vsyncadd (%p7687_p2), %s1417_s3, 4294967040  ;;  %s1429_s1 = scalar_lea.vmem [#allocation8], %s7134_s10  ;;  %s1435_s15 = scalar_lea.sflag [#allocation10], %s1416_s11 }
 0x3f0   : > { %s1438_s7 = scalar_lea.vmem [#allocation9], %s7134_s10 }
 0x3f1   : > { %6146 = dma.done.wait (%p7687_p2), %s1435_s15, 384  }
 0x3f2   : > { %6148 = vsyncadd (%p7687_p2), %s1435_s15, 4294966912  ;;  %s4156_s8 = sshll.u32 %s7131_s20, 4  ;;  %s1453_s25 = scalar_lea.sflag [#allocation13], %s1416_s11 }
 0x3f3   : > { %s7155_s4 = scalar_lea.vmem [#allocation11], %s4156_s8  ;;  %s7157_s29 = scalar_lea.vmem [#allocation12], %s4156_s8 }
 0x3f4   : > { %6150 = dma.done.wait (%p7687_p2), %s1453_s25, 272  }
 0x3f5   : > { %6152 = vsyncadd (%p7687_p2), %s1453_s25, 4294967024  ;;  %s1464_s12 = scalar_lea.vmem [#allocation14], %s7131_s20  ;;  %p7688_p4 = scmp.eq.s32.totalorder %s6536_s2, 0 }
 0x3f7   : > { %6154 = dma.done.wait (%p7688_p4), [#allocation16], 528   ;;  %p7689_p6 = pmov %p7688_p4 }
 0x3f8   : > { %p7690_p8 = pmov %p7688_p4 }
 0x3f9   : > { %6156 = vsyncadd (%p7689_p6), [#allocation16], 4294966768 }
 0x3fa   : > { %6158 = dma.done.wait (%p7690_p8), [#allocation19], 528   ;;  %p7691_p0 = pmov %p7688_p4 }
 0x3fc   : > { %6160 = vsyncadd (%p7691_p0), [#allocation19], 4294966768  ;;  %p7692_p5 = pmov %p7691_p0 }
 0x3fd   : > { %p7693_p13 = pmov %p7691_p0 }
 0x3fe   : > { %6162 = dma.done.wait (%p7692_p5), [#allocation22], 528  }
 0x3ff   : > { %6164 = vsyncadd (%p7693_p13), [#allocation22], 4294966768  ;;  %p7694_p12 = pmov %p7691_p0 }
 0x400   : > { %p7695_p7 = pmov %p7691_p0 }
 0x401   : > { %6166 = dma.done.wait (%p7694_p12), [#allocation25], 528  }
 0x402   : > { %6168 = vsyncadd (%p7695_p7), [#allocation25], 4294966768  ;;  %p7696_p10 = pmov %p7691_p0 }
 0x403   : > { %p7697_p1 = pmov %p7691_p0 }
 0x404   : > { %6170 = dma.done.wait (%p7696_p10), [#allocation28], 528  }
 0x405   : > { %6172 = vsyncadd (%p7697_p1), [#allocation28], 4294966768  ;;  %p7698_p3 = pmov %p7691_p0 }
 0x406   : > { %p7699_p11 = pmov %p7691_p0 }
 0x407   : > { %6174 = dma.done.wait (%p7698_p3), [#allocation31], 528  }
 0x408   : > { %6176 = vsyncadd (%p7699_p11), [#allocation31], 4294966768  ;;  %p7700_p9 = pmov %p7691_p0 }
 0x409   : > { %p7701_p2 = pmov %p7691_p0 }
 0x40a   : > { %6178 = dma.done.wait (%p7700_p9), [#allocation34], 528  }
 0x40b   : > { %6180 = vsyncadd (%p7701_p2), [#allocation34], 4294966768  ;;  %p7702_p4 = pmov %p7691_p0 }
 0x40c   : > { %p7703_p6 = pmov %p7691_p0 }
 0x40d   : > { %6182 = dma.done.wait (%p7702_p4), [#allocation37], 528  }
 0x40e   : > { %6184 = vsyncadd (%p7703_p6), [#allocation37], 4294966768  ;;  %p7704_p8 = pmov %p7691_p0 }
 0x410   : > { %6186 = dma.done.wait (%p7704_p8), [#allocation40], 528  }
 0x411   : > { %6188 = vsyncadd (%p7691_p0), [#allocation40], 4294966768  ;;  %p7705_p5 = pmov %p7691_p0 }
 0x412   : > { %p7706_p13 = pmov %p7691_p0 }
 0x413   : > { %6190 = dma.done.wait (%p7705_p5), [#allocation43], 1040  }
 0x414   : > { %6192 = vsyncadd (%p7706_p13), [#allocation43], 4294966256  ;;  %p7707_p12 = pmov %p7691_p0 }
 0x415   : > { %p7708_p7 = pmov %p7691_p0 }
 0x416   : > { %6194 = dma.done.wait (%p7707_p12), [#allocation46], 32  }
 0x417   : > { %6196 = vsyncadd (%p7708_p7), [#allocation46], 4294967264  ;;  %p7709_p10 = pmov %p7691_p0 }
 0x418   : > { %p7710_p1 = pmov %p7691_p0 }
 0x419   : > { %6198 = dma.done.wait (%p7709_p10), [#allocation49], 32  }
 0x41a   : > { %6200 = vsyncadd (%p7710_p1), [#allocation49], 4294967264  ;;  %p7711_p3 = pmov %p7691_p0 }
 0x41b   : > { %p7712_p11 = pmov %p7691_p0 }
 0x41c   : > { %6202 = dma.done.wait (%p7711_p3), [#allocation52], 32  }
 0x41d   : > { %6204 = vsyncadd (%p7712_p11), [#allocation52], 4294967264  ;;  %p7713_p9 = pmov %p7691_p0 }
 0x41e   : > { %p7714_p2 = pmov %p7691_p0 }
 0x41f   : > { %6206 = dma.done.wait (%p7713_p9), [#allocation55], 32  }
 0x420   : > { %6208 = vsyncadd (%p7714_p2), [#allocation55], 4294967264  ;;  %v6311_v0 = vmov 0.0   ;;  %vm6312_vm0 = vmmov 0   ;;  %v5009_v1 = vld [vmem:[#allocation15] sm:$0xff]   ;;  %v5010_v2 = vld [vmem:[#allocation15 + $0x8] sm:$0xff]  }
 0x421   : > { %4365 = vmatprep.subr.bf16.mxu1 %v6311_v0  ;;  %4373 = vmatprep.mubr.msk.bf16.mxu1 %vm6312_vm0, %v6311_v0  ;;  %v5011_v3 = vld [vmem:[#allocation15 + $0x10] sm:$0xff]   ;;  %v7229_v4 = vld [vmem:[%s1411_s23] sm:$0xff]  ;;  %vm1743_vm1 = vcmask 523264   ;;  %vm1959_vm2 = vcmask 130048   ;;  %s6313_s2 = smov 96   ;;  %s6314_s26 = smov 112  }
 0x422   : > { %4389 = vmatprep.subr.bf16.mxu0 %v6311_v0  ;;  %4397 = vmatprep.mubr.msk.bf16.mxu0 %vm6312_vm0, %v6311_v0  ;;  %v7233_v5 = vld [vmem:[%s1420_s5] sm:$0xff]  ;;  %v5013_v8 = vld [vmem:[#allocation18] sm:$0xff]   ;;  %v4187_v26 = vld [vmem:[#allocation17] ss:$0 sm:$0xff]  ;;  %s6315_s6 = smov 80   ;;  %vm2022_vm3 = vcmask 1043456  }
 0x423   : > { %4366 = vmatpush3.bf16.msra.mxu1 %v5009_v1  ;;  %v5012_v6 = vld [vmem:[#allocation15 + $0x18] sm:$0xff]   ;;  %v1702_v7 = vadd.f32 %v7233_v5, %v7229_v4  ;;  %v5014_v10 = vld [vmem:[#allocation18 + $0x8] sm:$0xff]   ;;  %v4193_v27 = vld [vmem:[#allocation20] ss:$0 sm:$0xff]  ;;  %vm2006_vm4 = vcmask 64512   ;;  %s6316_s19 = smov 16  }
 0x424   : > { %4367 = vmatprep.subr.bf16.mxu1 %v6311_v0  ;;  %v5015_v11 = vld [vmem:[#allocation18 + $0x10] sm:$0xff]   ;;  %v1695_v12 = vld [vmem:[%s1429_s1] sm:$0xff]  ;;  %s6317_s23 = smov 32   ;;  %s6318_s11 = smov 48   ;;  %vm2184_vm5 = vcmask 261248   ;;  %vm2300_vm6 = vcmask 392448  }
 0x425   : > { %v1704_v9 = vpack.c.bf16 %v1702_v7, %v1702_v7  ;;  %v1696_v13 = vld [vmem:[%s1438_s7] sm:$0xff]  ;;  %v5017_v17 = vld [vmem:[#allocation21] sm:$0xff]   ;;  %v1872_v21 = vpack.c.bf16 %v1695_v12, %v1695_v12  ;;  %vm2416_vm7 = vcmask 523648   ;;  %s7715_s3 = sld [smem:[#allocation114_spill]]  ;;  %s7716_s5 = sld [smem:[#allocation112_spill]] }
 0x426   : > { %v5016_v14 = vld [vmem:[#allocation18 + $0x18] sm:$0xff]   ;;  %v1787_v15 = vadd.f32 %v1696_v13, %v1695_v12  ;;  %4390 = vmatpush3.bf16.msra.mxu0 %v5017_v17  ;;  %v5018_v18 = vld [vmem:[#allocation21 + $0x8] sm:$0xff]   ;;  %v4199_v38 = vld [vmem:[#allocation23] ss:$0 sm:$0xff]  ;;  %s1691_s15 = scalar_lea.vmem [#allocation57], %s7134_s10  ;;  %p7717_p6 = scmp.ne.s32.totalorder %s7644_s17, 0 }
 0x427   : > { %4368 = vmatpush3.bf16.msra.mxu1 %v5010_v2  ;;  %4391 = vmatprep.subr.bf16.mxu0 %v6311_v0  ;;  %v5019_v19 = vld [vmem:[#allocation21 + $0x10] sm:$0xff]   ;;  %v5020_v20 = vld [vmem:[#allocation21 + $0x18] sm:$0xff]   ;;  %s3596_s7 = sshll.u32 %s1691_s15, 4  ;;  %s7468_s7 = int_to_ptr.vmem [resolvable:$true] %s3596_s7 }
 0x428   : > { %4369 = vmatprep.subr.bf16.mxu1 %v6311_v0  ;;  %v1789_v16 = vpack.c.bf16 %v1787_v15, %v1787_v15  ;;  %s6085_s25 = scalar_lea.vmem %s7468_s7, 128 }
 0x429   : > { %p6086_p4 = scmp.ne.s32.totalorder %s7468_s7, %s6085_s25 }
 0x42a   : > { %4392 = vmatpush3.bf16.msra.mxu0 %v5018_v18 }
 0x42b   : > { %4370 = vmatpush3.bf16.msra.mxu1 %v5011_v3  ;;  %4393 = vmatprep.subr.bf16.mxu0 %v6311_v0  ;;  %s4274_s1 = sshll.u32 %s7715_s3, 7  ;;  %p6087_p8 = pnand %p6086_p4, %p7717_p6 }
 0x42c   : > { %4371 = vmatprep.subr.bf16.mxu1 %v6311_v0  ;;  %s7466_s8 = scalar_lea.hbm %s7716_s5, %s4274_s1 }
 0x42d   : > { %p6088_p0 = pneg %p6087_p8 }
 0x42e   : > { %4394 = vmatpush3.bf16.msra.mxu0 %v5019_v19 }
 0x42f   : > { %4372 = vmatpush3.bf16.msra.mxu1 %v5012_v6  ;;  %4395 = vmatprep.subr.bf16.mxu0 %v6311_v0 }
 0x430   : > { %4377 = vmatprep.subr.bf16.mxu1 %v6311_v0 }
 0x432   : > { %4374 = vmatmul.mubr.msk.bf16.vlgmr.msra.gmra.mrb[0].mxu1 %vm1743_vm1, %v1704_v9  ;;  %4396 = vmatpush3.bf16.msra.mxu0 %v5020_v20 }
 0x433   : > { %4378 = vmatpush3.bf16.msra.mxu1 %v5013_v8  ;;  %4385 = vmatprep.mubr.msk.bf16.mxu1 %vm6312_vm0, %v6311_v0 }
 0x434   : > { %4379 = vmatprep.subr.bf16.mxu1 %v6311_v0  ;;  %4413 = vmatprep.subr.bf16.mxu0 %v6311_v0 }
 0x435   : > { %4398 = vmatmul.mubr.msk.bf16.vlgmr.msra.gmra.mrb[0].mxu0 %vm1743_vm1, %v1872_v21 }
 0x436   : > { %4415 = vmatprep.mubr.msk.bf16.mxu0 %vm6312_vm0, %v6311_v0 }
 0x437   : > { %4380 = vmatpush3.bf16.msra.mxu1 %v5014_v10 }
 0x438   : > { %4381 = vmatprep.subr.bf16.mxu1 %v6311_v0 }
 0x43b   : > { %4382 = vmatpush3.bf16.msra.mxu1 %v5015_v11 }
 0x43c   : > { %4383 = vmatprep.subr.bf16.mxu1 %v6311_v0 }
 0x43f   : > { %4384 = vmatpush3.bf16.msra.mxu1 %v5016_v14 }
 0x440   : > { %4401 = vmatprep.subr.bf16.mxu1 %v6311_v0 }
 0x442   : > { %4386 = vmatmul.mubr.msk.bf16.vlgmr.msra.gmra.mrb[4].mxu1 %vm1743_vm1, %v1789_v16 }
 0x443   : > { %4403 = vmatprep.mubr.msk.bf16.mxu1 %vm6312_vm0, %v6311_v0 }
 0x505   : > { %v1781_v22 = vpop.f32.mrb[0].mxu1 }
 0x506   : > { %v4375_v23 = vpop.f32.mrb[1].mxu1  ;;  %v1782_v28 = vadd.f32 %v4187_v26, %v1781_v22 }
 0x507   : > { %v1784_v24 = vpop.f32.mrb[2].mxu1 }
 0x508   : > { %v4376_v25 = vpop.f32.mrb[3].mxu1  ;;  %v1955_v33 = vmul.f32 0.25, %v1782_v28  ;;  %v1948_v39 = vpop.f32.mrb[0].mxu0 }
 0x509   : > { %v1949_v40 = vadd.f32 %v4199_v38, %v1948_v39  ;;  %v4399_v41 = vpop.f32.mrb[1].mxu0 }
 0x50a   : > { %v1956_v37 = vpack.c.bf16 %v1955_v33, %v1955_v33  ;;  %v1951_v42 = vpop.f32.mrb[2].mxu0 }
 0x50b   : > { %v7272_v43 = vpack.c.bf16 %v1949_v40, %v1949_v40  ;;  %v4400_v44 = vpop.f32.mrb[3].mxu0 }
 0x50d   : > { %v2024_v46 = vsel %vm2022_vm3, %v7272_v43, 0 }
 0x515   : > { %v1865_v29 = vpop.f32.mrb[4].mxu1 }
 0x516   : > { %v1866_v30 = vadd.f32 %v4193_v27, %v1865_v29  ;;  %v4387_v31 = vpop.f32.mrb[5].mxu1 }
 0x517   : > { %v1868_v32 = vpop.f32.mrb[6].mxu1 }
 0x518   : > { %v1957_v34 = vpack.c.bf16 %v1866_v30, %v1866_v30  ;;  %v4388_v35 = vpop.f32.mrb[7].mxu1 }
 0x51a   : > { %2188 = vrot.lane.b32.xlu1 %v1957_v34, %s6313_s2  ;;  %2071 = vrot.lane.b32.xlu0 %v1957_v34, %s6314_s26  ;;  %v1964_v36 = vsel %vm1959_vm2, %v1957_v34, 0 }
 0x51b   : > { %4402 = vmatpush3.bf16.xpose.msra.mxu1 %v1964_v36 }
 0x51c   : > { %4407 = vmatprep.subr.bf16.mxu1 %v6311_v0 }
 0x51e   : > { %2186 = vrot.lane.b32.xlu1 %v1956_v37, %s6313_s2  ;;  %2068 = vrot.lane.b32.xlu0 %v1956_v37, %s6314_s26 }
 0x522   : > { %2302 = vrot.lane.b32.xlu1 %v1956_v37, %s6315_s6  ;;  %2304 = vrot.lane.b32.xlu0 %v1957_v34, %s6315_s6 }
 0x523   : > { %4404 = vmatmul.mubr.msk.bf16.vlgmr.msra.gmra.mrb[8].mxu1 %vm1959_vm2, %v1956_v37 }
 0x524   : > { %4409 = vmatprep.mubr.msk.bf16.mxu1 %vm6312_vm0, %v6311_v0  ;;  %4408 = vmatpush3.bf16.msra.mxu1 %v2024_v46 }
 0x525   : > { %4419 = vmatprep.subr.bf16.mxu1 %v6311_v0 }
 0x58c   : > { %v2072_v45 = vpop.permute.xlu0 %2071  ;;  %v2189_v48 = vpop.permute.xlu1 %2188 }
 0x58d   : > { %v2077_v47 = vsel %vm1959_vm2, %v2072_v45, 0  ;;  %v2194_v50 = vsel %vm1959_vm2, %v2189_v48, 0 }
 0x58e   : > { %4414 = vmatpush3.bf16.xpose.msra.mxu0 %v2077_v47 }
 0x58f   : > { %4425 = vmatprep.subr.bf16.mxu0 %v6311_v0 }
 0x590   : > { %v2069_v49 = vpop.permute.xlu0 %2068  ;;  %v2187_v52 = vpop.permute.xlu1 %2186 }
 0x594   : > { %v2305_v51 = vpop.permute.xlu0 %2304  ;;  %v2303_v54 = vpop.permute.xlu1 %2302 }
 0x595   : > { %4416 = vmatmul.mubr.msk.bf16.vlgmr.msra.gmra.mrb[4].mxu0 %vm1959_vm2, %v2069_v49  ;;  %v2310_v53 = vsel %vm1959_vm2, %v2305_v51, 0 }
 0x596   : > { %4426 = vmatpush3.bf16.xpose.msra.mxu0 %v2194_v50  ;;  %4427 = vmatprep.mubr.msk.bf16.mxu0 %vm6312_vm0, %v6311_v0 }
 0x597   : > { %4437 = vmatprep.subr.bf16.mxu0 %v6311_v0 }
 0x59d   : > { %4428 = vmatmul.mubr.msk.bf16.vlgmr.msra.gmra.mrb[8].mxu0 %vm1959_vm2, %v2187_v52 }
 0x59e   : > { %4438 = vmatpush3.bf16.xpose.msra.mxu0 %v2310_v53  ;;  %4439 = vmatprep.mubr.msk.bf16.mxu0 %vm6312_vm0, %v6311_v0 }
 0x59f   : > { %4449 = vmatprep.subr.bf16.mxu0 %v6311_v0 }
 0x5a5   : > { %4440 = vmatmul.mubr.msk.bf16.vlgmr.msra.gmra.mrb[12].mxu0 %vm1959_vm2, %v2303_v54 }
 0x5a6   : > { %4457 = vmatprep.mubr.msk.bf16.mxu0 %vm6312_vm0, %v6311_v0 }
 0x5f6   : > { %v2000_v55 = vpop.f32.mrb[8].mxu1 }
 0x5f7   : > { %v4405_v56 = vpop.f32.mrb[9].mxu1  ;;  %v2007_v57 = vsel %vm2006_vm4, %v2000_v55, -inf }
 0x5f8   : > { %2008 = vmax.xlane.f32.xlu0 %v2007_v57  ;;  %v2003_v58 = vpop.f32.mrb[10].mxu1 }
 0x5f9   : > { %v4406_v59 = vpop.f32.mrb[11].mxu1 }
 0x668   : > { %v2113_v60 = vpop.f32.mrb[4].mxu0 }
 0x669   : > { %v4417_v61 = vpop.f32.mrb[5].mxu0  ;;  %v2119_v62 = vsel %vm2006_vm4, %v2113_v60, -inf }
 0x66a   : > { %2120 = vmax.xlane.f32.xlu1 %v2119_v62  ;;  %v2116_v63 = vpop.f32.mrb[6].mxu0  ;;  %v5022_v61 = vld [vmem:[#allocation24 + $0x8] sm:$0xff]  }
 0x66b   : > { %v4418_v1 = vpop.f32.mrb[7].mxu0 }
 0x670   : > { %v2230_v2 = vpop.f32.mrb[8].mxu0 }
 0x671   : > { %v4429_v3 = vpop.f32.mrb[9].mxu0  ;;  %v2236_v6 = vsel %vm2006_vm4, %v2230_v2, -inf }
 0x672   : > { %v2233_v7 = vpop.f32.mrb[10].mxu0  ;;  %2237 = vmax.xlane.f32.xlu0 %v2236_v6  ;;  %v5023_v3 = vld [vmem:[#allocation24 + $0x10] sm:$0xff]   ;;  %v5024_v6 = vld [vmem:[#allocation24 + $0x18] sm:$0xff]  }
 0x673   : > { %v4430_v8 = vpop.f32.mrb[11].mxu0 }
 0x678   : > { %v2346_v9 = vpop.f32.mrb[12].mxu0 }
 0x679   : > { %v4441_v10 = vpop.f32.mrb[13].mxu0  ;;  %v2352_v11 = vsel %vm2006_vm4, %v2346_v9, -inf }
 0x67a   : > { %v2349_v12 = vpop.f32.mrb[14].mxu0  ;;  %2353 = vmax.xlane.f32.xlu0 %v2352_v11 }
 0x67b   : > { %v4442_v13 = vpop.f32.mrb[15].mxu0 }
 0x685   : > { %v2009_v14 = vpop.xlane.xlu0 %2008 }
 0x686   : > { %v2010_v15 = vsub.f32 %v2000_v55, %v2009_v14 }
 0x688   : > { %v2011_v16 = vmul.f32 1.442695, %v2010_v15 }
 0x68a   : > { %5053 = vpow2.f32 %v2011_v16 }
 0x694   : > { %v5054_v17 = vpop.eup %5053 }
 0x695   : > { %v2013_v18 = vsel %vm2006_vm4, %v5054_v17, 0.0 }
 0x696   : > { %2014 = vadd.xlane.f32.xlu1 %v2013_v18 }
 0x6a7   : > { %2132 = vrot.lane.b32.xlu1 %v7272_v43, %s6314_s26 }
 0x6f7   : > { %v2121_v19 = vpop.xlane.xlu1 %2120 }
 0x6f8   : > { %v2122_v20 = vsub.f32 %v2113_v60, %v2121_v19  ;;  %v5021_v60 = vld [vmem:[#allocation24] sm:$0xff]  }
 0x6f9   : > { %4450 = vmatpush3.bf16.msra.mxu0 %v5021_v60 }
 0x6fa   : > { %v2123_v21 = vmul.f32 1.442695, %v2122_v20  ;;  %4451 = vmatprep.subr.bf16.mxu0 %v6311_v0  ;;  %v4213_v20 = vld [vmem:[#allocation26] ss:$0 sm:$0xff] }
 0x6fc   : > { %5055 = vpow2.f32 %v2123_v21 }
 0x6fd   : > { %4452 = vmatpush3.bf16.msra.mxu0 %v5022_v61 }
 0x6fe   : > { %4453 = vmatprep.subr.bf16.mxu0 %v6311_v0 }
 0x6ff   : > { %v2238_v22 = vpop.xlane.xlu0 %2237 }
 0x700   : > { %v2239_v23 = vsub.f32 %v2230_v2, %v2238_v22 }
 0x701   : > { %4454 = vmatpush3.bf16.msra.mxu0 %v5023_v3 }
 0x702   : > { %v2240_v24 = vmul.f32 1.442695, %v2239_v23  ;;  %4455 = vmatprep.subr.bf16.mxu0 %v6311_v0 }
 0x704   : > { %5057 = vpow2.f32 %v2240_v24 }
 0x705   : > { %4456 = vmatpush3.bf16.msra.mxu0 %v5024_v6 }
 0x706   : > { %v5056_v25 = vpop.eup %5055  ;;  %4473 = vmatprep.subr.bf16.mxu0 %v6311_v0 }
 0x707   : > { %v2354_v26 = vpop.xlane.xlu0 %2353  ;;  %v2125_v27 = vsel %vm2006_vm4, %v5056_v25, 0.0 }
 0x708   : > { %v2355_v28 = vsub.f32 %v2346_v9, %v2354_v26  ;;  %2126 = vadd.xlane.f32.xlu0 %v2125_v27 }
 0x70a   : > { %v2356_v29 = vmul.f32 1.442695, %v2355_v28  ;;  %v5025_v28 = vld [vmem:[#allocation30] sm:$0xff]  }
 0x70c   : > { %5059 = vpow2.f32 %v2356_v29  ;;  %v5026_v29 = vld [vmem:[#allocation30 + $0x8] sm:$0xff]  }
 0x70e   : > { %v5058_v30 = vpop.eup %5057 }
 0x70f   : > { %v2242_v31 = vsel %vm2006_vm4, %v5058_v30, 0.0 }
 0x710   : > { %2243 = vadd.xlane.f32.xlu1 %v2242_v31 }
 0x716   : > { %v5060_v32 = vpop.eup %5059 }
 0x717   : > { %v2358_v33 = vsel %vm2006_vm4, %v5060_v32, 0.0 }
 0x718   : > { %2359 = vadd.xlane.f32.xlu0 %v2358_v33 }
 0x721   : > { %2364 = vrot.lane.b32.xlu1 %v7272_v43, %s6315_s6 }
 0x723   : > { %v2015_v34 = vpop.xlane.xlu1 %2014 }
 0x724   : > { %5061 = vrcp.f32 %v2015_v34  ;;  %v5027_v34 = vld [vmem:[#allocation30 + $0x10] sm:$0xff]  }
 0x727   : > { %v2133_v37 = vpop.permute.xlu1 %2132 }
 0x728   : > { %v2138_v39 = vsel %vm2022_vm3, %v2133_v37, 0  ;;  %v7348_v37 = vld [vmem:[%s7155_s4 + $0x8] sm:$0xff] }
 0x72e   : > { %v5062_v35 = vpop.eup %5061  ;;  %2248 = vrot.lane.b32.xlu0 %v7272_v43, %s6313_s2 }
 0x72f   : > { %v2017_v36 = vmul.f32 %v5062_v35, %v5054_v17  ;;  %v5028_v35 = vld [vmem:[#allocation30 + $0x18] sm:$0xff]  }
 0x731   : > { %v2018_v38 = vpack.c.bf16 %v2017_v36, %v2017_v36  ;;  %v7345_v36 = vld [vmem:[%s7155_s4] sm:$0xff]  ;;  %s3582_s4 = scalar_lea.sflag [#allocation5], %s7131_s20 }
 0x733   : > { %4410 = vmatmul.mubr.msk.bf16.vlgmr.msra.gmra.mrb[12].mxu1 %vm2006_vm4, %v2018_v38  ;;  %v1699_v38 = vld [vmem:[%s7157_s29] sm:$0xff] }
 0x734   : > { %4420 = vmatpush3.bf16.msra.mxu1 %v2138_v39  ;;  %4421 = vmatprep.mubr.msk.bf16.mxu1 %vm6312_vm0, %v6311_v0  ;;  %v1700_v39 = vld [vmem:[%s7157_s29 + $0x8] sm:$0xff]  ;;  %s6319_s29 = smov [#allocation57]  }
 0x735   : > { %4431 = vmatprep.subr.bf16.mxu1 %v6311_v0  ;;  %s6089_s10 = sshll.u32 %s6319_s29, 4  ;;  %s6090_s10 = int_to_ptr.vmem [resolvable:$false] %s6089_s10 }
 0x736   : > { %p6092_p5 = scmp.lt.s32.totalorder %s7468_s7, %s6090_s10 }
 0x795   : > { %v2127_v40 = vpop.xlane.xlu0 %2126 }
 0x796   : > { %5063 = vrcp.f32 %v2127_v40  ;;  %v2616_v40 = vadd.f32 %v1699_v38, %v7345_v36 }
 0x79d   : > { %v2244_v41 = vpop.xlane.xlu1 %2243 }
 0x79e   : > { %5065 = vrcp.f32 %v2244_v41  ;;  %v2617_v41 = vadd.f32 %v1700_v39, %v7348_v37 }
 0x7a0   : > { %v5064_v42 = vpop.eup %5063 }
 0x7a1   : > { %v2129_v44 = vmul.f32 %v5064_v42, %v5056_v25  ;;  %v2365_v50 = vpop.permute.xlu1 %2364  ;;  %v2619_v42 = vpack.c.bf16 %v2617_v41, %v2616_v40 }
 0x7a2   : > { %v2370_v52 = vsel %vm2022_vm3, %v2365_v50, 0 }
 0x7a3   : > { %v2130_v43 = vpack.c.bf16 %v2129_v44, %v2129_v44  ;;  %v5029_v44 = vld [vmem:[#allocation27] sm:$0xff]  }
 0x7a5   : > { %4422 = vmatmul.mubr.msk.bf16.vlgmr.msra.gmra.mrb[16].mxu1 %vm2006_vm4, %v2130_v43  ;;  %v2360_v45 = vpop.xlane.xlu0 %2359  ;;  %v5030_v43 = vld [vmem:[#allocation27 + $0x8] sm:$0xff]  }
 0x7a6   : > { %5067 = vrcp.f32 %v2360_v45  ;;  %4433 = vmatprep.mubr.msk.bf16.mxu1 %vm6312_vm0, %v6311_v0  ;;  %v5031_v45 = vld [vmem:[#allocation27 + $0x10] sm:$0xff]  }
 0x7a8   : > { %v5066_v46 = vpop.eup %5065 }
 0x7a9   : > { %v2246_v47 = vmul.f32 %v5066_v46, %v5058_v30  ;;  %v2249_v48 = vpop.permute.xlu0 %2248  ;;  %v5032_v46 = vld [vmem:[#allocation27 + $0x18] sm:$0xff]  }
 0x7aa   : > { %v2254_v49 = vsel %vm2022_vm3, %v2249_v48, 0 }
 0x7ab   : > { %4432 = vmatpush3.bf16.msra.mxu1 %v2254_v49  ;;  %v2247_v51 = vpack.c.bf16 %v2246_v47, %v2246_v47 }
 0x7ac   : > { %4443 = vmatprep.subr.bf16.mxu1 %v6311_v0 }
 0x7ae   : > { %4434 = vmatmul.mubr.msk.bf16.vlgmr.msra.gmra.mrb[20].mxu1 %vm2006_vm4, %v2247_v51  ;;  %v4219_v51 = vld [vmem:[#allocation45] ss:$0 sm:$0xff] }
 0x7af   : > { %4444 = vmatpush3.bf16.msra.mxu1 %v2370_v52  ;;  %4445 = vmatprep.mubr.msk.bf16.mxu1 %vm6312_vm0, %v6311_v0 }
 0x7b0   : > { %v5068_v53 = vpop.eup %5067  ;;  %4461 = vmatprep.subr.bf16.mxu1 %v6311_v0 }
 0x7b1   : > { %v2362_v54 = vmul.f32 %v5068_v53, %v5060_v32  ;;  %v4220_v53 = vld [vmem:[#allocation47] ss:$0 sm:$0xff] }
 0x7b3   : > { %v2363_v55 = vpack.c.bf16 %v2362_v54, %v2362_v54 }
 0x7b6   : > { %4446 = vmatmul.mubr.msk.bf16.vlgmr.msra.gmra.mrb[24].mxu1 %vm2006_vm4, %v2363_v55 }
 0x7b7   : > { %4469 = vmatprep.mubr.msk.bf16.mxu1 %vm6312_vm0, %v6311_v0  ;;  %4462 = vmatpush3.bf16.msra.mxu1 %v5029_v44 }
 0x7b8   : > { %4463 = vmatprep.subr.bf16.mxu1 %v6311_v0 }
 0x7bb   : > { %4464 = vmatpush3.bf16.msra.mxu1 %v5030_v43 }
 0x7bc   : > { %4465 = vmatprep.subr.bf16.mxu1 %v6311_v0 }
 0x7bf   : > { %4466 = vmatpush3.bf16.msra.mxu1 %v5031_v45 }
 0x7c0   : > { %4467 = vmatprep.subr.bf16.mxu1 %v6311_v0 }
 0x7c3   : > { %4468 = vmatpush3.bf16.msra.mxu1 %v5032_v46 }
 0x7c4   : > { %4485 = vmatprep.subr.bf16.mxu1 %v6311_v0 }
 0x806   : > { %v2060_v56 = vpop.f32.mrb[12].mxu1 }
 0x807   : > { %2066 = vst.msk [vmem:[#allocation2] sm:$0xff] %vm1959_vm2, %v2060_v56  ;;  %v4411_v57 = vpop.f32.mrb[13].mxu1 }
 0x808   : > { %v2063_v58 = vpop.f32.mrb[14].mxu1 }
 0x809   : > { %v4412_v59 = vpop.f32.mrb[15].mxu1  ;;  %v4227_v58 = vld [vmem:[#allocation32] ss:$0 sm:$0xff] }
 0x878   : > { %v2174_v62 = vpop.f32.mrb[16].mxu1 }
 0x879   : > { %2181 = vrot.lane.b32.xlu1 %v2174_v62, %s6316_s19  ;;  %v4423_v63 = vpop.f32.mrb[17].mxu1 }
 0x87a   : > { %v2177_v1 = vpop.f32.mrb[18].mxu1 }
 0x87b   : > { %v4424_v2 = vpop.f32.mrb[19].mxu1 }
 0x881   : > { %v2290_v7 = vpop.f32.mrb[20].mxu1 }
 0x882   : > { %2297 = vrot.lane.b32.xlu0 %v2290_v7, %s6317_s23  ;;  %v4435_v8 = vpop.f32.mrb[21].mxu1 }
 0x883   : > { %v2293_v9 = vpop.f32.mrb[22].mxu1 }
 0x884   : > { %v4436_v10 = vpop.f32.mrb[23].mxu1 }
 0x889   : > { %v2406_v11 = vpop.f32.mrb[24].mxu1 }
 0x88a   : > { %2413 = vrot.lane.b32.xlu1 %v2406_v11, %s6318_s11  ;;  %v4447_v12 = vpop.f32.mrb[25].mxu1 }
 0x88b   : > { %v2409_v13 = vpop.f32.mrb[26].mxu1 }
 0x88c   : > { %v4448_v14 = vpop.f32.mrb[27].mxu1 }
 0x8eb   : > { %v2182_v15 = vpop.permute.xlu1 %2181 }
 0x8ec   : > { %2185 = vst.msk [vmem:[#allocation2] sm:$0xff] %vm2184_vm5, %v2182_v15  ;;  %v5033_v15 = vld [vmem:[#allocation33] sm:$0xff]  }
 0x8f4   : > { %v2298_v16 = vpop.permute.xlu0 %2297 }
 0x8f5   : > { %2301 = vst.msk [vmem:[#allocation2] sm:$0xff] %vm2300_vm6, %v2298_v16  ;;  %v5034_v16 = vld [vmem:[#allocation33 + $0x8] sm:$0xff]  }
 0x8fc   : > { %v2414_v17 = vpop.permute.xlu1 %2413 }
 0x8fd   : > { %2417 = vst.msk [vmem:[#allocation2] sm:$0xff] %vm2416_vm7, %v2414_v17  ;;  %v5035_v17 = vld [vmem:[#allocation33 + $0x10] sm:$0xff]  }
 0x904   : > { %v2418_v18 = vld [vmem:[#allocation2] sm:$0xff] }
 0x905   : > { %v2419_v19 = vpack.c.bf16 %v2418_v18, %v2418_v18  ;;  %v5036_v18 = vld [vmem:[#allocation33 + $0x18] sm:$0xff]  }
 0x907   : > { %4458 = vmatmul.mubr.msk.bf16.vlgmr.msra.gmra.mrb[16].mxu0 %vm1743_vm1, %v2419_v19  ;;  %v2703_v19 = vpack.c.bf16 %v7348_v37, %v7345_v36 }
 0x908   : > { %4481 = vmatprep.mubr.msk.bf16.mxu0 %vm6312_vm0, %v6311_v0  ;;  %4474 = vmatpush3.bf16.msra.mxu0 %v5025_v28 }
 0x909   : > { %4475 = vmatprep.subr.bf16.mxu0 %v6311_v0 }
 0x90c   : > { %4476 = vmatpush3.bf16.msra.mxu0 %v5026_v29 }
 0x90d   : > { %4477 = vmatprep.subr.bf16.mxu0 %v6311_v0 }
 0x910   : > { %4478 = vmatpush3.bf16.msra.mxu0 %v5027_v34 }
 0x911   : > { %4479 = vmatprep.subr.bf16.mxu0 %v6311_v0 }
 0x914   : > { %4480 = vmatpush3.bf16.msra.mxu0 %v5028_v35 }
 0x915   : > { %4497 = vmatprep.subr.bf16.mxu0 %v6311_v0 }
 0x917   : > { %4482 = vmatmul.mubr.msk.bf16.vlgmr.msra.gmra.mrb[20].mxu0 %vm1743_vm1, %v2619_v42 }
 0x918   : > { %4499 = vmatprep.mubr.msk.bf16.mxu0 %vm6312_vm0, %v6311_v0 }
 0x9da   : > { %v2495_v21 = vpop.f32.mrb[16].mxu0 }
 0x9db   : > { %v2496_v22 = vadd.f32 %v4213_v20, %v2495_v21  ;;  %v4459_v23 = vpop.f32.mrb[17].mxu0 }
 0x9dc   : > { %v2498_v24 = vpop.f32.mrb[18].mxu0 }
 0x9dd   : > { %v4460_v25 = vpop.f32.mrb[19].mxu0  ;;  %v2501_v26 = vadd.f32 %v2496_v22, %v7229_v4 }
 0x9df   : > { %v2504_v27 = vsel %vm1743_vm1, %v2501_v26, 0.0 }
 0x9e0   : > { %2505 = vadd.xlane.f32.xlu0 %v2504_v27  ;;  %v4239_v27 = vld [vmem:[%s1464_s12] ss:$0 sm:$0xff]  ;;  %s6091_s12 = scalar_lea.vmem %s6090_s10, 256 }
 0x9e1   : > { %p6093_p13 = scmp.lt.s32.totalorder %s6091_s12, %s6085_s25 }
 0x9e3   : > { %p6094_p12 = por %p6093_p13, %p6092_p5 }
 0x9e5   : > { %p6095_p7 = pnand %p6094_p12, %p6088_p0 }
 0x9ea   : > { %v2695_v59 = vpop.f32.mrb[20].mxu0 }
 0x9eb   : > { %v2696_v60 = vadd.f32 %v4227_v58, %v2695_v59  ;;  %v4483_v61 = vpop.f32.mrb[21].mxu0 }
 0x9ec   : > { %v2698_v62 = vpop.f32.mrb[22].mxu0 }
 0x9ed   : > { %v2699_v63 = vadd.f32 %v4227_v58, %v2698_v62  ;;  %v4484_v1 = vpop.f32.mrb[23].mxu0 }
 0x9ef   : > { %v2789_v2 = vpack.c.bf16 %v2699_v63, %v2696_v60 }
 0x9f1   : > { %v2801_v3 = vsel %vm1959_vm2, %v2789_v2, 0 }
 0x9f2   : > { %4498 = vmatpush3.bf16.xpose.msra.mxu0 %v2801_v3 }
 0x9f3   : > { %4509 = vmatprep.subr.bf16.mxu0 %v6311_v0 }
 0x9f6   : > { %2903 = vrot.lane.b32.xlu0 %v2789_v2, %s6314_s26 }
 0x9fa   : > { %3017 = vrot.lane.b32.xlu0 %v2789_v2, %s6313_s2 }
 0x9fe   : > { %3130 = vrot.lane.b32.xlu0 %v2789_v2, %s6315_s6 }
 0xa6d   : > { %v2506_v30 = vpop.xlane.xlu0 %2505 }
 0xa6e   : > { %v2508_v31 = vmul.f32 0.015625, %v2506_v30 }
 0xa70   : > { %v2509_v32 = vsub.f32 %v2501_v26, %v2508_v31 }
 0xa71   : > { %v2904_v12 = vpop.permute.xlu0 %2903 }
 0xa72   : > { %v2510_v33 = vmul.f32 %v2509_v32, %v2509_v32  ;;  %v2909_v14 = vsel %vm1959_vm2, %v2904_v12, 0 }
 0xa74   : > { %v2511_v4 = vsel %vm1743_vm1, %v2510_v33, 0.0 }
 0xa75   : > { %2512 = vadd.xlane.f32.xlu1 %v2511_v4  ;;  %v3018_v20 = vpop.permute.xlu0 %3017  ;;  %v4233_v4 = vld [vmem:[#allocation35] ss:$0 sm:$0xff] }
 0xa76   : > { %v3023_v22 = vsel %vm1959_vm2, %v3018_v20, 0 }
 0xa79   : > { %v3131_v23 = vpop.permute.xlu0 %3130 }
 0xa7a   : > { %v3136_v25 = vsel %vm1959_vm2, %v3131_v23, 0 }
 0xb02   : > { %v2513_v47 = vpop.xlane.xlu1 %2512 }
 0xb03   : > { %v2514_v48 = vmul.f32 0.015625, %v2513_v47 }
 0xb05   : > { %v2515_v49 = vadd.f32 1e-05, %v2514_v48 }
 0xb07   : > { %5069 = vrsqrt.f32 %v2515_v49 }
 0xb11   : > { %v5070_v50 = vpop.eup %5069 }
 0xb12   : > { %v2517_v52 = vmul.f32 %v5070_v50, %v2509_v32 }
 0xb14   : > { %v2524_v54 = vmul.f32 %v4219_v51, %v2517_v52 }
 0xb16   : > { %v7362_v55 = vadd.f32 %v4220_v53, %v2524_v54 }
 0xb18   : > { %v2532_v56 = vadd.f32 %v7362_v55, %v7233_v5  ;;  %v4221_v5 = vld [vmem:[#allocation29] ss:$0 sm:$0xff] }
 0xb1a   : > { %v2534_v57 = vpack.c.bf16 %v2532_v56, %v2532_v56 }
 0xb1c   : > { %4470 = vmatmul.mubr.msk.bf16.vlgmr.msra.gmra.mrb[28].mxu1 %vm1743_vm1, %v2534_v57 }
 0xb1d   : > { %4493 = vmatprep.mubr.msk.bf16.mxu1 %vm6312_vm0, %v6311_v0  ;;  %4486 = vmatpush3.bf16.msra.mxu1 %v5033_v15 }
 0xb1e   : > { %4487 = vmatprep.subr.bf16.mxu1 %v6311_v0 }
 0xb21   : > { %4488 = vmatpush3.bf16.msra.mxu1 %v5034_v16 }
 0xb22   : > { %4489 = vmatprep.subr.bf16.mxu1 %v6311_v0 }
 0xb25   : > { %4490 = vmatpush3.bf16.msra.mxu1 %v5035_v17 }
 0xb26   : > { %4491 = vmatprep.subr.bf16.mxu1 %v6311_v0 }
 0xb29   : > { %4492 = vmatpush3.bf16.msra.mxu1 %v5036_v18 }
 0xb2a   : > { %4503 = vmatprep.subr.bf16.mxu1 %v6311_v0 }
 0xb2c   : > { %4494 = vmatmul.mubr.msk.bf16.vlgmr.msra.gmra.mrb[32].mxu1 %vm1743_vm1, %v2703_v19 }
 0xb2d   : > { %4505 = vmatprep.mubr.msk.bf16.mxu1 %vm6312_vm0, %v6311_v0 }
 0xbef   : > { %v2610_v6 = vpop.f32.mrb[28].mxu1 }
 0xbf0   : > { %v2611_v7 = vadd.f32 %v4221_v5, %v2610_v6  ;;  %v4471_v8 = vpop.f32.mrb[29].mxu1 }
 0xbf1   : > { %v2613_v9 = vpop.f32.mrb[30].mxu1 }
 0xbf2   : > { %v2787_v10 = vmul.f32 0.25, %v2611_v7  ;;  %v4472_v11 = vpop.f32.mrb[31].mxu1 }
 0xbf4   : > { %v2788_v13 = vpack.c.bf16 %v2787_v10, %v2787_v10 }
 0xbf6   : > { %2900 = vrot.lane.b32.xlu1 %v2788_v13, %s6314_s26  ;;  %4500 = vmatmul.mubr.msk.bf16.vlgmr.msra.gmra.mrb[24].mxu0 %vm1959_vm2, %v2788_v13 }
 0xbf7   : > { %4510 = vmatpush3.bf16.xpose.msra.mxu0 %v2909_v14  ;;  %4511 = vmatprep.mubr.msk.bf16.mxu0 %vm6312_vm0, %v6311_v0 }
 0xbf8   : > { %4521 = vmatprep.subr.bf16.mxu0 %v6311_v0 }
 0xbfa   : > { %3015 = vrot.lane.b32.xlu1 %v2788_v13, %s6313_s2 }
 0xbfe   : > { %3128 = vrot.lane.b32.xlu1 %v2788_v13, %s6315_s6 }
 0xbff   : > { %v2779_v34 = vpop.f32.mrb[32].mxu1 }
 0xc00   : > { %v2780_v35 = vadd.f32 %v4233_v4, %v2779_v34  ;;  %v4495_v36 = vpop.f32.mrb[33].mxu1 }
 0xc01   : > { %v2782_v37 = vpop.f32.mrb[34].mxu1 }
 0xc02   : > { %v2783_v38 = vadd.f32 %v4233_v4, %v2782_v37  ;;  %v4496_v39 = vpop.f32.mrb[35].mxu1 }
 0xc04   : > { %v2790_v40 = vpack.c.bf16 %v2783_v38, %v2780_v35 }
 0xc06   : > { %4504 = vmatpush3.bf16.msra.mxu1 %v2790_v40 }
 0xc07   : > { %4515 = vmatprep.subr.bf16.mxu1 %v6311_v0 }
 0xc68   : > { %v2901_v21 = vpop.permute.xlu1 %2900 }
 0xc69   : > { %4512 = vmatmul.mubr.msk.bf16.vlgmr.msra.gmra.mrb[28].mxu0 %vm1959_vm2, %v2901_v21 }
 0xc6a   : > { %4522 = vmatpush3.bf16.xpose.msra.mxu0 %v3023_v22  ;;  %4523 = vmatprep.mubr.msk.bf16.mxu0 %vm6312_vm0, %v6311_v0 }
 0xc6b   : > { %4533 = vmatprep.subr.bf16.mxu0 %v6311_v0 }
 0xc6c   : > { %v3016_v24 = vpop.permute.xlu1 %3015 }
 0xc70   : > { %v3129_v26 = vpop.permute.xlu1 %3128 }
 0xc71   : > { %4524 = vmatmul.mubr.msk.bf16.vlgmr.msra.gmra.mrb[32].mxu0 %vm1959_vm2, %v3016_v24 }
 0xc72   : > { %4534 = vmatpush3.bf16.xpose.msra.mxu0 %v3136_v25  ;;  %4535 = vmatprep.mubr.msk.bf16.mxu0 %vm6312_vm0, %v6311_v0 }
 0xc73   : > { %4545 = vmatprep.subr.bf16.mxu0 %v6311_v0 }
 0xc79   : > { %4536 = vmatmul.mubr.msk.bf16.vlgmr.msra.gmra.mrb[36].mxu0 %vm1959_vm2, %v3129_v26 }
 0xc7a   : > { %4553 = vmatprep.mubr.msk.bf16.mxu0 %vm6312_vm0, %v6311_v0 }
 0xcc9   : > { %v2837_v28 = vpop.f32.mrb[24].mxu0 }
 0xcca   : > { %v2838_v29 = vadd.f32 %v4239_v27, %v2837_v28  ;;  %v4501_v30 = vpop.f32.mrb[25].mxu0 }
 0xccb   : > { %v2840_v31 = vpop.f32.mrb[26].mxu0 }
 0xccc   : > { %v4502_v32 = vpop.f32.mrb[27].mxu0  ;;  %v2843_v33 = vsel %vm1959_vm2, %v2838_v29, -inf }
 0xccd   : > { %2844 = vmax.xlane.f32.xlu0 %v2843_v33 }
 0xd3c   : > { %v2945_v41 = vpop.f32.mrb[28].mxu0 }
 0xd3d   : > { %v2946_v42 = vadd.f32 %v4239_v27, %v2945_v41  ;;  %v4513_v44 = vpop.f32.mrb[29].mxu0  ;;  %v5038_v41 = vld [vmem:[#allocation36 + $0x8] sm:$0xff]  }
 0xd3e   : > { %v2948_v43 = vpop.f32.mrb[30].mxu0 }
 0xd3f   : > { %v4514_v45 = vpop.f32.mrb[31].mxu0  ;;  %v2951_v46 = vsel %vm1959_vm2, %v2946_v42, -inf }
 0xd40   : > { %2952 = vmax.xlane.f32.xlu1 %v2951_v46  ;;  %v5039_v46 = vld [vmem:[#allocation36 + $0x10] sm:$0xff]  }
 0xd44   : > { %v3059_v47 = vpop.f32.mrb[32].mxu0 }
 0xd45   : > { %v3060_v48 = vadd.f32 %v4239_v27, %v3059_v47  ;;  %v4525_v49 = vpop.f32.mrb[33].mxu0  ;;  %v5040_v47 = vld [vmem:[#allocation36 + $0x18] sm:$0xff]  }
 0xd46   : > { %v3062_v50 = vpop.f32.mrb[34].mxu0 }
 0xd47   : > { %v4526_v51 = vpop.f32.mrb[35].mxu0  ;;  %v3065_v52 = vsel %vm1959_vm2, %v3060_v48, -inf }
 0xd48   : > { %3066 = vmax.xlane.f32.xlu0 %v3065_v52 }
 0xd4c   : > { %v3172_v53 = vpop.f32.mrb[36].mxu0 }
 0xd4d   : > { %v3173_v54 = vadd.f32 %v4239_v27, %v3172_v53  ;;  %v4537_v56 = vpop.f32.mrb[37].mxu0 }
 0xd4e   : > { %v3175_v57 = vpop.f32.mrb[38].mxu0 }
 0xd4f   : > { %v4538_v58 = vpop.f32.mrb[39].mxu0  ;;  %v3178_v59 = vsel %vm1959_vm2, %v3173_v54, -inf }
 0xd50   : > { %3179 = vmax.xlane.f32.xlu0 %v3178_v59 }
 0xd5a   : > { %v2845_v60 = vpop.xlane.xlu0 %2844 }
 0xd5b   : > { %v2846_v61 = vsub.f32 %v2838_v29, %v2845_v60 }
 0xd5d   : > { %v2847_v62 = vmul.f32 1.442695, %v2846_v61 }
 0xd5f   : > { %5071 = vpow2.f32 %v2847_v62  ;;  %v4248_v62 = vld [vmem:[#allocation38] ss:$0 sm:$0xff] }
 0xd69   : > { %v5072_v63 = vpop.eup %5071 }
 0xd6a   : > { %v2849_v1 = vsel %vm1959_vm2, %v5072_v63, 0.0 }
 0xd6b   : > { %2850 = vadd.xlane.f32.xlu1 %v2849_v1 }
 0xd7c   : > { %2964 = vrot.lane.b32.xlu1 %v2790_v40, %s6314_s26 }
 0xdcd   : > { %v2953_v2 = vpop.xlane.xlu1 %2952 }
 0xdce   : > { %v2954_v3 = vsub.f32 %v2946_v42, %v2953_v2 }
 0xdd0   : > { %v2955_v5 = vmul.f32 1.442695, %v2954_v3 }
 0xdd2   : > { %5073 = vpow2.f32 %v2955_v5 }
 0xdd5   : > { %v3067_v6 = vpop.xlane.xlu0 %3066 }
 0xdd6   : > { %v3068_v7 = vsub.f32 %v3060_v48, %v3067_v6 }
 0xdd8   : > { %v3069_v8 = vmul.f32 1.442695, %v3068_v7 }
 0xdda   : > { %5075 = vpow2.f32 %v3069_v8 }
 0xddc   : > { %v5074_v9 = vpop.eup %5073 }
 0xddd   : > { %v3180_v10 = vpop.xlane.xlu0 %3179  ;;  %v2957_v11 = vsel %vm1959_vm2, %v5074_v9, 0.0 }
 0xdde   : > { %v3181_v12 = vsub.f32 %v3173_v54, %v3180_v10  ;;  %2958 = vadd.xlane.f32.xlu0 %v2957_v11 }
 0xde0   : > { %v3182_v13 = vmul.f32 1.442695, %v3181_v12 }
 0xde2   : > { %5077 = vpow2.f32 %v3182_v13  ;;  %v5041_v13 = vld [vmem:[#allocation39] sm:$0xff]  }
 0xde4   : > { %v5076_v14 = vpop.eup %5075 }
 0xde5   : > { %v3071_v15 = vsel %vm1959_vm2, %v5076_v14, 0.0 }
 0xde6   : > { %3072 = vadd.xlane.f32.xlu1 %v3071_v15  ;;  %v5043_v15 = vld [vmem:[#allocation39 + $0x10] sm:$0xff]  }
 0xdec   : > { %v5078_v16 = vpop.eup %5077 }
 0xded   : > { %v3184_v17 = vsel %vm1959_vm2, %v5078_v16, 0.0 }
 0xdee   : > { %3185 = vadd.xlane.f32.xlu0 %v3184_v17  ;;  %v5046_v17 = vld [vmem:[#allocation42 + $0x8] sm:$0xff]  }
 0xdf7   : > { %3190 = vrot.lane.b32.xlu1 %v2790_v40, %s6315_s6 }
 0xdf8   : > { %v2851_v18 = vpop.xlane.xlu1 %2850 }
 0xdf9   : > { %5079 = vrcp.f32 %v2851_v18  ;;  %v5047_v18 = vld [vmem:[#allocation42 + $0x10] sm:$0xff]  }
 0xdfc   : > { %v2965_v22 = vpop.permute.xlu1 %2964 }
 0xe03   : > { %v5080_v19 = vpop.eup %5079 }
 0xe04   : > { %v2853_v20 = vmul.f32 %v5080_v19, %v5072_v63  ;;  %3077 = vrot.lane.b32.xlu0 %v2790_v40, %s6313_s2  ;;  %v5037_v40 = vld [vmem:[#allocation36] sm:$0xff]  }
 0xe05   : > { %4546 = vmatpush3.bf16.msra.mxu0 %v5037_v40  ;;  %v5048_v19 = vld [vmem:[#allocation42 + $0x18] sm:$0xff]  }
 0xe06   : > { %v2854_v21 = vpack.c.bf16 %v2853_v20, %v2853_v20  ;;  %4547 = vmatprep.subr.bf16.mxu0 %v6311_v0  ;;  %v5049_v20 = vld [vmem:[#allocation42 + $0x20] sm:$0xff]  }
 0xe08   : > { %4506 = vmatmul.mubr.msk.bf16.vlgmr.msra.gmra.mrb[36].mxu1 %vm1959_vm2, %v2854_v21  ;;  %v5050_v21 = vld [vmem:[#allocation42 + $0x28] sm:$0xff]  }
 0xe09   : > { %4516 = vmatpush3.bf16.msra.mxu1 %v2965_v22  ;;  %4517 = vmatprep.mubr.msk.bf16.mxu1 %vm6312_vm0, %v6311_v0 }
 0xe0a   : > { %4527 = vmatprep.subr.bf16.mxu1 %v6311_v0  ;;  %4548 = vmatpush3.bf16.msra.mxu0 %v5038_v41  ;;  %v4262_v41 = vld [vmem:[#allocation44] ss:$0 sm:$0xff] }
 0xe0b   : > { %4549 = vmatprep.subr.bf16.mxu0 %v6311_v0 }
 0xe0e   : > { %4550 = vmatpush3.bf16.msra.mxu0 %v5039_v46 }
 0xe0f   : > { %4551 = vmatprep.subr.bf16.mxu0 %v6311_v0 }
 0xe12   : > { %4552 = vmatpush3.bf16.msra.mxu0 %v5040_v47 }
 0xe13   : > { %4569 = vmatprep.subr.bf16.mxu0 %v6311_v0 }
 0xe6b   : > { %v2959_v23 = vpop.xlane.xlu0 %2958 }
 0xe6c   : > { %5081 = vrcp.f32 %v2959_v23 }
 0xe73   : > { %v3073_v24 = vpop.xlane.xlu1 %3072 }
 0xe74   : > { %5083 = vrcp.f32 %v3073_v24 }
 0xe76   : > { %v5082_v25 = vpop.eup %5081 }
 0xe77   : > { %v2961_v26 = vmul.f32 %v5082_v25, %v5074_v9  ;;  %v3191_v33 = vpop.permute.xlu1 %3190 }
 0xe79   : > { %v2962_v27 = vpack.c.bf16 %v2961_v26, %v2961_v26  ;;  %v4254_v26 = vld [vmem:[#allocation48] ss:$0 sm:$0xff] }
 0xe7b   : > { %v3186_v28 = vpop.xlane.xlu0 %3185  ;;  %4518 = vmatmul.mubr.msk.bf16.vlgmr.msra.gmra.mrb[40].mxu1 %vm1959_vm2, %v2962_v27 }
 0xe7c   : > { %5085 = vrcp.f32 %v3186_v28  ;;  %4529 = vmatprep.mubr.msk.bf16.mxu1 %vm6312_vm0, %v6311_v0  ;;  %v4255_v28 = vld [vmem:[#allocation50] ss:$0 sm:$0xff] }
 0xe7e   : > { %v5084_v29 = vpop.eup %5083 }
 0xe7f   : > { %v3075_v30 = vmul.f32 %v5084_v29, %v5076_v14  ;;  %v3078_v31 = vpop.permute.xlu0 %3077  ;;  %v5042_v14 = vld [vmem:[#allocation39 + $0x8] sm:$0xff]  }
 0xe80   : > { %4528 = vmatpush3.bf16.msra.mxu1 %v3078_v31 }
 0xe81   : > { %v3076_v32 = vpack.c.bf16 %v3075_v30, %v3075_v30  ;;  %4539 = vmatprep.subr.bf16.mxu1 %v6311_v0 }
 0xe83   : > { %4530 = vmatmul.mubr.msk.bf16.vlgmr.msra.gmra.mrb[44].mxu1 %vm1959_vm2, %v3076_v32  ;;  %v5051_v32 = vld [vmem:[#allocation42 + $0x30] sm:$0xff]  }
 0xe84   : > { %4540 = vmatpush3.bf16.msra.mxu1 %v3191_v33  ;;  %4541 = vmatprep.mubr.msk.bf16.mxu1 %vm6312_vm0, %v6311_v0  ;;  %v5052_v33 = vld [vmem:[#allocation42 + $0x38] sm:$0xff]  }
 0xe85   : > { %4557 = vmatprep.subr.bf16.mxu1 %v6311_v0 }
 0xe86   : > { %v5086_v4 = vpop.eup %5085 }
 0xe87   : > { %v3188_v34 = vmul.f32 %v5086_v4, %v5078_v16  ;;  %v5045_v16 = vld [vmem:[#allocation42] sm:$0xff]   ;;  %v4256_v4 = vld [vmem:[#allocation41] ss:$0 sm:$0xff] }
 0xe89   : > { %v3189_v35 = vpack.c.bf16 %v3188_v34, %v3188_v34 }
 0xe8b   : > { %4542 = vmatmul.mubr.msk.bf16.vlgmr.msra.gmra.mrb[48].mxu1 %vm1959_vm2, %v3189_v35 }
 0xe8c   : > { %4565 = vmatprep.mubr.msk.bf16.mxu1 %vm6312_vm0, %v6311_v0  ;;  %4558 = vmatpush3.bf16.msra.mxu1 %v5041_v13 }
 0xe8d   : > { %4559 = vmatprep.subr.bf16.mxu1 %v6311_v0 }
 0xe90   : > { %4560 = vmatpush3.bf16.msra.mxu1 %v5042_v14 }
 0xe91   : > { %4561 = vmatprep.subr.bf16.mxu1 %v6311_v0 }
 0xe94   : > { %4562 = vmatpush3.bf16.msra.mxu1 %v5043_v15 }
 0xe95   : > { %4563 = vmatprep.subr.bf16.mxu1 %v6311_v0 }
 0xedb   : > { %v2892_v36 = vpop.f32.mrb[36].mxu1 }
 0xedc   : > { %2898 = vst.msk [vmem:[#allocation2] sm:$0xff] %vm1959_vm2, %v2892_v36  ;;  %v4507_v37 = vpop.f32.mrb[37].mxu1 }
 0xedd   : > { %v2895_v38 = vpop.f32.mrb[38].mxu1 }
 0xede   : > { %v4508_v39 = vpop.f32.mrb[39].mxu1 }
 0xf4e   : > { %v3004_v42 = vpop.f32.mrb[40].mxu1 }
 0xf4f   : > { %3011 = vrot.lane.b32.xlu1 %v3004_v42, %s6316_s19  ;;  %v4519_v44 = vpop.f32.mrb[41].mxu1 }
 0xf50   : > { %v3007_v43 = vpop.f32.mrb[42].mxu1 }
 0xf51   : > { %v4520_v45 = vpop.f32.mrb[43].mxu1 }
 0xf56   : > { %v3117_v48 = vpop.f32.mrb[44].mxu1 }
 0xf57   : > { %3124 = vrot.lane.b32.xlu0 %v3117_v48, %s6317_s23  ;;  %v4531_v49 = vpop.f32.mrb[45].mxu1 }
 0xf58   : > { %v3120_v50 = vpop.f32.mrb[46].mxu1 }
 0xf59   : > { %v4532_v51 = vpop.f32.mrb[47].mxu1 }
 0xf5e   : > { %v3230_v52 = vpop.f32.mrb[48].mxu1 }
 0xf5f   : > { %3237 = vrot.lane.b32.xlu1 %v3230_v52, %s6318_s11  ;;  %v4543_v53 = vpop.f32.mrb[49].mxu1 }
 0xf60   : > { %v3233_v54 = vpop.f32.mrb[50].mxu1 }
 0xf61   : > { %v4544_v56 = vpop.f32.mrb[51].mxu1 }
 0xfc1   : > { %v3012_v57 = vpop.permute.xlu1 %3011 }
 0xfc2   : > { %3014 = vst.msk [vmem:[#allocation2] sm:$0xff] %vm2184_vm5, %v3012_v57 }
 0xfc9   : > { %v3125_v58 = vpop.permute.xlu0 %3124 }
 0xfca   : > { %3127 = vst.msk [vmem:[#allocation2] sm:$0xff] %vm2300_vm6, %v3125_v58  ;;  %v4271_v58 = vld [vmem:[#allocation51] ss:$0 sm:$0xff] }
 0xfd1   : > { %v3238_v59 = vpop.permute.xlu1 %3237 }
 0xfd2   : > { %3240 = vst.msk [vmem:[#allocation2] sm:$0xff] %vm2416_vm7, %v3238_v59 }
 0xfd9   : > { %v3241_v60 = vld [vmem:[#allocation2] sm:$0xff] }
 0xfda   : > { %v3242_v61 = vpack.c.bf16 %v3241_v60, %v3241_v60  ;;  %v4272_v60 = vld [vmem:[#allocation53] ss:$0 sm:$0xff] }
 0xfdc   : > { %4554 = vmatmul.mubr.msk.bf16.vlgmr.msra.gmra.mrb[40].mxu0 %vm1743_vm1, %v3242_v61 }
 0xfdd   : > { %4585 = vmatprep.mubr.msk.bf16.mxu0 %vm6312_vm0, %v6311_v0  ;;  %4570 = vmatpush3.bf16.msra.mxu0 %v5045_v16 }
 0xfde   : > { %4571 = vmatprep.subr.bf16.mxu0 %v6311_v0 }
 0xfe1   : > { %4572 = vmatpush3.bf16.msra.mxu0 %v5046_v17 }
 0xfe2   : > { %4573 = vmatprep.subr.bf16.mxu0 %v6311_v0 }
 0xfe5   : > { %4574 = vmatpush3.bf16.msra.mxu0 %v5047_v18 }
 0xfe6   : > { %4575 = vmatprep.subr.bf16.mxu0 %v6311_v0 }
 0xfe9   : > { %4576 = vmatpush3.bf16.msra.mxu0 %v5048_v19 }
 0xfea   : > { %4577 = vmatprep.subr.bf16.mxu0 %v6311_v0 }
 0xfed   : > { %4578 = vmatpush3.bf16.msra.mxu0 %v5049_v20 }
 0xfee   : > { %4579 = vmatprep.subr.bf16.mxu0 %v6311_v0 }
 0xff1   : > { %4580 = vmatpush3.bf16.msra.mxu0 %v5050_v21 }
 0xff2   : > { %4581 = vmatprep.subr.bf16.mxu0 %v6311_v0 }
 0xff5   : > { %4582 = vmatpush3.bf16.msra.mxu0 %v5051_v32 }
 0xff6   : > { %4583 = vmatprep.subr.bf16.mxu0 %v6311_v0 }
 0xff9   : > { %4584 = vmatpush3.bf16.msra.mxu0 %v5052_v33 }
0x10af   : > { %v3318_v63 = vpop.f32.mrb[40].mxu0 }
0x10b0   : > { %v3319_v1 = vadd.f32 %v4248_v62, %v3318_v63  ;;  %v4555_v2 = vpop.f32.mrb[41].mxu0 }
0x10b1   : > { %v3321_v3 = vpop.f32.mrb[42].mxu0 }
0x10b2   : > { %v4556_v5 = vpop.f32.mrb[43].mxu0  ;;  %v3324_v6 = vadd.f32 %v3319_v1, %v7362_v55  ;;  %v5044_v55 = vld [vmem:[#allocation39 + $0x18] sm:$0xff]  }
0x10b3   : > { %4564 = vmatpush3.bf16.msra.mxu1 %v5044_v55 }
0x10b4   : > { %v3327_v7 = vsel %vm1743_vm1, %v3324_v6, 0.0 }
0x10b5   : > { %3328 = vadd.xlane.f32.xlu0 %v3327_v7 }
0x1142   : > { %v3329_v8 = vpop.xlane.xlu0 %3328 }
0x1143   : > { %v3330_v9 = vmul.f32 0.015625, %v3329_v8 }
0x1145   : > { %v3331_v10 = vsub.f32 %v3324_v6, %v3330_v9 }
0x1147   : > { %v3332_v11 = vmul.f32 %v3331_v10, %v3331_v10 }
0x1149   : > { %v3333_v12 = vsel %vm1743_vm1, %v3332_v11, 0.0 }
0x114a   : > { %3334 = vadd.xlane.f32.xlu1 %v3333_v12 }
0x11d7   : > { %v3335_v22 = vpop.xlane.xlu1 %3334 }
0x11d8   : > { %v3336_v23 = vmul.f32 0.015625, %v3335_v22 }
0x11da   : > { %v3337_v24 = vadd.f32 1e-05, %v3336_v23 }
0x11dc   : > { %5087 = vrsqrt.f32 %v3337_v24 }
0x11e6   : > { %v5088_v25 = vpop.eup %5087 }
0x11e7   : > { %v3339_v27 = vmul.f32 %v5088_v25, %v3331_v10 }
0x11e9   : > { %v3346_v29 = vmul.f32 %v4254_v26, %v3339_v27 }
0x11eb   : > { %v3353_v30 = vadd.f32 %v4255_v28, %v3346_v29 }
0x11ed   : > { %v3355_v31 = vpack.c.bf16 %v3353_v30, %v3353_v30 }
0x11ef   : > { %4566 = vmatmul.mubr.msk.bf16.vlgmr.msra.gmra.mrb[52].mxu1 %vm1743_vm1, %v3355_v31 }
0x12c2   : > { %v3431_v34 = vpop.f32.mrb[52].mxu1 }
0x12c3   : > { %v3432_v35 = vadd.f32 %v4256_v4, %v3431_v34  ;;  %v4567_v36 = vpop.f32.mrb[53].mxu1 }
0x12c4   : > { %v3434_v37 = vpop.f32.mrb[54].mxu1 }
0x12c5   : > { %v3437_v38 = vmax.f32 %v3432_v35, 0.0  ;;  %v4568_v39 = vpop.f32.mrb[55].mxu1 }
0x12c7   : > { %v3439_v40 = vpack.c.bf16 %v3437_v38, %v3437_v38 }
0x12c9   : > { %4586 = vmatmul.mubr.bf16.vlgmr.msra.gmra.mrb[44].mxu0 %v3439_v40 }
0x139c   : > { %v3544_v42 = vpop.f32.mrb[44].mxu0 }
0x139d   : > { %v3545_v44 = vadd.f32 %v4262_v41, %v3544_v42  ;;  %v4587_v43 = vpop.f32.mrb[45].mxu0 }
0x139e   : > { %v3547_v45 = vpop.f32.mrb[46].mxu0 }
0x139f   : > { %v4588_v46 = vpop.f32.mrb[47].mxu0  ;;  %v3550_v47 = vadd.f32 %v3545_v44, %v3353_v30 }
0x13a1   : > { %v3553_v0 = vsel %vm1743_vm1, %v3550_v47, 0.0 }
0x13a2   : > { %3554 = vadd.xlane.f32.xlu0 %v3553_v0 }
0x142f   : > { %v3555_v48 = vpop.xlane.xlu0 %3554 }
0x1430   : > { %v3556_v49 = vmul.f32 0.015625, %v3555_v48 }
0x1432   : > { %v3557_v50 = vsub.f32 %v3550_v47, %v3556_v49 }
0x1434   : > { %v3558_v51 = vmul.f32 %v3557_v50, %v3557_v50 }
0x1436   : > { %v3559_v52 = vsel %vm1743_vm1, %v3558_v51, 0.0 }
0x1437   : > { %3560 = vadd.xlane.f32.xlu0 %v3559_v52 }
0x14c4   : > { %v3561_v53 = vpop.xlane.xlu0 %3560 }
0x14c5   : > { %v3562_v54 = vmul.f32 0.015625, %v3561_v53 }
0x14c7   : > { %v3563_v56 = vadd.f32 1e-05, %v3562_v54 }
0x14c9   : > { %5089 = vrsqrt.f32 %v3563_v56 }
0x14d3   : > { %v5090_v57 = vpop.eup %5089 }
0x14d4   : > { %v3565_v59 = vmul.f32 %v5090_v57, %v3557_v50 }
0x14d6   : > { %v3572_v61 = vmul.f32 %v4271_v58, %v3565_v59 }
0x14d8   : > { %v3579_v62 = vadd.f32 %v4272_v60, %v3572_v61 }
0x14da   : > { %3580 = vst.msk [vmem:[%s1691_s15] sm:$0xff] %vm1743_vm1, %v3579_v62 }
0x14db   : > { %6098 = shalt.err (!%p6095_p7)
}
0x14dc   : > { %s6099_s20 = scalar_lea.hbm %s7466_s8, 128  ;;  %s6103_s2 = scalar_lea.hbm %s7716_s5, 256 }
0x14dd   : > { %p6100_p10 = scmp.ne.s32.totalorder %s7466_s8, %s6099_s20  ;;  %p6104_p11 = scmp.lt.u32.totalorder %s7466_s8, %s7716_s5 }
0x14de   : > { %p6105_p9 = scmp.lt.u32.totalorder %s6103_s2, %s6099_s20  ;;  %p6107_p4 = scmp.lt.u32.totalorder %s6099_s20, %s7466_s8 }
0x14df   : > { %p6101_p1 = pnand %p6100_p10, %p7717_p6 }
0x14e0   : > { %p6106_p2 = por %p6105_p9, %p6104_p11 }
0x14e1   : > { %p6102_p3 = pneg %p6101_p1 }
0x14e2   : > { %p6108_p8 = por %p6107_p4, %p6106_p2 }
0x14e4   : > { %p6109_p0 = pnand %p6108_p8, %p6102_p3 }
0x14e6   : > { %6112 = shalt.err (!%p6109_p0)
}
0x14e7   : > { %4715 = dma.vmem_to_hbm [thread:$0]  (%p7717_p6), %s7468_s7, 128, %s7466_s8, %s3582_s4  }
0x14e8 PF: > { %s7718_s26 = sld [smem:[#allocation115_spill]]  ;;  %s3608_s6 = sand.u32 1, %s6215_s0  }
0x14e9   : > { %p7719_p5 = scmp.ne.s32.totalorder %s7646_s18, 0  ;;  %s3609_s19 = scalar_lea.sflag [#allocation5], %s3608_s6 }
0x14ee   : > { %p7720_p13 = scmp.ge.s32.totalorder %s7718_s26, 2 }
0x14f0   : > { %p4825_p12 = pnand %p7720_p13, %p7719_p5 }
0x14f2   : > { %6210 = dma.done.wait (!%p4825_p12), %s3609_s19, 128  }
0x14f3   : > { %6212 = vsyncadd (!%p4825_p12), %s3609_s19, 4294967168  ;;  %s110_s1 = sadd.s32 1, %s7718_s26   ;;  %s7721_s23 = sld [smem:[#allocation113_spill]] }
0x14f4   : > { %p107_p7 = scmp.ge.s32.totalorder %s110_s1, 4   ;;  %s7722_s17 = sld [smem:[#allocation118_spill]] }
0x14f5   : > { %s7723_s11 = sld [smem:[#allocation117_spill]]  ;;  %s7724_s0 = smov %s6219_s22 }
0x14f6   : > { %s7727_s26 = smov %s6231_s28  ;;  %109 = sbr.rel (!%p107_p7) target bundleno = 101 (0x65), region = 424 }
0x14f9   : > { %s7725_s22 = smov %s7721_s23 }
0x14fa   : > { %s7726_s23 = smov %s7722_s17 }
0x14fb   : > { %s7728_s28 = smov %s7723_s11 }
0x14fd   :  { %3614 = vsyncpa [#allocation4], 1 }
0x14fe   :  { %3616 = vsyncpa [#allocation4 + $0x1], 1 }
0x14ff   :  { %3617 = vsyncpa [#allocation7], 1 }
0x1500   :  { %3619 = vsyncpa [#allocation7 + $0x1], 1 }
0x1501   :  { %3620 = vsyncpa [#allocation10], 1 }
0x1502   :  { %3622 = vsyncpa [#allocation10 + $0x1], 1 }
0x1503   :  { %3623 = vsyncpa [#allocation13], 1 }
0x1504   :  { %3625 = vsyncpa [#allocation13 + $0x1], 1 }
0x1505   :  { %3626 = vsyncpa [#allocation16], 1 }
0x1506   :  { %3627 = vsyncpa [#allocation19], 1 }
0x1507   :  { %3628 = vsyncpa [#allocation22], 1 }
0x1508   :  { %3629 = vsyncpa [#allocation25], 1 }
0x1509   :  { %3630 = vsyncpa [#allocation28], 1 }
0x150a   :  { %3631 = vsyncpa [#allocation31], 1 }
0x150b   :  { %3632 = vsyncpa [#allocation34], 1 }
0x150c   :  { %3633 = vsyncpa [#allocation37], 1 }
0x150d   :  { %3634 = vsyncpa [#allocation40], 1 }
0x150e   :  { %3635 = vsyncpa [#allocation43], 1 }
0x150f   :  { %3636 = vsyncpa [#allocation46], 1 }
0x1510   :  { %3637 = vsyncpa [#allocation49], 1 }
0x1511   :  { %3638 = vsyncpa [#allocation52], 1 }
0x1512   :  { %3639 = vsyncpa [#allocation55], 1 }
0x1513   :  { %3640 = vsyncpa [#allocation5], 1 }
0x1514   :  { %3642 = vsyncpa [#allocation5 + $0x1], 1 }

// kernel: transformer_forward.7
= control target key start
LH: loop header
LB: loop body
LE: loop exit
PB: predicated region body
PF: predicated region fallthrough
CT: control target
= control target key end

     0   :  { %s6270_s6 = smov 1   ;;  %s6271_s10 = smov 2   ;;  %s7547_s0 = inlined_call_operand.smem [shape: u32[36], index: -1, kind: input, shape index: {}] }
   0x1   :  { %s6361_s5 = sld [smem:[%s7547_s0]]   ;;  %s6272_s14 = smov 3  }
   0x2   :  { %s6366_s9 = sld [smem:[%s7547_s0 + %s6270_s6]]   ;;  %s6273_s18 = smov 4  }
   0x3   :  { %s6371_s13 = sld [smem:[%s7547_s0 + %s6271_s10]]   ;;  %s6274_s22 = smov 5  }
   0x4   :  { %s6376_s17 = sld [smem:[%s7547_s0 + %s6272_s14]]   ;;  %s6275_s26 = smov 6  }
   0x5   :  { %s6381_s21 = sld [smem:[%s7547_s0 + %s6273_s18]]   ;;  %s6276_s30 = smov 7  }
   0x6   :  { %s6386_s25 = sld [smem:[%s7547_s0 + %s6274_s22]]   ;;  %s6277_s4 = smov 8  }
   0x7   :  { %7616 = sst [smem:[#allocation77_spill]] %s6361_s5  ;;  %s6278_s10 = smov 9  }
   0x8   :  { %7617 = sst [smem:[#allocation78_spill]] %s6366_s9  ;;  %s6279_s15 = smov 10  }
   0x9   :  { %7618 = sst [smem:[#allocation79_spill]] %s6371_s13  ;;  %s6280_s20 = smov 11  }
   0xa   :  { %7619 = sst [smem:[#allocation80_spill]] %s6376_s17  ;;  %s6282_s1 = smov 13  }
   0xb   :  { %7620 = sst [smem:[#allocation81_spill]] %s6381_s21  ;;  %s6283_s7 = smov 14  }
   0xc   :  { %7621 = sst [smem:[#allocation82_spill]] %s6386_s25  ;;  %s6285_s22 = smov 16  }
   0xd   :  { %s6391_s29 = sld [smem:[%s7547_s0 + %s6275_s26]]   ;;  %s6281_s26 = smov 12  }
   0xe   :  { %s6396_s3 = sld [smem:[%s7547_s0 + %s6276_s30]]   ;;  %s6286_s28 = smov 17  }
   0xf   :  { %s6401_s8 = sld [smem:[%s7547_s0 + %s6277_s4]]  }
  0x10   :  { %s6406_s14 = sld [smem:[%s7547_s0 + %s6278_s10]]  }
  0x11   :  { %s6411_s19 = sld [smem:[%s7547_s0 + %s6279_s15]]   ;;  %s6284_s15 = smov 15  }
  0x12   :  { %s6416_s24 = sld [smem:[%s7547_s0 + %s6280_s20]]  }
  0x13   :  { %7622 = sst [smem:[#allocation83_spill]] %s6391_s29 }
  0x14   :  { %7623 = sst [smem:[#allocation84_spill]] %s6396_s3 }
  0x15   :  { %7624 = sst [smem:[#allocation85_spill]] %s6401_s8 }
  0x16   :  { %7625 = sst [smem:[#allocation86_spill]] %s6406_s14 }
  0x17   :  { %7626 = sst [smem:[#allocation87_spill]] %s6411_s19 }
  0x18   :  { %7627 = sst [smem:[#allocation88_spill]] %s6416_s24 }
  0x19   :  { %s6421_s30 = sld [smem:[%s7547_s0 + %s6281_s26]]  }
  0x1a   :  { %s6426_s6 = sld [smem:[%s7547_s0 + %s6282_s1]]  }
  0x1b   :  { %s6431_s12 = sld [smem:[%s7547_s0 + %s6283_s7]]   ;;  %s6287_s7 = smov 18  }
  0x1c   :  { %s6436_s20 = sld [smem:[%s7547_s0 + %s6284_s15]]   ;;  %s6288_s15 = smov 19  }
  0x1d   :  { %s6441_s27 = sld [smem:[%s7547_s0 + %s6285_s22]]   ;;  %s6289_s22 = smov 20  }
  0x1e   :  { %s6446_s4 = sld [smem:[%s7547_s0 + %s6286_s28]]   ;;  %s6290_s28 = smov 21  }
  0x1f   :  { %7628 = sst [smem:[#allocation89_spill]] %s6421_s30 }
  0x20   :  { %7629 = sst [smem:[#allocation90_spill]] %s6426_s6 }
  0x21   :  { %7630 = sst [smem:[#allocation91_spill]] %s6431_s12 }
  0x22   :  { %7631 = sst [smem:[#allocation92_spill]] %s6436_s20 }
  0x23   :  { %7632 = sst [smem:[#allocation93_spill]] %s6441_s27 }
  0x24   :  { %7633 = sst [smem:[#allocation94_spill]] %s6446_s4 }
  0x25   :  { %s6451_s29 = sld [smem:[%s7547_s0 + %s6287_s7]]   ;;  %s6291_s7 = smov 22  }
  0x26   :  { %s6456_s13 = sld [smem:[%s7547_s0 + %s6288_s15]]   ;;  %s6292_s15 = smov 23  }
  0x27   :  { %s6461_s5 = sld [smem:[%s7547_s0 + %s6289_s22]]   ;;  %s6293_s22 = smov 24  }
  0x28   :  { %s6466_s27 = sld [smem:[%s7547_s0 + %s6290_s28]]   ;;  %s6294_s28 = smov 25  }
  0x29   :  { %s6476_s12 = sld [smem:[%s7547_s0 + %s6292_s15]]   ;;  %s6296_s15 = smov 27  }
  0x2a   :  { %s6486_s30 = sld [smem:[%s7547_s0 + %s6294_s28]]   ;;  %s6298_s28 = smov 29  }
  0x2b   :  { %7634 = sst [smem:[#allocation95_spill]] %s6451_s29 }
  0x2c   :  { %7635 = sst [smem:[#allocation96_spill]] %s6456_s13 }
  0x2d   :  { %7636 = sst [smem:[#allocation97_spill]] %s6461_s5 }
  0x2e   :  { %7637 = sst [smem:[#allocation98_spill]] %s6466_s27 }
  0x2f   :  { %s6471_s29 = sld [smem:[%s7547_s0 + %s6291_s7]]   ;;  %s6295_s7 = smov 26  }
  0x30   :  { %7639 = sst [smem:[#allocation100_spill]] %s6476_s12 }
  0x31   :  { %s6481_s5 = sld [smem:[%s7547_s0 + %s6293_s22]]   ;;  %s6297_s22 = smov 28  }
  0x32   :  { %7641 = sst [smem:[#allocation102_spill]] %s6486_s30 }
  0x33   :  { %s6496_s19 = sld [smem:[%s7547_s0 + %s6296_s15]]   ;;  %s6300_s15 = smov 31  }
  0x34   :  { %s6506_s8 = sld [smem:[%s7547_s0 + %s6298_s28]]   ;;  %s6302_s28 = smov 33  }
  0x35   :  { %7638 = sst [smem:[#allocation99_spill]] %s6471_s29 }
  0x36   :  { %s6491_s29 = sld [smem:[%s7547_s0 + %s6295_s7]]   ;;  %s6299_s7 = smov 30  }
  0x37   :  { %7640 = sst [smem:[#allocation101_spill]] %s6481_s5 }
  0x38   :  { %s6501_s5 = sld [smem:[%s7547_s0 + %s6297_s22]]   ;;  %s6301_s22 = smov 32  }
  0x39   :  { %7643 = sst [smem:[#allocation104_spill]] %s6496_s19 }
  0x3a   :  { %7645 = sst [smem:[#allocation106_spill]] %s6506_s8 }
  0x3b   :  { %s6516_s25 = sld [smem:[%s7547_s0 + %s6300_s15]]   ;;  %s6304_s15 = smov 35  }
  0x3c   :  { %7642 = sst [smem:[#allocation103_spill]] %s6491_s29 }
  0x3d   :  { %s6511_s29 = sld [smem:[%s7547_s0 + %s6299_s7]]   ;;  %s6303_s7 = smov 34  }
  0x3e   :  { %7644 = sst [smem:[#allocation105_spill]] %s6501_s5 }
  0x3f   :  { %s6521_s5 = sld [smem:[%s7547_s0 + %s6301_s22]]  }
  0x40   :  { %s6526_s21 = sld [smem:[%s7547_s0 + %s6302_s28]]  }
  0x41   :  { %7647 = sst [smem:[#allocation108_spill]] %s6516_s25 }
  0x42   :  { %s6536_s17 = sld [smem:[%s7547_s0 + %s6304_s15]]  }
  0x43   :  { %7646 = sst [smem:[#allocation107_spill]] %s6511_s29 }
  0x44   :  { %s6531_s29 = sld [smem:[%s7547_s0 + %s6303_s7]]  }
  0x45   :  { %7648 = sst [smem:[#allocation109_spill]] %s6521_s5 }
  0x46   :  { %7649 = sst [smem:[#allocation110_spill]] %s6526_s21 }
  0x48   :  { %7651 = sst [smem:[#allocation112_spill]] %s6536_s17 }
  0x4a   :  { %7650 = sst [smem:[#allocation111_spill]] %s6531_s29 }
  0x4b   :  { %76 = vsyncpa [#allocation4], 0 }
  0x4c   :  { %78 = vsyncpa [#allocation4 + $0x1], 0 }
  0x4d   :  { %79 = vsyncpa [#allocation7], 0 }
  0x4e   :  { %81 = vsyncpa [#allocation7 + $0x1], 0 }
  0x4f   :  { %82 = vsyncpa [#allocation10], 0 }
  0x50   :  { %84 = vsyncpa [#allocation10 + $0x1], 0 }
  0x51   :  { %85 = vsyncpa [#allocation13], 0 }
  0x52   :  { %87 = vsyncpa [#allocation13 + $0x1], 0 }
  0x53   :  { %88 = vsyncpa [#allocation16], 0 }
  0x54   :  { %89 = vsyncpa [#allocation19], 0 }
  0x55   :  { %90 = vsyncpa [#allocation22], 0 }
  0x56   :  { %91 = vsyncpa [#allocation25], 0 }
  0x57   :  { %92 = vsyncpa [#allocation28], 0 }
  0x58   :  { %93 = vsyncpa [#allocation31], 0 }
  0x59   :  { %94 = vsyncpa [#allocation34], 0 }
  0x5a   :  { %95 = vsyncpa [#allocation37], 0 }
  0x5b   :  { %96 = vsyncpa [#allocation40], 0 }
  0x5c   :  { %97 = vsyncpa [#allocation43], 0 }
  0x5d   :  { %98 = vsyncpa [#allocation46], 0 }
  0x5e   :  { %99 = vsyncpa [#allocation49], 0 }
  0x5f   :  { %100 = vsyncpa [#allocation52], 0 }
  0x60   :  { %101 = vsyncpa [#allocation55], 0 }
  0x61   :  { %102 = vsyncpa [#allocation5], 0 }
  0x62   :  { %104 = vsyncpa [#allocation5 + $0x1], 0  ;;  %s6538_s0 = smov 0   ;;  %s6540_s22 = smov 0  }
  0x63   :  { %s6542_s23 = smov 0   ;;  %s6544_s26 = smov 0  }
  0x64   :  { %s6546_s28 = smov 0   ;;  %s6548_s1 = smov 0  }
  0x65 LB: > { %s7652_s5 = sld [smem:[#allocation109_spill]]  ;;  %s7653_s30 = sld [smem:[#allocation102_spill]]  ;;  %s6260_s26 = sphi %s6544_s26, %s7762_s26   ;;  %s6256_s23 = sphi %s6542_s23, %s7761_s23   ;;  %s6252_s22 = sphi %s6540_s22, %s7760_s22   ;;  %s6248_s0 = sphi %s6538_s0, %s7759_s0   ;;  %s6268_s1 = sphi %s6548_s1, %s110_s1   ;;  %s6264_s28 = sphi %s6546_s28, %s7763_s28  }
  0x66   : > { %s7654_s27 = sld [smem:[#allocation98_spill]]  ;;  %s7655_s9 = sld [smem:[#allocation78_spill]] }
  0x67   : > { %s7656_s25 = sld [smem:[#allocation108_spill]]  ;;  %s7657_s24 = sld [smem:[#allocation88_spill]] }
  0x68   : > { %s7658_s21 = sld [smem:[#allocation110_spill]]  ;;  %s7659_s20 = sld [smem:[#allocation92_spill]] }
  0x69   : > { %s7660_s19 = sld [smem:[#allocation104_spill]]  ;;  %s7662_s12 = sld [smem:[#allocation100_spill]] }
  0x6a   : > { %s7661_s13 = sld [smem:[#allocation96_spill]]  ;;  %s7663_s8 = sld [smem:[#allocation106_spill]] }
  0x6b   : > { %s7664_s6 = sld [smem:[#allocation90_spill]]  ;;  %s7665_s4 = sld [smem:[#allocation94_spill]] }
  0x6c   : > { %s7666_s14 = sld [smem:[#allocation86_spill]]  ;;  %s7667_s3 = sld [smem:[#allocation84_spill]] }
  0x6d   : > { %7668 = sst [smem:[#allocation113_spill]] %s6256_s23  ;;  %s6569_s2 = sadd.s32 4294967295, %s6268_s1  }
  0x6e   : > { %7669 = sst [smem:[#allocation114_spill]] %s6260_s26  ;;  %p4135_p0 = scmp.ge.s32.totalorder %s6268_s1, 1 }
  0x6f   : > { %7670 = sst [smem:[#allocation115_spill]] %s6268_s1  ;;  %p7568_p1 = scmp.eq.s32.totalorder %s6569_s2, 0 }
  0x70   : > { %p929_p2 = scmp.lt.s32.totalorder %s6268_s1, 3  ;;  %s6305_s10 = smov [#allocation15]  }
  0x71   : > { %s941_s11 = sshll.u32 %s6305_s10, 4  ;;  %s6306_s16 = smov [#allocation18]   ;;  %s6578_s11 = int_to_ptr.vmem [resolvable:$true] %s941_s11 }
  0x72   : > { %p6574_p3 = pnand %p4135_p0, %p929_p2  ;;  %s965_s18 = sshll.u32 %s6306_s16, 4  ;;  %s6589_s18 = int_to_ptr.vmem [resolvable:$true] %s965_s18 }
  0x73   : > { %s6307_s17 = smov [#allocation21]   ;;  %s5124_s29 = scalar_lea.hbm %s7667_s3, 512 }
  0x74   : > { %s7671_s7 = scalar_select %p6574_p3, 1, 0 }
  0x75   : > { %p4748_p4 = pneg %p6574_p3  ;;  %s6591_s26 = sshll.u32 %s6307_s17, 4  ;;  %s990_s26 = int_to_ptr.vmem [resolvable:$true] %s6591_s26 }
  0x76   : > { %7672 = sst [smem:[#allocation116_spill]] %s7671_s7  ;;  %p5125_p7 = scmp.ne.s32.totalorder %s7667_s3, %s5124_s29 }
  0x77   : > { %p6585_p6 = pnand %p4748_p4, %p7568_p1  ;;  %p5131_p11 = scmp.lt.u32.totalorder %s5124_s29, %s7667_s3 }
  0x79   : > { %s7673_s15 = scalar_select %p6585_p6, 1, 0 }
  0x7a   : > { %p6597_p8 = pneg %p6585_p6 }
  0x7c   : > { %s7674_s10 = scalar_select %p6597_p8, 1, 0 }
  0x7d   : > { %p5127_p9 = pnand %p6597_p8, %p5125_p7 }
  0x7f   : > { %p5128_p10 = pneg %p5127_p9 }
  0x81   : > { %p5133_p12 = pnand %p5131_p11, %p5128_p10 }
  0x83   : > { %5136 = shalt.err (!%p5133_p12)
}
  0x84   : > { %s5137_s17 = scalar_lea.vmem %s6578_s11, 512  ;;  %p5145_p4 = scmp.lt.s32.totalorder %s6578_s11, %s6578_s11 }
  0x85   : > { %p5138_p13 = scmp.ne.s32.totalorder %s6578_s11, %s5137_s17  ;;  %p5146_p5 = scmp.lt.s32.totalorder %s5137_s17, %s5137_s17 }
  0x87   : > { %p5140_p0 = pnand %p5138_p13, %p6597_p8  ;;  %p5147_p1 = por %p5146_p5, %p5145_p4 }
  0x89   : > { %p5141_p2 = pneg %p5140_p0 }
  0x8b   : > { %p5148_p3 = pnand %p5147_p1, %p5141_p2 }
  0x8d   : > { %5151 = shalt.err (!%p5148_p3)
}
  0x8e   : > { %s6308_s16 = smov 64   ;;  %s6309_s29 = smov 4  }
  0x8f   : > { %4751 = dma.hbm_to_vmem [thread:$0]  (!%p6585_p6), %s7667_s3, 512, %s6578_s11, [#allocation16], %s6308_s16, %s6308_s16, %s6309_s29  }
  0x90   : > { %s5152_s7 = scalar_lea.hbm %s7666_s14, 512 }
  0x91   : > { %p5153_p7 = scmp.ne.s32.totalorder %s7666_s14, %s5152_s7  ;;  %p5159_p3 = scmp.lt.u32.totalorder %s5152_s7, %s7666_s14 }
  0x93   : > { %p5155_p5 = pnand %p5153_p7, %p6597_p8 }
  0x95   : > { %p5156_p1 = pneg %p5155_p5 }
  0x97   : > { %p5161_p9 = pnand %p5159_p3, %p5156_p1 }
  0x99   : > { %5164 = shalt.err (!%p5161_p9)
}
  0x9a   : > { %s5165_s17 = scalar_lea.vmem %s6589_s18, 512  ;;  %p5173_p13 = scmp.lt.s32.totalorder %s6589_s18, %s6589_s18 }
  0x9b   : > { %p5166_p10 = scmp.ne.s32.totalorder %s6589_s18, %s5165_s17  ;;  %p5174_p0 = scmp.lt.s32.totalorder %s5165_s17, %s5165_s17 }
  0x9d   : > { %p5168_p11 = pnand %p5166_p10, %p6597_p8  ;;  %p5175_p2 = por %p5174_p0, %p5173_p13 }
  0x9f   : > { %p5169_p12 = pneg %p5168_p11 }
  0xa1   : > { %p5176_p4 = pnand %p5175_p2, %p5169_p12 }
  0xa3   : > { %5179 = shalt.err (!%p5176_p4)
}
  0xa4   : > { %4757 = dma.hbm_to_vmem [thread:$0]  (!%p6585_p6), %s7666_s14, 512, %s6589_s18, [#allocation19], %s6308_s16, %s6308_s16, %s6309_s29  }
  0xa5   : > { %s5180_s7 = scalar_lea.hbm %s7657_s24, 512 }
  0xa6   : > { %p5181_p7 = scmp.ne.s32.totalorder %s7657_s24, %s5180_s7  ;;  %p5187_p3 = scmp.lt.u32.totalorder %s5180_s7, %s7657_s24 }
  0xa8   : > { %p5183_p5 = pnand %p5181_p7, %p6597_p8 }
  0xaa   : > { %p5184_p1 = pneg %p5183_p5 }
  0xac   : > { %p5189_p9 = pnand %p5187_p3, %p5184_p1 }
  0xae   : > { %5192 = shalt.err (!%p5189_p9)
}
  0xaf   : > { %s5193_s11 = scalar_lea.vmem %s990_s26, 512  ;;  %p5201_p13 = scmp.lt.s32.totalorder %s990_s26, %s990_s26 }
  0xb0   : > { %p5194_p10 = scmp.ne.s32.totalorder %s990_s26, %s5193_s11  ;;  %p5202_p0 = scmp.lt.s32.totalorder %s5193_s11, %s5193_s11 }
  0xb2   : > { %p5196_p11 = pnand %p5194_p10, %p6597_p8  ;;  %p5203_p2 = por %p5202_p0, %p5201_p13 }
  0xb4   : > { %p5197_p12 = pneg %p5196_p11 }
  0xb6   : > { %p5204_p4 = pnand %p5203_p2, %p5197_p12 }
  0xb8   : > { %5207 = shalt.err (!%p5204_p4)
}
  0xb9   : > { %4763 = dma.hbm_to_vmem [thread:$0]  (!%p6585_p6), %s7657_s24, 512, %s990_s26, [#allocation22], %s6308_s16, %s6308_s16, %s6309_s29  }
  0xba   : > { %s6310_s18 = smov [#allocation24]   ;;  %s6311_s7 = smov [#allocation27]  }
  0xbb   : > { %s1013_s17 = sshll.u32 %s6310_s18, 4  ;;  %s1037_s3 = sshll.u32 %s6311_s7, 4  ;;  %s1014_s17 = int_to_ptr.vmem [resolvable:$true] %s1013_s17  ;;  %s1038_s3 = int_to_ptr.vmem [resolvable:$true] %s1037_s3 }
  0xbc   : > { %s5208_s11 = scalar_lea.hbm %s7664_s6, 512 }
  0xbd   : > { %p5209_p7 = scmp.ne.s32.totalorder %s7664_s6, %s5208_s11  ;;  %p5215_p3 = scmp.lt.u32.totalorder %s5208_s11, %s7664_s6 }
  0xbf   : > { %p5211_p5 = pnand %p5209_p7, %p6597_p8 }
  0xc1   : > { %p5212_p1 = pneg %p5211_p5 }
  0xc3   : > { %p5217_p9 = pnand %p5215_p3, %p5212_p1 }
  0xc5   : > { %5220 = shalt.err (!%p5217_p9)
}
  0xc6   : > { %s5221_s14 = scalar_lea.vmem %s1014_s17, 512  ;;  %p5229_p13 = scmp.lt.s32.totalorder %s1014_s17, %s1014_s17 }
  0xc7   : > { %p5222_p10 = scmp.ne.s32.totalorder %s1014_s17, %s5221_s14  ;;  %p5230_p0 = scmp.lt.s32.totalorder %s5221_s14, %s5221_s14 }
  0xc9   : > { %p5224_p11 = pnand %p5222_p10, %p6597_p8  ;;  %p5231_p2 = por %p5230_p0, %p5229_p13 }
  0xcb   : > { %p5225_p12 = pneg %p5224_p11 }
  0xcd   : > { %p5232_p4 = pnand %p5231_p2, %p5225_p12 }
  0xcf   : > { %5235 = shalt.err (!%p5232_p4)
}
  0xd0   : > { %4769 = dma.hbm_to_vmem [thread:$0]  (!%p6585_p6), %s7664_s6, 512, %s1014_s17, [#allocation25], %s6308_s16, %s6308_s16, %s6309_s29  }
  0xd1   : > { %s5236_s26 = scalar_lea.hbm %s7659_s20, 512 }
  0xd2   : > { %p5237_p7 = scmp.ne.s32.totalorder %s7659_s20, %s5236_s26  ;;  %p5243_p3 = scmp.lt.u32.totalorder %s5236_s26, %s7659_s20 }
  0xd4   : > { %p5239_p5 = pnand %p5237_p7, %p6597_p8 }
  0xd6   : > { %p5240_p1 = pneg %p5239_p5 }
  0xd8   : > { %p5245_p9 = pnand %p5243_p3, %p5240_p1 }
  0xda   : > { %5248 = shalt.err (!%p5245_p9)
}
  0xdb   : > { %s5249_s14 = scalar_lea.vmem %s1038_s3, 512  ;;  %p5257_p13 = scmp.lt.s32.totalorder %s1038_s3, %s1038_s3 }
  0xdc   : > { %p5250_p10 = scmp.ne.s32.totalorder %s1038_s3, %s5249_s14  ;;  %p5258_p0 = scmp.lt.s32.totalorder %s5249_s14, %s5249_s14 }
  0xde   : > { %p5252_p11 = pnand %p5250_p10, %p6597_p8  ;;  %p5259_p2 = por %p5258_p0, %p5257_p13 }
  0xe0   : > { %p5253_p12 = pneg %p5252_p11 }
  0xe2   : > { %p5260_p4 = pnand %p5259_p2, %p5253_p12 }
  0xe4   : > { %5263 = shalt.err (!%p5260_p4)
}
  0xe5   : > { %4775 = dma.hbm_to_vmem [thread:$0]  (!%p6585_p6), %s7659_s20, 512, %s1038_s3, [#allocation28], %s6308_s16, %s6308_s16, %s6309_s29  }
  0xe6   : > { %s6312_s18 = smov [#allocation30]   ;;  %s6313_s7 = smov [#allocation33]  }
  0xe7   : > { %s1061_s17 = sshll.u32 %s6312_s18, 4  ;;  %s1085_s11 = sshll.u32 %s6313_s7, 4  ;;  %s1062_s17 = int_to_ptr.vmem [resolvable:$true] %s1061_s17  ;;  %s1086_s11 = int_to_ptr.vmem [resolvable:$true] %s1085_s11 }
  0xe8   : > { %s5264_s26 = scalar_lea.hbm %s7665_s4, 512 }
  0xe9   : > { %p5265_p7 = scmp.ne.s32.totalorder %s7665_s4, %s5264_s26  ;;  %p5271_p3 = scmp.lt.u32.totalorder %s5264_s26, %s7665_s4 }
  0xeb   : > { %p5267_p5 = pnand %p5265_p7, %p6597_p8 }
  0xed   : > { %p5268_p1 = pneg %p5267_p5 }
  0xef   : > { %p5273_p9 = pnand %p5271_p3, %p5268_p1 }
  0xf1   : > { %5276 = shalt.err (!%p5273_p9)
}
  0xf2   : > { %s5277_s14 = scalar_lea.vmem %s1062_s17, 512  ;;  %p5285_p13 = scmp.lt.s32.totalorder %s1062_s17, %s1062_s17 }
  0xf3   : > { %p5278_p10 = scmp.ne.s32.totalorder %s1062_s17, %s5277_s14  ;;  %p5286_p0 = scmp.lt.s32.totalorder %s5277_s14, %s5277_s14 }
  0xf5   : > { %p5280_p11 = pnand %p5278_p10, %p6597_p8  ;;  %p5287_p2 = por %p5286_p0, %p5285_p13 }
  0xf7   : > { %p5281_p12 = pneg %p5280_p11 }
  0xf9   : > { %p5288_p4 = pnand %p5287_p2, %p5281_p12 }
  0xfb   : > { %5291 = shalt.err (!%p5288_p4)
}
  0xfc   : > { %4781 = dma.hbm_to_vmem [thread:$0]  (!%p6585_p6), %s7665_s4, 512, %s1062_s17, [#allocation31], %s6308_s16, %s6308_s16, %s6309_s29  }
  0xfd   : > { %s5292_s3 = scalar_lea.hbm %s7661_s13, 512 }
  0xfe   : > { %p5293_p7 = scmp.ne.s32.totalorder %s7661_s13, %s5292_s3  ;;  %p5299_p3 = scmp.lt.u32.totalorder %s5292_s3, %s7661_s13 }
 0x100   : > { %p5295_p5 = pnand %p5293_p7, %p6597_p8 }
 0x102   : > { %p5296_p1 = pneg %p5295_p5 }
 0x104   : > { %p5301_p9 = pnand %p5299_p3, %p5296_p1 }
 0x106   : > { %5304 = shalt.err (!%p5301_p9)
}
 0x107   : > { %s5305_s18 = scalar_lea.vmem %s1086_s11, 512  ;;  %p5313_p13 = scmp.lt.s32.totalorder %s1086_s11, %s1086_s11 }
 0x108   : > { %p5306_p10 = scmp.ne.s32.totalorder %s1086_s11, %s5305_s18  ;;  %p5314_p0 = scmp.lt.s32.totalorder %s5305_s18, %s5305_s18 }
 0x10a   : > { %p5308_p11 = pnand %p5306_p10, %p6597_p8  ;;  %p5315_p2 = por %p5314_p0, %p5313_p13 }
 0x10c   : > { %p5309_p12 = pneg %p5308_p11 }
 0x10e   : > { %p5316_p4 = pnand %p5315_p2, %p5309_p12 }
 0x110   : > { %5319 = shalt.err (!%p5316_p4)
}
 0x111   : > { %4787 = dma.hbm_to_vmem [thread:$0]  (!%p6585_p6), %s7661_s13, 512, %s1086_s11, [#allocation34], %s6308_s16, %s6308_s16, %s6309_s29  }
 0x112   : > { %s6314_s17 = smov [#allocation36]   ;;  %s6315_s26 = smov [#allocation39]  }
 0x113   : > { %s1109_s7 = sshll.u32 %s6314_s17, 4  ;;  %s1133_s14 = sshll.u32 %s6315_s26, 4  ;;  %s1110_s7 = int_to_ptr.vmem [resolvable:$true] %s1109_s7  ;;  %s1134_s14 = int_to_ptr.vmem [resolvable:$true] %s1133_s14 }
 0x114   : > { %s5320_s3 = scalar_lea.hbm %s7654_s27, 512 }
 0x115   : > { %p5321_p7 = scmp.ne.s32.totalorder %s7654_s27, %s5320_s3  ;;  %p5327_p3 = scmp.lt.u32.totalorder %s5320_s3, %s7654_s27 }
 0x117   : > { %p5323_p5 = pnand %p5321_p7, %p6597_p8 }
 0x119   : > { %p5324_p1 = pneg %p5323_p5 }
 0x11b   : > { %p5329_p9 = pnand %p5327_p3, %p5324_p1 }
 0x11d   : > { %5332 = shalt.err (!%p5329_p9)
}
 0x11e   : > { %s5333_s18 = scalar_lea.vmem %s1110_s7, 512  ;;  %p5341_p13 = scmp.lt.s32.totalorder %s1110_s7, %s1110_s7 }
 0x11f   : > { %p5334_p10 = scmp.ne.s32.totalorder %s1110_s7, %s5333_s18  ;;  %p5342_p0 = scmp.lt.s32.totalorder %s5333_s18, %s5333_s18 }
 0x121   : > { %p5336_p11 = pnand %p5334_p10, %p6597_p8  ;;  %p5343_p2 = por %p5342_p0, %p5341_p13 }
 0x123   : > { %p5337_p12 = pneg %p5336_p11 }
 0x125   : > { %p5344_p4 = pnand %p5343_p2, %p5337_p12 }
 0x127   : > { %5347 = shalt.err (!%p5344_p4)
}
 0x128   : > { %4793 = dma.hbm_to_vmem [thread:$0]  (!%p6585_p6), %s7654_s27, 512, %s1110_s7, [#allocation37], %s6308_s16, %s6308_s16, %s6309_s29  }
 0x129   : > { %s5348_s11 = scalar_lea.hbm %s7662_s12, 512 }
 0x12a   : > { %p5349_p7 = scmp.ne.s32.totalorder %s7662_s12, %s5348_s11  ;;  %p5355_p3 = scmp.lt.u32.totalorder %s5348_s11, %s7662_s12 }
 0x12c   : > { %p5351_p5 = pnand %p5349_p7, %p6597_p8 }
 0x12e   : > { %p5352_p1 = pneg %p5351_p5 }
 0x130   : > { %p5357_p9 = pnand %p5355_p3, %p5352_p1 }
 0x132   : > { %5360 = shalt.err (!%p5357_p9)
}
 0x133   : > { %s5361_s17 = scalar_lea.vmem %s1134_s14, 512  ;;  %p5369_p13 = scmp.lt.s32.totalorder %s1134_s14, %s1134_s14 }
 0x134   : > { %p5362_p10 = scmp.ne.s32.totalorder %s1134_s14, %s5361_s17  ;;  %p5370_p0 = scmp.lt.s32.totalorder %s5361_s17, %s5361_s17 }
 0x136   : > { %p5364_p11 = pnand %p5362_p10, %p6597_p8  ;;  %p5371_p2 = por %p5370_p0, %p5369_p13 }
 0x138   : > { %p5365_p12 = pneg %p5364_p11 }
 0x13a   : > { %p5372_p4 = pnand %p5371_p2, %p5365_p12 }
 0x13c   : > { %5375 = shalt.err (!%p5372_p4)
}
 0x13d   : > { %4799 = dma.hbm_to_vmem [thread:$0]  (!%p6585_p6), %s7662_s12, 512, %s1134_s14, [#allocation40], %s6308_s16, %s6308_s16, %s6309_s29  }
 0x13e   : > { %s6316_s7 = smov [#allocation42]   ;;  %s6317_s3 = smov [#allocation45]  }
 0x13f   : > { %s1157_s26 = sshll.u32 %s6316_s7, 4  ;;  %s1182_s18 = sshll.u32 %s6317_s3, 4  ;;  %s1158_s26 = int_to_ptr.vmem [resolvable:$true] %s1157_s26  ;;  %s1183_s18 = int_to_ptr.vmem [resolvable:$true] %s1182_s18 }
 0x140   : > { %s5376_s11 = scalar_lea.hbm %s7653_s30, 1024 }
 0x141   : > { %p5377_p7 = scmp.ne.s32.totalorder %s7653_s30, %s5376_s11  ;;  %p5383_p3 = scmp.lt.u32.totalorder %s5376_s11, %s7653_s30 }
 0x143   : > { %p5379_p5 = pnand %p5377_p7, %p6597_p8 }
 0x145   : > { %p5380_p1 = pneg %p5379_p5 }
 0x147   : > { %p5385_p9 = pnand %p5383_p3, %p5380_p1 }
 0x149   : > { %5388 = shalt.err (!%p5385_p9)
}
 0x14a   : > { %s5389_s17 = scalar_lea.vmem %s1158_s26, 1024  ;;  %p5397_p13 = scmp.lt.s32.totalorder %s1158_s26, %s1158_s26 }
 0x14b   : > { %p5390_p10 = scmp.ne.s32.totalorder %s1158_s26, %s5389_s17  ;;  %p5398_p0 = scmp.lt.s32.totalorder %s5389_s17, %s5389_s17 }
 0x14d   : > { %p5392_p11 = pnand %p5390_p10, %p6597_p8  ;;  %p5399_p2 = por %p5398_p0, %p5397_p13 }
 0x14f   : > { %p5393_p12 = pneg %p5392_p11 }
 0x151   : > { %p5400_p4 = pnand %p5399_p2, %p5393_p12 }
 0x153   : > { %5403 = shalt.err (!%p5400_p4)
}
 0x154   : > { %4805 = dma.hbm_to_vmem [thread:$0]  (!%p6585_p6), %s7653_s30, 1024, %s1158_s26, [#allocation43], %s6308_s16, %s6308_s16, %s6309_s29  }
 0x155   : > { %s5404_s14 = scalar_lea.hbm %s7660_s19, 16 }
 0x156   : > { %p5405_p7 = scmp.ne.s32.totalorder %s7660_s19, %s5404_s14  ;;  %p5411_p3 = scmp.lt.u32.totalorder %s5404_s14, %s7660_s19 }
 0x158   : > { %p5407_p5 = pnand %p5405_p7, %p6597_p8 }
 0x15a   : > { %p5408_p1 = pneg %p5407_p5 }
 0x15c   : > { %p5413_p9 = pnand %p5411_p3, %p5408_p1 }
 0x15e   : > { %5416 = shalt.err (!%p5413_p9)
}
 0x15f   : > { %s5417_s7 = scalar_lea.vmem %s1183_s18, 16  ;;  %s5424_s3 = scalar_lea.vmem %s1183_s18, 32 }
 0x160   : > { %p5418_p10 = scmp.ne.s32.totalorder %s1183_s18, %s5417_s7  ;;  %p5425_p13 = scmp.lt.s32.totalorder %s1183_s18, %s1183_s18 }
 0x161   : > { %p5426_p0 = scmp.lt.s32.totalorder %s5424_s3, %s5417_s7 }
 0x162   : > { %p5420_p11 = pnand %p5418_p10, %p6597_p8 }
 0x163   : > { %p5427_p2 = por %p5426_p0, %p5425_p13 }
 0x164   : > { %p5421_p12 = pneg %p5420_p11 }
 0x166   : > { %p5428_p4 = pnand %p5427_p2, %p5421_p12 }
 0x168   : > { %5431 = shalt.err (!%p5428_p4)
}
 0x169   : > { %4811 = dma.hbm_to_vmem [thread:$0]  (!%p6585_p6), %s7660_s19, 16, %s1183_s18, [#allocation46]  }
 0x16a   : > { %s6318_s16 = smov [#allocation48]   ;;  %s6319_s26 = smov [#allocation51]  }
 0x16b   : > { %s1204_s29 = sshll.u32 %s6318_s16, 4  ;;  %s1226_s11 = sshll.u32 %s6319_s26, 4  ;;  %s1205_s29 = int_to_ptr.vmem [resolvable:$true] %s1204_s29  ;;  %s1227_s11 = int_to_ptr.vmem [resolvable:$true] %s1226_s11 }
 0x16c   : > { %s5432_s17 = scalar_lea.hbm %s7663_s8, 16 }
 0x16d   : > { %p5433_p7 = scmp.ne.s32.totalorder %s7663_s8, %s5432_s17  ;;  %p5439_p3 = scmp.lt.u32.totalorder %s5432_s17, %s7663_s8 }
 0x16f   : > { %p5435_p5 = pnand %p5433_p7, %p6597_p8 }
 0x171   : > { %p5436_p1 = pneg %p5435_p5 }
 0x173   : > { %p5441_p9 = pnand %p5439_p3, %p5436_p1 }
 0x175   : > { %5444 = shalt.err (!%p5441_p9)
}
 0x176   : > { %s5445_s14 = scalar_lea.vmem %s1205_s29, 16  ;;  %s5452_s18 = scalar_lea.vmem %s1205_s29, 32 }
 0x177   : > { %p5446_p10 = scmp.ne.s32.totalorder %s1205_s29, %s5445_s14  ;;  %p5453_p13 = scmp.lt.s32.totalorder %s1205_s29, %s1205_s29 }
 0x178   : > { %p5454_p0 = scmp.lt.s32.totalorder %s5452_s18, %s5445_s14 }
 0x179   : > { %p5448_p11 = pnand %p5446_p10, %p6597_p8 }
 0x17a   : > { %p5455_p2 = por %p5454_p0, %p5453_p13 }
 0x17b   : > { %p5449_p12 = pneg %p5448_p11 }
 0x17d   : > { %p5456_p4 = pnand %p5455_p2, %p5449_p12 }
 0x17f   : > { %5459 = shalt.err (!%p5456_p4)
}
 0x180   : > { %4817 = dma.hbm_to_vmem [thread:$0]  (!%p6585_p6), %s7663_s8, 16, %s1205_s29, [#allocation49]  }
 0x181   : > { %s5460_s7 = scalar_lea.hbm %s7656_s25, 16 }
 0x182   : > { %p5461_p7 = scmp.ne.s32.totalorder %s7656_s25, %s5460_s7  ;;  %p5467_p3 = scmp.lt.u32.totalorder %s5460_s7, %s7656_s25 }
 0x184   : > { %p5463_p5 = pnand %p5461_p7, %p6597_p8 }
 0x186   : > { %p5464_p1 = pneg %p5463_p5 }
 0x188   : > { %p5469_p9 = pnand %p5467_p3, %p5464_p1 }
 0x18a   : > { %5472 = shalt.err (!%p5469_p9)
}
 0x18b   : > { %s5473_s3 = scalar_lea.vmem %s1227_s11, 16  ;;  %s5480_s16 = scalar_lea.vmem %s1227_s11, 32 }
 0x18c   : > { %p5474_p10 = scmp.ne.s32.totalorder %s1227_s11, %s5473_s3  ;;  %p5481_p13 = scmp.lt.s32.totalorder %s1227_s11, %s1227_s11 }
 0x18d   : > { %p5482_p0 = scmp.lt.s32.totalorder %s5480_s16, %s5473_s3 }
 0x18e   : > { %p5476_p11 = pnand %p5474_p10, %p6597_p8 }
 0x18f   : > { %p5483_p2 = por %p5482_p0, %p5481_p13 }
 0x190   : > { %p5477_p12 = pneg %p5476_p11 }
 0x192   : > { %p5484_p4 = pnand %p5483_p2, %p5477_p12 }
 0x194   : > { %5487 = shalt.err (!%p5484_p4)
}
 0x195   : > { %4823 = dma.hbm_to_vmem [thread:$0]  (!%p6585_p6), %s7656_s25, 16, %s1227_s11, [#allocation52]  }
 0x196   : > { %s6320_s29 = smov [#allocation54]   ;;  %s5488_s17 = scalar_lea.hbm %s7658_s21, 16 }
 0x197   : > { %s1248_s26 = sshll.u32 %s6320_s29, 4  ;;  %p5489_p7 = scmp.ne.s32.totalorder %s7658_s21, %s5488_s17  ;;  %s1249_s26 = int_to_ptr.vmem [resolvable:$true] %s1248_s26 }
 0x198   : > { %p5495_p3 = scmp.lt.u32.totalorder %s5488_s17, %s7658_s21 }
 0x199   : > { %p5491_p5 = pnand %p5489_p7, %p6597_p8 }
 0x19b   : > { %p5492_p1 = pneg %p5491_p5 }
 0x19d   : > { %p5497_p9 = pnand %p5495_p3, %p5492_p1 }
 0x19f   : > { %5500 = shalt.err (!%p5497_p9)
}
 0x1a0   : > { %s5501_s14 = scalar_lea.vmem %s1249_s26, 16  ;;  %s5508_s18 = scalar_lea.vmem %s1249_s26, 32 }
 0x1a1   : > { %p5502_p10 = scmp.ne.s32.totalorder %s1249_s26, %s5501_s14  ;;  %p5509_p13 = scmp.lt.s32.totalorder %s1249_s26, %s1249_s26 }
 0x1a2   : > { %p5510_p0 = scmp.lt.s32.totalorder %s5508_s18, %s5501_s14 }
 0x1a3   : > { %p5504_p11 = pnand %p5502_p10, %p6597_p8 }
 0x1a4   : > { %p5511_p2 = por %p5510_p0, %p5509_p13 }
 0x1a5   : > { %p5505_p12 = pneg %p5504_p11 }
 0x1a7   : > { %p5512_p4 = pnand %p5511_p2, %p5505_p12 }
 0x1a9   : > { %5515 = shalt.err (!%p5512_p4)
}
 0x1aa   : > { %4829 = dma.hbm_to_vmem [thread:$0]  (!%p6585_p6), %s7658_s21, 16, %s1249_s26, [#allocation55]  }
 0x1ab   : > { %s4134_s11 = sadd.s32 4294967294, %s6268_s1   ;;  %s122_s7 = sadd.s32 1, %s6264_s28 }
 0x1ac   : > { %p124_p7 = scmp.ge.s32.totalorder %s122_s7, 2  ;;  %s131_s3 = sadd.s32 1, %s6256_s23 }
 0x1ad   : > { %p138_p5 = scmp.ne.s32.totalorder %s6256_s23, %s6252_s22  ;;  %p139_p1 = scmp.eq.s32.totalorder %s6268_s1, 0 }
 0x1ae   : > { %s7765_s7 = smov (%p124_p7, %s122_s7), 0  ;;  %p144_p9 = scmp.ne.s32.totalorder %s6252_s22, %s6248_s0 }
 0x1af   : > { %7675 = sst [smem:[#allocation117_spill]] %s7765_s7  ;;  %p6788_p3 = por %p139_p1, %p138_p5 }
 0x1b0   : > { %s126_s29 = ssub.s32 %s6264_s28, %s7765_s7  ;;  %p916_p10 = scmp.eq.s32.totalorder %s6569_s2, 1 }
 0x1b1   : > { %p129_p11 = scmp.eq.s32.totalorder %s126_s29, 0  ;;  %p7677_p12 = scmp.eq.s32.totalorder %s6569_s2, 0 }
 0x1b2   : > { %p6803_p0 = por %p916_p10, %p138_p5  ;;  %p922_p2 = scmp.eq.s32.totalorder %s4134_s11, 1 }
 0x1b3   : > { %p6799_p13 = por %p7677_p12, %p144_p9  ;;  %p4887_p7 = scmp.lt.s32.totalorder %s6268_s1, 2 }
 0x1b4   : > { %s7679_s17 = scalar_select %p6803_p0, 1, 0 }
 0x1b5   : > { %s7678_s26 = scalar_select %p6799_p13, 1, 0 }
 0x1b6   : > { %s6808_s14 = scalar_select %p129_p11, %s6256_s23, %s131_s3  }
 0x1b7   : > { %p6810_p4 = por %p922_p2, %p144_p9  ;;  %s6816_s4 = sand.u32 1, %s6256_s23  }
 0x1b8   : > { %7680 = sst [smem:[#allocation118_spill]] %s6808_s14  ;;  %s6819_s29 = sshll.u32 %s6264_s28, 7 }
 0x1b9   : > { %s7681_s18 = scalar_select %p6810_p4, 1, 0 }
 0x1ba   : > { %s6822_s6 = sshll.u32 %s6816_s4, 3  ;;  %p6826_p5 = pnand %p4887_p7, %p6788_p3 }
 0x1bb   : > { %s6831_s3 = sand.u32 1, %s6268_s1   ;;  %s6835_s8 = scalar_lea.hbm %s7655_s9, %s6819_s29 }
 0x1bc   : > { %s7682_s11 = scalar_select %p6826_p5, 1, 0 }
 0x1bd   : > { %s1293_s12 = scalar_lea.vmem [#allocation6], %s6822_s6  ;;  %s5516_s19 = scalar_lea.hbm %s6835_s8, 128 }
 0x1be   : > { %s1301_s13 = sshll.u32 %s1293_s12, 4  ;;  %p5517_p1 = scmp.ne.s32.totalorder %s6835_s8, %s5516_s19  ;;  %s6838_s13 = int_to_ptr.vmem [resolvable:$true] %s1301_s13 }
 0x1bf   : > { %p6845_p3 = pneg %p6826_p5  ;;  %s5521_s21 = scalar_lea.hbm %s7655_s9, 256 }
 0x1c0   : > { %p5522_p11 = scmp.lt.u32.totalorder %s6835_s8, %s7655_s9  ;;  %p5523_p12 = scmp.lt.u32.totalorder %s5521_s21, %s5516_s19 }
 0x1c1   : > { %s7683_s20 = scalar_select %p6845_p3, 1, 0 }
 0x1c2   : > { %p5519_p9 = pnand %p6845_p3, %p5517_p1  ;;  %p5524_p2 = por %p5523_p12, %p5522_p11 }
 0x1c3   : > { %p5525_p7 = scmp.lt.u32.totalorder %s5516_s19, %s6835_s8 }
 0x1c4   : > { %p5520_p10 = pneg %p5519_p9 }
 0x1c5   : > { %p5526_p4 = por %p5525_p7, %p5524_p2 }
 0x1c7   : > { %p5527_p0 = pnand %p5526_p4, %p5520_p10 }
 0x1c9   : > { %5530 = shalt.err (!%p5527_p0)
}
 0x1ca   : > { %s5531_s12 = scalar_lea.vmem %s6838_s13, 128  ;;  %s6321_s16 = smov [#allocation6]  }
 0x1cb   : > { %p5532_p13 = scmp.ne.s32.totalorder %s6838_s13, %s5531_s12  ;;  %s5536_s24 = sshll.u32 %s6321_s16, 4  ;;  %s5537_s24 = int_to_ptr.vmem [resolvable:$false] %s5536_s24 }
 0x1cc   : > { %s5538_s25 = scalar_lea.vmem %s5537_s24, 256  ;;  %p5539_p1 = scmp.lt.s32.totalorder %s6838_s13, %s5537_s24 }
 0x1cd   : > { %p5534_p6 = pnand %p5532_p13, %p6845_p3  ;;  %p5540_p9 = scmp.lt.s32.totalorder %s5538_s25, %s5531_s12 }
 0x1cf   : > { %p5535_p8 = pneg %p5534_p6  ;;  %p5541_p11 = por %p5540_p9, %p5539_p1 }
 0x1d1   : > { %p5542_p12 = pnand %p5541_p11, %p5535_p8 }
 0x1d3   : > { %5545 = shalt.err (!%p5542_p12)
}
 0x1d4   : > { %s7684_s21 = scalar_lea.sflag [#allocation7], %s6831_s3  ;;  %s7685_s19 = sld [smem:[#allocation80_spill]] }
 0x1d5   : > { %4839 = dma.hbm_to_vmem [thread:$0]  (!%p6826_p5), %s6835_s8, 128, %s6838_s13, %s7684_s21  }
 0x1d6   : > { %s1330_s25 = scalar_lea.vmem [#allocation9], %s6822_s6  ;;  %s4173_s12 = sshll.u32 %s6816_s4, 4 }
 0x1d7   : > { %s1337_s16 = sshll.u32 %s1330_s25, 4  ;;  %s7594_s9 = scalar_lea.sflag [#allocation10], %s6831_s3  ;;  %s6871_s16 = int_to_ptr.vmem [resolvable:$true] %s1337_s16 }
 0x1da   : > { %s6868_s24 = scalar_lea.hbm %s7685_s19, %s6819_s29  ;;  %s5551_s30 = scalar_lea.hbm %s7685_s19, 256 }
 0x1db   : > { %s5546_s27 = scalar_lea.hbm %s6868_s24, 128  ;;  %p5552_p0 = scmp.lt.u32.totalorder %s6868_s24, %s7685_s19 }
 0x1dc   : > { %p5547_p6 = scmp.ne.s32.totalorder %s6868_s24, %s5546_s27  ;;  %p5553_p4 = scmp.lt.u32.totalorder %s5551_s30, %s5546_s27 }
 0x1dd   : > { %p5555_p2 = scmp.lt.u32.totalorder %s5546_s27, %s6868_s24 }
 0x1de   : > { %p5549_p8 = pnand %p5547_p6, %p6845_p3  ;;  %p5554_p10 = por %p5553_p4, %p5552_p0 }
 0x1e0   : > { %p5550_p13 = pneg %p5549_p8  ;;  %p5556_p7 = por %p5555_p2, %p5554_p10 }
 0x1e2   : > { %p5557_p1 = pnand %p5556_p7, %p5550_p13 }
 0x1e4   : > { %5560 = shalt.err (!%p5557_p1)
}
 0x1e5   : > { %s5561_s13 = scalar_lea.vmem %s6871_s16, 128  ;;  %s6322_s8 = smov [#allocation9]  }
 0x1e6   : > { %p5562_p9 = scmp.ne.s32.totalorder %s6871_s16, %s5561_s13  ;;  %s5566_s21 = sshll.u32 %s6322_s8, 4  ;;  %s5567_s21 = int_to_ptr.vmem [resolvable:$false] %s5566_s21 }
 0x1e7   : > { %s5568_s25 = scalar_lea.vmem %s5567_s21, 256  ;;  %p5569_p6 = scmp.lt.s32.totalorder %s6871_s16, %s5567_s21 }
 0x1e8   : > { %p5564_p11 = pnand %p5562_p9, %p6845_p3  ;;  %p5570_p8 = scmp.lt.s32.totalorder %s5568_s25, %s5561_s13 }
 0x1ea   : > { %p5565_p12 = pneg %p5564_p11  ;;  %p5571_p0 = por %p5570_p8, %p5569_p6 }
 0x1ec   : > { %p5572_p4 = pnand %p5571_p0, %p5565_p12 }
 0x1ee   : > { %5575 = shalt.err (!%p5572_p4)
}
 0x1ef   : > { %s7686_s30 = sld [smem:[#allocation81_spill]]  ;;  %s7687_s27 = sld [smem:[#allocation82_spill]] }
 0x1f0   : > { %4845 = dma.hbm_to_vmem [thread:$0]  (!%p6826_p5), %s6868_s24, 128, %s6871_s16, %s7594_s9  }
 0x1f1   : > { %s4308_s13 = sshll.u32 %s6264_s28, 8  ;;  %s1348_s21 = scalar_lea.vmem [#allocation11], %s4173_s12 }
 0x1f2   : > { %s1355_s25 = sshll.u32 %s1348_s21, 4  ;;  %s1369_s7 = scalar_lea.vmem [#allocation12], %s4173_s12  ;;  %s6900_s25 = int_to_ptr.vmem [resolvable:$true] %s1355_s25 }
 0x1f3   : > { %s1376_s14 = sshll.u32 %s1369_s7, 4  ;;  %s6907_s14 = int_to_ptr.vmem [resolvable:$true] %s1376_s14 }
 0x1f5   : > { %s6896_s8 = scalar_lea.hbm %s7686_s30, %s4308_s13  ;;  %s6903_s19 = scalar_lea.hbm %s7687_s27, %s4308_s13 }
 0x1f6   : > { %s5576_s16 = scalar_lea.hbm %s6903_s19, 256  ;;  %s5581_s21 = scalar_lea.hbm %s7687_s27, 512 }
 0x1f7   : > { %p5577_p13 = scmp.ne.s32.totalorder %s6903_s19, %s5576_s16  ;;  %p5582_p7 = scmp.lt.u32.totalorder %s6903_s19, %s7687_s27 }
 0x1f8   : > { %p5583_p1 = scmp.lt.u32.totalorder %s5581_s21, %s5576_s16  ;;  %p5585_p11 = scmp.lt.u32.totalorder %s5576_s16, %s6903_s19 }
 0x1f9   : > { %p5579_p10 = pnand %p5577_p13, %p6845_p3 }
 0x1fa   : > { %p5584_p9 = por %p5583_p1, %p5582_p7 }
 0x1fb   : > { %p5580_p2 = pneg %p5579_p10 }
 0x1fc   : > { %p5586_p12 = por %p5585_p11, %p5584_p9 }
 0x1fe   : > { %p5587_p6 = pnand %p5586_p12, %p5580_p2 }
 0x200   : > { %5590 = shalt.err (!%p5587_p6)
}
 0x201   : > { %s5591_s7 = scalar_lea.vmem %s6907_s14, 256  ;;  %s6323_s12 = smov [#allocation12]  }
 0x202   : > { %p5592_p8 = scmp.ne.s32.totalorder %s6907_s14, %s5591_s7  ;;  %s5596_s13 = sshll.u32 %s6323_s12, 4  ;;  %s5597_s13 = int_to_ptr.vmem [resolvable:$false] %s5596_s13 }
 0x203   : > { %s5598_s9 = scalar_lea.vmem %s5597_s13, 512  ;;  %p5599_p13 = scmp.lt.s32.totalorder %s6907_s14, %s5597_s13 }
 0x204   : > { %p5594_p0 = pnand %p5592_p8, %p6845_p3  ;;  %p5600_p10 = scmp.lt.s32.totalorder %s5598_s9, %s5591_s7 }
 0x206   : > { %p5595_p4 = pneg %p5594_p0  ;;  %p5601_p7 = por %p5600_p10, %p5599_p13 }
 0x208   : > { %p5602_p1 = pnand %p5601_p7, %p5595_p4 }
 0x20a   : > { %5605 = shalt.err (!%p5602_p1)
}
 0x20b   : > { %s7603_s16 = smov 128   ;;  %s7688_s21 = sld [smem:[#allocation85_spill]] }
 0x20c   : > { %s7604_s24 = smov 8   ;;  %s7689_s12 = scalar_lea.sflag [#allocation13], %s6831_s3 }
 0x20d   : > { %4851 = dma.hbm_to_vmem [thread:$0]  (!%p6826_p5), %s6903_s19, 256, %s6907_s14, %s7689_s12, %s7603_s16, %s7603_s16, %s7604_s24  }
 0x20e   : > { %s6326_s9 = smov [#allocation17]   ;;  %s6327_s13 = smov [#allocation20]  }
 0x20f   : > { %s955_s7 = sshll.u32 %s6326_s9, 4  ;;  %s979_s27 = sshll.u32 %s6327_s13, 4  ;;  %s956_s7 = int_to_ptr.vmem [resolvable:$true] %s955_s7  ;;  %s980_s27 = int_to_ptr.vmem [resolvable:$true] %s979_s27 }
 0x210   : > { %p7690_p9 = scmp.ne.s32.totalorder %s7674_s10, 0 }
 0x211   : > { %s5606_s23 = scalar_lea.hbm %s7688_s21, 16 }
 0x212   : > { %p5607_p2 = scmp.ne.s32.totalorder %s7688_s21, %s5606_s23  ;;  %p5613_p6 = scmp.lt.u32.totalorder %s5606_s23, %s7688_s21 }
 0x214   : > { %p5609_p11 = pnand %p5607_p2, %p7690_p9 }
 0x216   : > { %p5610_p12 = pneg %p5609_p11 }
 0x218   : > { %p5615_p8 = pnand %p5613_p6, %p5610_p12 }
 0x21a   : > { %5618 = shalt.err (!%p5615_p8)
}
 0x21b   : > { %s5619_s1 = scalar_lea.vmem %s956_s7, 16  ;;  %s5626_s14 = scalar_lea.vmem %s956_s7, 32 }
 0x21c   : > { %p5620_p0 = scmp.ne.s32.totalorder %s956_s7, %s5619_s1  ;;  %p5627_p10 = scmp.lt.s32.totalorder %s956_s7, %s956_s7 }
 0x21d   : > { %p5628_p7 = scmp.lt.s32.totalorder %s5626_s14, %s5619_s1 }
 0x21e   : > { %p5622_p4 = pnand %p5620_p0, %p7690_p9 }
 0x21f   : > { %p5629_p1 = por %p5628_p7, %p5627_p10 }
 0x220   : > { %p5623_p13 = pneg %p5622_p4 }
 0x222   : > { %p5630_p5 = pnand %p5629_p1, %p5623_p13 }
 0x224   : > { %5633 = shalt.err (!%p5630_p5)
}
 0x225   : > { %p7691_p3 = scmp.ne.s32.totalorder %s7673_s15, 0  ;;  %s7692_s19 = sld [smem:[#allocation87_spill]] }
 0x227   : > { %4754 = dma.hbm_to_vmem [thread:$0]  (!%p7691_p3), %s7688_s21, 16, %s956_s7, [#allocation16]  }
 0x22b   : > { %s5634_s23 = scalar_lea.hbm %s7692_s19, 16 }
 0x22c   : > { %p5635_p2 = scmp.ne.s32.totalorder %s7692_s19, %s5634_s23  ;;  %p5641_p6 = scmp.lt.u32.totalorder %s5634_s23, %s7692_s19 }
 0x22e   : > { %p5637_p11 = pnand %p5635_p2, %p7690_p9 }
 0x230   : > { %p5638_p12 = pneg %p5637_p11 }
 0x232   : > { %p5643_p8 = pnand %p5641_p6, %p5638_p12 }
 0x234   : > { %5646 = shalt.err (!%p5643_p8)
}
 0x235   : > { %s5647_s1 = scalar_lea.vmem %s980_s27, 16  ;;  %s5654_s12 = scalar_lea.vmem %s980_s27, 32 }
 0x236   : > { %p5648_p5 = scmp.ne.s32.totalorder %s980_s27, %s5647_s1  ;;  %p5655_p13 = scmp.lt.s32.totalorder %s980_s27, %s980_s27 }
 0x237   : > { %p5656_p10 = scmp.lt.s32.totalorder %s5654_s12, %s5647_s1 }
 0x238   : > { %p5650_p0 = pnand %p5648_p5, %p7690_p9 }
 0x239   : > { %p5657_p7 = por %p5656_p10, %p5655_p13 }
 0x23a   : > { %p5651_p4 = pneg %p5650_p0 }
 0x23c   : > { %p5658_p1 = pnand %p5657_p7, %p5651_p4 }
 0x23e   : > { %5661 = shalt.err (!%p5658_p1)
}
 0x23f   : > { %s7693_s9 = sld [smem:[#allocation89_spill]]  ;;  %s6328_s7 = smov [#allocation23]  }
 0x240   : > { %4760 = dma.hbm_to_vmem [thread:$0]  (!%p7691_p3), %s7692_s19, 16, %s980_s27, [#allocation19]  }
 0x241   : > { %s1003_s13 = sshll.u32 %s6328_s7, 4  ;;  %s6329_s14 = smov [#allocation26]   ;;  %s1004_s13 = int_to_ptr.vmem [resolvable:$true] %s1003_s13 }
 0x242   : > { %s1027_s23 = sshll.u32 %s6329_s14, 4  ;;  %s1028_s23 = int_to_ptr.vmem [resolvable:$true] %s1027_s23 }
 0x245   : > { %s5662_s16 = scalar_lea.hbm %s7693_s9, 16 }
 0x246   : > { %p5663_p2 = scmp.ne.s32.totalorder %s7693_s9, %s5662_s16  ;;  %p5669_p6 = scmp.lt.u32.totalorder %s5662_s16, %s7693_s9 }
 0x248   : > { %p5665_p11 = pnand %p5663_p2, %p7690_p9 }
 0x24a   : > { %p5666_p12 = pneg %p5665_p11 }
 0x24c   : > { %p5671_p8 = pnand %p5669_p6, %p5666_p12 }
 0x24e   : > { %5674 = shalt.err (!%p5671_p8)
}
 0x24f   : > { %s5675_s1 = scalar_lea.vmem %s1004_s13, 16  ;;  %s5682_s27 = scalar_lea.vmem %s1004_s13, 32 }
 0x250   : > { %p5676_p5 = scmp.ne.s32.totalorder %s1004_s13, %s5675_s1  ;;  %p5683_p13 = scmp.lt.s32.totalorder %s1004_s13, %s1004_s13 }
 0x251   : > { %p5684_p10 = scmp.lt.s32.totalorder %s5682_s27, %s5675_s1 }
 0x252   : > { %p5678_p0 = pnand %p5676_p5, %p7690_p9 }
 0x253   : > { %p5685_p7 = por %p5684_p10, %p5683_p13 }
 0x254   : > { %p5679_p4 = pneg %p5678_p0 }
 0x256   : > { %p5686_p1 = pnand %p5685_p7, %p5679_p4 }
 0x258   : > { %5689 = shalt.err (!%p5686_p1)
}
 0x259   : > { %s7694_s12 = sld [smem:[#allocation91_spill]] }
 0x25a   : > { %4766 = dma.hbm_to_vmem [thread:$0]  (!%p7691_p3), %s7693_s9, 16, %s1004_s13, [#allocation22]  }
 0x25f   : > { %s5690_s16 = scalar_lea.hbm %s7694_s12, 16 }
 0x260   : > { %p5691_p2 = scmp.ne.s32.totalorder %s7694_s12, %s5690_s16  ;;  %p5697_p6 = scmp.lt.u32.totalorder %s5690_s16, %s7694_s12 }
 0x262   : > { %p5693_p11 = pnand %p5691_p2, %p7690_p9 }
 0x264   : > { %p5694_p12 = pneg %p5693_p11 }
 0x266   : > { %p5699_p8 = pnand %p5697_p6, %p5694_p12 }
 0x268   : > { %5702 = shalt.err (!%p5699_p8)
}
 0x269   : > { %s5703_s7 = scalar_lea.vmem %s1028_s23, 16  ;;  %s5710_s14 = scalar_lea.vmem %s1028_s23, 32 }
 0x26a   : > { %p5704_p5 = scmp.ne.s32.totalorder %s1028_s23, %s5703_s7  ;;  %p5711_p13 = scmp.lt.s32.totalorder %s1028_s23, %s1028_s23 }
 0x26b   : > { %p5712_p10 = scmp.lt.s32.totalorder %s5710_s14, %s5703_s7 }
 0x26c   : > { %p5706_p0 = pnand %p5704_p5, %p7690_p9 }
 0x26d   : > { %p5713_p7 = por %p5712_p10, %p5711_p13 }
 0x26e   : > { %p5707_p4 = pneg %p5706_p0 }
 0x270   : > { %p5714_p1 = pnand %p5713_p7, %p5707_p4 }
 0x272   : > { %5717 = shalt.err (!%p5714_p1)
}
 0x273   : > { %s7695_s13 = sld [smem:[#allocation93_spill]]  ;;  %s6330_s1 = smov [#allocation29]  }
 0x274   : > { %4772 = dma.hbm_to_vmem [thread:$0]  (!%p7691_p3), %s7694_s12, 16, %s1028_s23, [#allocation25]  }
 0x275   : > { %s1051_s27 = sshll.u32 %s6330_s1, 4  ;;  %s6331_s16 = smov [#allocation32]   ;;  %s1052_s27 = int_to_ptr.vmem [resolvable:$true] %s1051_s27 }
 0x276   : > { %s1075_s24 = sshll.u32 %s6331_s16, 4  ;;  %s1076_s24 = int_to_ptr.vmem [resolvable:$true] %s1075_s24 }
 0x279   : > { %s5718_s9 = scalar_lea.hbm %s7695_s13, 16 }
 0x27a   : > { %p5719_p2 = scmp.ne.s32.totalorder %s7695_s13, %s5718_s9  ;;  %p5725_p6 = scmp.lt.u32.totalorder %s5718_s9, %s7695_s13 }
 0x27c   : > { %p5721_p11 = pnand %p5719_p2, %p7690_p9 }
 0x27e   : > { %p5722_p12 = pneg %p5721_p11 }
 0x280   : > { %p5727_p8 = pnand %p5725_p6, %p5722_p12 }
 0x282   : > { %5730 = shalt.err (!%p5727_p8)
}
 0x283   : > { %s5731_s7 = scalar_lea.vmem %s1052_s27, 16  ;;  %s5738_s23 = scalar_lea.vmem %s1052_s27, 32 }
 0x284   : > { %p5732_p5 = scmp.ne.s32.totalorder %s1052_s27, %s5731_s7  ;;  %p5739_p13 = scmp.lt.s32.totalorder %s1052_s27, %s1052_s27 }
 0x285   : > { %p5740_p10 = scmp.lt.s32.totalorder %s5738_s23, %s5731_s7 }
 0x286   : > { %p5734_p0 = pnand %p5732_p5, %p7690_p9 }
 0x287   : > { %p5741_p7 = por %p5740_p10, %p5739_p13 }
 0x288   : > { %p5735_p4 = pneg %p5734_p0 }
 0x28a   : > { %p5742_p1 = pnand %p5741_p7, %p5735_p4 }
 0x28c   : > { %5745 = shalt.err (!%p5742_p1)
}
 0x28d   : > { %s7696_s14 = sld [smem:[#allocation95_spill]] }
 0x28e   : > { %4778 = dma.hbm_to_vmem [thread:$0]  (!%p7691_p3), %s7695_s13, 16, %s1052_s27, [#allocation28]  }
 0x293   : > { %s5746_s9 = scalar_lea.hbm %s7696_s14, 16 }
 0x294   : > { %p5747_p2 = scmp.ne.s32.totalorder %s7696_s14, %s5746_s9  ;;  %p5753_p6 = scmp.lt.u32.totalorder %s5746_s9, %s7696_s14 }
 0x296   : > { %p5749_p11 = pnand %p5747_p2, %p7690_p9 }
 0x298   : > { %p5750_p12 = pneg %p5749_p11 }
 0x29a   : > { %p5755_p8 = pnand %p5753_p6, %p5750_p12 }
 0x29c   : > { %5758 = shalt.err (!%p5755_p8)
}
 0x29d   : > { %s5759_s1 = scalar_lea.vmem %s1076_s24, 16  ;;  %s5766_s16 = scalar_lea.vmem %s1076_s24, 32 }
 0x29e   : > { %p5760_p5 = scmp.ne.s32.totalorder %s1076_s24, %s5759_s1  ;;  %p5767_p13 = scmp.lt.s32.totalorder %s1076_s24, %s1076_s24 }
 0x29f   : > { %p5768_p10 = scmp.lt.s32.totalorder %s5766_s16, %s5759_s1 }
 0x2a0   : > { %p5762_p0 = pnand %p5760_p5, %p7690_p9 }
 0x2a1   : > { %p5769_p7 = por %p5768_p10, %p5767_p13 }
 0x2a2   : > { %p5763_p4 = pneg %p5762_p0 }
 0x2a4   : > { %p5770_p1 = pnand %p5769_p7, %p5763_p4 }
 0x2a6   : > { %5773 = shalt.err (!%p5770_p1)
}
 0x2a7   : > { %s7697_s27 = sld [smem:[#allocation97_spill]]  ;;  %s6332_s7 = smov [#allocation35]  }
 0x2a8   : > { %4784 = dma.hbm_to_vmem [thread:$0]  (!%p7691_p3), %s7696_s14, 16, %s1076_s24, [#allocation31]  }
 0x2a9   : > { %s1099_s23 = sshll.u32 %s6332_s7, 4  ;;  %s6333_s9 = smov [#allocation38]   ;;  %s1100_s23 = int_to_ptr.vmem [resolvable:$true] %s1099_s23 }
 0x2aa   : > { %s1123_s12 = sshll.u32 %s6333_s9, 4  ;;  %s1124_s12 = int_to_ptr.vmem [resolvable:$true] %s1123_s12 }
 0x2ad   : > { %s5774_s13 = scalar_lea.hbm %s7697_s27, 16 }
 0x2ae   : > { %p5775_p2 = scmp.ne.s32.totalorder %s7697_s27, %s5774_s13  ;;  %p5781_p6 = scmp.lt.u32.totalorder %s5774_s13, %s7697_s27 }
 0x2b0   : > { %p5777_p11 = pnand %p5775_p2, %p7690_p9 }
 0x2b2   : > { %p5778_p12 = pneg %p5777_p11 }
 0x2b4   : > { %p5783_p8 = pnand %p5781_p6, %p5778_p12 }
 0x2b6   : > { %5786 = shalt.err (!%p5783_p8)
}
 0x2b7   : > { %s5787_s1 = scalar_lea.vmem %s1100_s23, 16  ;;  %s5794_s24 = scalar_lea.vmem %s1100_s23, 32 }
 0x2b8   : > { %p5788_p5 = scmp.ne.s32.totalorder %s1100_s23, %s5787_s1  ;;  %p5795_p13 = scmp.lt.s32.totalorder %s1100_s23, %s1100_s23 }
 0x2b9   : > { %p5796_p10 = scmp.lt.s32.totalorder %s5794_s24, %s5787_s1 }
 0x2ba   : > { %p5790_p0 = pnand %p5788_p5, %p7690_p9 }
 0x2bb   : > { %p5797_p7 = por %p5796_p10, %p5795_p13 }
 0x2bc   : > { %p5791_p4 = pneg %p5790_p0 }
 0x2be   : > { %p5798_p1 = pnand %p5797_p7, %p5791_p4 }
 0x2c0   : > { %5801 = shalt.err (!%p5798_p1)
}
 0x2c1   : > { %s7698_s16 = sld [smem:[#allocation99_spill]] }
 0x2c2   : > { %4790 = dma.hbm_to_vmem [thread:$0]  (!%p7691_p3), %s7697_s27, 16, %s1100_s23, [#allocation34]  }
 0x2c7   : > { %s5802_s13 = scalar_lea.hbm %s7698_s16, 16 }
 0x2c8   : > { %p5803_p2 = scmp.ne.s32.totalorder %s7698_s16, %s5802_s13  ;;  %p5809_p6 = scmp.lt.u32.totalorder %s5802_s13, %s7698_s16 }
 0x2ca   : > { %p5805_p11 = pnand %p5803_p2, %p7690_p9 }
 0x2cc   : > { %p5806_p12 = pneg %p5805_p11 }
 0x2ce   : > { %p5811_p8 = pnand %p5809_p6, %p5806_p12 }
 0x2d0   : > { %5814 = shalt.err (!%p5811_p8)
}
 0x2d1   : > { %s5815_s7 = scalar_lea.vmem %s1124_s12, 16  ;;  %s5822_s9 = scalar_lea.vmem %s1124_s12, 32 }
 0x2d2   : > { %p5816_p5 = scmp.ne.s32.totalorder %s1124_s12, %s5815_s7  ;;  %p5823_p13 = scmp.lt.s32.totalorder %s1124_s12, %s1124_s12 }
 0x2d3   : > { %p5824_p10 = scmp.lt.s32.totalorder %s5822_s9, %s5815_s7 }
 0x2d4   : > { %p5818_p0 = pnand %p5816_p5, %p7690_p9 }
 0x2d5   : > { %p5825_p7 = por %p5824_p10, %p5823_p13 }
 0x2d6   : > { %p5819_p4 = pneg %p5818_p0 }
 0x2d8   : > { %p5826_p1 = pnand %p5825_p7, %p5819_p4 }
 0x2da   : > { %5829 = shalt.err (!%p5826_p1)
}
 0x2db   : > { %s7699_s23 = sld [smem:[#allocation101_spill]]  ;;  %s6334_s1 = smov [#allocation41]  }
 0x2dc   : > { %4796 = dma.hbm_to_vmem [thread:$0]  (!%p7691_p3), %s7698_s16, 16, %s1124_s12, [#allocation37]  }
 0x2dd   : > { %s1147_s13 = sshll.u32 %s6334_s1, 4  ;;  %s6335_s14 = smov [#allocation44]   ;;  %s1148_s13 = int_to_ptr.vmem [resolvable:$true] %s1147_s13 }
 0x2de   : > { %s1171_s19 = sshll.u32 %s6335_s14, 4  ;;  %s1172_s19 = int_to_ptr.vmem [resolvable:$true] %s1171_s19 }
 0x2e1   : > { %s7700_s24 = smov %s7699_s23  ;;  %s5830_s21 = scalar_lea.hbm %s7699_s23, 16 }
 0x2e2   : > { %p5831_p2 = scmp.ne.s32.totalorder %s7700_s24, %s5830_s21  ;;  %p5837_p6 = scmp.lt.u32.totalorder %s5830_s21, %s7700_s24 }
 0x2e4   : > { %p5833_p11 = pnand %p5831_p2, %p7690_p9 }
 0x2e6   : > { %p5834_p12 = pneg %p5833_p11 }
 0x2e8   : > { %p5839_p8 = pnand %p5837_p6, %p5834_p12 }
 0x2ea   : > { %5842 = shalt.err (!%p5839_p8)
}
 0x2eb   : > { %s5843_s7 = scalar_lea.vmem %s1148_s13, 16  ;;  %s5850_s12 = scalar_lea.vmem %s1148_s13, 32 }
 0x2ec   : > { %p5844_p5 = scmp.ne.s32.totalorder %s1148_s13, %s5843_s7  ;;  %p5851_p13 = scmp.lt.s32.totalorder %s1148_s13, %s1148_s13 }
 0x2ed   : > { %p5852_p10 = scmp.lt.s32.totalorder %s5850_s12, %s5843_s7 }
 0x2ee   : > { %p5846_p0 = pnand %p5844_p5, %p7690_p9 }
 0x2ef   : > { %p5853_p7 = por %p5852_p10, %p5851_p13 }
 0x2f0   : > { %p5847_p4 = pneg %p5846_p0 }
 0x2f2   : > { %p5854_p1 = pnand %p5853_p7, %p5847_p4 }
 0x2f4   : > { %5857 = shalt.err (!%p5854_p1)
}
 0x2f5   : > { %s7701_s14 = sld [smem:[#allocation103_spill]] }
 0x2f6   : > { %4802 = dma.hbm_to_vmem [thread:$0]  (!%p7691_p3), %s7700_s24, 16, %s1148_s13, [#allocation40]  }
 0x2fb   : > { %s5858_s21 = scalar_lea.hbm %s7701_s14, 16 }
 0x2fc   : > { %p5859_p2 = scmp.ne.s32.totalorder %s7701_s14, %s5858_s21  ;;  %p5865_p6 = scmp.lt.u32.totalorder %s5858_s21, %s7701_s14 }
 0x2fe   : > { %p5861_p11 = pnand %p5859_p2, %p7690_p9 }
 0x300   : > { %p5862_p12 = pneg %p5861_p11 }
 0x302   : > { %p5867_p8 = pnand %p5865_p6, %p5862_p12 }
 0x304   : > { %5870 = shalt.err (!%p5867_p8)
}
 0x305   : > { %s5871_s9 = scalar_lea.vmem %s1172_s19, 16  ;;  %s5878_s23 = scalar_lea.vmem %s1172_s19, 32 }
 0x306   : > { %p5872_p5 = scmp.ne.s32.totalorder %s1172_s19, %s5871_s9  ;;  %p5879_p13 = scmp.lt.s32.totalorder %s1172_s19, %s1172_s19 }
 0x307   : > { %p5880_p10 = scmp.lt.s32.totalorder %s5878_s23, %s5871_s9 }
 0x308   : > { %p5874_p0 = pnand %p5872_p5, %p7690_p9 }
 0x309   : > { %p5881_p7 = por %p5880_p10, %p5879_p13 }
 0x30a   : > { %p5875_p4 = pneg %p5874_p0 }
 0x30c   : > { %p5882_p1 = pnand %p5881_p7, %p5875_p4 }
 0x30e   : > { %5885 = shalt.err (!%p5882_p1)
}
 0x30f   : > { %s7702_s1 = sld [smem:[#allocation105_spill]]  ;;  %s6336_s7 = smov [#allocation47]  }
 0x310   : > { %4808 = dma.hbm_to_vmem [thread:$0]  (!%p7691_p3), %s7701_s14, 16, %s1172_s19, [#allocation43]  }
 0x311   : > { %s1193_s12 = sshll.u32 %s6336_s7, 4  ;;  %s6337_s21 = smov [#allocation50]   ;;  %s1194_s12 = int_to_ptr.vmem [resolvable:$true] %s1193_s12 }
 0x312   : > { %s1215_s16 = sshll.u32 %s6337_s21, 4  ;;  %s1216_s16 = int_to_ptr.vmem [resolvable:$true] %s1215_s16 }
 0x315   : > { %s7703_s13 = smov %s7702_s1  ;;  %s5886_s24 = scalar_lea.hbm %s7702_s1, 16 }
 0x316   : > { %p5887_p2 = scmp.ne.s32.totalorder %s7703_s13, %s5886_s24  ;;  %p5893_p6 = scmp.lt.u32.totalorder %s5886_s24, %s7703_s13 }
 0x318   : > { %p5889_p11 = pnand %p5887_p2, %p7690_p9 }
 0x31a   : > { %p5890_p12 = pneg %p5889_p11 }
 0x31c   : > { %p5895_p8 = pnand %p5893_p6, %p5890_p12 }
 0x31e   : > { %5898 = shalt.err (!%p5895_p8)
}
 0x31f   : > { %s5899_s9 = scalar_lea.vmem %s1194_s12, 16  ;;  %s5906_s19 = scalar_lea.vmem %s1194_s12, 32 }
 0x320   : > { %p5900_p5 = scmp.ne.s32.totalorder %s1194_s12, %s5899_s9  ;;  %p5907_p13 = scmp.lt.s32.totalorder %s1194_s12, %s1194_s12 }
 0x321   : > { %p5908_p10 = scmp.lt.s32.totalorder %s5906_s19, %s5899_s9 }
 0x322   : > { %p5902_p0 = pnand %p5900_p5, %p7690_p9 }
 0x323   : > { %p5909_p7 = por %p5908_p10, %p5907_p13 }
 0x324   : > { %p5903_p4 = pneg %p5902_p0 }
 0x326   : > { %p5910_p1 = pnand %p5909_p7, %p5903_p4 }
 0x328   : > { %5913 = shalt.err (!%p5910_p1)
}
 0x329   : > { %s7704_s23 = sld [smem:[#allocation107_spill]] }
 0x32a   : > { %4814 = dma.hbm_to_vmem [thread:$0]  (!%p7691_p3), %s7703_s13, 16, %s1194_s12, [#allocation46]  }
 0x32f   : > { %s7705_s7 = smov %s7704_s23  ;;  %s5914_s24 = scalar_lea.hbm %s7704_s23, 16 }
 0x330   : > { %p5915_p2 = scmp.ne.s32.totalorder %s7705_s7, %s5914_s24  ;;  %p5921_p6 = scmp.lt.u32.totalorder %s5914_s24, %s7705_s7 }
 0x332   : > { %p5917_p11 = pnand %p5915_p2, %p7690_p9 }
 0x334   : > { %p5918_p12 = pneg %p5917_p11 }
 0x336   : > { %p5923_p8 = pnand %p5921_p6, %p5918_p12 }
 0x338   : > { %5926 = shalt.err (!%p5923_p8)
}
 0x339   : > { %s5927_s1 = scalar_lea.vmem %s1216_s16, 16  ;;  %s5934_s21 = scalar_lea.vmem %s1216_s16, 32 }
 0x33a   : > { %p5928_p5 = scmp.ne.s32.totalorder %s1216_s16, %s5927_s1  ;;  %p5935_p13 = scmp.lt.s32.totalorder %s1216_s16, %s1216_s16 }
 0x33b   : > { %p5936_p10 = scmp.lt.s32.totalorder %s5934_s21, %s5927_s1 }
 0x33c   : > { %p5930_p0 = pnand %p5928_p5, %p7690_p9 }
 0x33d   : > { %p5937_p7 = por %p5936_p10, %p5935_p13 }
 0x33e   : > { %p5931_p4 = pneg %p5930_p0 }
 0x340   : > { %p5938_p1 = pnand %p5937_p7, %p5931_p4 }
 0x342   : > { %5941 = shalt.err (!%p5938_p1)
}
 0x343   : > { %4820 = dma.hbm_to_vmem [thread:$0]  (!%p7691_p3), %s7705_s7, 16, %s1216_s16, [#allocation49]  }
 0x344   : > { %s6338_s12 = smov [#allocation53]   ;;  %s6339_s19 = smov [#allocation56]  }
 0x345   : > { %s1237_s9 = sshll.u32 %s6338_s12, 4  ;;  %s1259_s23 = sshll.u32 %s6339_s19, 4  ;;  %s1238_s9 = int_to_ptr.vmem [resolvable:$true] %s1237_s9  ;;  %s1260_s23 = int_to_ptr.vmem [resolvable:$true] %s1259_s23 }
 0x346   : > { %s5942_s24 = scalar_lea.hbm %s7652_s5, 16 }
 0x347   : > { %p5943_p2 = scmp.ne.s32.totalorder %s7652_s5, %s5942_s24  ;;  %p5949_p6 = scmp.lt.u32.totalorder %s5942_s24, %s7652_s5 }
 0x349   : > { %p5945_p11 = pnand %p5943_p2, %p7690_p9 }
 0x34b   : > { %p5946_p12 = pneg %p5945_p11 }
 0x34d   : > { %p5951_p8 = pnand %p5949_p6, %p5946_p12 }
 0x34f   : > { %5954 = shalt.err (!%p5951_p8)
}
 0x350   : > { %s5955_s1 = scalar_lea.vmem %s1238_s9, 16  ;;  %s5962_s16 = scalar_lea.vmem %s1238_s9, 32 }
 0x351   : > { %p5956_p5 = scmp.ne.s32.totalorder %s1238_s9, %s5955_s1  ;;  %p5963_p13 = scmp.lt.s32.totalorder %s1238_s9, %s1238_s9 }
 0x352   : > { %p5964_p10 = scmp.lt.s32.totalorder %s5962_s16, %s5955_s1 }
 0x353   : > { %p5958_p0 = pnand %p5956_p5, %p7690_p9 }
 0x354   : > { %p5965_p7 = por %p5964_p10, %p5963_p13 }
 0x355   : > { %p5959_p4 = pneg %p5958_p0 }
 0x357   : > { %p5966_p1 = pnand %p5965_p7, %p5959_p4 }
 0x359   : > { %5969 = shalt.err (!%p5966_p1)
}
 0x35a   : > { %s7706_s21 = sld [smem:[#allocation111_spill]] }
 0x35b   : > { %4826 = dma.hbm_to_vmem [thread:$0]  (!%p7691_p3), %s7652_s5, 16, %s1238_s9, [#allocation52]  }
 0x360   : > { %s5970_s12 = scalar_lea.hbm %s7706_s21, 16 }
 0x361   : > { %p5971_p2 = scmp.ne.s32.totalorder %s7706_s21, %s5970_s12  ;;  %p5977_p6 = scmp.lt.u32.totalorder %s5970_s12, %s7706_s21 }
 0x363   : > { %p5973_p11 = pnand %p5971_p2, %p7690_p9 }
 0x365   : > { %p5974_p12 = pneg %p5973_p11 }
 0x367   : > { %p5979_p8 = pnand %p5977_p6, %p5974_p12 }
 0x369   : > { %5982 = shalt.err (!%p5979_p8)
}
 0x36a   : > { %s5983_s19 = scalar_lea.vmem %s1260_s23, 16  ;;  %s5990_s24 = scalar_lea.vmem %s1260_s23, 32 }
 0x36b   : > { %p5984_p5 = scmp.ne.s32.totalorder %s1260_s23, %s5983_s19  ;;  %p5991_p13 = scmp.lt.s32.totalorder %s1260_s23, %s1260_s23 }
 0x36c   : > { %p5992_p10 = scmp.lt.s32.totalorder %s5990_s24, %s5983_s19 }
 0x36d   : > { %p5986_p0 = pnand %p5984_p5, %p7690_p9 }
 0x36e   : > { %p5993_p7 = por %p5992_p10, %p5991_p13 }
 0x36f   : > { %p5987_p4 = pneg %p5986_p0 }
 0x371   : > { %p5994_p1 = pnand %p5993_p7, %p5987_p4 }
 0x373   : > { %5997 = shalt.err (!%p5994_p1)
}
 0x374   : > { %s7707_s9 = sld [smem:[#allocation77_spill]]  ;;  %s7708_s1 = sld [smem:[#allocation79_spill]] }
 0x375   : > { %4832 = dma.hbm_to_vmem [thread:$0]  (!%p7691_p3), %s7706_s21, 16, %s1260_s23, [#allocation55]  }
 0x376   : > { %s1274_s12 = scalar_lea.vmem [#allocation3], %s6822_s6  ;;  %s1271_s24 = scalar_lea.sflag [#allocation4], %s6816_s4 }
 0x377   : > { %s1282_s19 = sshll.u32 %s1274_s12, 4  ;;  %p7710_p2 = scmp.ne.s32.totalorder %s7683_s20, 0  ;;  %s7077_s19 = int_to_ptr.vmem [resolvable:$true] %s1282_s19 }
 0x37a   : > { %s7709_s16 = smov %s7708_s1  ;;  %s7074_s10 = scalar_lea.hbm %s7707_s9, %s6819_s29 }
 0x37b   : > { %s7081_s15 = scalar_lea.hbm %s7708_s1, %s6819_s29  ;;  %s5998_s5 = scalar_lea.hbm %s7074_s10, 128 }
 0x37c   : > { %p5999_p9 = scmp.ne.s32.totalorder %s7074_s10, %s5998_s5  ;;  %s6003_s7 = scalar_lea.hbm %s7707_s9, 256 }
 0x37d   : > { %p6004_p3 = scmp.lt.u32.totalorder %s7074_s10, %s7707_s9  ;;  %p6005_p6 = scmp.lt.u32.totalorder %s6003_s7, %s5998_s5 }
 0x37e   : > { %p6001_p11 = pnand %p5999_p9, %p7710_p2  ;;  %p6007_p5 = scmp.lt.u32.totalorder %s5998_s5, %s7074_s10 }
 0x37f   : > { %p6006_p8 = por %p6005_p6, %p6004_p3 }
 0x380   : > { %p6002_p12 = pneg %p6001_p11 }
 0x381   : > { %p6008_p0 = por %p6007_p5, %p6006_p8 }
 0x383   : > { %p6009_p4 = pnand %p6008_p0, %p6002_p12 }
 0x385   : > { %6012 = shalt.err (!%p6009_p4)
}
 0x386   : > { %s6013_s29 = scalar_lea.vmem %s7077_s19, 128  ;;  %s6340_s23 = smov [#allocation3]  }
 0x387   : > { %p6014_p13 = scmp.ne.s32.totalorder %s7077_s19, %s6013_s29  ;;  %s6018_s1 = sshll.u32 %s6340_s23, 4  ;;  %s6019_s1 = int_to_ptr.vmem [resolvable:$false] %s6018_s1 }
 0x388   : > { %s6020_s12 = scalar_lea.vmem %s6019_s1, 256  ;;  %p6021_p1 = scmp.lt.s32.totalorder %s7077_s19, %s6019_s1 }
 0x389   : > { %p6016_p10 = pnand %p6014_p13, %p7710_p2  ;;  %p6022_p9 = scmp.lt.s32.totalorder %s6020_s12, %s6013_s29 }
 0x38b   : > { %p6017_p7 = pneg %p6016_p10  ;;  %p6023_p11 = por %p6022_p9, %p6021_p1 }
 0x38d   : > { %p6024_p3 = pnand %p6023_p11, %p6017_p7 }
 0x38f   : > { %6027 = shalt.err (!%p6024_p3)
}
 0x390   : > { %p7711_p12 = scmp.ne.s32.totalorder %s7682_s11, 0  ;;  %s1312_s5 = scalar_lea.vmem [#allocation8], %s6822_s6 }
 0x391   : > { %s1319_s7 = sshll.u32 %s1312_s5, 4  ;;  %s4179_s29 = sshll.u32 %s6264_s28, 4  ;;  %s1320_s7 = int_to_ptr.vmem [resolvable:$true] %s1319_s7 }
 0x392   : > { %4836 = dma.hbm_to_vmem [thread:$0]  (!%p7711_p12), %s7074_s10, 128, %s7077_s19, %s1271_s24  }
 0x393   : > { %s6028_s23 = scalar_lea.hbm %s7081_s15, 128  ;;  %s6033_s1 = scalar_lea.hbm %s7709_s16, 256 }
 0x394   : > { %p6029_p6 = scmp.ne.s32.totalorder %s7081_s15, %s6028_s23  ;;  %p6034_p0 = scmp.lt.u32.totalorder %s7081_s15, %s7709_s16 }
 0x395   : > { %p6035_p4 = scmp.lt.u32.totalorder %s6033_s1, %s6028_s23  ;;  %p6037_p10 = scmp.lt.u32.totalorder %s6028_s23, %s7081_s15 }
 0x396   : > { %p6031_p8 = pnand %p6029_p6, %p7710_p2 }
 0x397   : > { %p6036_p13 = por %p6035_p4, %p6034_p0 }
 0x398   : > { %p6032_p5 = pneg %p6031_p8 }
 0x399   : > { %p6038_p7 = por %p6037_p10, %p6036_p13 }
 0x39b   : > { %p6039_p1 = pnand %p6038_p7, %p6032_p5 }
 0x39d   : > { %6042 = shalt.err (!%p6039_p1)
}
 0x39e   : > { %s6043_s12 = scalar_lea.vmem %s1320_s7, 128  ;;  %s6341_s6 = smov [#allocation8]  }
 0x39f   : > { %p6044_p9 = scmp.ne.s32.totalorder %s1320_s7, %s6043_s12  ;;  %s6048_s10 = sshll.u32 %s6341_s6, 4  ;;  %s6049_s10 = int_to_ptr.vmem [resolvable:$false] %s6048_s10 }
 0x3a0   : > { %s6050_s19 = scalar_lea.vmem %s6049_s10, 256  ;;  %p6051_p6 = scmp.lt.s32.totalorder %s1320_s7, %s6049_s10 }
 0x3a1   : > { %p6046_p11 = pnand %p6044_p9, %p7710_p2  ;;  %p6052_p8 = scmp.lt.s32.totalorder %s6050_s19, %s6043_s12 }
 0x3a3   : > { %p6047_p3 = pneg %p6046_p11  ;;  %p6053_p12 = por %p6052_p8, %p6051_p6 }
 0x3a5   : > { %p6054_p0 = pnand %p6053_p12, %p6047_p3 }
 0x3a7   : > { %6057 = shalt.err (!%p6054_p0)
}
 0x3a8   : > { %p7712_p4 = scmp.ne.s32.totalorder %s7682_s11, 0  ;;  %s7713_s24 = scalar_lea.sflag [#allocation7], %s6831_s3 }
 0x3a9   : > { %s6058_s5 = scalar_lea.hbm %s6896_s8, 256  ;;  %s6063_s23 = scalar_lea.hbm %s7686_s30, 512 }
 0x3aa   : > { %4842 = dma.hbm_to_vmem [thread:$0]  (!%p7712_p4), %s7081_s15, 128, %s1320_s7, %s7713_s24  }
 0x3ab   : > { %p6059_p5 = scmp.ne.s32.totalorder %s6896_s8, %s6058_s5  ;;  %p6064_p12 = scmp.lt.u32.totalorder %s6896_s8, %s7686_s30 }
 0x3ac   : > { %p6065_p7 = scmp.lt.u32.totalorder %s6063_s23, %s6058_s5  ;;  %p6067_p9 = scmp.lt.u32.totalorder %s6058_s5, %s6896_s8 }
 0x3ad   : > { %p6061_p13 = pnand %p6059_p5, %p7710_p2 }
 0x3ae   : > { %p6066_p1 = por %p6065_p7, %p6064_p12 }
 0x3af   : > { %p6062_p10 = pneg %p6061_p13 }
 0x3b0   : > { %p6068_p11 = por %p6067_p9, %p6066_p1 }
 0x3b2   : > { %p6069_p3 = pnand %p6068_p11, %p6062_p10 }
 0x3b4   : > { %6072 = shalt.err (!%p6069_p3)
}
 0x3b5   : > { %s6073_s1 = scalar_lea.vmem %s6900_s25, 256  ;;  %s6342_s15 = smov [#allocation11]  }
 0x3b6   : > { %p6074_p6 = scmp.ne.s32.totalorder %s6900_s25, %s6073_s1  ;;  %s6078_s7 = sshll.u32 %s6342_s15, 4  ;;  %s6079_s7 = int_to_ptr.vmem [resolvable:$false] %s6078_s7 }
 0x3b7   : > { %s6080_s12 = scalar_lea.vmem %s6079_s7, 512  ;;  %p6081_p5 = scmp.lt.s32.totalorder %s6900_s25, %s6079_s7 }
 0x3b8   : > { %p6076_p8 = pnand %p6074_p6, %p7710_p2  ;;  %p6082_p13 = scmp.lt.s32.totalorder %s6080_s12, %s6073_s1 }
 0x3ba   : > { %p6077_p0 = pneg %p6076_p8  ;;  %p6083_p12 = por %p6082_p13, %p6081_p5 }
 0x3bc   : > { %p6084_p7 = pnand %p6083_p12, %p6077_p0 }
 0x3be   : > { %6087 = shalt.err (!%p6084_p7)
}
 0x3bf   : > { %s7714_s6 = smov 8   ;;  %s7715_s10 = smov 128  }
 0x3c0   : > { %s7716_s19 = scalar_lea.sflag [#allocation10], %s6831_s3  ;;  %s7717_s24 = sld [smem:[#allocation83_spill]] }
 0x3c1   : > { %4848 = dma.hbm_to_vmem [thread:$0]  (!%p7712_p4), %s6896_s8, 256, %s6900_s25, %s7716_s19, %s7715_s10, %s7715_s10, %s7714_s6  }
 0x3c2   : > { %s1389_s23 = scalar_lea.vmem [#allocation14], %s6816_s4 }
 0x3c3   : > { %s1396_s1 = sshll.u32 %s1389_s23, 4  ;;  %s1397_s1 = int_to_ptr.vmem [resolvable:$true] %s1396_s1 }
 0x3c6   : > { %s7143_s5 = scalar_lea.hbm %s7717_s24, %s4179_s29  ;;  %s6093_s7 = scalar_lea.hbm %s7717_s24, 32 }
 0x3c7   : > { %s6088_s15 = scalar_lea.hbm %s7143_s5, 16  ;;  %p6094_p11 = scmp.lt.u32.totalorder %s7143_s5, %s7717_s24 }
 0x3c8   : > { %p6089_p10 = scmp.ne.s32.totalorder %s7143_s5, %s6088_s15  ;;  %p6095_p3 = scmp.lt.u32.totalorder %s6093_s7, %s6088_s15 }
 0x3c9   : > { %p6097_p8 = scmp.lt.u32.totalorder %s6088_s15, %s7143_s5 }
 0x3ca   : > { %p6091_p1 = pnand %p6089_p10, %p7710_p2  ;;  %p6096_p6 = por %p6095_p3, %p6094_p11 }
 0x3cc   : > { %p6092_p9 = pneg %p6091_p1  ;;  %p6098_p0 = por %p6097_p8, %p6096_p6 }
 0x3ce   : > { %p6099_p5 = pnand %p6098_p0, %p6092_p9 }
 0x3d0   : > { %6102 = shalt.err (!%p6099_p5)
}
 0x3d1   : > { %s6103_s8 = scalar_lea.vmem %s1397_s1, 16  ;;  %s6343_s4 = smov [#allocation14]  }
 0x3d2   : > { %p6104_p13 = scmp.ne.s32.totalorder %s1397_s1, %s6103_s8  ;;  %s6108_s25 = sshll.u32 %s6343_s4, 4  ;;  %s6109_s25 = int_to_ptr.vmem [resolvable:$false] %s6108_s25 }
 0x3d3   : > { %s6110_s29 = scalar_lea.vmem %s6109_s25, 32  ;;  %p6111_p10 = scmp.lt.s32.totalorder %s1397_s1, %s6109_s25 }
 0x3d4   : > { %p6106_p12 = pnand %p6104_p13, %p7710_p2  ;;  %p6112_p1 = scmp.lt.s32.totalorder %s6110_s29, %s6103_s8 }
 0x3d6   : > { %p6107_p7 = pneg %p6106_p12  ;;  %p6113_p4 = por %p6112_p1, %p6111_p10 }
 0x3d8   : > { %p6114_p3 = pnand %p6113_p4, %p6107_p7 }
 0x3da   : > { %6117 = shalt.err (!%p6114_p3)
}
 0x3db   : > { %p7718_p11 = scmp.ne.s32.totalorder %s7682_s11, 0  ;;  %s7719_s12 = scalar_lea.sflag [#allocation13], %s6831_s3 }
 0x3dc   : > { %s7720_s6 = sld [smem:[#allocation116_spill]] }
 0x3dd   : > { %4854 = dma.hbm_to_vmem [thread:$0]  (!%p7718_p11), %s7143_s5, 16, %s1397_s1, %s7719_s12  }
 0x3e2   : > { %p7721_p9 = scmp.ne.s32.totalorder %s7720_s6, 0 }
 0x3e3   : > { %s7164_s20 = sand.u32 (!%p7721_p9), 1, %s6252_s22   ;;  %p7722_p2 = scmp.ne.s32.totalorder (!%p7721_p9), %s7678_s26, 0 }
 0x3e4   : > { %1405 = sbr.rel (%p7721_p9) target bundleno = 5665 (0x1621), region = 160  ;;  %s7167_s10 = sshll.u32 (!%p7721_p9), %s7164_s20, 3 }
 0x3e5   : > { %s1408_s19 = scalar_lea.sflag (!%p7721_p9), [#allocation4], %s7164_s20  ;;  %s1411_s23 = scalar_lea.vmem (!%p7721_p9), [#allocation3], %s7167_s10 }
 0x3eb   : > { %6171 = dma.done.wait (%p7722_p2), %s1408_s19, 128  }
 0x3ec   : > { %6173 = vsyncadd (%p7722_p2), %s1408_s19, 4294967168  ;;  %s1416_s11 = sand.u32 1, %s6569_s2   ;;  %s1420_s5 = scalar_lea.vmem [#allocation6], %s7167_s10 }
 0x3ed   : > { %s1417_s3 = scalar_lea.sflag [#allocation7], %s1416_s11 }
 0x3ee   : > { %6175 = dma.done.wait (%p7722_p2), %s1417_s3, 256  }
 0x3ef   : > { %6177 = vsyncadd (%p7722_p2), %s1417_s3, 4294967040  ;;  %s1429_s1 = scalar_lea.vmem [#allocation8], %s7167_s10  ;;  %s1435_s15 = scalar_lea.sflag [#allocation10], %s1416_s11 }
 0x3f0   : > { %s1438_s7 = scalar_lea.vmem [#allocation9], %s7167_s10 }
 0x3f1   : > { %6179 = dma.done.wait (%p7722_p2), %s1435_s15, 384  }
 0x3f2   : > { %6181 = vsyncadd (%p7722_p2), %s1435_s15, 4294966912  ;;  %s4185_s8 = sshll.u32 %s7164_s20, 4  ;;  %s1453_s25 = scalar_lea.sflag [#allocation13], %s1416_s11 }
 0x3f3   : > { %s7188_s4 = scalar_lea.vmem [#allocation11], %s4185_s8  ;;  %s7190_s29 = scalar_lea.vmem [#allocation12], %s4185_s8 }
 0x3f4   : > { %6183 = dma.done.wait (%p7722_p2), %s1453_s25, 272  }
 0x3f5   : > { %6185 = vsyncadd (%p7722_p2), %s1453_s25, 4294967024  ;;  %s1464_s12 = scalar_lea.vmem [#allocation14], %s7164_s20  ;;  %p7723_p4 = scmp.eq.s32.totalorder %s6569_s2, 0 }
 0x3f7   : > { %6187 = dma.done.wait (%p7723_p4), [#allocation16], 528   ;;  %p7724_p6 = pmov %p7723_p4 }
 0x3f8   : > { %p7725_p8 = pmov %p7723_p4 }
 0x3f9   : > { %6189 = vsyncadd (%p7724_p6), [#allocation16], 4294966768 }
 0x3fa   : > { %6191 = dma.done.wait (%p7725_p8), [#allocation19], 528   ;;  %p7726_p0 = pmov %p7723_p4 }
 0x3fc   : > { %6193 = vsyncadd (%p7726_p0), [#allocation19], 4294966768  ;;  %p7727_p5 = pmov %p7726_p0 }
 0x3fd   : > { %p7728_p13 = pmov %p7726_p0 }
 0x3fe   : > { %6195 = dma.done.wait (%p7727_p5), [#allocation22], 528  }
 0x3ff   : > { %6197 = vsyncadd (%p7728_p13), [#allocation22], 4294966768  ;;  %p7729_p12 = pmov %p7726_p0 }
 0x400   : > { %p7730_p7 = pmov %p7726_p0 }
 0x401   : > { %6199 = dma.done.wait (%p7729_p12), [#allocation25], 528  }
 0x402   : > { %6201 = vsyncadd (%p7730_p7), [#allocation25], 4294966768  ;;  %p7731_p10 = pmov %p7726_p0 }
 0x403   : > { %p7732_p1 = pmov %p7726_p0 }
 0x404   : > { %6203 = dma.done.wait (%p7731_p10), [#allocation28], 528  }
 0x405   : > { %6205 = vsyncadd (%p7732_p1), [#allocation28], 4294966768  ;;  %p7733_p3 = pmov %p7726_p0 }
 0x406   : > { %p7734_p11 = pmov %p7726_p0 }
 0x407   : > { %6207 = dma.done.wait (%p7733_p3), [#allocation31], 528  }
 0x408   : > { %6209 = vsyncadd (%p7734_p11), [#allocation31], 4294966768  ;;  %p7735_p9 = pmov %p7726_p0 }
 0x409   : > { %p7736_p2 = pmov %p7726_p0 }
 0x40a   : > { %6211 = dma.done.wait (%p7735_p9), [#allocation34], 528  }
 0x40b   : > { %6213 = vsyncadd (%p7736_p2), [#allocation34], 4294966768  ;;  %p7737_p4 = pmov %p7726_p0 }
 0x40c   : > { %p7738_p6 = pmov %p7726_p0 }
 0x40d   : > { %6215 = dma.done.wait (%p7737_p4), [#allocation37], 528  }
 0x40e   : > { %6217 = vsyncadd (%p7738_p6), [#allocation37], 4294966768  ;;  %p7739_p8 = pmov %p7726_p0 }
 0x410   : > { %6219 = dma.done.wait (%p7739_p8), [#allocation40], 528  }
 0x411   : > { %6221 = vsyncadd (%p7726_p0), [#allocation40], 4294966768  ;;  %p7740_p5 = pmov %p7726_p0 }
 0x412   : > { %p7741_p13 = pmov %p7726_p0 }
 0x413   : > { %6223 = dma.done.wait (%p7740_p5), [#allocation43], 1040  }
 0x414   : > { %6225 = vsyncadd (%p7741_p13), [#allocation43], 4294966256  ;;  %p7742_p12 = pmov %p7726_p0 }
 0x415   : > { %p7743_p7 = pmov %p7726_p0 }
 0x416   : > { %6227 = dma.done.wait (%p7742_p12), [#allocation46], 32  }
 0x417   : > { %6229 = vsyncadd (%p7743_p7), [#allocation46], 4294967264  ;;  %p7744_p10 = pmov %p7726_p0 }
 0x418   : > { %p7745_p1 = pmov %p7726_p0 }
 0x419   : > { %6231 = dma.done.wait (%p7744_p10), [#allocation49], 32  }
 0x41a   : > { %6233 = vsyncadd (%p7745_p1), [#allocation49], 4294967264  ;;  %p7746_p3 = pmov %p7726_p0 }
 0x41b   : > { %p7747_p11 = pmov %p7726_p0 }
 0x41c   : > { %6235 = dma.done.wait (%p7746_p3), [#allocation52], 32  }
 0x41d   : > { %6237 = vsyncadd (%p7747_p11), [#allocation52], 4294967264  ;;  %p7748_p9 = pmov %p7726_p0 }
 0x41e   : > { %p7749_p2 = pmov %p7726_p0 }
 0x41f   : > { %6239 = dma.done.wait (%p7748_p9), [#allocation55], 32  }
 0x420   : > { %6241 = vsyncadd (%p7749_p2), [#allocation55], 4294967264  ;;  %v6344_v0 = vmov 0.0   ;;  %vm6345_vm0 = vmmov 0   ;;  %v5040_v1 = vld [vmem:[#allocation15] sm:$0xff]   ;;  %v5041_v2 = vld [vmem:[#allocation15 + $0x8] sm:$0xff]  }
 0x421   : > { %4396 = vmatprep.subr.bf16.mxu1 %v6344_v0  ;;  %4404 = vmatprep.mubr.msk.bf16.mxu1 %vm6345_vm0, %v6344_v0  ;;  %v5042_v3 = vld [vmem:[#allocation15 + $0x10] sm:$0xff]   ;;  %v7262_v4 = vld [vmem:[%s1411_s23] sm:$0xff]  ;;  %vm1743_vm1 = vcmask 523264   ;;  %vm1959_vm2 = vcmask 130048   ;;  %s6346_s2 = smov 96   ;;  %s6347_s26 = smov 112  }
 0x422   : > { %4420 = vmatprep.subr.bf16.mxu0 %v6344_v0  ;;  %4428 = vmatprep.mubr.msk.bf16.mxu0 %vm6345_vm0, %v6344_v0  ;;  %v7266_v5 = vld [vmem:[%s1420_s5] sm:$0xff]  ;;  %v5044_v8 = vld [vmem:[#allocation18] sm:$0xff]   ;;  %v4216_v26 = vld [vmem:[#allocation17] ss:$0 sm:$0xff]  ;;  %s6348_s6 = smov 80   ;;  %vm2022_vm3 = vcmask 1043456  }
 0x423   : > { %4397 = vmatpush3.bf16.msra.mxu1 %v5040_v1  ;;  %v5043_v6 = vld [vmem:[#allocation15 + $0x18] sm:$0xff]   ;;  %v1702_v7 = vadd.f32 %v7266_v5, %v7262_v4  ;;  %v5045_v10 = vld [vmem:[#allocation18 + $0x8] sm:$0xff]   ;;  %v4222_v27 = vld [vmem:[#allocation20] ss:$0 sm:$0xff]  ;;  %vm2006_vm4 = vcmask 64512   ;;  %s6349_s19 = smov 16  }
 0x424   : > { %4398 = vmatprep.subr.bf16.mxu1 %v6344_v0  ;;  %v5046_v11 = vld [vmem:[#allocation18 + $0x10] sm:$0xff]   ;;  %v1695_v12 = vld [vmem:[%s1429_s1] sm:$0xff]  ;;  %s6350_s23 = smov 32   ;;  %s6351_s11 = smov 48   ;;  %vm2184_vm5 = vcmask 261248   ;;  %vm2300_vm6 = vcmask 392448  }
 0x425   : > { %v1704_v9 = vpack.c.bf16 %v1702_v7, %v1702_v7  ;;  %v1696_v13 = vld [vmem:[%s1438_s7] sm:$0xff]  ;;  %v5048_v17 = vld [vmem:[#allocation21] sm:$0xff]   ;;  %v1872_v21 = vpack.c.bf16 %v1695_v12, %v1695_v12  ;;  %vm2416_vm7 = vcmask 523648   ;;  %s7750_s3 = sld [smem:[#allocation114_spill]]  ;;  %s7751_s5 = sld [smem:[#allocation112_spill]] }
 0x426   : > { %v5047_v14 = vld [vmem:[#allocation18 + $0x18] sm:$0xff]   ;;  %v1787_v15 = vadd.f32 %v1696_v13, %v1695_v12  ;;  %4421 = vmatpush3.bf16.msra.mxu0 %v5048_v17  ;;  %v5049_v18 = vld [vmem:[#allocation21 + $0x8] sm:$0xff]   ;;  %v4228_v38 = vld [vmem:[#allocation23] ss:$0 sm:$0xff]  ;;  %s1691_s15 = scalar_lea.vmem [#allocation57], %s7167_s10  ;;  %p7752_p6 = scmp.ne.s32.totalorder %s7679_s17, 0 }
 0x427   : > { %4399 = vmatpush3.bf16.msra.mxu1 %v5041_v2  ;;  %4422 = vmatprep.subr.bf16.mxu0 %v6344_v0  ;;  %v5050_v19 = vld [vmem:[#allocation21 + $0x10] sm:$0xff]   ;;  %v5051_v20 = vld [vmem:[#allocation21 + $0x18] sm:$0xff]   ;;  %s3625_s7 = sshll.u32 %s1691_s15, 4  ;;  %s7503_s7 = int_to_ptr.vmem [resolvable:$true] %s3625_s7 }
 0x428   : > { %4400 = vmatprep.subr.bf16.mxu1 %v6344_v0  ;;  %v1789_v16 = vpack.c.bf16 %v1787_v15, %v1787_v15  ;;  %s6118_s25 = scalar_lea.vmem %s7503_s7, 128 }
 0x429   : > { %p6119_p4 = scmp.ne.s32.totalorder %s7503_s7, %s6118_s25 }
 0x42a   : > { %4423 = vmatpush3.bf16.msra.mxu0 %v5049_v18 }
 0x42b   : > { %4401 = vmatpush3.bf16.msra.mxu1 %v5042_v3  ;;  %4424 = vmatprep.subr.bf16.mxu0 %v6344_v0  ;;  %s4305_s1 = sshll.u32 %s7750_s3, 7  ;;  %p6120_p8 = pnand %p6119_p4, %p7752_p6 }
 0x42c   : > { %4402 = vmatprep.subr.bf16.mxu1 %v6344_v0  ;;  %s7501_s8 = scalar_lea.hbm %s7751_s5, %s4305_s1 }
 0x42d   : > { %p6121_p0 = pneg %p6120_p8 }
 0x42e   : > { %4425 = vmatpush3.bf16.msra.mxu0 %v5050_v19 }
 0x42f   : > { %4403 = vmatpush3.bf16.msra.mxu1 %v5043_v6  ;;  %4426 = vmatprep.subr.bf16.mxu0 %v6344_v0 }
 0x430   : > { %4408 = vmatprep.subr.bf16.mxu1 %v6344_v0 }
 0x432   : > { %4405 = vmatmul.mubr.msk.bf16.vlgmr.msra.gmra.mrb[0].mxu1 %vm1743_vm1, %v1704_v9  ;;  %4427 = vmatpush3.bf16.msra.mxu0 %v5051_v20 }
 0x433   : > { %4409 = vmatpush3.bf16.msra.mxu1 %v5044_v8  ;;  %4416 = vmatprep.mubr.msk.bf16.mxu1 %vm6345_vm0, %v6344_v0 }
 0x434   : > { %4410 = vmatprep.subr.bf16.mxu1 %v6344_v0  ;;  %4444 = vmatprep.subr.bf16.mxu0 %v6344_v0 }
 0x435   : > { %4429 = vmatmul.mubr.msk.bf16.vlgmr.msra.gmra.mrb[0].mxu0 %vm1743_vm1, %v1872_v21 }
 0x436   : > { %4446 = vmatprep.mubr.msk.bf16.mxu0 %vm6345_vm0, %v6344_v0 }
 0x437   : > { %4411 = vmatpush3.bf16.msra.mxu1 %v5045_v10 }
 0x438   : > { %4412 = vmatprep.subr.bf16.mxu1 %v6344_v0 }
 0x43b   : > { %4413 = vmatpush3.bf16.msra.mxu1 %v5046_v11 }
 0x43c   : > { %4414 = vmatprep.subr.bf16.mxu1 %v6344_v0 }
 0x43f   : > { %4415 = vmatpush3.bf16.msra.mxu1 %v5047_v14 }
 0x440   : > { %4432 = vmatprep.subr.bf16.mxu1 %v6344_v0 }
 0x442   : > { %4417 = vmatmul.mubr.msk.bf16.vlgmr.msra.gmra.mrb[4].mxu1 %vm1743_vm1, %v1789_v16 }
 0x443   : > { %4434 = vmatprep.mubr.msk.bf16.mxu1 %vm6345_vm0, %v6344_v0 }
 0x505   : > { %v1781_v22 = vpop.f32.mrb[0].mxu1 }
 0x506   : > { %v4406_v23 = vpop.f32.mrb[1].mxu1  ;;  %v1782_v28 = vadd.f32 %v4216_v26, %v1781_v22 }
 0x507   : > { %v1784_v24 = vpop.f32.mrb[2].mxu1 }
 0x508   : > { %v4407_v25 = vpop.f32.mrb[3].mxu1  ;;  %v1955_v33 = vmul.f32 0.25, %v1782_v28  ;;  %v1948_v39 = vpop.f32.mrb[0].mxu0 }
 0x509   : > { %v1949_v40 = vadd.f32 %v4228_v38, %v1948_v39  ;;  %v4430_v41 = vpop.f32.mrb[1].mxu0 }
 0x50a   : > { %v1956_v37 = vpack.c.bf16 %v1955_v33, %v1955_v33  ;;  %v1951_v42 = vpop.f32.mrb[2].mxu0 }
 0x50b   : > { %v7305_v43 = vpack.c.bf16 %v1949_v40, %v1949_v40  ;;  %v4431_v44 = vpop.f32.mrb[3].mxu0 }
 0x50d   : > { %v2024_v46 = vsel %vm2022_vm3, %v7305_v43, 0 }
 0x515   : > { %v1865_v29 = vpop.f32.mrb[4].mxu1 }
 0x516   : > { %v1866_v30 = vadd.f32 %v4222_v27, %v1865_v29  ;;  %v4418_v31 = vpop.f32.mrb[5].mxu1 }
 0x517   : > { %v1868_v32 = vpop.f32.mrb[6].mxu1 }
 0x518   : > { %v1957_v34 = vpack.c.bf16 %v1866_v30, %v1866_v30  ;;  %v4419_v35 = vpop.f32.mrb[7].mxu1 }
 0x51a   : > { %2188 = vrot.lane.b32.xlu1 %v1957_v34, %s6346_s2  ;;  %2071 = vrot.lane.b32.xlu0 %v1957_v34, %s6347_s26  ;;  %v1964_v36 = vsel %vm1959_vm2, %v1957_v34, 0 }
 0x51b   : > { %4433 = vmatpush3.bf16.xpose.msra.mxu1 %v1964_v36 }
 0x51c   : > { %4438 = vmatprep.subr.bf16.mxu1 %v6344_v0 }
 0x51e   : > { %2186 = vrot.lane.b32.xlu1 %v1956_v37, %s6346_s2  ;;  %2068 = vrot.lane.b32.xlu0 %v1956_v37, %s6347_s26 }
 0x522   : > { %2302 = vrot.lane.b32.xlu1 %v1956_v37, %s6348_s6  ;;  %2304 = vrot.lane.b32.xlu0 %v1957_v34, %s6348_s6 }
 0x523   : > { %4435 = vmatmul.mubr.msk.bf16.vlgmr.msra.gmra.mrb[8].mxu1 %vm1959_vm2, %v1956_v37 }
 0x524   : > { %4440 = vmatprep.mubr.msk.bf16.mxu1 %vm6345_vm0, %v6344_v0  ;;  %4439 = vmatpush3.bf16.msra.mxu1 %v2024_v46 }
 0x525   : > { %4450 = vmatprep.subr.bf16.mxu1 %v6344_v0 }
 0x58c   : > { %v2072_v45 = vpop.permute.xlu0 %2071  ;;  %v2189_v48 = vpop.permute.xlu1 %2188 }
 0x58d   : > { %v2077_v47 = vsel %vm1959_vm2, %v2072_v45, 0  ;;  %v2194_v50 = vsel %vm1959_vm2, %v2189_v48, 0 }
 0x58e   : > { %4445 = vmatpush3.bf16.xpose.msra.mxu0 %v2077_v47 }
 0x58f   : > { %4456 = vmatprep.subr.bf16.mxu0 %v6344_v0 }
 0x590   : > { %v2069_v49 = vpop.permute.xlu0 %2068  ;;  %v2187_v52 = vpop.permute.xlu1 %2186 }
 0x594   : > { %v2305_v51 = vpop.permute.xlu0 %2304  ;;  %v2303_v54 = vpop.permute.xlu1 %2302 }
 0x595   : > { %4447 = vmatmul.mubr.msk.bf16.vlgmr.msra.gmra.mrb[4].mxu0 %vm1959_vm2, %v2069_v49  ;;  %v2310_v53 = vsel %vm1959_vm2, %v2305_v51, 0 }
 0x596   : > { %4457 = vmatpush3.bf16.xpose.msra.mxu0 %v2194_v50  ;;  %4458 = vmatprep.mubr.msk.bf16.mxu0 %vm6345_vm0, %v6344_v0 }
 0x597   : > { %4468 = vmatprep.subr.bf16.mxu0 %v6344_v0 }
 0x59d   : > { %4459 = vmatmul.mubr.msk.bf16.vlgmr.msra.gmra.mrb[8].mxu0 %vm1959_vm2, %v2187_v52 }
 0x59e   : > { %4469 = vmatpush3.bf16.xpose.msra.mxu0 %v2310_v53  ;;  %4470 = vmatprep.mubr.msk.bf16.mxu0 %vm6345_vm0, %v6344_v0 }
 0x59f   : > { %4480 = vmatprep.subr.bf16.mxu0 %v6344_v0 }
 0x5a5   : > { %4471 = vmatmul.mubr.msk.bf16.vlgmr.msra.gmra.mrb[12].mxu0 %vm1959_vm2, %v2303_v54 }
 0x5a6   : > { %4488 = vmatprep.mubr.msk.bf16.mxu0 %vm6345_vm0, %v6344_v0 }
 0x5f6   : > { %v2000_v55 = vpop.f32.mrb[8].mxu1 }
 0x5f7   : > { %v4436_v56 = vpop.f32.mrb[9].mxu1  ;;  %v2007_v57 = vsel %vm2006_vm4, %v2000_v55, -inf }
 0x5f8   : > { %2008 = vmax.xlane.f32.xlu0 %v2007_v57  ;;  %v2003_v58 = vpop.f32.mrb[10].mxu1 }
 0x5f9   : > { %v4437_v59 = vpop.f32.mrb[11].mxu1 }
 0x668   : > { %v2113_v60 = vpop.f32.mrb[4].mxu0 }
 0x669   : > { %v4448_v61 = vpop.f32.mrb[5].mxu0  ;;  %v2119_v62 = vsel %vm2006_vm4, %v2113_v60, -inf }
 0x66a   : > { %2120 = vmax.xlane.f32.xlu1 %v2119_v62  ;;  %v2116_v63 = vpop.f32.mrb[6].mxu0  ;;  %v5053_v61 = vld [vmem:[#allocation24 + $0x8] sm:$0xff]  }
 0x66b   : > { %v4449_v1 = vpop.f32.mrb[7].mxu0 }
 0x670   : > { %v2230_v2 = vpop.f32.mrb[8].mxu0 }
 0x671   : > { %v4460_v3 = vpop.f32.mrb[9].mxu0  ;;  %v2236_v6 = vsel %vm2006_vm4, %v2230_v2, -inf }
 0x672   : > { %v2233_v7 = vpop.f32.mrb[10].mxu0  ;;  %2237 = vmax.xlane.f32.xlu0 %v2236_v6  ;;  %v5054_v3 = vld [vmem:[#allocation24 + $0x10] sm:$0xff]   ;;  %v5055_v6 = vld [vmem:[#allocation24 + $0x18] sm:$0xff]  }
 0x673   : > { %v4461_v8 = vpop.f32.mrb[11].mxu0 }
 0x678   : > { %v2346_v9 = vpop.f32.mrb[12].mxu0 }
 0x679   : > { %v4472_v10 = vpop.f32.mrb[13].mxu0  ;;  %v2352_v11 = vsel %vm2006_vm4, %v2346_v9, -inf }
 0x67a   : > { %v2349_v12 = vpop.f32.mrb[14].mxu0  ;;  %2353 = vmax.xlane.f32.xlu0 %v2352_v11 }
 0x67b   : > { %v4473_v13 = vpop.f32.mrb[15].mxu0 }
 0x685   : > { %v2009_v14 = vpop.xlane.xlu0 %2008 }
 0x686   : > { %v2010_v15 = vsub.f32 %v2000_v55, %v2009_v14 }
 0x688   : > { %v2011_v16 = vmul.f32 1.442695, %v2010_v15 }
 0x68a   : > { %5084 = vpow2.f32 %v2011_v16 }
 0x694   : > { %v5085_v17 = vpop.eup %5084 }
 0x695   : > { %v2013_v18 = vsel %vm2006_vm4, %v5085_v17, 0.0 }
 0x696   : > { %2014 = vadd.xlane.f32.xlu1 %v2013_v18 }
 0x6a7   : > { %2132 = vrot.lane.b32.xlu1 %v7305_v43, %s6347_s26 }
 0x6f7   : > { %v2121_v19 = vpop.xlane.xlu1 %2120 }
 0x6f8   : > { %v2122_v20 = vsub.f32 %v2113_v60, %v2121_v19  ;;  %v5052_v60 = vld [vmem:[#allocation24] sm:$0xff]  }
 0x6f9   : > { %4481 = vmatpush3.bf16.msra.mxu0 %v5052_v60 }
 0x6fa   : > { %v2123_v21 = vmul.f32 1.442695, %v2122_v20  ;;  %4482 = vmatprep.subr.bf16.mxu0 %v6344_v0  ;;  %v4242_v20 = vld [vmem:[#allocation26] ss:$0 sm:$0xff] }
 0x6fc   : > { %5086 = vpow2.f32 %v2123_v21 }
 0x6fd   : > { %4483 = vmatpush3.bf16.msra.mxu0 %v5053_v61 }
 0x6fe   : > { %4484 = vmatprep.subr.bf16.mxu0 %v6344_v0 }
 0x6ff   : > { %v2238_v22 = vpop.xlane.xlu0 %2237 }
 0x700   : > { %v2239_v23 = vsub.f32 %v2230_v2, %v2238_v22 }
 0x701   : > { %4485 = vmatpush3.bf16.msra.mxu0 %v5054_v3 }
 0x702   : > { %v2240_v24 = vmul.f32 1.442695, %v2239_v23  ;;  %4486 = vmatprep.subr.bf16.mxu0 %v6344_v0 }
 0x704   : > { %5088 = vpow2.f32 %v2240_v24 }
 0x705   : > { %4487 = vmatpush3.bf16.msra.mxu0 %v5055_v6 }
 0x706   : > { %v5087_v25 = vpop.eup %5086  ;;  %4504 = vmatprep.subr.bf16.mxu0 %v6344_v0 }
 0x707   : > { %v2354_v26 = vpop.xlane.xlu0 %2353  ;;  %v2125_v27 = vsel %vm2006_vm4, %v5087_v25, 0.0 }
 0x708   : > { %v2355_v28 = vsub.f32 %v2346_v9, %v2354_v26  ;;  %2126 = vadd.xlane.f32.xlu0 %v2125_v27 }
 0x70a   : > { %v2356_v29 = vmul.f32 1.442695, %v2355_v28  ;;  %v5056_v28 = vld [vmem:[#allocation30] sm:$0xff]  }
 0x70c   : > { %5090 = vpow2.f32 %v2356_v29  ;;  %v5057_v29 = vld [vmem:[#allocation30 + $0x8] sm:$0xff]  }
 0x70e   : > { %v5089_v30 = vpop.eup %5088 }
 0x70f   : > { %v2242_v31 = vsel %vm2006_vm4, %v5089_v30, 0.0 }
 0x710   : > { %2243 = vadd.xlane.f32.xlu1 %v2242_v31 }
 0x716   : > { %v5091_v32 = vpop.eup %5090 }
 0x717   : > { %v2358_v33 = vsel %vm2006_vm4, %v5091_v32, 0.0 }
 0x718   : > { %2359 = vadd.xlane.f32.xlu0 %v2358_v33 }
 0x721   : > { %2364 = vrot.lane.b32.xlu1 %v7305_v43, %s6348_s6 }
 0x723   : > { %v2015_v34 = vpop.xlane.xlu1 %2014 }
 0x724   : > { %5092 = vrcp.f32 %v2015_v34  ;;  %v5058_v34 = vld [vmem:[#allocation30 + $0x10] sm:$0xff]  }
 0x727   : > { %v2133_v37 = vpop.permute.xlu1 %2132 }
 0x728   : > { %v2138_v39 = vsel %vm2022_vm3, %v2133_v37, 0  ;;  %v7381_v37 = vld [vmem:[%s7188_s4 + $0x8] sm:$0xff] }
 0x72e   : > { %v5093_v35 = vpop.eup %5092  ;;  %2248 = vrot.lane.b32.xlu0 %v7305_v43, %s6346_s2 }
 0x72f   : > { %v2017_v36 = vmul.f32 %v5093_v35, %v5085_v17  ;;  %v5059_v35 = vld [vmem:[#allocation30 + $0x18] sm:$0xff]  }
 0x731   : > { %v2018_v38 = vpack.c.bf16 %v2017_v36, %v2017_v36  ;;  %v7378_v36 = vld [vmem:[%s7188_s4] sm:$0xff]  ;;  %s3611_s4 = scalar_lea.sflag [#allocation5], %s7164_s20 }
 0x733   : > { %4441 = vmatmul.mubr.msk.bf16.vlgmr.msra.gmra.mrb[12].mxu1 %vm2006_vm4, %v2018_v38  ;;  %v1699_v38 = vld [vmem:[%s7190_s29] sm:$0xff] }
 0x734   : > { %4451 = vmatpush3.bf16.msra.mxu1 %v2138_v39  ;;  %4452 = vmatprep.mubr.msk.bf16.mxu1 %vm6345_vm0, %v6344_v0  ;;  %v1700_v39 = vld [vmem:[%s7190_s29 + $0x8] sm:$0xff]  ;;  %s6352_s29 = smov [#allocation57]  }
 0x735   : > { %4462 = vmatprep.subr.bf16.mxu1 %v6344_v0  ;;  %s6122_s10 = sshll.u32 %s6352_s29, 4  ;;  %s6123_s10 = int_to_ptr.vmem [resolvable:$false] %s6122_s10 }
 0x736   : > { %p6125_p5 = scmp.lt.s32.totalorder %s7503_s7, %s6123_s10 }
 0x795   : > { %v2127_v40 = vpop.xlane.xlu0 %2126 }
 0x796   : > { %5094 = vrcp.f32 %v2127_v40  ;;  %v2616_v40 = vadd.f32 %v1699_v38, %v7378_v36 }
 0x79d   : > { %v2244_v41 = vpop.xlane.xlu1 %2243 }
 0x79e   : > { %5096 = vrcp.f32 %v2244_v41  ;;  %v2617_v41 = vadd.f32 %v1700_v39, %v7381_v37 }
 0x7a0   : > { %v5095_v42 = vpop.eup %5094 }
 0x7a1   : > { %v2129_v44 = vmul.f32 %v5095_v42, %v5087_v25  ;;  %v2365_v50 = vpop.permute.xlu1 %2364  ;;  %v2619_v42 = vpack.c.bf16 %v2617_v41, %v2616_v40 }
 0x7a2   : > { %v2370_v52 = vsel %vm2022_vm3, %v2365_v50, 0 }
 0x7a3   : > { %v2130_v43 = vpack.c.bf16 %v2129_v44, %v2129_v44  ;;  %v5060_v44 = vld [vmem:[#allocation27] sm:$0xff]  }
 0x7a5   : > { %4453 = vmatmul.mubr.msk.bf16.vlgmr.msra.gmra.mrb[16].mxu1 %vm2006_vm4, %v2130_v43  ;;  %v2360_v45 = vpop.xlane.xlu0 %2359  ;;  %v5061_v43 = vld [vmem:[#allocation27 + $0x8] sm:$0xff]  }
 0x7a6   : > { %5098 = vrcp.f32 %v2360_v45  ;;  %4464 = vmatprep.mubr.msk.bf16.mxu1 %vm6345_vm0, %v6344_v0  ;;  %v5062_v45 = vld [vmem:[#allocation27 + $0x10] sm:$0xff]  }
 0x7a8   : > { %v5097_v46 = vpop.eup %5096 }
 0x7a9   : > { %v2246_v47 = vmul.f32 %v5097_v46, %v5089_v30  ;;  %v2249_v48 = vpop.permute.xlu0 %2248  ;;  %v5063_v46 = vld [vmem:[#allocation27 + $0x18] sm:$0xff]  }
 0x7aa   : > { %v2254_v49 = vsel %vm2022_vm3, %v2249_v48, 0 }
 0x7ab   : > { %4463 = vmatpush3.bf16.msra.mxu1 %v2254_v49  ;;  %v2247_v51 = vpack.c.bf16 %v2246_v47, %v2246_v47 }
 0x7ac   : > { %4474 = vmatprep.subr.bf16.mxu1 %v6344_v0 }
 0x7ae   : > { %4465 = vmatmul.mubr.msk.bf16.vlgmr.msra.gmra.mrb[20].mxu1 %vm2006_vm4, %v2247_v51  ;;  %v4248_v51 = vld [vmem:[#allocation45] ss:$0 sm:$0xff] }
 0x7af   : > { %4475 = vmatpush3.bf16.msra.mxu1 %v2370_v52  ;;  %4476 = vmatprep.mubr.msk.bf16.mxu1 %vm6345_vm0, %v6344_v0 }
 0x7b0   : > { %v5099_v53 = vpop.eup %5098  ;;  %4492 = vmatprep.subr.bf16.mxu1 %v6344_v0 }
 0x7b1   : > { %v2362_v54 = vmul.f32 %v5099_v53, %v5091_v32  ;;  %v4249_v53 = vld [vmem:[#allocation47] ss:$0 sm:$0xff] }
 0x7b3   : > { %v2363_v55 = vpack.c.bf16 %v2362_v54, %v2362_v54 }
 0x7b6   : > { %4477 = vmatmul.mubr.msk.bf16.vlgmr.msra.gmra.mrb[24].mxu1 %vm2006_vm4, %v2363_v55 }
 0x7b7   : > { %4500 = vmatprep.mubr.msk.bf16.mxu1 %vm6345_vm0, %v6344_v0  ;;  %4493 = vmatpush3.bf16.msra.mxu1 %v5060_v44 }
 0x7b8   : > { %4494 = vmatprep.subr.bf16.mxu1 %v6344_v0 }
 0x7bb   : > { %4495 = vmatpush3.bf16.msra.mxu1 %v5061_v43 }
 0x7bc   : > { %4496 = vmatprep.subr.bf16.mxu1 %v6344_v0 }
 0x7bf   : > { %4497 = vmatpush3.bf16.msra.mxu1 %v5062_v45 }
 0x7c0   : > { %4498 = vmatprep.subr.bf16.mxu1 %v6344_v0 }
 0x7c3   : > { %4499 = vmatpush3.bf16.msra.mxu1 %v5063_v46 }
 0x7c4   : > { %4516 = vmatprep.subr.bf16.mxu1 %v6344_v0 }
 0x806   : > { %v2060_v56 = vpop.f32.mrb[12].mxu1 }
 0x807   : > { %2066 = vst.msk [vmem:[#allocation2] sm:$0xff] %vm1959_vm2, %v2060_v56  ;;  %v4442_v57 = vpop.f32.mrb[13].mxu1 }
 0x808   : > { %v2063_v58 = vpop.f32.mrb[14].mxu1 }
 0x809   : > { %v4443_v59 = vpop.f32.mrb[15].mxu1  ;;  %v4256_v58 = vld [vmem:[#allocation32] ss:$0 sm:$0xff] }
 0x878   : > { %v2174_v62 = vpop.f32.mrb[16].mxu1 }
 0x879   : > { %2181 = vrot.lane.b32.xlu1 %v2174_v62, %s6349_s19  ;;  %v4454_v63 = vpop.f32.mrb[17].mxu1 }
 0x87a   : > { %v2177_v1 = vpop.f32.mrb[18].mxu1 }
 0x87b   : > { %v4455_v2 = vpop.f32.mrb[19].mxu1 }
 0x881   : > { %v2290_v7 = vpop.f32.mrb[20].mxu1 }
 0x882   : > { %2297 = vrot.lane.b32.xlu0 %v2290_v7, %s6350_s23  ;;  %v4466_v8 = vpop.f32.mrb[21].mxu1 }
 0x883   : > { %v2293_v9 = vpop.f32.mrb[22].mxu1 }
 0x884   : > { %v4467_v10 = vpop.f32.mrb[23].mxu1 }
 0x889   : > { %v2406_v11 = vpop.f32.mrb[24].mxu1 }
 0x88a   : > { %2413 = vrot.lane.b32.xlu1 %v2406_v11, %s6351_s11  ;;  %v4478_v12 = vpop.f32.mrb[25].mxu1 }
 0x88b   : > { %v2409_v13 = vpop.f32.mrb[26].mxu1 }
 0x88c   : > { %v4479_v14 = vpop.f32.mrb[27].mxu1 }
 0x8eb   : > { %v2182_v15 = vpop.permute.xlu1 %2181 }
 0x8ec   : > { %2185 = vst.msk [vmem:[#allocation2] sm:$0xff] %vm2184_vm5, %v2182_v15  ;;  %v5064_v15 = vld [vmem:[#allocation33] sm:$0xff]  }
 0x8f4   : > { %v2298_v16 = vpop.permute.xlu0 %2297 }
 0x8f5   : > { %2301 = vst.msk [vmem:[#allocation2] sm:$0xff] %vm2300_vm6, %v2298_v16  ;;  %v5065_v16 = vld [vmem:[#allocation33 + $0x8] sm:$0xff]  }
 0x8fc   : > { %v2414_v17 = vpop.permute.xlu1 %2413 }
 0x8fd   : > { %2417 = vst.msk [vmem:[#allocation2] sm:$0xff] %vm2416_vm7, %v2414_v17  ;;  %v5066_v17 = vld [vmem:[#allocation33 + $0x10] sm:$0xff]  }
 0x904   : > { %v2418_v18 = vld [vmem:[#allocation2] sm:$0xff] }
 0x905   : > { %v2419_v19 = vpack.c.bf16 %v2418_v18, %v2418_v18  ;;  %v5067_v18 = vld [vmem:[#allocation33 + $0x18] sm:$0xff]  }
 0x907   : > { %4489 = vmatmul.mubr.msk.bf16.vlgmr.msra.gmra.mrb[16].mxu0 %vm1743_vm1, %v2419_v19  ;;  %v2703_v19 = vpack.c.bf16 %v7381_v37, %v7378_v36 }
 0x908   : > { %4512 = vmatprep.mubr.msk.bf16.mxu0 %vm6345_vm0, %v6344_v0  ;;  %4505 = vmatpush3.bf16.msra.mxu0 %v5056_v28 }
 0x909   : > { %4506 = vmatprep.subr.bf16.mxu0 %v6344_v0 }
 0x90c   : > { %4507 = vmatpush3.bf16.msra.mxu0 %v5057_v29 }
 0x90d   : > { %4508 = vmatprep.subr.bf16.mxu0 %v6344_v0 }
 0x910   : > { %4509 = vmatpush3.bf16.msra.mxu0 %v5058_v34 }
 0x911   : > { %4510 = vmatprep.subr.bf16.mxu0 %v6344_v0 }
 0x914   : > { %4511 = vmatpush3.bf16.msra.mxu0 %v5059_v35 }
 0x915   : > { %4528 = vmatprep.subr.bf16.mxu0 %v6344_v0 }
 0x917   : > { %4513 = vmatmul.mubr.msk.bf16.vlgmr.msra.gmra.mrb[20].mxu0 %vm1743_vm1, %v2619_v42 }
 0x918   : > { %4530 = vmatprep.mubr.msk.bf16.mxu0 %vm6345_vm0, %v6344_v0 }
 0x9da   : > { %v2495_v21 = vpop.f32.mrb[16].mxu0 }
 0x9db   : > { %v2496_v22 = vadd.f32 %v4242_v20, %v2495_v21  ;;  %v4490_v23 = vpop.f32.mrb[17].mxu0 }
 0x9dc   : > { %v2498_v24 = vpop.f32.mrb[18].mxu0 }
 0x9dd   : > { %v4491_v25 = vpop.f32.mrb[19].mxu0  ;;  %v2501_v26 = vadd.f32 %v2496_v22, %v7262_v4 }
 0x9df   : > { %v2504_v27 = vsel %vm1743_vm1, %v2501_v26, 0.0 }
 0x9e0   : > { %2505 = vadd.xlane.f32.xlu0 %v2504_v27  ;;  %v4268_v27 = vld [vmem:[%s1464_s12] ss:$0 sm:$0xff]  ;;  %s6124_s12 = scalar_lea.vmem %s6123_s10, 256 }
 0x9e1   : > { %p6126_p13 = scmp.lt.s32.totalorder %s6124_s12, %s6118_s25 }
 0x9e3   : > { %p6127_p12 = por %p6126_p13, %p6125_p5 }
 0x9e5   : > { %p6128_p7 = pnand %p6127_p12, %p6121_p0 }
 0x9ea   : > { %v2695_v59 = vpop.f32.mrb[20].mxu0 }
 0x9eb   : > { %v2696_v60 = vadd.f32 %v4256_v58, %v2695_v59  ;;  %v4514_v61 = vpop.f32.mrb[21].mxu0 }
 0x9ec   : > { %v2698_v62 = vpop.f32.mrb[22].mxu0 }
 0x9ed   : > { %v2699_v63 = vadd.f32 %v4256_v58, %v2698_v62  ;;  %v4515_v1 = vpop.f32.mrb[23].mxu0 }
 0x9ef   : > { %v2789_v2 = vpack.c.bf16 %v2699_v63, %v2696_v60 }
 0x9f1   : > { %v2801_v3 = vsel %vm1959_vm2, %v2789_v2, 0 }
 0x9f2   : > { %4529 = vmatpush3.bf16.xpose.msra.mxu0 %v2801_v3 }
 0x9f3   : > { %4540 = vmatprep.subr.bf16.mxu0 %v6344_v0 }
 0x9f6   : > { %2903 = vrot.lane.b32.xlu0 %v2789_v2, %s6347_s26 }
 0x9fa   : > { %3017 = vrot.lane.b32.xlu0 %v2789_v2, %s6346_s2 }
 0x9fe   : > { %3130 = vrot.lane.b32.xlu0 %v2789_v2, %s6348_s6 }
 0xa6d   : > { %v2506_v30 = vpop.xlane.xlu0 %2505 }
 0xa6e   : > { %v2508_v31 = vmul.f32 0.015625, %v2506_v30 }
 0xa70   : > { %v2509_v32 = vsub.f32 %v2501_v26, %v2508_v31 }
 0xa71   : > { %v2904_v12 = vpop.permute.xlu0 %2903 }
 0xa72   : > { %v2510_v33 = vmul.f32 %v2509_v32, %v2509_v32  ;;  %v2909_v14 = vsel %vm1959_vm2, %v2904_v12, 0 }
 0xa74   : > { %v2511_v4 = vsel %vm1743_vm1, %v2510_v33, 0.0 }
 0xa75   : > { %2512 = vadd.xlane.f32.xlu1 %v2511_v4  ;;  %v3018_v20 = vpop.permute.xlu0 %3017  ;;  %v4262_v4 = vld [vmem:[#allocation35] ss:$0 sm:$0xff] }
 0xa76   : > { %v3023_v22 = vsel %vm1959_vm2, %v3018_v20, 0 }
 0xa79   : > { %v3131_v23 = vpop.permute.xlu0 %3130 }
 0xa7a   : > { %v3136_v25 = vsel %vm1959_vm2, %v3131_v23, 0 }
 0xb02   : > { %v2513_v47 = vpop.xlane.xlu1 %2512 }
 0xb03   : > { %v2514_v48 = vmul.f32 0.015625, %v2513_v47 }
 0xb05   : > { %v2515_v49 = vadd.f32 1e-05, %v2514_v48 }
 0xb07   : > { %5100 = vrsqrt.f32 %v2515_v49 }
 0xb11   : > { %v5101_v50 = vpop.eup %5100 }
 0xb12   : > { %v2517_v52 = vmul.f32 %v5101_v50, %v2509_v32 }
 0xb14   : > { %v2524_v54 = vmul.f32 %v4248_v51, %v2517_v52 }
 0xb16   : > { %v7395_v55 = vadd.f32 %v4249_v53, %v2524_v54 }
 0xb18   : > { %v2532_v56 = vadd.f32 %v7395_v55, %v7266_v5  ;;  %v4250_v5 = vld [vmem:[#allocation29] ss:$0 sm:$0xff] }
 0xb1a   : > { %v2534_v57 = vpack.c.bf16 %v2532_v56, %v2532_v56 }
 0xb1c   : > { %4501 = vmatmul.mubr.msk.bf16.vlgmr.msra.gmra.mrb[28].mxu1 %vm1743_vm1, %v2534_v57 }
 0xb1d   : > { %4524 = vmatprep.mubr.msk.bf16.mxu1 %vm6345_vm0, %v6344_v0  ;;  %4517 = vmatpush3.bf16.msra.mxu1 %v5064_v15 }
 0xb1e   : > { %4518 = vmatprep.subr.bf16.mxu1 %v6344_v0 }
 0xb21   : > { %4519 = vmatpush3.bf16.msra.mxu1 %v5065_v16 }
 0xb22   : > { %4520 = vmatprep.subr.bf16.mxu1 %v6344_v0 }
 0xb25   : > { %4521 = vmatpush3.bf16.msra.mxu1 %v5066_v17 }
 0xb26   : > { %4522 = vmatprep.subr.bf16.mxu1 %v6344_v0 }
 0xb29   : > { %4523 = vmatpush3.bf16.msra.mxu1 %v5067_v18 }
 0xb2a   : > { %4534 = vmatprep.subr.bf16.mxu1 %v6344_v0 }
 0xb2c   : > { %4525 = vmatmul.mubr.msk.bf16.vlgmr.msra.gmra.mrb[32].mxu1 %vm1743_vm1, %v2703_v19 }
 0xb2d   : > { %4536 = vmatprep.mubr.msk.bf16.mxu1 %vm6345_vm0, %v6344_v0 }
 0xbef   : > { %v2610_v6 = vpop.f32.mrb[28].mxu1 }
 0xbf0   : > { %v2611_v7 = vadd.f32 %v4250_v5, %v2610_v6  ;;  %v4502_v8 = vpop.f32.mrb[29].mxu1 }
 0xbf1   : > { %v2613_v9 = vpop.f32.mrb[30].mxu1 }
 0xbf2   : > { %v2787_v10 = vmul.f32 0.25, %v2611_v7  ;;  %v4503_v11 = vpop.f32.mrb[31].mxu1 }
 0xbf4   : > { %v2788_v13 = vpack.c.bf16 %v2787_v10, %v2787_v10 }
 0xbf6   : > { %2900 = vrot.lane.b32.xlu1 %v2788_v13, %s6347_s26  ;;  %4531 = vmatmul.mubr.msk.bf16.vlgmr.msra.gmra.mrb[24].mxu0 %vm1959_vm2, %v2788_v13 }
 0xbf7   : > { %4541 = vmatpush3.bf16.xpose.msra.mxu0 %v2909_v14  ;;  %4542 = vmatprep.mubr.msk.bf16.mxu0 %vm6345_vm0, %v6344_v0 }
 0xbf8   : > { %4552 = vmatprep.subr.bf16.mxu0 %v6344_v0 }
 0xbfa   : > { %3015 = vrot.lane.b32.xlu1 %v2788_v13, %s6346_s2 }
 0xbfe   : > { %3128 = vrot.lane.b32.xlu1 %v2788_v13, %s6348_s6 }
 0xbff   : > { %v2779_v34 = vpop.f32.mrb[32].mxu1 }
 0xc00   : > { %v2780_v35 = vadd.f32 %v4262_v4, %v2779_v34  ;;  %v4526_v36 = vpop.f32.mrb[33].mxu1 }
 0xc01   : > { %v2782_v37 = vpop.f32.mrb[34].mxu1 }
 0xc02   : > { %v2783_v38 = vadd.f32 %v4262_v4, %v2782_v37  ;;  %v4527_v39 = vpop.f32.mrb[35].mxu1 }
 0xc04   : > { %v2790_v40 = vpack.c.bf16 %v2783_v38, %v2780_v35 }
 0xc06   : > { %4535 = vmatpush3.bf16.msra.mxu1 %v2790_v40 }
 0xc07   : > { %4546 = vmatprep.subr.bf16.mxu1 %v6344_v0 }
 0xc68   : > { %v2901_v21 = vpop.permute.xlu1 %2900 }
 0xc69   : > { %4543 = vmatmul.mubr.msk.bf16.vlgmr.msra.gmra.mrb[28].mxu0 %vm1959_vm2, %v2901_v21 }
 0xc6a   : > { %4553 = vmatpush3.bf16.xpose.msra.mxu0 %v3023_v22  ;;  %4554 = vmatprep.mubr.msk.bf16.mxu0 %vm6345_vm0, %v6344_v0 }
 0xc6b   : > { %4564 = vmatprep.subr.bf16.mxu0 %v6344_v0 }
 0xc6c   : > { %v3016_v24 = vpop.permute.xlu1 %3015 }
 0xc70   : > { %v3129_v26 = vpop.permute.xlu1 %3128 }
 0xc71   : > { %4555 = vmatmul.mubr.msk.bf16.vlgmr.msra.gmra.mrb[32].mxu0 %vm1959_vm2, %v3016_v24 }
 0xc72   : > { %4565 = vmatpush3.bf16.xpose.msra.mxu0 %v3136_v25  ;;  %4566 = vmatprep.mubr.msk.bf16.mxu0 %vm6345_vm0, %v6344_v0 }
 0xc73   : > { %4576 = vmatprep.subr.bf16.mxu0 %v6344_v0 }
 0xc79   : > { %4567 = vmatmul.mubr.msk.bf16.vlgmr.msra.gmra.mrb[36].mxu0 %vm1959_vm2, %v3129_v26 }
 0xc7a   : > { %4584 = vmatprep.mubr.msk.bf16.mxu0 %vm6345_vm0, %v6344_v0 }
 0xcc9   : > { %v2837_v28 = vpop.f32.mrb[24].mxu0 }
 0xcca   : > { %v2838_v29 = vadd.f32 %v4268_v27, %v2837_v28  ;;  %v4532_v30 = vpop.f32.mrb[25].mxu0 }
 0xccb   : > { %v2840_v31 = vpop.f32.mrb[26].mxu0 }
 0xccc   : > { %v4533_v32 = vpop.f32.mrb[27].mxu0  ;;  %v2843_v33 = vsel %vm1959_vm2, %v2838_v29, -inf }
 0xccd   : > { %2844 = vmax.xlane.f32.xlu0 %v2843_v33 }
 0xd3c   : > { %v2945_v41 = vpop.f32.mrb[28].mxu0 }
 0xd3d   : > { %v2946_v42 = vadd.f32 %v4268_v27, %v2945_v41  ;;  %v4544_v44 = vpop.f32.mrb[29].mxu0  ;;  %v5069_v41 = vld [vmem:[#allocation36 + $0x8] sm:$0xff]  }
 0xd3e   : > { %v2948_v43 = vpop.f32.mrb[30].mxu0 }
 0xd3f   : > { %v4545_v45 = vpop.f32.mrb[31].mxu0  ;;  %v2951_v46 = vsel %vm1959_vm2, %v2946_v42, -inf }
 0xd40   : > { %2952 = vmax.xlane.f32.xlu1 %v2951_v46  ;;  %v5070_v46 = vld [vmem:[#allocation36 + $0x10] sm:$0xff]  }
 0xd44   : > { %v3059_v47 = vpop.f32.mrb[32].mxu0 }
 0xd45   : > { %v3060_v48 = vadd.f32 %v4268_v27, %v3059_v47  ;;  %v4556_v49 = vpop.f32.mrb[33].mxu0  ;;  %v5071_v47 = vld [vmem:[#allocation36 + $0x18] sm:$0xff]  }
 0xd46   : > { %v3062_v50 = vpop.f32.mrb[34].mxu0 }
 0xd47   : > { %v4557_v51 = vpop.f32.mrb[35].mxu0  ;;  %v3065_v52 = vsel %vm1959_vm2, %v3060_v48, -inf }
 0xd48   : > { %3066 = vmax.xlane.f32.xlu0 %v3065_v52 }
 0xd4c   : > { %v3172_v53 = vpop.f32.mrb[36].mxu0 }
 0xd4d   : > { %v3173_v54 = vadd.f32 %v4268_v27, %v3172_v53  ;;  %v4568_v56 = vpop.f32.mrb[37].mxu0 }
 0xd4e   : > { %v3175_v57 = vpop.f32.mrb[38].mxu0 }
 0xd4f   : > { %v4569_v58 = vpop.f32.mrb[39].mxu0  ;;  %v3178_v59 = vsel %vm1959_vm2, %v3173_v54, -inf }
 0xd50   : > { %3179 = vmax.xlane.f32.xlu0 %v3178_v59 }
 0xd5a   : > { %v2845_v60 = vpop.xlane.xlu0 %2844 }
 0xd5b   : > { %v2846_v61 = vsub.f32 %v2838_v29, %v2845_v60 }
 0xd5d   : > { %v2847_v62 = vmul.f32 1.442695, %v2846_v61 }
 0xd5f   : > { %5102 = vpow2.f32 %v2847_v62  ;;  %v4277_v62 = vld [vmem:[#allocation38] ss:$0 sm:$0xff] }
 0xd69   : > { %v5103_v63 = vpop.eup %5102 }
 0xd6a   : > { %v2849_v1 = vsel %vm1959_vm2, %v5103_v63, 0.0 }
 0xd6b   : > { %2850 = vadd.xlane.f32.xlu1 %v2849_v1 }
 0xd7c   : > { %2964 = vrot.lane.b32.xlu1 %v2790_v40, %s6347_s26 }
 0xdcd   : > { %v2953_v2 = vpop.xlane.xlu1 %2952 }
 0xdce   : > { %v2954_v3 = vsub.f32 %v2946_v42, %v2953_v2 }
 0xdd0   : > { %v2955_v5 = vmul.f32 1.442695, %v2954_v3 }
 0xdd2   : > { %5104 = vpow2.f32 %v2955_v5 }
 0xdd5   : > { %v3067_v6 = vpop.xlane.xlu0 %3066 }
 0xdd6   : > { %v3068_v7 = vsub.f32 %v3060_v48, %v3067_v6 }
 0xdd8   : > { %v3069_v8 = vmul.f32 1.442695, %v3068_v7 }
 0xdda   : > { %5106 = vpow2.f32 %v3069_v8 }
 0xddc   : > { %v5105_v9 = vpop.eup %5104 }
 0xddd   : > { %v3180_v10 = vpop.xlane.xlu0 %3179  ;;  %v2957_v11 = vsel %vm1959_vm2, %v5105_v9, 0.0 }
 0xdde   : > { %v3181_v12 = vsub.f32 %v3173_v54, %v3180_v10  ;;  %2958 = vadd.xlane.f32.xlu0 %v2957_v11 }
 0xde0   : > { %v3182_v13 = vmul.f32 1.442695, %v3181_v12 }
 0xde2   : > { %5108 = vpow2.f32 %v3182_v13  ;;  %v5072_v13 = vld [vmem:[#allocation39] sm:$0xff]  }
 0xde4   : > { %v5107_v14 = vpop.eup %5106 }
 0xde5   : > { %v3071_v15 = vsel %vm1959_vm2, %v5107_v14, 0.0 }
 0xde6   : > { %3072 = vadd.xlane.f32.xlu1 %v3071_v15  ;;  %v5074_v15 = vld [vmem:[#allocation39 + $0x10] sm:$0xff]  }
 0xdec   : > { %v5109_v16 = vpop.eup %5108 }
 0xded   : > { %v3184_v17 = vsel %vm1959_vm2, %v5109_v16, 0.0 }
 0xdee   : > { %3185 = vadd.xlane.f32.xlu0 %v3184_v17  ;;  %v5077_v17 = vld [vmem:[#allocation42 + $0x8] sm:$0xff]  }
 0xdf7   : > { %3190 = vrot.lane.b32.xlu1 %v2790_v40, %s6348_s6 }
 0xdf8   : > { %v2851_v18 = vpop.xlane.xlu1 %2850 }
 0xdf9   : > { %5110 = vrcp.f32 %v2851_v18  ;;  %v5078_v18 = vld [vmem:[#allocation42 + $0x10] sm:$0xff]  }
 0xdfc   : > { %v2965_v22 = vpop.permute.xlu1 %2964 }
 0xe03   : > { %v5111_v19 = vpop.eup %5110 }
 0xe04   : > { %v2853_v20 = vmul.f32 %v5111_v19, %v5103_v63  ;;  %3077 = vrot.lane.b32.xlu0 %v2790_v40, %s6346_s2  ;;  %v5068_v40 = vld [vmem:[#allocation36] sm:$0xff]  }
 0xe05   : > { %4577 = vmatpush3.bf16.msra.mxu0 %v5068_v40  ;;  %v5079_v19 = vld [vmem:[#allocation42 + $0x18] sm:$0xff]  }
 0xe06   : > { %v2854_v21 = vpack.c.bf16 %v2853_v20, %v2853_v20  ;;  %4578 = vmatprep.subr.bf16.mxu0 %v6344_v0  ;;  %v5080_v20 = vld [vmem:[#allocation42 + $0x20] sm:$0xff]  }
 0xe08   : > { %4537 = vmatmul.mubr.msk.bf16.vlgmr.msra.gmra.mrb[36].mxu1 %vm1959_vm2, %v2854_v21  ;;  %v5081_v21 = vld [vmem:[#allocation42 + $0x28] sm:$0xff]  }
 0xe09   : > { %4547 = vmatpush3.bf16.msra.mxu1 %v2965_v22  ;;  %4548 = vmatprep.mubr.msk.bf16.mxu1 %vm6345_vm0, %v6344_v0 }
 0xe0a   : > { %4558 = vmatprep.subr.bf16.mxu1 %v6344_v0  ;;  %4579 = vmatpush3.bf16.msra.mxu0 %v5069_v41  ;;  %v4291_v41 = vld [vmem:[#allocation44] ss:$0 sm:$0xff] }
 0xe0b   : > { %4580 = vmatprep.subr.bf16.mxu0 %v6344_v0 }
 0xe0e   : > { %4581 = vmatpush3.bf16.msra.mxu0 %v5070_v46 }
 0xe0f   : > { %4582 = vmatprep.subr.bf16.mxu0 %v6344_v0 }
 0xe12   : > { %4583 = vmatpush3.bf16.msra.mxu0 %v5071_v47 }
 0xe13   : > { %4600 = vmatprep.subr.bf16.mxu0 %v6344_v0 }
 0xe6b   : > { %v2959_v23 = vpop.xlane.xlu0 %2958 }
 0xe6c   : > { %5112 = vrcp.f32 %v2959_v23 }
 0xe73   : > { %v3073_v24 = vpop.xlane.xlu1 %3072 }
 0xe74   : > { %5114 = vrcp.f32 %v3073_v24 }
 0xe76   : > { %v5113_v25 = vpop.eup %5112 }
 0xe77   : > { %v2961_v26 = vmul.f32 %v5113_v25, %v5105_v9  ;;  %v3191_v33 = vpop.permute.xlu1 %3190 }
 0xe79   : > { %v2962_v27 = vpack.c.bf16 %v2961_v26, %v2961_v26  ;;  %v4283_v26 = vld [vmem:[#allocation48] ss:$0 sm:$0xff] }
 0xe7b   : > { %v3186_v28 = vpop.xlane.xlu0 %3185  ;;  %4549 = vmatmul.mubr.msk.bf16.vlgmr.msra.gmra.mrb[40].mxu1 %vm1959_vm2, %v2962_v27 }
 0xe7c   : > { %5116 = vrcp.f32 %v3186_v28  ;;  %4560 = vmatprep.mubr.msk.bf16.mxu1 %vm6345_vm0, %v6344_v0  ;;  %v4284_v28 = vld [vmem:[#allocation50] ss:$0 sm:$0xff] }
 0xe7e   : > { %v5115_v29 = vpop.eup %5114 }
 0xe7f   : > { %v3075_v30 = vmul.f32 %v5115_v29, %v5107_v14  ;;  %v3078_v31 = vpop.permute.xlu0 %3077  ;;  %v5073_v14 = vld [vmem:[#allocation39 + $0x8] sm:$0xff]  }
 0xe80   : > { %4559 = vmatpush3.bf16.msra.mxu1 %v3078_v31 }
 0xe81   : > { %v3076_v32 = vpack.c.bf16 %v3075_v30, %v3075_v30  ;;  %4570 = vmatprep.subr.bf16.mxu1 %v6344_v0 }
 0xe83   : > { %4561 = vmatmul.mubr.msk.bf16.vlgmr.msra.gmra.mrb[44].mxu1 %vm1959_vm2, %v3076_v32  ;;  %v5082_v32 = vld [vmem:[#allocation42 + $0x30] sm:$0xff]  }
 0xe84   : > { %4571 = vmatpush3.bf16.msra.mxu1 %v3191_v33  ;;  %4572 = vmatprep.mubr.msk.bf16.mxu1 %vm6345_vm0, %v6344_v0  ;;  %v5083_v33 = vld [vmem:[#allocation42 + $0x38] sm:$0xff]  }
 0xe85   : > { %4588 = vmatprep.subr.bf16.mxu1 %v6344_v0 }
 0xe86   : > { %v5117_v4 = vpop.eup %5116 }
 0xe87   : > { %v3188_v34 = vmul.f32 %v5117_v4, %v5109_v16  ;;  %v5076_v16 = vld [vmem:[#allocation42] sm:$0xff]   ;;  %v4285_v4 = vld [vmem:[#allocation41] ss:$0 sm:$0xff] }
 0xe89   : > { %v3189_v35 = vpack.c.bf16 %v3188_v34, %v3188_v34 }
 0xe8b   : > { %4573 = vmatmul.mubr.msk.bf16.vlgmr.msra.gmra.mrb[48].mxu1 %vm1959_vm2, %v3189_v35 }
 0xe8c   : > { %4596 = vmatprep.mubr.msk.bf16.mxu1 %vm6345_vm0, %v6344_v0  ;;  %4589 = vmatpush3.bf16.msra.mxu1 %v5072_v13  ;;  %v4303_v13 = vld [vmem:[#allocation56] ss:$0 sm:$0xff] }
 0xe8d   : > { %4590 = vmatprep.subr.bf16.mxu1 %v6344_v0 }
 0xe90   : > { %4591 = vmatpush3.bf16.msra.mxu1 %v5073_v14 }
 0xe91   : > { %4592 = vmatprep.subr.bf16.mxu1 %v6344_v0 }
 0xe94   : > { %4593 = vmatpush3.bf16.msra.mxu1 %v5074_v15 }
 0xe95   : > { %4594 = vmatprep.subr.bf16.mxu1 %v6344_v0 }
 0xedb   : > { %v2892_v36 = vpop.f32.mrb[36].mxu1 }
 0xedc   : > { %2898 = vst.msk [vmem:[#allocation2] sm:$0xff] %vm1959_vm2, %v2892_v36  ;;  %v4538_v37 = vpop.f32.mrb[37].mxu1 }
 0xedd   : > { %v2895_v38 = vpop.f32.mrb[38].mxu1 }
 0xede   : > { %v4539_v39 = vpop.f32.mrb[39].mxu1 }
 0xf4e   : > { %v3004_v42 = vpop.f32.mrb[40].mxu1 }
 0xf4f   : > { %3011 = vrot.lane.b32.xlu1 %v3004_v42, %s6349_s19  ;;  %v4550_v44 = vpop.f32.mrb[41].mxu1 }
 0xf50   : > { %v3007_v43 = vpop.f32.mrb[42].mxu1 }
 0xf51   : > { %v4551_v45 = vpop.f32.mrb[43].mxu1 }
 0xf56   : > { %v3117_v48 = vpop.f32.mrb[44].mxu1 }
 0xf57   : > { %3124 = vrot.lane.b32.xlu0 %v3117_v48, %s6350_s23  ;;  %v4562_v49 = vpop.f32.mrb[45].mxu1 }
 0xf58   : > { %v3120_v50 = vpop.f32.mrb[46].mxu1 }
 0xf59   : > { %v4563_v51 = vpop.f32.mrb[47].mxu1 }
 0xf5e   : > { %v3230_v52 = vpop.f32.mrb[48].mxu1 }
 0xf5f   : > { %3237 = vrot.lane.b32.xlu1 %v3230_v52, %s6351_s11  ;;  %v4574_v53 = vpop.f32.mrb[49].mxu1 }
 0xf60   : > { %v3233_v54 = vpop.f32.mrb[50].mxu1 }
 0xf61   : > { %v4575_v56 = vpop.f32.mrb[51].mxu1 }
 0xfc1   : > { %v3012_v57 = vpop.permute.xlu1 %3011 }
 0xfc2   : > { %3014 = vst.msk [vmem:[#allocation2] sm:$0xff] %vm2184_vm5, %v3012_v57 }
 0xfc9   : > { %v3125_v58 = vpop.permute.xlu0 %3124 }
 0xfca   : > { %3127 = vst.msk [vmem:[#allocation2] sm:$0xff] %vm2300_vm6, %v3125_v58  ;;  %v4300_v58 = vld [vmem:[#allocation51] ss:$0 sm:$0xff] }
 0xfd1   : > { %v3238_v59 = vpop.permute.xlu1 %3237 }
 0xfd2   : > { %3240 = vst.msk [vmem:[#allocation2] sm:$0xff] %vm2416_vm7, %v3238_v59 }
 0xfd9   : > { %v3241_v60 = vld [vmem:[#allocation2] sm:$0xff] }
 0xfda   : > { %v3242_v61 = vpack.c.bf16 %v3241_v60, %v3241_v60  ;;  %v4301_v60 = vld [vmem:[#allocation53] ss:$0 sm:$0xff] }
 0xfdc   : > { %4585 = vmatmul.mubr.msk.bf16.vlgmr.msra.gmra.mrb[40].mxu0 %vm1743_vm1, %v3242_v61 }
 0xfdd   : > { %4616 = vmatprep.mubr.msk.bf16.mxu0 %vm6345_vm0, %v6344_v0  ;;  %4601 = vmatpush3.bf16.msra.mxu0 %v5076_v16 }
 0xfde   : > { %4602 = vmatprep.subr.bf16.mxu0 %v6344_v0 }
 0xfe1   : > { %4603 = vmatpush3.bf16.msra.mxu0 %v5077_v17 }
 0xfe2   : > { %4604 = vmatprep.subr.bf16.mxu0 %v6344_v0 }
 0xfe5   : > { %4605 = vmatpush3.bf16.msra.mxu0 %v5078_v18 }
 0xfe6   : > { %4606 = vmatprep.subr.bf16.mxu0 %v6344_v0 }
 0xfe9   : > { %4607 = vmatpush3.bf16.msra.mxu0 %v5079_v19 }
 0xfea   : > { %4608 = vmatprep.subr.bf16.mxu0 %v6344_v0 }
 0xfed   : > { %4609 = vmatpush3.bf16.msra.mxu0 %v5080_v20 }
 0xfee   : > { %4610 = vmatprep.subr.bf16.mxu0 %v6344_v0 }
 0xff1   : > { %4611 = vmatpush3.bf16.msra.mxu0 %v5081_v21 }
 0xff2   : > { %4612 = vmatprep.subr.bf16.mxu0 %v6344_v0 }
 0xff5   : > { %4613 = vmatpush3.bf16.msra.mxu0 %v5082_v32 }
 0xff6   : > { %4614 = vmatprep.subr.bf16.mxu0 %v6344_v0 }
 0xff9   : > { %4615 = vmatpush3.bf16.msra.mxu0 %v5083_v33 }
0x10af   : > { %v3318_v63 = vpop.f32.mrb[40].mxu0 }
0x10b0   : > { %v3319_v1 = vadd.f32 %v4277_v62, %v3318_v63  ;;  %v4586_v2 = vpop.f32.mrb[41].mxu0 }
0x10b1   : > { %v3321_v3 = vpop.f32.mrb[42].mxu0 }
0x10b2   : > { %v4587_v5 = vpop.f32.mrb[43].mxu0  ;;  %v3324_v6 = vadd.f32 %v3319_v1, %v7395_v55  ;;  %v5075_v55 = vld [vmem:[#allocation39 + $0x18] sm:$0xff]  }
0x10b3   : > { %4595 = vmatpush3.bf16.msra.mxu1 %v5075_v55 }
0x10b4   : > { %v3327_v7 = vsel %vm1743_vm1, %v3324_v6, 0.0 }
0x10b5   : > { %3328 = vadd.xlane.f32.xlu0 %v3327_v7 }
0x1142   : > { %v3329_v8 = vpop.xlane.xlu0 %3328 }
0x1143   : > { %v3330_v9 = vmul.f32 0.015625, %v3329_v8 }
0x1145   : > { %v3331_v10 = vsub.f32 %v3324_v6, %v3330_v9 }
0x1147   : > { %v3332_v11 = vmul.f32 %v3331_v10, %v3331_v10 }
0x1149   : > { %v3333_v12 = vsel %vm1743_vm1, %v3332_v11, 0.0  ;;  %v4302_v11 = vld [vmem:[#allocation54] ss:$0 sm:$0xff] }
0x114a   : > { %3334 = vadd.xlane.f32.xlu1 %v3333_v12 }
0x11d7   : > { %v3335_v22 = vpop.xlane.xlu1 %3334 }
0x11d8   : > { %v3336_v23 = vmul.f32 0.015625, %v3335_v22 }
0x11da   : > { %v3337_v24 = vadd.f32 1e-05, %v3336_v23 }
0x11dc   : > { %5118 = vrsqrt.f32 %v3337_v24 }
0x11e6   : > { %v5119_v25 = vpop.eup %5118 }
0x11e7   : > { %v3339_v27 = vmul.f32 %v5119_v25, %v3331_v10 }
0x11e9   : > { %v3346_v29 = vmul.f32 %v4283_v26, %v3339_v27 }
0x11eb   : > { %v3353_v30 = vadd.f32 %v4284_v28, %v3346_v29 }
0x11ed   : > { %v3355_v31 = vpack.c.bf16 %v3353_v30, %v3353_v30 }
0x11ef   : > { %4597 = vmatmul.mubr.msk.bf16.vlgmr.msra.gmra.mrb[52].mxu1 %vm1743_vm1, %v3355_v31 }
0x12c2   : > { %v3431_v34 = vpop.f32.mrb[52].mxu1 }
0x12c3   : > { %v3432_v35 = vadd.f32 %v4285_v4, %v3431_v34  ;;  %v4598_v36 = vpop.f32.mrb[53].mxu1 }
0x12c4   : > { %v3434_v37 = vpop.f32.mrb[54].mxu1 }
0x12c5   : > { %v3437_v38 = vmax.f32 %v3432_v35, 0.0  ;;  %v4599_v39 = vpop.f32.mrb[55].mxu1 }
0x12c7   : > { %v3439_v40 = vpack.c.bf16 %v3437_v38, %v3437_v38 }
0x12c9   : > { %4617 = vmatmul.mubr.bf16.vlgmr.msra.gmra.mrb[44].mxu0 %v3439_v40 }
0x139c   : > { %v3544_v42 = vpop.f32.mrb[44].mxu0 }
0x139d   : > { %v3545_v44 = vadd.f32 %v4291_v41, %v3544_v42  ;;  %v4618_v43 = vpop.f32.mrb[45].mxu0 }
0x139e   : > { %v3547_v45 = vpop.f32.mrb[46].mxu0 }
0x139f   : > { %v4619_v46 = vpop.f32.mrb[47].mxu0  ;;  %v3550_v47 = vadd.f32 %v3545_v44, %v3353_v30 }
0x13a1   : > { %v3553_v0 = vsel %vm1743_vm1, %v3550_v47, 0.0 }
0x13a2   : > { %3554 = vadd.xlane.f32.xlu0 %v3553_v0 }
0x142f   : > { %v3555_v48 = vpop.xlane.xlu0 %3554 }
0x1430   : > { %v3556_v49 = vmul.f32 0.015625, %v3555_v48 }
0x1432   : > { %v3557_v50 = vsub.f32 %v3550_v47, %v3556_v49 }
0x1434   : > { %v3558_v51 = vmul.f32 %v3557_v50, %v3557_v50 }
0x1436   : > { %v3559_v52 = vsel %vm1743_vm1, %v3558_v51, 0.0 }
0x1437   : > { %3560 = vadd.xlane.f32.xlu0 %v3559_v52 }
0x14c4   : > { %v3561_v53 = vpop.xlane.xlu0 %3560 }
0x14c5   : > { %v3562_v54 = vmul.f32 0.015625, %v3561_v53 }
0x14c7   : > { %v3563_v56 = vadd.f32 1e-05, %v3562_v54 }
0x14c9   : > { %5120 = vrsqrt.f32 %v3563_v56 }
0x14d3   : > { %v5121_v57 = vpop.eup %5120 }
0x14d4   : > { %v3565_v59 = vmul.f32 %v5121_v57, %v3557_v50 }
0x14d6   : > { %v3572_v61 = vmul.f32 %v4300_v58, %v3565_v59 }
0x14d8   : > { %v3579_v62 = vadd.f32 %v4301_v60, %v3572_v61 }
0x14da   : > { %v3582_v63 = vsel %vm1743_vm1, %v3579_v62, 0.0 }
0x14db   : > { %3583 = vadd.xlane.f32.xlu1 %v3582_v63 }
0x1568   : > { %v3584_v1 = vpop.xlane.xlu1 %3583 }
0x1569   : > { %v3585_v2 = vmul.f32 0.015625, %v3584_v1 }
0x156b   : > { %v3586_v3 = vsub.f32 %v3579_v62, %v3585_v2 }
0x156d   : > { %v3587_v5 = vmul.f32 %v3586_v3, %v3586_v3 }
0x156f   : > { %v3588_v6 = vsel %vm1743_vm1, %v3587_v5, 0.0 }
0x1570   : > { %3589 = vadd.xlane.f32.xlu0 %v3588_v6 }
0x15fd   : > { %v3590_v7 = vpop.xlane.xlu0 %3589 }
0x15fe   : > { %v3591_v8 = vmul.f32 0.015625, %v3590_v7 }
0x1600   : > { %v3592_v9 = vadd.f32 1e-05, %v3591_v8 }
0x1602   : > { %5122 = vrsqrt.f32 %v3592_v9 }
0x160c   : > { %v5123_v10 = vpop.eup %5122 }
0x160d   : > { %v3594_v12 = vmul.f32 %v5123_v10, %v3586_v3 }
0x160f   : > { %v3601_v14 = vmul.f32 %v4302_v11, %v3594_v12 }
0x1611   : > { %v3608_v15 = vadd.f32 %v4303_v13, %v3601_v14 }
0x1613   : > { %3609 = vst.msk [vmem:[%s1691_s15] sm:$0xff] %vm1743_vm1, %v3608_v15 }
0x1614   : > { %6131 = shalt.err (!%p6128_p7)
}
0x1615   : > { %s6132_s20 = scalar_lea.hbm %s7501_s8, 128  ;;  %s6136_s2 = scalar_lea.hbm %s7751_s5, 256 }
0x1616   : > { %p6133_p10 = scmp.ne.s32.totalorder %s7501_s8, %s6132_s20  ;;  %p6137_p11 = scmp.lt.u32.totalorder %s7501_s8, %s7751_s5 }
0x1617   : > { %p6138_p9 = scmp.lt.u32.totalorder %s6136_s2, %s6132_s20  ;;  %p6140_p4 = scmp.lt.u32.totalorder %s6132_s20, %s7501_s8 }
0x1618   : > { %p6134_p1 = pnand %p6133_p10, %p7752_p6 }
0x1619   : > { %p6139_p2 = por %p6138_p9, %p6137_p11 }
0x161a   : > { %p6135_p3 = pneg %p6134_p1 }
0x161b   : > { %p6141_p8 = por %p6140_p4, %p6139_p2 }
0x161d   : > { %p6142_p0 = pnand %p6141_p8, %p6135_p3 }
0x161f   : > { %6145 = shalt.err (!%p6142_p0)
}
0x1620   : > { %4746 = dma.vmem_to_hbm [thread:$0]  (%p7752_p6), %s7503_s7, 128, %s7501_s8, %s3611_s4  }
0x1621 PF: > { %s7753_s26 = sld [smem:[#allocation115_spill]]  ;;  %s3637_s6 = sand.u32 1, %s6248_s0  }
0x1622   : > { %p7754_p5 = scmp.ne.s32.totalorder %s7681_s18, 0  ;;  %s3638_s19 = scalar_lea.sflag [#allocation5], %s3637_s6 }
0x1627   : > { %p7755_p13 = scmp.ge.s32.totalorder %s7753_s26, 2 }
0x1629   : > { %p4856_p12 = pnand %p7755_p13, %p7754_p5 }
0x162b   : > { %6243 = dma.done.wait (!%p4856_p12), %s3638_s19, 128  }
0x162c   : > { %6245 = vsyncadd (!%p4856_p12), %s3638_s19, 4294967168  ;;  %s110_s1 = sadd.s32 1, %s7753_s26   ;;  %s7756_s23 = sld [smem:[#allocation113_spill]] }
0x162d   : > { %p107_p7 = scmp.ge.s32.totalorder %s110_s1, 4   ;;  %s7757_s17 = sld [smem:[#allocation118_spill]] }
0x162e   : > { %s7758_s11 = sld [smem:[#allocation117_spill]]  ;;  %s7759_s0 = smov %s6252_s22 }
0x162f   : > { %s7762_s26 = smov %s6264_s28  ;;  %109 = sbr.rel (!%p107_p7) target bundleno = 101 (0x65), region = 424 }
0x1632   : > { %s7760_s22 = smov %s7756_s23 }
0x1633   : > { %s7761_s23 = smov %s7757_s17 }
0x1634   : > { %s7763_s28 = smov %s7758_s11 }
0x1636   :  { %3643 = vsyncpa [#allocation4], 1 }
0x1637   :  { %3645 = vsyncpa [#allocation4 + $0x1], 1 }
0x1638   :  { %3646 = vsyncpa [#allocation7], 1 }
0x1639   :  { %3648 = vsyncpa [#allocation7 + $0x1], 1 }
0x163a   :  { %3649 = vsyncpa [#allocation10], 1 }
0x163b   :  { %3651 = vsyncpa [#allocation10 + $0x1], 1 }
0x163c   :  { %3652 = vsyncpa [#allocation13], 1 }
0x163d   :  { %3654 = vsyncpa [#allocation13 + $0x1], 1 }
0x163e   :  { %3655 = vsyncpa [#allocation16], 1 }
0x163f   :  { %3656 = vsyncpa [#allocation19], 1 }
0x1640   :  { %3657 = vsyncpa [#allocation22], 1 }
0x1641   :  { %3658 = vsyncpa [#allocation25], 1 }
0x1642   :  { %3659 = vsyncpa [#allocation28], 1 }
0x1643   :  { %3660 = vsyncpa [#allocation31], 1 }
0x1644   :  { %3661 = vsyncpa [#allocation34], 1 }
0x1645   :  { %3662 = vsyncpa [#allocation37], 1 }
0x1646   :  { %3663 = vsyncpa [#allocation40], 1 }
0x1647   :  { %3664 = vsyncpa [#allocation43], 1 }
0x1648   :  { %3665 = vsyncpa [#allocation46], 1 }
0x1649   :  { %3666 = vsyncpa [#allocation49], 1 }
0x164a   :  { %3667 = vsyncpa [#allocation52], 1 }
0x164b   :  { %3668 = vsyncpa [#allocation55], 1 }
0x164c   :  { %3669 = vsyncpa [#allocation5], 1 }
0x164d   :  { %3671 = vsyncpa [#allocation5 + $0x1], 1 }

</bundles_post_ra>
